<compile_context>
chip_gen: v6e
topology: v6e:2x2x1
jax: 0.10.0
libtpu: 0.0.40
codegen_flags: <defaults>
</compile_context>

<pallas_src>
import functools

import jax
import jax.numpy as jnp
from jax import lax
from jax.experimental import pallas as pl
from jax.experimental.pallas import tpu as pltpu

LANES = 128      # output-channel (lane) width inside the kernel
CIN1_PAD = 8     # layer1 input channels padded 1 -> 8 (f32 sublane tile)
WPAD_L = 8       # left spatial pad of scratch W axis (sublane-aligned interior)


def _fused_mydnn_kernel(x_ref, w1_ref, b1_ref, w2_ref, b2_ref, w3_ref, b3_ref,
                        out_ref, a1_ref, a2_ref, *, H, W):
    """One batch image per grid step.

    x_ref : (1, H+2, W+2, CIN1_PAD)   input, spatially zero-padded by 1
    wK_ref: (9, CinK, 128)            3x3 taps stacked on the leading axis
    bK_ref: (1, 128)
    out_ref:(1, H, W, 128)            only lane 0 is the real output channel
    a1_ref: (H+2, W+WPAD_L+1, 16)     VMEM scratch: zero-padded layer1 act.
    a2_ref: (H+2, W+WPAD_L+1, 32)     VMEM scratch: zero-padded layer3 act.
    """
    M = H * W

    # Zero the scratch halos (the interiors are fully overwritten below).
    a1_ref[...] = jnp.zeros_like(a1_ref)
    a2_ref[...] = jnp.zeros_like(a2_ref)

    def conv3x3(read_tap, cin, w_ref, b_ref):
        # 3x3, stride 1 == sum of 9 shifted (M, cin) x (cin, 128) matmuls.
        acc = None
        for k in range(9):
            dy, dx = divmod(k, 3)
            tap = read_tap(dy, dx).reshape(M, cin)
            d = jnp.dot(tap, w_ref[k], preferred_element_type=jnp.float32)
            acc = d if acc is None else acc + d
        return acc + b_ref[...]          # (M, 128), bias broadcasts over rows

    def store_interior(dst_ref, z):
        # ReLU + keep only the real output channels, write into the
        # sublane-aligned interior of the zero-padded scratch.
        c = dst_ref.shape[-1]
        dst_ref[1:H + 1, WPAD_L:WPAD_L + W, :] = (
            jnp.maximum(z, 0.0)[:, :c].reshape(H, W, c))

    def scratch_tap(src_ref):
        return lambda dy, dx: src_ref[dy:dy + H,
                                      WPAD_L - 1 + dx:WPAD_L - 1 + dx + W, :]

    # layer1: 1 (padded to 8) -> 16, ReLU
    z = conv3x3(lambda dy, dx: x_ref[0, dy:dy + H, dx:dx + W, :],
                x_ref.shape[-1], w1_ref, b1_ref)
    store_interior(a1_ref, z)

    # layer3: 16 -> 32, ReLU
    z = conv3x3(scratch_tap(a1_ref), a1_ref.shape[-1], w2_ref, b2_ref)
    store_interior(a2_ref, z)

    # layer5: 32 -> 1 (kept lane-dense at 128 for the HBM store)
    z = conv3x3(scratch_tap(a2_ref), a2_ref.shape[-1], w3_ref, b3_ref)
    out_ref[...] = z.reshape(1, H, W, LANES)


def _prep_weights(w_hwio, b, cin_pad):
    """(3,3,Cin,Cout) HWIO -> (9, cin_pad, 128); bias -> (1, 128)."""
    kh, kw, cin, cout = w_hwio.shape
    w = jnp.pad(w_hwio.astype(jnp.float32),
                ((0, 0), (0, 0), (0, cin_pad - cin), (0, LANES - cout)))
    w = w.reshape(kh * kw, cin_pad, LANES)
    bp = jnp.pad(b.astype(jnp.float32), (0, LANES - cout)).reshape(1, LANES)
    return w, bp


@jax.jit
def mydnn_forward(x_nchw, params):
    """Reproduces MyDNN.forward: conv->relu->conv->relu->conv. NCHW in/out."""
    x = jnp.transpose(x_nchw.astype(jnp.float32), (0, 2, 3, 1))  # NCHW -> NHWC
    N, H, W, cin = x.shape
    c1 = params["layer1"][0].shape[-1]   # 16
    c2 = params["layer3"][0].shape[-1]   # 32
    c3 = params["layer5"][0].shape[-1]   # 1

    xpad = jnp.pad(x, ((0, 0), (1, 1), (1, 1), (0, CIN1_PAD - cin)))
    w1, b1 = _prep_weights(*params["layer1"], CIN1_PAD)
    w2, b2 = _prep_weights(*params["layer3"], c1)
    w3, b3 = _prep_weights(*params["layer5"], c2)

    wscr = W + WPAD_L + 1   # scratch W extent: 8-left halo, interior, 1-right
    out = pl.pallas_call(
        functools.partial(_fused_mydnn_kernel, H=H, W=W),
        out_shape=jax.ShapeDtypeStruct((N, H, W, LANES), jnp.float32),
        grid_spec=pltpu.PrefetchScalarGridSpec(
            num_scalar_prefetch=0,
            grid=(N,),
            in_specs=[
                pl.BlockSpec((1, H + 2, W + 2, CIN1_PAD),
                             lambda n: (n, 0, 0, 0)),
                pl.BlockSpec((9, CIN1_PAD, LANES), lambda n: (0, 0, 0)),
                pl.BlockSpec((1, LANES), lambda n: (0, 0)),
                pl.BlockSpec((9, c1, LANES), lambda n: (0, 0, 0)),
                pl.BlockSpec((1, LANES), lambda n: (0, 0)),
                pl.BlockSpec((9, c2, LANES), lambda n: (0, 0, 0)),
                pl.BlockSpec((1, LANES), lambda n: (0, 0)),
            ],
            out_specs=pl.BlockSpec((1, H, W, LANES), lambda n: (n, 0, 0, 0)),
            scratch_shapes=[
                pltpu.VMEM((H + 2, wscr, c1), jnp.float32),
                pltpu.VMEM((H + 2, wscr, c2), jnp.float32),
            ],
        ),
        compiler_params=pltpu.CompilerParams(
            dimension_semantics=("parallel",)),
    )(xpad, w1, b1, w2, b2, w3, b3)

    out = out[..., :c3]
    return jnp.transpose(out, (0, 3, 1, 2))   # NHWC -> NCHW


def init_params(key):
    """Deterministic params with PyTorch Conv2d-style uniform init (HWIO)."""
    params = {}
    shapes = {
        "layer1": (3, 3, 1, 16),
        "layer3": (3, 3, 16, 32),
        "layer5": (3, 3, 32, 1),
    }
    for name, (kh, kw, cin, cout) in shapes.items():
        key, kw_key, kb_key = jax.random.split(key, 3)
        bound = 1.0 / jnp.sqrt(cin * kh * kw)
        w = jax.random.uniform(kw_key, (kh, kw, cin, cout), jnp.float32,
                               -bound, bound)
        b = jax.random.uniform(kb_key, (cout,), jnp.float32, -bound, bound)
        params[name] = (w, b)
    return params


def _reference_forward(x_nchw, params):
    """Pure-JAX reference (lax conv) for correctness check."""
    x = jnp.transpose(x_nchw.astype(jnp.float32), (0, 2, 3, 1))
    dn = lax.conv_dimension_numbers(x.shape, params["layer1"][0].shape,
                                    ("NHWC", "HWIO", "NHWC"))

    def conv(x, w, b, relu):
        y = lax.conv_general_dilated(x, w, (1, 1), "SAME",
                                     dimension_numbers=dn) + b
        return jnp.maximum(y, 0.0) if relu else y

    x = conv(x, *params["layer1"], True)
    x = conv(x, *params["layer3"], True)
    x = conv(x, *params["layer5"], False)
    return jnp.transpose(x, (0, 3, 1, 2))


if __name__ == "__main__":
    key = jax.random.PRNGKey(0)
    key, xkey = jax.random.split(key)
    # MyDNN expects a single-channel NCHW image.
    x = jax.random.normal(xkey, (2, 1, 16, 16), jnp.float32)

    params = init_params(key)

    out = jax.block_until_ready(mydnn_forward(x, params))
    assert out.shape == (2, 1, 16, 16), out.shape

    ref = jax.block_until_ready(_reference_forward(x, params))
    assert jnp.allclose(out, ref, atol=1e-4, rtol=1e-4), \
        float(jnp.max(jnp.abs(out - ref)))

    print("KERNEL_OK")
</pallas_src>

<mosaic_0001>
module attributes {stable_mosaic.version = 11 : i64} {
  func.func @_fused_mydnn_kernel(%arg0: i32, %arg1: memref<1x18x18x8xf32, #tpu.memory_space<vmem>>, %arg2: memref<9x8x128xf32, #tpu.memory_space<vmem>>, %arg3: memref<1x128xf32, #tpu.memory_space<vmem>>, %arg4: memref<9x16x128xf32, #tpu.memory_space<vmem>>, %arg5: memref<1x128xf32, #tpu.memory_space<vmem>>, %arg6: memref<9x32x128xf32, #tpu.memory_space<vmem>>, %arg7: memref<1x128xf32, #tpu.memory_space<vmem>>, %arg8: memref<1x16x16x128xf32, #tpu.memory_space<vmem>>, %arg9: memref<18x25x16xf32, #tpu.memory_space<vmem>>, %arg10: memref<18x25x32xf32, #tpu.memory_space<vmem>>) attributes {dimension_semantics = [#tpu.dimension_semantics<parallel>], iteration_bounds = array<i64: 2>, scalar_prefetch = 0 : i64, scratch_operands = 2 : i64, tpu.core_type = #tpu.core_type<tc>, window_params = [{transform_indices = @transform_0, window_bounds = array<i64: 1, 18, 18, 8>}, {pipeline_mode = #tpu.pipeline_mode<synchronous>, transform_indices = @transform_1, window_bounds = array<i64: 9, 8, 128>}, {pipeline_mode = #tpu.pipeline_mode<synchronous>, transform_indices = @transform_2, window_bounds = array<i64: 1, 128>}, {pipeline_mode = #tpu.pipeline_mode<synchronous>, transform_indices = @transform_3, window_bounds = array<i64: 9, 16, 128>}, {pipeline_mode = #tpu.pipeline_mode<synchronous>, transform_indices = @transform_4, window_bounds = array<i64: 1, 128>}, {pipeline_mode = #tpu.pipeline_mode<synchronous>, transform_indices = @transform_5, window_bounds = array<i64: 9, 32, 128>}, {pipeline_mode = #tpu.pipeline_mode<synchronous>, transform_indices = @transform_6, window_bounds = array<i64: 1, 128>}, {transform_indices = @transform_7, window_bounds = array<i64: 1, 16, 16, 128>}]} {
    %cst = arith.constant 0.000000e+00 : f32
    %0 = vector.broadcast %cst : f32 to vector<18x25x16xf32>
    %c0 = arith.constant 0 : index
    %c0_0 = arith.constant 0 : index
    %c0_1 = arith.constant 0 : index
    %1 = vector.load %arg9[%c0, %c0_0, %c0_1] : memref<18x25x16xf32, #tpu.memory_space<vmem>>, vector<18x25x16xf32>
    tpu.vector_store %arg9[%c0, %c0_0, %c0_1], %0 {strides = array<i32>} : memref<18x25x16xf32, #tpu.memory_space<vmem>>, vector<18x25x16xf32>,
    %cst_2 = arith.constant 0.000000e+00 : f32
    %2 = vector.broadcast %cst_2 : f32 to vector<18x25x32xf32>
    %c0_3 = arith.constant 0 : index
    %c0_4 = arith.constant 0 : index
    %c0_5 = arith.constant 0 : index
    %3 = vector.load %arg10[%c0_3, %c0_4, %c0_5] : memref<18x25x32xf32, #tpu.memory_space<vmem>>, vector<18x25x32xf32>
    tpu.vector_store %arg10[%c0_3, %c0_4, %c0_5], %2 {strides = array<i32>} : memref<18x25x32xf32, #tpu.memory_space<vmem>>, vector<18x25x32xf32>,
    %c0_6 = arith.constant 0 : index
    %c0_7 = arith.constant 0 : index
    %c0_8 = arith.constant 0 : index
    %c0_9 = arith.constant 0 : index
    %4 = vector.load %arg1[%c0_6, %c0_7, %c0_8, %c0_9] : memref<1x18x18x8xf32, #tpu.memory_space<vmem>>, vector<1x16x16x8xf32>
    %5 = vector.shape_cast %4 : vector<1x16x16x8xf32> to vector<16x16x8xf32>
    %6 = vector.shape_cast %5 : vector<16x16x8xf32> to vector<256x8xf32>
    %c0_10 = arith.constant 0 : index
    %c0_11 = arith.constant 0 : index
    %c0_12 = arith.constant 0 : index
    %7 = vector.load %arg2[%c0_10, %c0_11, %c0_12] : memref<9x8x128xf32, #tpu.memory_space<vmem>>, vector<1x8x128xf32>
    %8 = vector.shape_cast %7 : vector<1x8x128xf32> to vector<8x128xf32>
    %cst_13 = arith.constant dense<0.000000e+00> : vector<256x128xf32>
    %9 = tpu.matmul %6, %8, %cst_13 {dimension_numbers = #tpu.dot_dimension_numbers<[1], [0], [0], [1], [0, 0, 1, 1], [], []>} : vector<256x8xf32>, vector<8x128xf32>, vector<256x128xf32> -> vector<256x128xf32>
    %c0_14 = arith.constant 0 : index
    %c0_15 = arith.constant 0 : index
    %c1 = arith.constant 1 : index
    %c0_16 = arith.constant 0 : index
    %10 = vector.load %arg1[%c0_14, %c0_15, %c1, %c0_16] : memref<1x18x18x8xf32, #tpu.memory_space<vmem>>, vector<1x16x16x8xf32>
    %11 = vector.shape_cast %10 : vector<1x16x16x8xf32> to vector<16x16x8xf32>
    %12 = vector.shape_cast %11 : vector<16x16x8xf32> to vector<256x8xf32>
    %c1_17 = arith.constant 1 : index
    %c0_18 = arith.constant 0 : index
    %c0_19 = arith.constant 0 : index
    %13 = vector.load %arg2[%c1_17, %c0_18, %c0_19] : memref<9x8x128xf32, #tpu.memory_space<vmem>>, vector<1x8x128xf32>
    %14 = vector.shape_cast %13 : vector<1x8x128xf32> to vector<8x128xf32>
    %cst_20 = arith.constant dense<0.000000e+00> : vector<256x128xf32>
    %15 = tpu.matmul %12, %14, %cst_20 {dimension_numbers = #tpu.dot_dimension_numbers<[1], [0], [0], [1], [0, 0, 1, 1], [], []>} : vector<256x8xf32>, vector<8x128xf32>, vector<256x128xf32> -> vector<256x128xf32>
    %16 = arith.addf %9, %15 : vector<256x128xf32>
    %c0_21 = arith.constant 0 : index
    %c0_22 = arith.constant 0 : index
    %c2 = arith.constant 2 : index
    %c0_23 = arith.constant 0 : index
    %17 = vector.load %arg1[%c0_21, %c0_22, %c2, %c0_23] : memref<1x18x18x8xf32, #tpu.memory_space<vmem>>, vector<1x16x16x8xf32>
    %18 = vector.shape_cast %17 : vector<1x16x16x8xf32> to vector<16x16x8xf32>
    %19 = vector.shape_cast %18 : vector<16x16x8xf32> to vector<256x8xf32>
    %c2_24 = arith.constant 2 : index
    %c0_25 = arith.constant 0 : index
    %c0_26 = arith.constant 0 : index
    %20 = vector.load %arg2[%c2_24, %c0_25, %c0_26] : memref<9x8x128xf32, #tpu.memory_space<vmem>>, vector<1x8x128xf32>
    %21 = vector.shape_cast %20 : vector<1x8x128xf32> to vector<8x128xf32>
    %cst_27 = arith.constant dense<0.000000e+00> : vector<256x128xf32>
    %22 = tpu.matmul %19, %21, %cst_27 {dimension_numbers = #tpu.dot_dimension_numbers<[1], [0], [0], [1], [0, 0, 1, 1], [], []>} : vector<256x8xf32>, vector<8x128xf32>, vector<256x128xf32> -> vector<256x128xf32>
    %23 = arith.addf %16, %22 : vector<256x128xf32>
    %c0_28 = arith.constant 0 : index
    %c1_29 = arith.constant 1 : index
    %c0_30 = arith.constant 0 : index
    %c0_31 = arith.constant 0 : index
    %24 = vector.load %arg1[%c0_28, %c1_29, %c0_30, %c0_31] : memref<1x18x18x8xf32, #tpu.memory_space<vmem>>, vector<1x16x16x8xf32>
    %25 = vector.shape_cast %24 : vector<1x16x16x8xf32> to vector<16x16x8xf32>
    %26 = vector.shape_cast %25 : vector<16x16x8xf32> to vector<256x8xf32>
    %c3 = arith.constant 3 : index
    %c0_32 = arith.constant 0 : index
    %c0_33 = arith.constant 0 : index
    %27 = vector.load %arg2[%c3, %c0_32, %c0_33] : memref<9x8x128xf32, #tpu.memory_space<vmem>>, vector<1x8x128xf32>
    %28 = vector.shape_cast %27 : vector<1x8x128xf32> to vector<8x128xf32>
    %cst_34 = arith.constant dense<0.000000e+00> : vector<256x128xf32>
    %29 = tpu.matmul %26, %28, %cst_34 {dimension_numbers = #tpu.dot_dimension_numbers<[1], [0], [0], [1], [0, 0, 1, 1], [], []>} : vector<256x8xf32>, vector<8x128xf32>, vector<256x128xf32> -> vector<256x128xf32>
    %30 = arith.addf %23, %29 : vector<256x128xf32>
    %c0_35 = arith.constant 0 : index
    %c1_36 = arith.constant 1 : index
    %c1_37 = arith.constant 1 : index
    %c0_38 = arith.constant 0 : index
    %31 = vector.load %arg1[%c0_35, %c1_36, %c1_37, %c0_38] : memref<1x18x18x8xf32, #tpu.memory_space<vmem>>, vector<1x16x16x8xf32>
    %32 = vector.shape_cast %31 : vector<1x16x16x8xf32> to vector<16x16x8xf32>
    %33 = vector.shape_cast %32 : vector<16x16x8xf32> to vector<256x8xf32>
    %c4 = arith.constant 4 : index
    %c0_39 = arith.constant 0 : index
    %c0_40 = arith.constant 0 : index
    %34 = vector.load %arg2[%c4, %c0_39, %c0_40] : memref<9x8x128xf32, #tpu.memory_space<vmem>>, vector<1x8x128xf32>
    %35 = vector.shape_cast %34 : vector<1x8x128xf32> to vector<8x128xf32>
    %cst_41 = arith.constant dense<0.000000e+00> : vector<256x128xf32>
    %36 = tpu.matmul %33, %35, %cst_41 {dimension_numbers = #tpu.dot_dimension_numbers<[1], [0], [0], [1], [0, 0, 1, 1], [], []>} : vector<256x8xf32>, vector<8x128xf32>, vector<256x128xf32> -> vector<256x128xf32>
    %37 = arith.addf %30, %36 : vector<256x128xf32>
    %c0_42 = arith.constant 0 : index
    %c1_43 = arith.constant 1 : index
    %c2_44 = arith.constant 2 : index
    %c0_45 = arith.constant 0 : index
    %38 = vector.load %arg1[%c0_42, %c1_43, %c2_44, %c0_45] : memref<1x18x18x8xf32, #tpu.memory_space<vmem>>, vector<1x16x16x8xf32>
    %39 = vector.shape_cast %38 : vector<1x16x16x8xf32> to vector<16x16x8xf32>
    %40 = vector.shape_cast %39 : vector<16x16x8xf32> to vector<256x8xf32>
    %c5 = arith.constant 5 : index
    %c0_46 = arith.constant 0 : index
    %c0_47 = arith.constant 0 : index
    %41 = vector.load %arg2[%c5, %c0_46, %c0_47] : memref<9x8x128xf32, #tpu.memory_space<vmem>>, vector<1x8x128xf32>
    %42 = vector.shape_cast %41 : vector<1x8x128xf32> to vector<8x128xf32>
    %cst_48 = arith.constant dense<0.000000e+00> : vector<256x128xf32>
    %43 = tpu.matmul %40, %42, %cst_48 {dimension_numbers = #tpu.dot_dimension_numbers<[1], [0], [0], [1], [0, 0, 1, 1], [], []>} : vector<256x8xf32>, vector<8x128xf32>, vector<256x128xf32> -> vector<256x128xf32>
    %44 = arith.addf %37, %43 : vector<256x128xf32>
    %c0_49 = arith.constant 0 : index
    %c2_50 = arith.constant 2 : index
    %c0_51 = arith.constant 0 : index
    %c0_52 = arith.constant 0 : index
    %45 = vector.load %arg1[%c0_49, %c2_50, %c0_51, %c0_52] : memref<1x18x18x8xf32, #tpu.memory_space<vmem>>, vector<1x16x16x8xf32>
    %46 = vector.shape_cast %45 : vector<1x16x16x8xf32> to vector<16x16x8xf32>
    %47 = vector.shape_cast %46 : vector<16x16x8xf32> to vector<256x8xf32>
    %c6 = arith.constant 6 : index
    %c0_53 = arith.constant 0 : index
    %c0_54 = arith.constant 0 : index
    %48 = vector.load %arg2[%c6, %c0_53, %c0_54] : memref<9x8x128xf32, #tpu.memory_space<vmem>>, vector<1x8x128xf32>
    %49 = vector.shape_cast %48 : vector<1x8x128xf32> to vector<8x128xf32>
    %cst_55 = arith.constant dense<0.000000e+00> : vector<256x128xf32>
    %50 = tpu.matmul %47, %49, %cst_55 {dimension_numbers = #tpu.dot_dimension_numbers<[1], [0], [0], [1], [0, 0, 1, 1], [], []>} : vector<256x8xf32>, vector<8x128xf32>, vector<256x128xf32> -> vector<256x128xf32>
    %51 = arith.addf %44, %50 : vector<256x128xf32>
    %c0_56 = arith.constant 0 : index
    %c2_57 = arith.constant 2 : index
    %c1_58 = arith.constant 1 : index
    %c0_59 = arith.constant 0 : index
    %52 = vector.load %arg1[%c0_56, %c2_57, %c1_58, %c0_59] : memref<1x18x18x8xf32, #tpu.memory_space<vmem>>, vector<1x16x16x8xf32>
    %53 = vector.shape_cast %52 : vector<1x16x16x8xf32> to vector<16x16x8xf32>
    %54 = vector.shape_cast %53 : vector<16x16x8xf32> to vector<256x8xf32>
    %c7 = arith.constant 7 : index
    %c0_60 = arith.constant 0 : index
    %c0_61 = arith.constant 0 : index
    %55 = vector.load %arg2[%c7, %c0_60, %c0_61] : memref<9x8x128xf32, #tpu.memory_space<vmem>>, vector<1x8x128xf32>
    %56 = vector.shape_cast %55 : vector<1x8x128xf32> to vector<8x128xf32>
    %cst_62 = arith.constant dense<0.000000e+00> : vector<256x128xf32>
    %57 = tpu.matmul %54, %56, %cst_62 {dimension_numbers = #tpu.dot_dimension_numbers<[1], [0], [0], [1], [0, 0, 1, 1], [], []>} : vector<256x8xf32>, vector<8x128xf32>, vector<256x128xf32> -> vector<256x128xf32>
    %58 = arith.addf %51, %57 : vector<256x128xf32>
    %c0_63 = arith.constant 0 : index
    %c2_64 = arith.constant 2 : index
    %c2_65 = arith.constant 2 : index
    %c0_66 = arith.constant 0 : index
    %59 = vector.load %arg1[%c0_63, %c2_64, %c2_65, %c0_66] : memref<1x18x18x8xf32, #tpu.memory_space<vmem>>, vector<1x16x16x8xf32>
    %60 = vector.shape_cast %59 : vector<1x16x16x8xf32> to vector<16x16x8xf32>
    %61 = vector.shape_cast %60 : vector<16x16x8xf32> to vector<256x8xf32>
    %c8 = arith.constant 8 : index
    %c0_67 = arith.constant 0 : index
    %c0_68 = arith.constant 0 : index
    %62 = vector.load %arg2[%c8, %c0_67, %c0_68] : memref<9x8x128xf32, #tpu.memory_space<vmem>>, vector<1x8x128xf32>
    %63 = vector.shape_cast %62 : vector<1x8x128xf32> to vector<8x128xf32>
    %cst_69 = arith.constant dense<0.000000e+00> : vector<256x128xf32>
    %64 = tpu.matmul %61, %63, %cst_69 {dimension_numbers = #tpu.dot_dimension_numbers<[1], [0], [0], [1], [0, 0, 1, 1], [], []>} : vector<256x8xf32>, vector<8x128xf32>, vector<256x128xf32> -> vector<256x128xf32>
    %65 = arith.addf %58, %64 : vector<256x128xf32>
    %c0_70 = arith.constant 0 : index
    %c0_71 = arith.constant 0 : index
    %66 = vector.load %arg3[%c0_70, %c0_71] : memref<1x128xf32, #tpu.memory_space<vmem>>, vector<1x128xf32>
    %67 = vector.broadcast %66 : vector<1x128xf32> to vector<256x128xf32>
    %68 = arith.addf %65, %67 : vector<256x128xf32>
    %cst_72 = arith.constant 0.000000e+00 : f32
    %69 = vector.broadcast %cst_72 : f32 to vector<256x128xf32>
    %70 = arith.maximumf %68, %69 : vector<256x128xf32>
    %71 = vector.extract_strided_slice %70 {offsets = [0, 0], sizes = [256, 16], strides = [1, 1]} : vector<256x128xf32> to vector<256x16xf32>
    %72 = vector.shape_cast %71 : vector<256x16xf32> to vector<16x16x16xf32>
    %c1_73 = arith.constant 1 : index
    %c8_74 = arith.constant 8 : index
    %c0_75 = arith.constant 0 : index
    %73 = vector.load %arg9[%c1_73, %c8_74, %c0_75] : memref<18x25x16xf32, #tpu.memory_space<vmem>>, vector<16x16x16xf32>
    tpu.vector_store %arg9[%c1_73, %c8_74, %c0_75], %72 {strides = array<i32>} : memref<18x25x16xf32, #tpu.memory_space<vmem>>, vector<16x16x16xf32>,
    %c0_76 = arith.constant 0 : index
    %c7_77 = arith.constant 7 : index
    %c0_78 = arith.constant 0 : index
    %74 = vector.load %arg9[%c0_76, %c7_77, %c0_78] : memref<18x25x16xf32, #tpu.memory_space<vmem>>, vector<16x16x16xf32>
    %75 = vector.shape_cast %74 : vector<16x16x16xf32> to vector<256x16xf32>
    %c0_79 = arith.constant 0 : index
    %c0_80 = arith.constant 0 : index
    %c0_81 = arith.constant 0 : index
    %76 = vector.load %arg4[%c0_79, %c0_80, %c0_81] : memref<9x16x128xf32, #tpu.memory_space<vmem>>, vector<1x16x128xf32>
    %77 = vector.shape_cast %76 : vector<1x16x128xf32> to vector<16x128xf32>
    %cst_82 = arith.constant dense<0.000000e+00> : vector<256x128xf32>
    %78 = tpu.matmul %75, %77, %cst_82 {dimension_numbers = #tpu.dot_dimension_numbers<[1], [0], [0], [1], [0, 0, 1, 1], [], []>} : vector<256x16xf32>, vector<16x128xf32>, vector<256x128xf32> -> vector<256x128xf32>
    %c0_83 = arith.constant 0 : index
    %c8_84 = arith.constant 8 : index
    %c0_85 = arith.constant 0 : index
    %79 = vector.load %arg9[%c0_83, %c8_84, %c0_85] : memref<18x25x16xf32, #tpu.memory_space<vmem>>, vector<16x16x16xf32>
    %80 = vector.shape_cast %79 : vector<16x16x16xf32> to vector<256x16xf32>
    %c1_86 = arith.constant 1 : index
    %c0_87 = arith.constant 0 : index
    %c0_88 = arith.constant 0 : index
    %81 = vector.load %arg4[%c1_86, %c0_87, %c0_88] : memref<9x16x128xf32, #tpu.memory_space<vmem>>, vector<1x16x128xf32>
    %82 = vector.shape_cast %81 : vector<1x16x128xf32> to vector<16x128xf32>
    %cst_89 = arith.constant dense<0.000000e+00> : vector<256x128xf32>
    %83 = tpu.matmul %80, %82, %cst_89 {dimension_numbers = #tpu.dot_dimension_numbers<[1], [0], [0], [1], [0, 0, 1, 1], [], []>} : vector<256x16xf32>, vector<16x128xf32>, vector<256x128xf32> -> vector<256x128xf32>
    %84 = arith.addf %78, %83 : vector<256x128xf32>
    %c0_90 = arith.constant 0 : index
    %c9 = arith.constant 9 : index
    %c0_91 = arith.constant 0 : index
    %85 = vector.load %arg9[%c0_90, %c9, %c0_91] : memref<18x25x16xf32, #tpu.memory_space<vmem>>, vector<16x16x16xf32>
    %86 = vector.shape_cast %85 : vector<16x16x16xf32> to vector<256x16xf32>
    %c2_92 = arith.constant 2 : index
    %c0_93 = arith.constant 0 : index
    %c0_94 = arith.constant 0 : index
    %87 = vector.load %arg4[%c2_92, %c0_93, %c0_94] : memref<9x16x128xf32, #tpu.memory_space<vmem>>, vector<1x16x128xf32>
    %88 = vector.shape_cast %87 : vector<1x16x128xf32> to vector<16x128xf32>
    %cst_95 = arith.constant dense<0.000000e+00> : vector<256x128xf32>
    %89 = tpu.matmul %86, %88, %cst_95 {dimension_numbers = #tpu.dot_dimension_numbers<[1], [0], [0], [1], [0, 0, 1, 1], [], []>} : vector<256x16xf32>, vector<16x128xf32>, vector<256x128xf32> -> vector<256x128xf32>
    %90 = arith.addf %84, %89 : vector<256x128xf32>
    %c1_96 = arith.constant 1 : index
    %c7_97 = arith.constant 7 : index
    %c0_98 = arith.constant 0 : index
    %91 = vector.load %arg9[%c1_96, %c7_97, %c0_98] : memref<18x25x16xf32, #tpu.memory_space<vmem>>, vector<16x16x16xf32>
    %92 = vector.shape_cast %91 : vector<16x16x16xf32> to vector<256x16xf32>
    %c3_99 = arith.constant 3 : index
    %c0_100 = arith.constant 0 : index
    %c0_101 = arith.constant 0 : index
    %93 = vector.load %arg4[%c3_99, %c0_100, %c0_101] : memref<9x16x128xf32, #tpu.memory_space<vmem>>, vector<1x16x128xf32>
    %94 = vector.shape_cast %93 : vector<1x16x128xf32> to vector<16x128xf32>
    %cst_102 = arith.constant dense<0.000000e+00> : vector<256x128xf32>
    %95 = tpu.matmul %92, %94, %cst_102 {dimension_numbers = #tpu.dot_dimension_numbers<[1], [0], [0], [1], [0, 0, 1, 1], [], []>} : vector<256x16xf32>, vector<16x128xf32>, vector<256x128xf32> -> vector<256x128xf32>
    %96 = arith.addf %90, %95 : vector<256x128xf32>
    %c1_103 = arith.constant 1 : index
    %c8_104 = arith.constant 8 : index
    %c0_105 = arith.constant 0 : index
    %97 = vector.load %arg9[%c1_103, %c8_104, %c0_105] : memref<18x25x16xf32, #tpu.memory_space<vmem>>, vector<16x16x16xf32>
    %98 = vector.shape_cast %97 : vector<16x16x16xf32> to vector<256x16xf32>
    %c4_106 = arith.constant 4 : index
    %c0_107 = arith.constant 0 : index
    %c0_108 = arith.constant 0 : index
    %99 = vector.load %arg4[%c4_106, %c0_107, %c0_108] : memref<9x16x128xf32, #tpu.memory_space<vmem>>, vector<1x16x128xf32>
    %100 = vector.shape_cast %99 : vector<1x16x128xf32> to vector<16x128xf32>
    %cst_109 = arith.constant dense<0.000000e+00> : vector<256x128xf32>
    %101 = tpu.matmul %98, %100, %cst_109 {dimension_numbers = #tpu.dot_dimension_numbers<[1], [0], [0], [1], [0, 0, 1, 1], [], []>} : vector<256x16xf32>, vector<16x128xf32>, vector<256x128xf32> -> vector<256x128xf32>
    %102 = arith.addf %96, %101 : vector<256x128xf32>
    %c1_110 = arith.constant 1 : index
    %c9_111 = arith.constant 9 : index
    %c0_112 = arith.constant 0 : index
    %103 = vector.load %arg9[%c1_110, %c9_111, %c0_112] : memref<18x25x16xf32, #tpu.memory_space<vmem>>, vector<16x16x16xf32>
    %104 = vector.shape_cast %103 : vector<16x16x16xf32> to vector<256x16xf32>
    %c5_113 = arith.constant 5 : index
    %c0_114 = arith.constant 0 : index
    %c0_115 = arith.constant 0 : index
    %105 = vector.load %arg4[%c5_113, %c0_114, %c0_115] : memref<9x16x128xf32, #tpu.memory_space<vmem>>, vector<1x16x128xf32>
    %106 = vector.shape_cast %105 : vector<1x16x128xf32> to vector<16x128xf32>
    %cst_116 = arith.constant dense<0.000000e+00> : vector<256x128xf32>
    %107 = tpu.matmul %104, %106, %cst_116 {dimension_numbers = #tpu.dot_dimension_numbers<[1], [0], [0], [1], [0, 0, 1, 1], [], []>} : vector<256x16xf32>, vector<16x128xf32>, vector<256x128xf32> -> vector<256x128xf32>
    %108 = arith.addf %102, %107 : vector<256x128xf32>
    %c2_117 = arith.constant 2 : index
    %c7_118 = arith.constant 7 : index
    %c0_119 = arith.constant 0 : index
    %109 = vector.load %arg9[%c2_117, %c7_118, %c0_119] : memref<18x25x16xf32, #tpu.memory_space<vmem>>, vector<16x16x16xf32>
    %110 = vector.shape_cast %109 : vector<16x16x16xf32> to vector<256x16xf32>
    %c6_120 = arith.constant 6 : index
    %c0_121 = arith.constant 0 : index
    %c0_122 = arith.constant 0 : index
    %111 = vector.load %arg4[%c6_120, %c0_121, %c0_122] : memref<9x16x128xf32, #tpu.memory_space<vmem>>, vector<1x16x128xf32>
    %112 = vector.shape_cast %111 : vector<1x16x128xf32> to vector<16x128xf32>
    %cst_123 = arith.constant dense<0.000000e+00> : vector<256x128xf32>
    %113 = tpu.matmul %110, %112, %cst_123 {dimension_numbers = #tpu.dot_dimension_numbers<[1], [0], [0], [1], [0, 0, 1, 1], [], []>} : vector<256x16xf32>, vector<16x128xf32>, vector<256x128xf32> -> vector<256x128xf32>
    %114 = arith.addf %108, %113 : vector<256x128xf32>
    %c2_124 = arith.constant 2 : index
    %c8_125 = arith.constant 8 : index
    %c0_126 = arith.constant 0 : index
    %115 = vector.load %arg9[%c2_124, %c8_125, %c0_126] : memref<18x25x16xf32, #tpu.memory_space<vmem>>, vector<16x16x16xf32>
    %116 = vector.shape_cast %115 : vector<16x16x16xf32> to vector<256x16xf32>
    %c7_127 = arith.constant 7 : index
    %c0_128 = arith.constant 0 : index
    %c0_129 = arith.constant 0 : index
    %117 = vector.load %arg4[%c7_127, %c0_128, %c0_129] : memref<9x16x128xf32, #tpu.memory_space<vmem>>, vector<1x16x128xf32>
    %118 = vector.shape_cast %117 : vector<1x16x128xf32> to vector<16x128xf32>
    %cst_130 = arith.constant dense<0.000000e+00> : vector<256x128xf32>
    %119 = tpu.matmul %116, %118, %cst_130 {dimension_numbers = #tpu.dot_dimension_numbers<[1], [0], [0], [1], [0, 0, 1, 1], [], []>} : vector<256x16xf32>, vector<16x128xf32>, vector<256x128xf32> -> vector<256x128xf32>
    %120 = arith.addf %114, %119 : vector<256x128xf32>
    %c2_131 = arith.constant 2 : index
    %c9_132 = arith.constant 9 : index
    %c0_133 = arith.constant 0 : index
    %121 = vector.load %arg9[%c2_131, %c9_132, %c0_133] : memref<18x25x16xf32, #tpu.memory_space<vmem>>, vector<16x16x16xf32>
    %122 = vector.shape_cast %121 : vector<16x16x16xf32> to vector<256x16xf32>
    %c8_134 = arith.constant 8 : index
    %c0_135 = arith.constant 0 : index
    %c0_136 = arith.constant 0 : index
    %123 = vector.load %arg4[%c8_134, %c0_135, %c0_136] : memref<9x16x128xf32, #tpu.memory_space<vmem>>, vector<1x16x128xf32>
    %124 = vector.shape_cast %123 : vector<1x16x128xf32> to vector<16x128xf32>
    %cst_137 = arith.constant dense<0.000000e+00> : vector<256x128xf32>
    %125 = tpu.matmul %122, %124, %cst_137 {dimension_numbers = #tpu.dot_dimension_numbers<[1], [0], [0], [1], [0, 0, 1, 1], [], []>} : vector<256x16xf32>, vector<16x128xf32>, vector<256x128xf32> -> vector<256x128xf32>
    %126 = arith.addf %120, %125 : vector<256x128xf32>
    %c0_138 = arith.constant 0 : index
    %c0_139 = arith.constant 0 : index
    %127 = vector.load %arg5[%c0_138, %c0_139] : memref<1x128xf32, #tpu.memory_space<vmem>>, vector<1x128xf32>
    %128 = vector.broadcast %127 : vector<1x128xf32> to vector<256x128xf32>
    %129 = arith.addf %126, %128 : vector<256x128xf32>
    %cst_140 = arith.constant 0.000000e+00 : f32
    %130 = vector.broadcast %cst_140 : f32 to vector<256x128xf32>
    %131 = arith.maximumf %129, %130 : vector<256x128xf32>
    %132 = vector.extract_strided_slice %131 {offsets = [0, 0], sizes = [256, 32], strides = [1, 1]} : vector<256x128xf32> to vector<256x32xf32>
    %133 = vector.shape_cast %132 : vector<256x32xf32> to vector<16x16x32xf32>
    %c1_141 = arith.constant 1 : index
    %c8_142 = arith.constant 8 : index
    %c0_143 = arith.constant 0 : index
    %134 = vector.load %arg10[%c1_141, %c8_142, %c0_143] : memref<18x25x32xf32, #tpu.memory_space<vmem>>, vector<16x16x32xf32>
    tpu.vector_store %arg10[%c1_141, %c8_142, %c0_143], %133 {strides = array<i32>} : memref<18x25x32xf32, #tpu.memory_space<vmem>>, vector<16x16x32xf32>,
    %c0_144 = arith.constant 0 : index
    %c7_145 = arith.constant 7 : index
    %c0_146 = arith.constant 0 : index
    %135 = vector.load %arg10[%c0_144, %c7_145, %c0_146] : memref<18x25x32xf32, #tpu.memory_space<vmem>>, vector<16x16x32xf32>
    %136 = vector.shape_cast %135 : vector<16x16x32xf32> to vector<256x32xf32>
    %c0_147 = arith.constant 0 : index
    %c0_148 = arith.constant 0 : index
    %c0_149 = arith.constant 0 : index
    %137 = vector.load %arg6[%c0_147, %c0_148, %c0_149] : memref<9x32x128xf32, #tpu.memory_space<vmem>>, vector<1x32x128xf32>
    %138 = vector.shape_cast %137 : vector<1x32x128xf32> to vector<32x128xf32>
    %cst_150 = arith.constant dense<0.000000e+00> : vector<256x128xf32>
    %139 = tpu.matmul %136, %138, %cst_150 {dimension_numbers = #tpu.dot_dimension_numbers<[1], [0], [0], [1], [0, 0, 1, 1], [], []>} : vector<256x32xf32>, vector<32x128xf32>, vector<256x128xf32> -> vector<256x128xf32>
    %c0_151 = arith.constant 0 : index
    %c8_152 = arith.constant 8 : index
    %c0_153 = arith.constant 0 : index
    %140 = vector.load %arg10[%c0_151, %c8_152, %c0_153] : memref<18x25x32xf32, #tpu.memory_space<vmem>>, vector<16x16x32xf32>
    %141 = vector.shape_cast %140 : vector<16x16x32xf32> to vector<256x32xf32>
    %c1_154 = arith.constant 1 : index
    %c0_155 = arith.constant 0 : index
    %c0_156 = arith.constant 0 : index
    %142 = vector.load %arg6[%c1_154, %c0_155, %c0_156] : memref<9x32x128xf32, #tpu.memory_space<vmem>>, vector<1x32x128xf32>
    %143 = vector.shape_cast %142 : vector<1x32x128xf32> to vector<32x128xf32>
    %cst_157 = arith.constant dense<0.000000e+00> : vector<256x128xf32>
    %144 = tpu.matmul %141, %143, %cst_157 {dimension_numbers = #tpu.dot_dimension_numbers<[1], [0], [0], [1], [0, 0, 1, 1], [], []>} : vector<256x32xf32>, vector<32x128xf32>, vector<256x128xf32> -> vector<256x128xf32>
    %145 = arith.addf %139, %144 : vector<256x128xf32>
    %c0_158 = arith.constant 0 : index
    %c9_159 = arith.constant 9 : index
    %c0_160 = arith.constant 0 : index
    %146 = vector.load %arg10[%c0_158, %c9_159, %c0_160] : memref<18x25x32xf32, #tpu.memory_space<vmem>>, vector<16x16x32xf32>
    %147 = vector.shape_cast %146 : vector<16x16x32xf32> to vector<256x32xf32>
    %c2_161 = arith.constant 2 : index
    %c0_162 = arith.constant 0 : index
    %c0_163 = arith.constant 0 : index
    %148 = vector.load %arg6[%c2_161, %c0_162, %c0_163] : memref<9x32x128xf32, #tpu.memory_space<vmem>>, vector<1x32x128xf32>
    %149 = vector.shape_cast %148 : vector<1x32x128xf32> to vector<32x128xf32>
    %cst_164 = arith.constant dense<0.000000e+00> : vector<256x128xf32>
    %150 = tpu.matmul %147, %149, %cst_164 {dimension_numbers = #tpu.dot_dimension_numbers<[1], [0], [0], [1], [0, 0, 1, 1], [], []>} : vector<256x32xf32>, vector<32x128xf32>, vector<256x128xf32> -> vector<256x128xf32>
    %151 = arith.addf %145, %150 : vector<256x128xf32>
    %c1_165 = arith.constant 1 : index
    %c7_166 = arith.constant 7 : index
    %c0_167 = arith.constant 0 : index
    %152 = vector.load %arg10[%c1_165, %c7_166, %c0_167] : memref<18x25x32xf32, #tpu.memory_space<vmem>>, vector<16x16x32xf32>
    %153 = vector.shape_cast %152 : vector<16x16x32xf32> to vector<256x32xf32>
    %c3_168 = arith.constant 3 : index
    %c0_169 = arith.constant 0 : index
    %c0_170 = arith.constant 0 : index
    %154 = vector.load %arg6[%c3_168, %c0_169, %c0_170] : memref<9x32x128xf32, #tpu.memory_space<vmem>>, vector<1x32x128xf32>
    %155 = vector.shape_cast %154 : vector<1x32x128xf32> to vector<32x128xf32>
    %cst_171 = arith.constant dense<0.000000e+00> : vector<256x128xf32>
    %156 = tpu.matmul %153, %155, %cst_171 {dimension_numbers = #tpu.dot_dimension_numbers<[1], [0], [0], [1], [0, 0, 1, 1], [], []>} : vector<256x32xf32>, vector<32x128xf32>, vector<256x128xf32> -> vector<256x128xf32>
    %157 = arith.addf %151, %156 : vector<256x128xf32>
    %c1_172 = arith.constant 1 : index
    %c8_173 = arith.constant 8 : index
    %c0_174 = arith.constant 0 : index
    %158 = vector.load %arg10[%c1_172, %c8_173, %c0_174] : memref<18x25x32xf32, #tpu.memory_space<vmem>>, vector<16x16x32xf32>
    %159 = vector.shape_cast %158 : vector<16x16x32xf32> to vector<256x32xf32>
    %c4_175 = arith.constant 4 : index
    %c0_176 = arith.constant 0 : index
    %c0_177 = arith.constant 0 : index
    %160 = vector.load %arg6[%c4_175, %c0_176, %c0_177] : memref<9x32x128xf32, #tpu.memory_space<vmem>>, vector<1x32x128xf32>
    %161 = vector.shape_cast %160 : vector<1x32x128xf32> to vector<32x128xf32>
    %cst_178 = arith.constant dense<0.000000e+00> : vector<256x128xf32>
    %162 = tpu.matmul %159, %161, %cst_178 {dimension_numbers = #tpu.dot_dimension_numbers<[1], [0], [0], [1], [0, 0, 1, 1], [], []>} : vector<256x32xf32>, vector<32x128xf32>, vector<256x128xf32> -> vector<256x128xf32>
    %163 = arith.addf %157, %162 : vector<256x128xf32>
    %c1_179 = arith.constant 1 : index
    %c9_180 = arith.constant 9 : index
    %c0_181 = arith.constant 0 : index
    %164 = vector.load %arg10[%c1_179, %c9_180, %c0_181] : memref<18x25x32xf32, #tpu.memory_space<vmem>>, vector<16x16x32xf32>
    %165 = vector.shape_cast %164 : vector<16x16x32xf32> to vector<256x32xf32>
    %c5_182 = arith.constant 5 : index
    %c0_183 = arith.constant 0 : index
    %c0_184 = arith.constant 0 : index
    %166 = vector.load %arg6[%c5_182, %c0_183, %c0_184] : memref<9x32x128xf32, #tpu.memory_space<vmem>>, vector<1x32x128xf32>
    %167 = vector.shape_cast %166 : vector<1x32x128xf32> to vector<32x128xf32>
    %cst_185 = arith.constant dense<0.000000e+00> : vector<256x128xf32>
    %168 = tpu.matmul %165, %167, %cst_185 {dimension_numbers = #tpu.dot_dimension_numbers<[1], [0], [0], [1], [0, 0, 1, 1], [], []>} : vector<256x32xf32>, vector<32x128xf32>, vector<256x128xf32> -> vector<256x128xf32>
    %169 = arith.addf %163, %168 : vector<256x128xf32>
    %c2_186 = arith.constant 2 : index
    %c7_187 = arith.constant 7 : index
    %c0_188 = arith.constant 0 : index
    %170 = vector.load %arg10[%c2_186, %c7_187, %c0_188] : memref<18x25x32xf32, #tpu.memory_space<vmem>>, vector<16x16x32xf32>
    %171 = vector.shape_cast %170 : vector<16x16x32xf32> to vector<256x32xf32>
    %c6_189 = arith.constant 6 : index
    %c0_190 = arith.constant 0 : index
    %c0_191 = arith.constant 0 : index
    %172 = vector.load %arg6[%c6_189, %c0_190, %c0_191] : memref<9x32x128xf32, #tpu.memory_space<vmem>>, vector<1x32x128xf32>
    %173 = vector.shape_cast %172 : vector<1x32x128xf32> to vector<32x128xf32>
    %cst_192 = arith.constant dense<0.000000e+00> : vector<256x128xf32>
    %174 = tpu.matmul %171, %173, %cst_192 {dimension_numbers = #tpu.dot_dimension_numbers<[1], [0], [0], [1], [0, 0, 1, 1], [], []>} : vector<256x32xf32>, vector<32x128xf32>, vector<256x128xf32> -> vector<256x128xf32>
    %175 = arith.addf %169, %174 : vector<256x128xf32>
    %c2_193 = arith.constant 2 : index
    %c8_194 = arith.constant 8 : index
    %c0_195 = arith.constant 0 : index
    %176 = vector.load %arg10[%c2_193, %c8_194, %c0_195] : memref<18x25x32xf32, #tpu.memory_space<vmem>>, vector<16x16x32xf32>
    %177 = vector.shape_cast %176 : vector<16x16x32xf32> to vector<256x32xf32>
    %c7_196 = arith.constant 7 : index
    %c0_197 = arith.constant 0 : index
    %c0_198 = arith.constant 0 : index
    %178 = vector.load %arg6[%c7_196, %c0_197, %c0_198] : memref<9x32x128xf32, #tpu.memory_space<vmem>>, vector<1x32x128xf32>
    %179 = vector.shape_cast %178 : vector<1x32x128xf32> to vector<32x128xf32>
    %cst_199 = arith.constant dense<0.000000e+00> : vector<256x128xf32>
    %180 = tpu.matmul %177, %179, %cst_199 {dimension_numbers = #tpu.dot_dimension_numbers<[1], [0], [0], [1], [0, 0, 1, 1], [], []>} : vector<256x32xf32>, vector<32x128xf32>, vector<256x128xf32> -> vector<256x128xf32>
    %181 = arith.addf %175, %180 : vector<256x128xf32>
    %c2_200 = arith.constant 2 : index
    %c9_201 = arith.constant 9 : index
    %c0_202 = arith.constant 0 : index
    %182 = vector.load %arg10[%c2_200, %c9_201, %c0_202] : memref<18x25x32xf32, #tpu.memory_space<vmem>>, vector<16x16x32xf32>
    %183 = vector.shape_cast %182 : vector<16x16x32xf32> to vector<256x32xf32>
    %c8_203 = arith.constant 8 : index
    %c0_204 = arith.constant 0 : index
    %c0_205 = arith.constant 0 : index
    %184 = vector.load %arg6[%c8_203, %c0_204, %c0_205] : memref<9x32x128xf32, #tpu.memory_space<vmem>>, vector<1x32x128xf32>
    %185 = vector.shape_cast %184 : vector<1x32x128xf32> to vector<32x128xf32>
    %cst_206 = arith.constant dense<0.000000e+00> : vector<256x128xf32>
    %186 = tpu.matmul %183, %185, %cst_206 {dimension_numbers = #tpu.dot_dimension_numbers<[1], [0], [0], [1], [0, 0, 1, 1], [], []>} : vector<256x32xf32>, vector<32x128xf32>, vector<256x128xf32> -> vector<256x128xf32>
    %187 = arith.addf %181, %186 : vector<256x128xf32>
    %c0_207 = arith.constant 0 : index
    %c0_208 = arith.constant 0 : index
    %188 = vector.load %arg7[%c0_207, %c0_208] : memref<1x128xf32, #tpu.memory_space<vmem>>, vector<1x128xf32>
    %189 = vector.broadcast %188 : vector<1x128xf32> to vector<256x128xf32>
    %190 = arith.addf %187, %189 : vector<256x128xf32>
    %191 = vector.shape_cast %190 : vector<256x128xf32> to vector<1x16x16x128xf32>
    %c0_209 = arith.constant 0 : index
    %c0_210 = arith.constant 0 : index
    %c0_211 = arith.constant 0 : index
    %c0_212 = arith.constant 0 : index
    %192 = vector.load %arg8[%c0_209, %c0_210, %c0_211, %c0_212] : memref<1x16x16x128xf32, #tpu.memory_space<vmem>>, vector<1x16x16x128xf32>
    tpu.vector_store %arg8[%c0_209, %c0_210, %c0_211, %c0_212], %191 {strides = array<i32>} : memref<1x16x16x128xf32, #tpu.memory_space<vmem>>, vector<1x16x16x128xf32>,
    return
  }
  func.func @transform_0(%arg0: i32) -> (i32, i32, i32, i32) {
    %c0_i32 = arith.constant 0 : i32
    %c0_i32_0 = arith.constant 0 : i32
    %c0_i32_1 = arith.constant 0 : i32
    %c0_i32_2 = arith.constant 0 : i32
    return %arg0, %c0_i32, %c0_i32_0, %c0_i32_1 : i32, i32, i32, i32
  }
  func.func @transform_1(%arg0: i32) -> (i32, i32, i32) {
    %c0_i32 = arith.constant 0 : i32
    %c0_i32_0 = arith.constant 0 : i32
    %c0_i32_1 = arith.constant 0 : i32
    %c0_i32_2 = arith.constant 0 : i32
    return %c0_i32, %c0_i32_0, %c0_i32_1 : i32, i32, i32
  }
  func.func @transform_2(%arg0: i32) -> (i32, i32) {
    %c0_i32 = arith.constant 0 : i32
    %c0_i32_0 = arith.constant 0 : i32
    %c0_i32_1 = arith.constant 0 : i32
    return %c0_i32, %c0_i32_0 : i32, i32
  }
  func.func @transform_3(%arg0: i32) -> (i32, i32, i32) {
    %c0_i32 = arith.constant 0 : i32
    %c0_i32_0 = arith.constant 0 : i32
    %c0_i32_1 = arith.constant 0 : i32
    %c0_i32_2 = arith.constant 0 : i32
    return %c0_i32, %c0_i32_0, %c0_i32_1 : i32, i32, i32
  }
  func.func @transform_4(%arg0: i32) -> (i32, i32) {
    %c0_i32 = arith.constant 0 : i32
    %c0_i32_0 = arith.constant 0 : i32
    %c0_i32_1 = arith.constant 0 : i32
    return %c0_i32, %c0_i32_0 : i32, i32
  }
  func.func @transform_5(%arg0: i32) -> (i32, i32, i32) {
    %c0_i32 = arith.constant 0 : i32
    %c0_i32_0 = arith.constant 0 : i32
    %c0_i32_1 = arith.constant 0 : i32
    %c0_i32_2 = arith.constant 0 : i32
    return %c0_i32, %c0_i32_0, %c0_i32_1 : i32, i32, i32
  }
  func.func @transform_6(%arg0: i32) -> (i32, i32) {
    %c0_i32 = arith.constant 0 : i32
    %c0_i32_0 = arith.constant 0 : i32
    %c0_i32_1 = arith.constant 0 : i32
    return %c0_i32, %c0_i32_0 : i32, i32
  }
  func.func @transform_7(%arg0: i32) -> (i32, i32, i32, i32) {
    %c0_i32 = arith.constant 0 : i32
    %c0_i32_0 = arith.constant 0 : i32
    %c0_i32_1 = arith.constant 0 : i32
    %c0_i32_2 = arith.constant 0 : i32
    return %arg0, %c0_i32, %c0_i32_0, %c0_i32_1 : i32, i32, i32, i32
  }
}

</mosaic_0001>

<bundles_post_ra>
// kernel: mydnn_forward.1
= control target key start
LH: loop header
LB: loop body
LE: loop exit
PB: predicated region body
PF: predicated region fallthrough
CT: control target
= control target key end

     0   :  { %s14593_s24 = smov 0   ;;  %s19366_s0 = inlined_call_operand.vmem [shape: f32[2,18,18,8], index: 0, kind: input, shape index: {}]   ;;  %s19367_s1 = inlined_call_operand.vmem [shape: f32[9,8,128], index: 1, kind: input, shape index: {}]   ;;  %s19368_s2 = inlined_call_operand.vmem [shape: f32[1,128], index: 2, kind: input, shape index: {}]   ;;  %s19369_s3 = inlined_call_operand.vmem [shape: f32[9,16,128], index: 3, kind: input, shape index: {}]   ;;  %s19370_s4 = inlined_call_operand.vmem [shape: f32[1,128], index: 4, kind: input, shape index: {}]   ;;  %s19371_s5 = inlined_call_operand.vmem [shape: f32[9,32,128], index: 5, kind: input, shape index: {}]   ;;  %s19372_s6 = inlined_call_operand.vmem [shape: f32[1,128], index: 6, kind: input, shape index: {}]   ;;  %s19373_s7 = inlined_call_operand.vmem [shape: f32[2,16,16,128], index: 7, kind: output, shape index: {}]  }
   0x1 LB: > { %s11056_s25 = sadd.s32 4294967295, %s14550_s24   ;;  %p11060_p0 = scmp.ge.s32.totalorder %s14550_s24, 1  ;;  %s14550_s24 = sphi %s14593_s24, %s17_s24  }
   0x2   : > { %p237_p1 = scmp.lt.s32.totalorder %s14550_s24, 3 }
   0x4   : > { %p238_p2 = pnand %p11060_p0, %p237_p1 }
   0x6   : > { %241 = sbr.rel (%p238_p2) target bundleno = 1448 (0x5a8), region = 48 }
   0xb   : > { %v11064_v0 = vld [vmem:[%s19367_s1 + $0x8] sm:$0xff]  ;;  %p269_p3 = scmp.lt.s32.totalorder %s11056_s25, 1  ;;  %v459_v1 = vld [vmem:[%s19367_s1] sm:$0xff]  ;;  %v11129_v2 = vld [vmem:[%s19367_s1 + $0x10] sm:$0xff]  ;;  %vm494_vm0 = vcmask 64512   ;;  %vm279_vm1 = vcmask 130048  }
   0xc   : > { %14531 = vmatprep.subr.mxu1 %v11064_v0  ;;  %13109 = vmatprep.subr.mxu0 %v11064_v0  ;;  %v14641_v9 = vld [vmem:[%s19367_s1 + $0x18] sm:$0xff]  ;;  %v14646_v10 = vld [vmem:[%s19367_s1 + $0x20] sm:$0xff]  ;;  %v14801_v43 = vld [vmem:[%s19367_s1 + $0x28] sm:$0xff]  ;;  %vm283_vm2 = vcmask 122880   ;;  %vm353_vm3 = vcmask 261120   ;;  %vm357_vm4 = vcmask 253952  }
   0xd   : > { %14532 = vmatpush3.msra.mxu1 %v11064_v0  ;;  %13110 = vmatpush3.msra.mxu0 %v11064_v0  ;;  %s20046_s25 = smov (!%p269_p3, %s11056_s25), 1  ;;  %v14806_v44 = vld [vmem:[%s19367_s1 + $0x30] sm:$0xff] }
   0xe   : > { %13159 = vmatprep.subr.mxu1 %v459_v1  ;;  %13209 = vmatprep.subr.mxu0 %v11129_v2  ;;  %s14533_s9 = smul.u32 432, %s20046_s25  ;;  %s12181_s13 = sshll.u32 %s20046_s25, 8 }
   0xf   : > { %s19186_s25 = scalar_lea.vmem %s19373_s7, %s12181_s13 }
  0x10   : > { %s14616_s12 = scalar_lea.vmem %s19366_s0, %s14533_s9 }
  0x11   : > { %v460_v3 = vld [vmem:[%s14616_s12 + $0x1] sm:$0xff]  ;;  %v461_v5 = vld [vmem:[%s14616_s12 + $0x9] sm:$0xff]  ;;  %v14630_v7 = vld [vmem:[%s14616_s12 + $0x19] sm:$0xff] }
  0x12   : > { %v14620_v4 = vld [vmem:[%s14616_s12 + $0xc1] sm:$0xff]  ;;  %13111 = vmatprep.mubr.msk.f32.mxu0 %vm494_vm0, %v460_v3  ;;  %v14627_v6 = vld [vmem:[%s14616_s12 + $0xc9] sm:$0xff]  ;;  %v14633_v8 = vld [vmem:[%s14616_s12 + $0xd9] sm:$0xff] }
  0x13   : > { %13135 = vmatprep.mubr.msk.f32.mxu1 %vm494_vm0, %v14620_v4  ;;  %13112 = vmatmul.mubr.msk.f32.vlgmr.msra.gmra.mxu0 %vm494_vm0, %v461_v5  ;;  %v14649_v11 = vld [vmem:[%s14616_s12 + $0x21] sm:$0xff]  ;;  %v14659_v13 = vld [vmem:[%s14616_s12 + $0x31] sm:$0xff]  ;;  %v14675_v15 = vld [vmem:[%s14616_s12 + $0x39] sm:$0xff] }
  0x14   : > { %13136 = vmatmul.mubr.msk.f32.vlgmr.msra.gmra.mxu1 %vm494_vm0, %v14627_v6  ;;  %13210 = vmatpush3.msra.mxu0 %v11129_v2  ;;  %v14652_v12 = vld [vmem:[%s14616_s12 + $0xe1] sm:$0xff]  ;;  %v14662_v14 = vld [vmem:[%s14616_s12 + $0xf1] sm:$0xff]  ;;  %v14678_v16 = vld [vmem:[%s14616_s12 + $0xf9] sm:$0xff] }
  0x15   : > { %13160 = vmatpush3.msra.mxu1 %v459_v1  ;;  %13114 = vmatprep.mubr.msk.f32.mxu0 %vm494_vm0, %v14630_v7  ;;  %v14681_v17 = vld [vmem:[%s14616_s12 + $0x49] sm:$0xff]  ;;  %v14695_v19 = vld [vmem:[%s14616_s12 + $0x51] sm:$0xff]  ;;  %v14701_v21 = vld [vmem:[%s14616_s12 + $0x61] sm:$0xff] }
  0x16   : > { %13138 = vmatprep.mubr.msk.f32.mxu1 %vm494_vm0, %v14633_v8  ;;  %13259 = vmatprep.subr.mxu1 %v14641_v9  ;;  %v14684_v18 = vld [vmem:[%s14616_s12 + $0x109] sm:$0xff]  ;;  %v14698_v20 = vld [vmem:[%s14616_s12 + $0x111] sm:$0xff]  ;;  %v14704_v22 = vld [vmem:[%s14616_s12 + $0x121] sm:$0xff] }
  0x17   : > { %13309 = vmatprep.subr.mxu0 %v14646_v10  ;;  %13115 = vmatmul.mubr.msk.f32.gmra.mxu0 %vm494_vm0, %v14649_v11  ;;  %v14715_v23 = vld [vmem:[%s14616_s12 + $0x69] sm:$0xff]  ;;  %v14721_v25 = vld [vmem:[%s14616_s12 + $0x79] sm:$0xff]  ;;  %v14735_v27 = vld [vmem:[%s14616_s12 + $0x81] sm:$0xff] }
  0x18   : > { %13139 = vmatmul.mubr.msk.f32.gmra.mxu1 %vm494_vm0, %v14652_v12  ;;  %13117 = vmatprep.mubr.msk.f32.mxu0 %vm494_vm0, %v14659_v13  ;;  %v14718_v24 = vld [vmem:[%s14616_s12 + $0x129] sm:$0xff]  ;;  %v14724_v26 = vld [vmem:[%s14616_s12 + $0x139] sm:$0xff]  ;;  %v14738_v28 = vld [vmem:[%s14616_s12 + $0x141] sm:$0xff] }
  0x19   : > { %13141 = vmatprep.mubr.msk.f32.mxu1 %vm494_vm0, %v14662_v14  ;;  %v14741_v29 = vld [vmem:[%s14616_s12 + $0x91] sm:$0xff]  ;;  %v14755_v31 = vld [vmem:[%s14616_s12 + $0x99] sm:$0xff]  ;;  %v14761_v33 = vld [vmem:[%s14616_s12 + $0xa9] sm:$0xff] }
  0x1a   : > { %v14744_v30 = vld [vmem:[%s14616_s12 + $0x151] sm:$0xff]  ;;  %v14758_v32 = vld [vmem:[%s14616_s12 + $0x159] sm:$0xff]  ;;  %v14764_v34 = vld [vmem:[%s14616_s12 + $0x169] sm:$0xff] }
  0x1b   : > { %13118 = vmatmul.mubr.msk.f32.gmra.mxu0 %vm494_vm0, %v14675_v15  ;;  %v14775_v35 = vld [vmem:[%s14616_s12 + $0xb1] sm:$0xff]  ;;  %v427_v37 = vld [vmem:[%s14616_s12] sm:$0xff]  ;;  %v428_v39 = vld [vmem:[%s14616_s12 + $0x8] sm:$0xff] }
  0x1c   : > { %13142 = vmatmul.mubr.msk.f32.gmra.mxu1 %vm494_vm0, %v14678_v16  ;;  %13120 = vmatprep.mubr.msk.f32.mxu0 %vm494_vm0, %v14681_v17  ;;  %v14778_v36 = vld [vmem:[%s14616_s12 + $0x171] sm:$0xff]  ;;  %v1137_v38 = vld [vmem:[%s14616_s12 + $0x2] sm:$0xff]  ;;  %v14794_v42 = vld [vmem:[%s14616_s12 + $0x1a] sm:$0xff] }
  0x1d   : > { %13144 = vmatprep.mubr.msk.f32.mxu1 %vm494_vm0, %v14684_v18  ;;  %19458 = vst [vmem:[#allocation4_spill] sm:$0xff] %v14778_v36  ;;  %v1138_v40 = vld [vmem:[%s14616_s12 + $0xa] sm:$0xff]  ;;  %v14791_v41 = vld [vmem:[%s14616_s12 + $0x18] sm:$0xff]  ;;  %19459 = vst [vmem:[#allocation5_spill] sm:$0xff] %v14794_v42 }
  0x1e   : > { %v14811_v45 = vld [vmem:[%s14616_s12 + $0x20] sm:$0xff]  ;;  %v14821_v47 = vld [vmem:[%s14616_s12 + $0x30] sm:$0xff]  ;;  %v14837_v49 = vld [vmem:[%s14616_s12 + $0x38] sm:$0xff] }
  0x1f   : > { %13121 = vmatmul.mubr.msk.f32.gmra.mxu0 %vm494_vm0, %v14695_v19  ;;  %v14814_v46 = vld [vmem:[%s14616_s12 + $0x22] sm:$0xff]  ;;  %v14824_v48 = vld [vmem:[%s14616_s12 + $0x32] sm:$0xff]  ;;  %v14840_v50 = vld [vmem:[%s14616_s12 + $0x3a] sm:$0xff] }
  0x20   : > { %13145 = vmatmul.mubr.msk.f32.gmra.mxu1 %vm494_vm0, %v14698_v20  ;;  %13123 = vmatprep.mubr.msk.f32.mxu0 %vm494_vm0, %v14701_v21  ;;  %19460 = vst [vmem:[#allocation6_spill] sm:$0xff] %v14814_v46  ;;  %19461 = vst [vmem:[#allocation7_spill] sm:$0xff] %v14824_v48  ;;  %v14843_v51 = vld [vmem:[%s14616_s12 + $0x48] sm:$0xff]  ;;  %v14857_v53 = vld [vmem:[%s14616_s12 + $0x50] sm:$0xff] }
  0x21   : > { %13147 = vmatprep.mubr.msk.f32.mxu1 %vm494_vm0, %v14704_v22  ;;  %19462 = vst [vmem:[#allocation8_spill] sm:$0xff] %v14840_v50  ;;  %v14846_v52 = vld [vmem:[%s14616_s12 + $0x4a] sm:$0xff]  ;;  %v14860_v54 = vld [vmem:[%s14616_s12 + $0x52] sm:$0xff]  ;;  %v14863_v55 = vld [vmem:[%s14616_s12 + $0x60] sm:$0xff] }
  0x22   : > { %19463 = vst [vmem:[#allocation9_spill] sm:$0xff] %v14846_v52  ;;  %19464 = vst [vmem:[#allocation10_spill] sm:$0xff] %v14860_v54  ;;  %v14866_v56 = vld [vmem:[%s14616_s12 + $0x62] sm:$0xff]  ;;  %v14880_v58 = vld [vmem:[%s14616_s12 + $0x6a] sm:$0xff] }
  0x23   : > { %13124 = vmatmul.mubr.msk.f32.gmra.mxu0 %vm494_vm0, %v14715_v23  ;;  %19465 = vst [vmem:[#allocation11_spill] sm:$0xff] %v14866_v56  ;;  %v14877_v57 = vld [vmem:[%s14616_s12 + $0x68] sm:$0xff]  ;;  %19466 = vst [vmem:[#allocation12_spill] sm:$0xff] %v14880_v58  ;;  %v14883_v59 = vld [vmem:[%s14616_s12 + $0x78] sm:$0xff] }
  0x24   : > { %13148 = vmatmul.mubr.msk.f32.gmra.mxu1 %vm494_vm0, %v14718_v24  ;;  %13126 = vmatprep.mubr.msk.f32.mxu0 %vm494_vm0, %v14721_v25  ;;  %v14886_v60 = vld [vmem:[%s14616_s12 + $0x7a] sm:$0xff]  ;;  %v14900_v62 = vld [vmem:[%s14616_s12 + $0x82] sm:$0xff]  ;;  %v14903_v63 = vld [vmem:[%s14616_s12 + $0x90] sm:$0xff] }
  0x25   : > { %13150 = vmatprep.mubr.msk.f32.mxu1 %vm494_vm0, %v14724_v26  ;;  %19467 = vst [vmem:[#allocation13_spill] sm:$0xff] %v14886_v60  ;;  %v14897_v61 = vld [vmem:[%s14616_s12 + $0x80] sm:$0xff]  ;;  %19468 = vst [vmem:[#allocation14_spill] sm:$0xff] %v14900_v62  ;;  %v14906_v0 = vld [vmem:[%s14616_s12 + $0x92] sm:$0xff] }
  0x26   : > { %19469 = vst [vmem:[#allocation15_spill] sm:$0xff] %v14906_v0  ;;  %v14917_v1 = vld [vmem:[%s14616_s12 + $0x98] sm:$0xff]  ;;  %v14923_v3 = vld [vmem:[%s14616_s12 + $0xa8] sm:$0xff] }
  0x27   : > { %13127 = vmatmul.mubr.msk.f32.gmra.mxu0 %vm494_vm0, %v14735_v27  ;;  %v14920_v2 = vld [vmem:[%s14616_s12 + $0x9a] sm:$0xff]  ;;  %v14926_v5 = vld [vmem:[%s14616_s12 + $0xaa] sm:$0xff] }
  0x28   : > { %13151 = vmatmul.mubr.msk.f32.gmra.mxu1 %vm494_vm0, %v14738_v28  ;;  %13129 = vmatprep.mubr.msk.f32.mxu0 %vm494_vm0, %v14741_v29  ;;  %19470 = vst [vmem:[#allocation16_spill] sm:$0xff] %v14920_v2  ;;  %19471 = vst [vmem:[#allocation17_spill] sm:$0xff] %v14926_v5 }
  0x29   : > { %13153 = vmatprep.mubr.msk.f32.mxu1 %vm494_vm0, %v14744_v30 }
  0x2b   : > { %13130 = vmatmul.mubr.msk.f32.gmra.mxu0 %vm494_vm0, %v14755_v31 }
  0x2c   : > { %13154 = vmatmul.mubr.msk.f32.gmra.mxu1 %vm494_vm0, %v14758_v32  ;;  %13132 = vmatprep.mubr.msk.f32.mxu0 %vm494_vm0, %v14761_v33 }
  0x2d   : > { %13156 = vmatprep.mubr.msk.f32.mxu1 %vm494_vm0, %v14764_v34 }
  0x2f   : > { %13133 = vmatmul.mubr.msk.f32.gmra.mxu0 %vm494_vm0, %v14775_v35 }
  0x30   : > { %13157 = vmatmul.mubr.msk.f32.gmra.mxu1 %vm494_vm0, %v14778_v36  ;;  %13211 = vmatprep.mubr.msk.f32.mxu0 %vm494_vm0, %v1137_v38  ;;  %v14946_v38 = vld [vmem:[%s14616_s12 + $0xc2] sm:$0xff]  ;;  %v15086_v36 = vld [vmem:[%s14616_s12 + $0x16a] sm:$0xff] }
  0x31   : > { %13161 = vmatprep.mubr.msk.f32.mxu1 %vm494_vm0, %v427_v37  ;;  %v14943_v37 = vld [vmem:[%s14616_s12 + $0xc0] sm:$0xff]  ;;  %19473 = vst [vmem:[#allocation19_spill] sm:$0xff] %v14946_v38  ;;  %19486 = vst [vmem:[#allocation32_spill] sm:$0xff] %v15086_v36 }
  0x33   : > { %13212 = vmatmul.mubr.msk.f32.vlgmr.msra.gmra.mxu0 %vm494_vm0, %v1138_v40  ;;  %v14960_v40 = vld [vmem:[%s14616_s12 + $0xca] sm:$0xff] }
  0x34   : > { %13162 = vmatmul.mubr.msk.f32.vlgmr.msra.gmra.mxu1 %vm494_vm0, %v428_v39  ;;  %13310 = vmatpush3.msra.mxu0 %v14646_v10  ;;  %v14940_v10 = vld [vmem:[%s14616_s12 + $0xb2] sm:$0xff]  ;;  %v14957_v39 = vld [vmem:[%s14616_s12 + $0xc8] sm:$0xff]  ;;  %19474 = vst [vmem:[#allocation20_spill] sm:$0xff] %v14960_v40 }
  0x35   : > { %13260 = vmatpush3.msra.mxu1 %v14641_v9  ;;  %13164 = vmatprep.mubr.msk.f32.mxu1 %vm494_vm0, %v14791_v41  ;;  %v14937_v9 = vld [vmem:[%s14616_s12 + $0xb0] sm:$0xff]  ;;  %19472 = vst [vmem:[#allocation18_spill] sm:$0xff] %v14940_v10 }
  0x36   : > { %13214 = vmatprep.mubr.msk.f32.mxu0 %vm494_vm0, %v14794_v42  ;;  %13359 = vmatprep.subr.mxu1 %v14801_v43  ;;  %v15083_v42 = vld [vmem:[%s14616_s12 + $0x168] sm:$0xff] }
  0x37   : > { %13409 = vmatprep.subr.mxu0 %v14806_v44  ;;  %13215 = vmatmul.mubr.msk.f32.gmra.mxu0 %vm494_vm0, %v14814_v46  ;;  %v15066_v46 = vld [vmem:[%s14616_s12 + $0x152] sm:$0xff] }
  0x38   : > { %13165 = vmatmul.mubr.msk.f32.gmra.mxu1 %vm494_vm0, %v14811_v45  ;;  %13217 = vmatprep.mubr.msk.f32.mxu0 %vm494_vm0, %v14824_v48  ;;  %v15063_v48 = vld [vmem:[%s14616_s12 + $0x150] sm:$0xff]  ;;  %19485 = vst [vmem:[#allocation31_spill] sm:$0xff] %v15066_v46 }
  0x39   : > { %13167 = vmatprep.mubr.msk.f32.mxu1 %vm494_vm0, %v14821_v47 }
  0x3b   : > { %13218 = vmatmul.mubr.msk.f32.gmra.mxu0 %vm494_vm0, %v14840_v50  ;;  %v15046_v50 = vld [vmem:[%s14616_s12 + $0x13a] sm:$0xff] }
  0x3c   : > { %13168 = vmatmul.mubr.msk.f32.gmra.mxu1 %vm494_vm0, %v14837_v49  ;;  %13220 = vmatprep.mubr.msk.f32.mxu0 %vm494_vm0, %v14846_v52  ;;  %v15043_v52 = vld [vmem:[%s14616_s12 + $0x138] sm:$0xff]  ;;  %19483 = vst [vmem:[#allocation29_spill] sm:$0xff] %v15046_v50 }
  0x3d   : > { %13170 = vmatprep.mubr.msk.f32.mxu1 %vm494_vm0, %v14843_v51 }
  0x3f   : > { %13221 = vmatmul.mubr.msk.f32.gmra.mxu0 %vm494_vm0, %v14860_v54  ;;  %v15026_v54 = vld [vmem:[%s14616_s12 + $0x122] sm:$0xff] }
  0x40   : > { %13171 = vmatmul.mubr.msk.f32.gmra.mxu1 %vm494_vm0, %v14857_v53  ;;  %13223 = vmatprep.mubr.msk.f32.mxu0 %vm494_vm0, %v14866_v56  ;;  %v15023_v56 = vld [vmem:[%s14616_s12 + $0x120] sm:$0xff]  ;;  %19481 = vst [vmem:[#allocation27_spill] sm:$0xff] %v15026_v54 }
  0x41   : > { %13173 = vmatprep.mubr.msk.f32.mxu1 %vm494_vm0, %v14863_v55 }
  0x43   : > { %13224 = vmatmul.mubr.msk.f32.gmra.mxu0 %vm494_vm0, %v14880_v58  ;;  %v15006_v58 = vld [vmem:[%s14616_s12 + $0x10a] sm:$0xff] }
  0x44   : > { %13174 = vmatmul.mubr.msk.f32.gmra.mxu1 %vm494_vm0, %v14877_v57  ;;  %13226 = vmatprep.mubr.msk.f32.mxu0 %vm494_vm0, %v14886_v60  ;;  %v15003_v60 = vld [vmem:[%s14616_s12 + $0x108] sm:$0xff]  ;;  %19479 = vst [vmem:[#allocation25_spill] sm:$0xff] %v15006_v58 }
  0x45   : > { %13176 = vmatprep.mubr.msk.f32.mxu1 %vm494_vm0, %v14883_v59 }
  0x47   : > { %13227 = vmatmul.mubr.msk.f32.gmra.mxu0 %vm494_vm0, %v14900_v62  ;;  %v14986_v62 = vld [vmem:[%s14616_s12 + $0xf2] sm:$0xff] }
  0x48   : > { %13177 = vmatmul.mubr.msk.f32.gmra.mxu1 %vm494_vm0, %v14897_v61  ;;  %13229 = vmatprep.mubr.msk.f32.mxu0 %vm494_vm0, %v14906_v0  ;;  %v14983_v0 = vld [vmem:[%s14616_s12 + $0xf0] sm:$0xff]  ;;  %19477 = vst [vmem:[#allocation23_spill] sm:$0xff] %v14986_v62 }
  0x49   : > { %13179 = vmatprep.mubr.msk.f32.mxu1 %vm494_vm0, %v14903_v63 }
  0x4b   : > { %13230 = vmatmul.mubr.msk.f32.gmra.mxu0 %vm494_vm0, %v14920_v2  ;;  %v14966_v2 = vld [vmem:[%s14616_s12 + $0xda] sm:$0xff] }
  0x4c   : > { %13180 = vmatmul.mubr.msk.f32.gmra.mxu1 %vm494_vm0, %v14917_v1  ;;  %13232 = vmatprep.mubr.msk.f32.mxu0 %vm494_vm0, %v14926_v5  ;;  %v14963_v5 = vld [vmem:[%s14616_s12 + $0xd8] sm:$0xff]  ;;  %19475 = vst [vmem:[#allocation21_spill] sm:$0xff] %v14966_v2 }
  0x4d   : > { %13182 = vmatprep.mubr.msk.f32.mxu1 %vm494_vm0, %v14923_v3 }
  0x4f   : > { %13233 = vmatmul.mubr.msk.f32.gmra.mxu0 %vm494_vm0, %v14940_v10  ;;  %v14980_v10 = vld [vmem:[%s14616_s12 + $0xe2] sm:$0xff] }
  0x50   : > { %13183 = vmatmul.mubr.msk.f32.gmra.mxu1 %vm494_vm0, %v14937_v9  ;;  %13235 = vmatprep.mubr.msk.f32.mxu0 %vm494_vm0, %v14946_v38  ;;  %v14977_v38 = vld [vmem:[%s14616_s12 + $0xe0] sm:$0xff]  ;;  %19476 = vst [vmem:[#allocation22_spill] sm:$0xff] %v14980_v10 }
  0x51   : > { %13185 = vmatprep.mubr.msk.f32.mxu1 %vm494_vm0, %v14943_v37 }
  0x53   : > { %13236 = vmatmul.mubr.msk.f32.gmra.mxu0 %vm494_vm0, %v14960_v40  ;;  %v15000_v40 = vld [vmem:[%s14616_s12 + $0xfa] sm:$0xff] }
  0x54   : > { %13186 = vmatmul.mubr.msk.f32.gmra.mxu1 %vm494_vm0, %v14957_v39  ;;  %13238 = vmatprep.mubr.msk.f32.mxu0 %vm494_vm0, %v14966_v2  ;;  %v14997_v2 = vld [vmem:[%s14616_s12 + $0xf8] sm:$0xff]  ;;  %19478 = vst [vmem:[#allocation24_spill] sm:$0xff] %v15000_v40 }
  0x55   : > { %13188 = vmatprep.mubr.msk.f32.mxu1 %vm494_vm0, %v14963_v5 }
  0x57   : > { %13239 = vmatmul.mubr.msk.f32.gmra.mxu0 %vm494_vm0, %v14980_v10  ;;  %v15020_v10 = vld [vmem:[%s14616_s12 + $0x112] sm:$0xff] }
  0x58   : > { %13189 = vmatmul.mubr.msk.f32.gmra.mxu1 %vm494_vm0, %v14977_v38  ;;  %13241 = vmatprep.mubr.msk.f32.mxu0 %vm494_vm0, %v14986_v62  ;;  %v15017_v62 = vld [vmem:[%s14616_s12 + $0x110] sm:$0xff]  ;;  %19480 = vst [vmem:[#allocation26_spill] sm:$0xff] %v15020_v10 }
  0x59   : > { %13191 = vmatprep.mubr.msk.f32.mxu1 %vm494_vm0, %v14983_v0 }
  0x5b   : > { %13242 = vmatmul.mubr.msk.f32.gmra.mxu0 %vm494_vm0, %v15000_v40  ;;  %v15040_v40 = vld [vmem:[%s14616_s12 + $0x12a] sm:$0xff] }
  0x5c   : > { %13192 = vmatmul.mubr.msk.f32.gmra.mxu1 %vm494_vm0, %v14997_v2  ;;  %13244 = vmatprep.mubr.msk.f32.mxu0 %vm494_vm0, %v15006_v58  ;;  %v15037_v58 = vld [vmem:[%s14616_s12 + $0x128] sm:$0xff]  ;;  %19482 = vst [vmem:[#allocation28_spill] sm:$0xff] %v15040_v40 }
  0x5d   : > { %13194 = vmatprep.mubr.msk.f32.mxu1 %vm494_vm0, %v15003_v60 }
  0x5f   : > { %13245 = vmatmul.mubr.msk.f32.gmra.mxu0 %vm494_vm0, %v15020_v10  ;;  %v15060_v10 = vld [vmem:[%s14616_s12 + $0x142] sm:$0xff] }
  0x60   : > { %13195 = vmatmul.mubr.msk.f32.gmra.mxu1 %vm494_vm0, %v15017_v62  ;;  %13247 = vmatprep.mubr.msk.f32.mxu0 %vm494_vm0, %v15026_v54  ;;  %v15057_v54 = vld [vmem:[%s14616_s12 + $0x140] sm:$0xff]  ;;  %19484 = vst [vmem:[#allocation30_spill] sm:$0xff] %v15060_v10 }
  0x61   : > { %13197 = vmatprep.mubr.msk.f32.mxu1 %vm494_vm0, %v15023_v56 }
  0x63   : > { %13248 = vmatmul.mubr.msk.f32.gmra.mxu0 %vm494_vm0, %v15040_v40  ;;  %v15080_v40 = vld [vmem:[%s14616_s12 + $0x15a] sm:$0xff] }
  0x64   : > { %13198 = vmatmul.mubr.msk.f32.gmra.mxu1 %vm494_vm0, %v15037_v58  ;;  %13250 = vmatprep.mubr.msk.f32.mxu0 %vm494_vm0, %v15046_v50  ;;  %v15077_v50 = vld [vmem:[%s14616_s12 + $0x158] sm:$0xff] }
  0x65   : > { %13200 = vmatprep.mubr.msk.f32.mxu1 %vm494_vm0, %v15043_v52 }
  0x67   : > { %13251 = vmatmul.mubr.msk.f32.gmra.mxu0 %vm494_vm0, %v15060_v10  ;;  %v15100_v10 = vld [vmem:[%s14616_s12 + $0x172] sm:$0xff] }
  0x68   : > { %13201 = vmatmul.mubr.msk.f32.gmra.mxu1 %vm494_vm0, %v15057_v54  ;;  %13253 = vmatprep.mubr.msk.f32.mxu0 %vm494_vm0, %v15066_v46  ;;  %v15097_v46 = vld [vmem:[%s14616_s12 + $0x170] sm:$0xff]  ;;  %19487 = vst [vmem:[#allocation33_spill] sm:$0xff] %v15100_v10 }
  0x69   : > { %13203 = vmatprep.mubr.msk.f32.mxu1 %vm494_vm0, %v15063_v48 }
  0x6b   : > { %13254 = vmatmul.mubr.msk.f32.gmra.mxu0 %vm494_vm0, %v15080_v40 }
  0x6c   : > { %13204 = vmatmul.mubr.msk.f32.gmra.mxu1 %vm494_vm0, %v15077_v50  ;;  %13256 = vmatprep.mubr.msk.f32.mxu0 %vm494_vm0, %v15086_v36  ;;  %v15117_v36 = vld [vmem:[%s19367_s1 + $0x38] sm:$0xff] }
  0x6d   : > { %13206 = vmatprep.mubr.msk.f32.mxu1 %vm494_vm0, %v15083_v42 }
  0x6f   : > { %13257 = vmatmul.mubr.msk.f32.gmra.mxu0 %vm494_vm0, %v15100_v10  ;;  %v15122_v10 = vld [vmem:[%s19367_s1 + $0x40] sm:$0xff] }
  0x70   : > { %13207 = vmatmul.mubr.msk.f32.gmra.mxu1 %vm494_vm0, %v15097_v46  ;;  %13311 = vmatprep.mubr.msk.f32.mxu0 %vm494_vm0, %v14630_v7  ;;  %v19489_v7 = vld [vmem:[#allocation4_spill] sm:$0xff] }
  0x71   : > { %13261 = vmatprep.mubr.msk.f32.mxu1 %vm494_vm0, %v14791_v41 }
  0x73   : > { %13312 = vmatmul.mubr.msk.f32.vlgmr.msra.gmra.mxu0 %vm494_vm0, %v14649_v11  ;;  %v15254_v11 = vld [vmem:[%s14616_s12 + $0x189] sm:$0xff] }
  0x74   : > { %13262 = vmatmul.mubr.msk.f32.vlgmr.msra.gmra.mxu1 %vm494_vm0, %v14811_v45  ;;  %13410 = vmatpush3.msra.mxu0 %v14806_v44  ;;  %19490 = vst [vmem:[#allocation4_spill] sm:$0xff] %v15254_v11  ;;  %v19508_v44 = vld [vmem:[#allocation22_spill] sm:$0xff]  ;;  %v19509_v45 = vld [vmem:[#allocation23_spill] sm:$0xff] }
  0x75   : > { %13360 = vmatpush3.msra.mxu1 %v14801_v43  ;;  %13264 = vmatprep.mubr.msk.f32.mxu1 %vm494_vm0, %v14821_v47 }
  0x76   : > { %13314 = vmatprep.mubr.msk.f32.mxu0 %vm494_vm0, %v14659_v13  ;;  %13459 = vmatprep.subr.mxu1 %v15117_v36 }
  0x77   : > { %13509 = vmatprep.subr.mxu0 %v15122_v10  ;;  %13315 = vmatmul.mubr.msk.f32.gmra.mxu0 %vm494_vm0, %v14675_v15 }
  0x78   : > { %13265 = vmatmul.mubr.msk.f32.gmra.mxu1 %vm494_vm0, %v14837_v49  ;;  %13317 = vmatprep.mubr.msk.f32.mxu0 %vm494_vm0, %v14681_v17 }
  0x79   : > { %13267 = vmatprep.mubr.msk.f32.mxu1 %vm494_vm0, %v14843_v51 }
  0x7b   : > { %13318 = vmatmul.mubr.msk.f32.gmra.mxu0 %vm494_vm0, %v14695_v19 }
  0x7c   : > { %13268 = vmatmul.mubr.msk.f32.gmra.mxu1 %vm494_vm0, %v14857_v53  ;;  %13320 = vmatprep.mubr.msk.f32.mxu0 %vm494_vm0, %v14701_v21 }
  0x7d   : > { %13270 = vmatprep.mubr.msk.f32.mxu1 %vm494_vm0, %v14863_v55 }
  0x7f   : > { %13321 = vmatmul.mubr.msk.f32.gmra.mxu0 %vm494_vm0, %v14715_v23 }
  0x80   : > { %13271 = vmatmul.mubr.msk.f32.gmra.mxu1 %vm494_vm0, %v14877_v57  ;;  %13323 = vmatprep.mubr.msk.f32.mxu0 %vm494_vm0, %v14721_v25 }
  0x81   : > { %13273 = vmatprep.mubr.msk.f32.mxu1 %vm494_vm0, %v14883_v59 }
  0x83   : > { %13324 = vmatmul.mubr.msk.f32.gmra.mxu0 %vm494_vm0, %v14735_v27 }
  0x84   : > { %13274 = vmatmul.mubr.msk.f32.gmra.mxu1 %vm494_vm0, %v14897_v61  ;;  %13326 = vmatprep.mubr.msk.f32.mxu0 %vm494_vm0, %v14741_v29  ;;  %v19500_v29 = vld [vmem:[#allocation14_spill] sm:$0xff] }
  0x85   : > { %13276 = vmatprep.mubr.msk.f32.mxu1 %vm494_vm0, %v14903_v63 }
  0x87   : > { %13327 = vmatmul.mubr.msk.f32.gmra.mxu0 %vm494_vm0, %v14755_v31  ;;  %v19502_v31 = vld [vmem:[#allocation16_spill] sm:$0xff] }
  0x88   : > { %13277 = vmatmul.mubr.msk.f32.gmra.mxu1 %vm494_vm0, %v14917_v1  ;;  %13329 = vmatprep.mubr.msk.f32.mxu0 %vm494_vm0, %v14761_v33  ;;  %v19504_v33 = vld [vmem:[#allocation18_spill] sm:$0xff] }
  0x89   : > { %13279 = vmatprep.mubr.msk.f32.mxu1 %vm494_vm0, %v14923_v3 }
  0x8b   : > { %13330 = vmatmul.mubr.msk.f32.gmra.mxu0 %vm494_vm0, %v14775_v35  ;;  %v19506_v35 = vld [vmem:[#allocation20_spill] sm:$0xff] }
  0x8c   : > { %13280 = vmatmul.mubr.msk.f32.gmra.mxu1 %vm494_vm0, %v14937_v9  ;;  %13332 = vmatprep.mubr.msk.f32.mxu0 %vm494_vm0, %v14620_v4  ;;  %v15237_v4 = vld [vmem:[%s14616_s12 + $0x180] sm:$0xff] }
  0x8d   : > { %13282 = vmatprep.mubr.msk.f32.mxu1 %vm494_vm0, %v14943_v37 }
  0x8f   : > { %13333 = vmatmul.mubr.msk.f32.gmra.mxu0 %vm494_vm0, %v14627_v6  ;;  %v15240_v6 = vld [vmem:[%s14616_s12 + $0x181] sm:$0xff] }
  0x90   : > { %13283 = vmatmul.mubr.msk.f32.gmra.mxu1 %vm494_vm0, %v14957_v39  ;;  %13335 = vmatprep.mubr.msk.f32.mxu0 %vm494_vm0, %v14633_v8  ;;  %19488 = vst [vmem:[#allocation34_spill] sm:$0xff] %v15240_v6  ;;  %v15251_v8 = vld [vmem:[%s14616_s12 + $0x188] sm:$0xff] }
  0x91   : > { %13285 = vmatprep.mubr.msk.f32.mxu1 %vm494_vm0, %v14963_v5 }
  0x93   : > { %13336 = vmatmul.mubr.msk.f32.gmra.mxu0 %vm494_vm0, %v14652_v12  ;;  %v19491_v12 = vld [vmem:[#allocation5_spill] sm:$0xff] }
  0x94   : > { %13286 = vmatmul.mubr.msk.f32.gmra.mxu1 %vm494_vm0, %v14977_v38  ;;  %13338 = vmatprep.mubr.msk.f32.mxu0 %vm494_vm0, %v14662_v14  ;;  %v19492_v14 = vld [vmem:[#allocation6_spill] sm:$0xff] }
  0x95   : > { %13288 = vmatprep.mubr.msk.f32.mxu1 %vm494_vm0, %v14983_v0 }
  0x97   : > { %13339 = vmatmul.mubr.msk.f32.gmra.mxu0 %vm494_vm0, %v14678_v16  ;;  %v19493_v16 = vld [vmem:[#allocation7_spill] sm:$0xff] }
  0x98   : > { %13289 = vmatmul.mubr.msk.f32.gmra.mxu1 %vm494_vm0, %v14997_v2  ;;  %13341 = vmatprep.mubr.msk.f32.mxu0 %vm494_vm0, %v14684_v18  ;;  %v19494_v18 = vld [vmem:[#allocation8_spill] sm:$0xff] }
  0x99   : > { %13291 = vmatprep.mubr.msk.f32.mxu1 %vm494_vm0, %v15003_v60 }
  0x9b   : > { %13342 = vmatmul.mubr.msk.f32.gmra.mxu0 %vm494_vm0, %v14698_v20  ;;  %v19495_v20 = vld [vmem:[#allocation9_spill] sm:$0xff] }
  0x9c   : > { %13292 = vmatmul.mubr.msk.f32.gmra.mxu1 %vm494_vm0, %v15017_v62  ;;  %13344 = vmatprep.mubr.msk.f32.mxu0 %vm494_vm0, %v14704_v22  ;;  %v19496_v22 = vld [vmem:[#allocation10_spill] sm:$0xff] }
  0x9d   : > { %13294 = vmatprep.mubr.msk.f32.mxu1 %vm494_vm0, %v15023_v56 }
  0x9f   : > { %13345 = vmatmul.mubr.msk.f32.gmra.mxu0 %vm494_vm0, %v14718_v24  ;;  %v19497_v24 = vld [vmem:[#allocation11_spill] sm:$0xff] }
  0xa0   : > { %13295 = vmatmul.mubr.msk.f32.gmra.mxu1 %vm494_vm0, %v15037_v58  ;;  %13347 = vmatprep.mubr.msk.f32.mxu0 %vm494_vm0, %v14724_v26  ;;  %v19498_v26 = vld [vmem:[#allocation12_spill] sm:$0xff] }
  0xa1   : > { %13297 = vmatprep.mubr.msk.f32.mxu1 %vm494_vm0, %v15043_v52 }
  0xa3   : > { %13348 = vmatmul.mubr.msk.f32.gmra.mxu0 %vm494_vm0, %v14738_v28  ;;  %v19499_v28 = vld [vmem:[#allocation13_spill] sm:$0xff] }
  0xa4   : > { %13298 = vmatmul.mubr.msk.f32.gmra.mxu1 %vm494_vm0, %v15057_v54  ;;  %13350 = vmatprep.mubr.msk.f32.mxu0 %vm494_vm0, %v14744_v30  ;;  %v19501_v30 = vld [vmem:[#allocation15_spill] sm:$0xff] }
  0xa5   : > { %13300 = vmatprep.mubr.msk.f32.mxu1 %vm494_vm0, %v15063_v48 }
  0xa7   : > { %13351 = vmatmul.mubr.msk.f32.gmra.mxu0 %vm494_vm0, %v14758_v32  ;;  %v19503_v32 = vld [vmem:[#allocation17_spill] sm:$0xff] }
  0xa8   : > { %13301 = vmatmul.mubr.msk.f32.gmra.mxu1 %vm494_vm0, %v15077_v50  ;;  %13353 = vmatprep.mubr.msk.f32.mxu0 %vm494_vm0, %v14764_v34  ;;  %v19505_v34 = vld [vmem:[#allocation19_spill] sm:$0xff] }
  0xa9   : > { %13303 = vmatprep.mubr.msk.f32.mxu1 %vm494_vm0, %v15083_v42 }
  0xab   : > { %13354 = vmatmul.mubr.msk.f32.gmra.mxu0 %vm494_vm0, %v19489_v7 }
  0xac   : > { %13304 = vmatmul.mubr.msk.f32.gmra.mxu1 %vm494_vm0, %v15097_v46  ;;  %13356 = vmatprep.mubr.msk.f32.mxu0 %vm494_vm0, %v15240_v6 }
  0xad   : > { %13306 = vmatprep.mubr.msk.f32.mxu1 %vm494_vm0, %v15237_v4 }
  0xaf   : > { %13357 = vmatmul.mubr.msk.f32.gmra.mxu0 %vm494_vm0, %v15254_v11  ;;  %v19526_v11 = vld [vmem:[#allocation33_spill] sm:$0xff] }
  0xb0   : > { %13307 = vmatmul.mubr.msk.f32.gmra.mxu1 %vm494_vm0, %v15251_v8  ;;  %13411 = vmatprep.mubr.msk.f32.mxu0 %vm494_vm0, %v14821_v47 }
  0xb1   : > { %13361 = vmatprep.mubr.msk.f32.mxu1 %vm494_vm0, %v19491_v12 }
  0xb3   : > { %13412 = vmatmul.mubr.msk.f32.vlgmr.msra.gmra.mxu0 %vm494_vm0, %v14837_v49 }
  0xb4   : > { %13362 = vmatmul.mubr.msk.f32.vlgmr.msra.gmra.mxu1 %vm494_vm0, %v19492_v14  ;;  %13510 = vmatpush3.msra.mxu0 %v15122_v10 }
  0xb5   : > { %13460 = vmatpush3.msra.mxu1 %v15117_v36  ;;  %13364 = vmatprep.mubr.msk.f32.mxu1 %vm494_vm0, %v19493_v16  ;;  %v19507_v36 = vld [vmem:[#allocation21_spill] sm:$0xff] }
  0xb6   : > { %13414 = vmatprep.mubr.msk.f32.mxu0 %vm494_vm0, %v14843_v51 }
  0xb7   : > { %13415 = vmatmul.mubr.msk.f32.gmra.mxu0 %vm494_vm0, %v14857_v53 }
  0xb8   : > { %13365 = vmatmul.mubr.msk.f32.gmra.mxu1 %vm494_vm0, %v19494_v18  ;;  %13417 = vmatprep.mubr.msk.f32.mxu0 %vm494_vm0, %v14863_v55  ;;  %v19510_v55 = vld [vmem:[#allocation24_spill] sm:$0xff] }
  0xb9   : > { %13367 = vmatprep.mubr.msk.f32.mxu1 %vm494_vm0, %v19495_v20 }
  0xbb   : > { %13418 = vmatmul.mubr.msk.f32.gmra.mxu0 %vm494_vm0, %v14877_v57  ;;  %v19511_v57 = vld [vmem:[#allocation25_spill] sm:$0xff] }
  0xbc   : > { %13368 = vmatmul.mubr.msk.f32.gmra.mxu1 %vm494_vm0, %v19496_v22  ;;  %13420 = vmatprep.mubr.msk.f32.mxu0 %vm494_vm0, %v14883_v59 }
  0xbd   : > { %13370 = vmatprep.mubr.msk.f32.mxu1 %vm494_vm0, %v19497_v24 }
  0xbf   : > { %13421 = vmatmul.mubr.msk.f32.gmra.mxu0 %vm494_vm0, %v14897_v61 }
  0xc0   : > { %13371 = vmatmul.mubr.msk.f32.gmra.mxu1 %vm494_vm0, %v19498_v26  ;;  %13423 = vmatprep.mubr.msk.f32.mxu0 %vm494_vm0, %v14903_v63 }
  0xc1   : > { %13373 = vmatprep.mubr.msk.f32.mxu1 %vm494_vm0, %v19499_v28 }
  0xc3   : > { %13424 = vmatmul.mubr.msk.f32.gmra.mxu0 %vm494_vm0, %v14917_v1 }
  0xc4   : > { %13374 = vmatmul.mubr.msk.f32.gmra.mxu1 %vm494_vm0, %v19500_v29  ;;  %13426 = vmatprep.mubr.msk.f32.mxu0 %vm494_vm0, %v14923_v3 }
  0xc5   : > { %13376 = vmatprep.mubr.msk.f32.mxu1 %vm494_vm0, %v19501_v30 }
  0xc7   : > { %13427 = vmatmul.mubr.msk.f32.gmra.mxu0 %vm494_vm0, %v14937_v9 }
  0xc8   : > { %13377 = vmatmul.mubr.msk.f32.gmra.mxu1 %vm494_vm0, %v19502_v31  ;;  %13429 = vmatprep.mubr.msk.f32.mxu0 %vm494_vm0, %v14943_v37 }
  0xc9   : > { %13379 = vmatprep.mubr.msk.f32.mxu1 %vm494_vm0, %v19503_v32 }
  0xcb   : > { %13430 = vmatmul.mubr.msk.f32.gmra.mxu0 %vm494_vm0, %v14957_v39 }
  0xcc   : > { %13380 = vmatmul.mubr.msk.f32.gmra.mxu1 %vm494_vm0, %v19504_v33  ;;  %13432 = vmatprep.mubr.msk.f32.mxu0 %vm494_vm0, %v14963_v5  ;;  %v19516_v5 = vld [vmem:[#allocation28_spill] sm:$0xff] }
  0xcd   : > { %13382 = vmatprep.mubr.msk.f32.mxu1 %vm494_vm0, %v19505_v34 }
  0xcf   : > { %13433 = vmatmul.mubr.msk.f32.gmra.mxu0 %vm494_vm0, %v14977_v38  ;;  %v19519_v38 = vld [vmem:[#allocation30_spill] sm:$0xff] }
  0xd0   : > { %13383 = vmatmul.mubr.msk.f32.gmra.mxu1 %vm494_vm0, %v19506_v35  ;;  %13435 = vmatprep.mubr.msk.f32.mxu0 %vm494_vm0, %v14983_v0  ;;  %v19513_v0 = vld [vmem:[#allocation26_spill] sm:$0xff] }
  0xd1   : > { %13385 = vmatprep.mubr.msk.f32.mxu1 %vm494_vm0, %v19507_v36 }
  0xd3   : > { %v15330_v41 = vpop.f32.mrf.mxu0  ;;  %13436 = vmatmul.mubr.msk.f32.gmra.mxu0 %vm494_vm0, %v14997_v2 }
  0xd4   : > { %v15332_v43 = vpop.f32.mrf.mxu1  ;;  %13386 = vmatmul.mubr.msk.f32.gmra.mxu1 %vm494_vm0, %v19508_v44  ;;  %13438 = vmatprep.mubr.msk.f32.mxu0 %vm494_vm0, %v15003_v60 }
  0xd5   : > { %13388 = vmatprep.mubr.msk.f32.mxu1 %vm494_vm0, %v19509_v45  ;;  %v15342_v47 = vpop.f32.mrf.mxu0 }
  0xd6   : > { %v15344_v49 = vpop.f32.mrf.mxu1 }
  0xd7   : > { %v15346_v51 = vpop.f32.mrf.mxu0  ;;  %13439 = vmatmul.mubr.msk.f32.gmra.mxu0 %vm494_vm0, %v15017_v62  ;;  %v19514_v62 = vld [vmem:[#allocation27_spill] sm:$0xff] }
  0xd8   : > { %v15348_v53 = vpop.f32.mrf.mxu1  ;;  %13389 = vmatmul.mubr.msk.f32.gmra.mxu1 %vm494_vm0, %v19510_v55  ;;  %13441 = vmatprep.mubr.msk.f32.mxu0 %vm494_vm0, %v15023_v56 }
  0xd9   : > { %13391 = vmatprep.mubr.msk.f32.mxu1 %vm494_vm0, %v19511_v57  ;;  %v15358_v59 = vpop.f32.mrf.mxu0 }
  0xda   : > { %v15360_v60 = vpop.f32.mrf.mxu1 }
  0xdb   : > { %19512 = vst [vmem:[#allocation5_spill] sm:$0xff] %v15360_v60  ;;  %v15362_v61 = vpop.f32.mrf.mxu0  ;;  %13442 = vmatmul.mubr.msk.f32.gmra.mxu0 %vm494_vm0, %v15037_v58  ;;  %v19517_v58 = vld [vmem:[#allocation29_spill] sm:$0xff] }
  0xdc   : > { %v15364_v63 = vpop.f32.mrf.mxu1  ;;  %13392 = vmatmul.mubr.msk.f32.gmra.mxu1 %vm494_vm0, %v19513_v0  ;;  %13444 = vmatprep.mubr.msk.f32.mxu0 %vm494_vm0, %v15043_v52 }
  0xdd   : > { %13394 = vmatprep.mubr.msk.f32.mxu1 %vm494_vm0, %v19514_v62  ;;  %v15374_v56 = vpop.f32.mrf.mxu0 }
  0xde   : > { %v15376_v1 = vpop.f32.mrf.mxu1 }
  0xdf   : > { %19515 = vst [vmem:[#allocation6_spill] sm:$0xff] %v15376_v1  ;;  %v15378_v2 = vpop.f32.mrf.mxu0  ;;  %13445 = vmatmul.mubr.msk.f32.gmra.mxu0 %vm494_vm0, %v15057_v54  ;;  %v19520_v54 = vld [vmem:[#allocation31_spill] sm:$0xff] }
  0xe0   : > { %v15380_v3 = vpop.f32.mrf.mxu1  ;;  %13395 = vmatmul.mubr.msk.f32.gmra.mxu1 %vm494_vm0, %v19516_v5  ;;  %13447 = vmatprep.mubr.msk.f32.mxu0 %vm494_vm0, %v15063_v48 }
  0xe1   : > { %13397 = vmatprep.mubr.msk.f32.mxu1 %vm494_vm0, %v19517_v58  ;;  %v15390_v52 = vpop.f32.mrf.mxu0 }
  0xe2   : > { %v15392_v9 = vpop.f32.mrf.mxu1 }
  0xe3   : > { %19518 = vst [vmem:[#allocation7_spill] sm:$0xff] %v15392_v9  ;;  %v15394_v10 = vpop.f32.mrf.mxu0  ;;  %13448 = vmatmul.mubr.msk.f32.gmra.mxu0 %vm494_vm0, %v15077_v50  ;;  %v19522_v50 = vld [vmem:[#allocation32_spill] sm:$0xff]  ;;  %v11387_v9 = vld [vmem:[%s14616_s12 + $0x198] sm:$0xff] }
  0xe4   : > { %v15396_v37 = vpop.f32.mrf.mxu1  ;;  %13398 = vmatmul.mubr.msk.f32.gmra.mxu1 %vm494_vm0, %v19519_v38  ;;  %13450 = vmatprep.mubr.msk.f32.mxu0 %vm494_vm0, %v15083_v42 }
  0xe5   : > { %13400 = vmatprep.mubr.msk.f32.mxu1 %vm494_vm0, %v19520_v54  ;;  %v15406_v48 = vpop.f32.mrf.mxu0 }
  0xe6   : > { %v15408_v39 = vpop.f32.mrf.mxu1 }
  0xe7   : > { %19521 = vst [vmem:[#allocation8_spill] sm:$0xff] %v15408_v39  ;;  %v15410_v7 = vpop.f32.mrf.mxu0  ;;  %13451 = vmatmul.mubr.msk.f32.gmra.mxu0 %vm494_vm0, %v15097_v46  ;;  %v15427_v39 = vld [vmem:[%s14616_s12 + $0x182] sm:$0xff]  ;;  %v15442_v46 = vld [vmem:[%s14616_s12 + $0x18a] sm:$0xff] }
  0xe8   : > { %v15412_v12 = vpop.f32.mrf.mxu1  ;;  %13401 = vmatmul.mubr.msk.f32.gmra.mxu1 %vm494_vm0, %v15080_v40  ;;  %13453 = vmatprep.mubr.msk.f32.mxu0 %vm494_vm0, %v15237_v4  ;;  %19524 = vst [vmem:[#allocation10_spill] sm:$0xff] %v15427_v39  ;;  %19527 = vst [vmem:[#allocation12_spill] sm:$0xff] %v15442_v46  ;;  %v11388_v4 = vld [vmem:[%s14616_s12 + $0x1a0] sm:$0xff] }
  0xe9   : > { %13403 = vmatprep.mubr.msk.f32.mxu1 %vm494_vm0, %v19522_v50  ;;  %v15422_v42 = vpop.f32.mrf.mxu0 }
  0xea   : > { %v15424_v14 = vpop.f32.mrf.mxu1 }
  0xeb   : > { %19523 = vst [vmem:[#allocation9_spill] sm:$0xff] %v15424_v14  ;;  %v15430_v1 = vpop.f32.mrf.mxu0  ;;  %13454 = vmatmul.mubr.msk.f32.gmra.mxu0 %vm494_vm0, %v15251_v8 }
  0xec   : > { %v15432_v60 = vpop.f32.mrf.mxu1  ;;  %13404 = vmatmul.mubr.msk.f32.gmra.mxu1 %vm494_vm0, %v19526_v11  ;;  %13456 = vmatprep.mubr.msk.f32.mxu0 %vm494_vm0, %v11387_v9 }
  0xed   : > { %19525 = vst [vmem:[#allocation11_spill] sm:$0xff] %v15432_v60  ;;  %13406 = vmatprep.mubr.msk.f32.mxu1 %vm494_vm0, %v15427_v39  ;;  %v15445_v50 = vpop.f32.mrf.mxu0 }
  0xee   : > { %v15447_v14 = vpop.f32.mrf.mxu1 }
  0xef   : > { %19528 = vst [vmem:[#allocation13_spill] sm:$0xff] %v15447_v14  ;;  %v15449_v6 = vpop.f32.mrf.mxu0  ;;  %13457 = vmatmul.mubr.msk.f32.gmra.mxu0 %vm494_vm0, %v11388_v4 }
  0xf0   : > { %v15451_v60 = vpop.f32.mrf.mxu1  ;;  %13407 = vmatmul.mubr.msk.f32.gmra.mxu1 %vm494_vm0, %v15442_v46  ;;  %13511 = vmatprep.mubr.msk.f32.mxu0 %vm494_vm0, %v19493_v16 }
  0xf1   : > { %19529 = vst [vmem:[#allocation14_spill] sm:$0xff] %v15451_v60  ;;  %13461 = vmatprep.mubr.msk.f32.mxu1 %vm494_vm0, %v14659_v13  ;;  %v15460_v8 = vpop.f32.mrf.mxu0 }
  0xf2   : > { %v15462_v11 = vpop.f32.mrf.mxu1 }
  0xf3   : > { %19530 = vst [vmem:[#allocation15_spill] sm:$0xff] %v15462_v11  ;;  %v13213_v14 = vpop.f32.mrf.mxu0  ;;  %13512 = vmatmul.mubr.msk.f32.vlgmr.msra.gmra.mxu0 %vm494_vm0, %v19494_v18 }
  0xf4   : > { %v13163_v9 = vpop.f32.mrf.mxu1  ;;  %13462 = vmatmul.mubr.msk.f32.vlgmr.msra.gmra.mxu1 %vm494_vm0, %v14675_v15  ;;  %13514 = vmatprep.mubr.msk.f32.mxu0 %vm494_vm0, %v19495_v20 }
  0xf5   : > { %v984_v4 = vadd.f32 %v13163_v9, %v15330_v41  ;;  %13464 = vmatprep.mubr.msk.f32.mxu1 %vm494_vm0, %v14681_v17  ;;  %v1333_v16 = vpop.f32.mrf.mxu0  ;;  %v11432_v9 = vld [vmem:[%s14616_s12 + $0xa9] sm:$0xff] }
  0xf6   : > { %v978_v13 = vpop.f32.mrf.mxu1 }
  0xf7   : > { %v15473_v60 = vadd.f32 %v13213_v14, %v984_v4  ;;  %v979_v11 = vadd.f32 %v978_v13, %v15342_v47  ;;  %v13216_v39 = vpop.f32.mrf.mxu0  ;;  %13515 = vmatmul.mubr.msk.f32.gmra.mxu0 %vm494_vm0, %v19496_v22 }
  0xf8   : > { %v13166_v46 = vpop.f32.mrf.mxu1  ;;  %13465 = vmatmul.mubr.msk.f32.gmra.mxu1 %vm494_vm0, %v14695_v19  ;;  %13517 = vmatprep.mubr.msk.f32.mxu0 %vm494_vm0, %v19497_v24 }
  0xf9   : > { %v15480_v15 = vadd.f32 %v1333_v16, %v979_v11  ;;  %v994_v17 = vadd.f32 %v13166_v46, %v15346_v51  ;;  %13467 = vmatprep.mubr.msk.f32.mxu1 %vm494_vm0, %v14701_v21  ;;  %v1343_v20 = vpop.f32.mrf.mxu0  ;;  %v11433_v16 = vld [vmem:[%s14616_s12 + $0xb1] sm:$0xff] }
  0xfa   : > { %v988_v18 = vpop.f32.mrf.mxu1 }
  0xfb   : > { %v15487_v41 = vadd.f32 %v13216_v39, %v994_v17  ;;  %v989_v19 = vadd.f32 %v988_v18, %v15358_v59  ;;  %v13219_v14 = vpop.f32.mrf.mxu0  ;;  %13518 = vmatmul.mubr.msk.f32.gmra.mxu0 %vm494_vm0, %v19498_v26  ;;  %v11430_v59 = vld [vmem:[%s14616_s12 + $0x91] sm:$0xff] }
  0xfc   : > { %v13169_v47 = vpop.f32.mrf.mxu1  ;;  %13468 = vmatmul.mubr.msk.f32.gmra.mxu1 %vm494_vm0, %v14715_v23  ;;  %13520 = vmatprep.mubr.msk.f32.mxu0 %vm494_vm0, %v19499_v28 }
  0xfd   : > { %v15494_v22 = vadd.f32 %v1343_v20, %v989_v19  ;;  %v1004_v21 = vadd.f32 %v13169_v47, %v15362_v61  ;;  %13470 = vmatprep.mubr.msk.f32.mxu1 %vm494_vm0, %v14721_v25  ;;  %v1353_v51 = vpop.f32.mrf.mxu0  ;;  %v11431_v61 = vld [vmem:[%s14616_s12 + $0x99] sm:$0xff]  ;;  %v11434_v20 = vld [vmem:[%s14616_s12 + $0xc1] sm:$0xff] }
  0xfe   : > { %v998_v24 = vpop.f32.mrf.mxu1 }
  0xff   : > { %v15502_v39 = vadd.f32 %v13219_v14, %v1004_v21  ;;  %v999_v23 = vadd.f32 %v998_v24, %v15374_v56  ;;  %v13222_v46 = vpop.f32.mrf.mxu0  ;;  %13521 = vmatmul.mubr.msk.f32.gmra.mxu0 %vm494_vm0, %v19500_v29  ;;  %v11435_v21 = vld [vmem:[%s14616_s12 + $0xc9] sm:$0xff] }
 0x100   : > { %v13172_v26 = vpop.f32.mrf.mxu1  ;;  %13471 = vmatmul.mubr.msk.f32.gmra.mxu1 %vm494_vm0, %v14735_v27  ;;  %13523 = vmatprep.mubr.msk.f32.mxu0 %vm494_vm0, %v19501_v30 }
 0x101   : > { %v15509_v25 = vadd.f32 %v1353_v51, %v999_v23  ;;  %v1014_v28 = vadd.f32 %v13172_v26, %v15378_v2  ;;  %13473 = vmatprep.mubr.msk.f32.mxu1 %vm494_vm0, %v11430_v59  ;;  %v1363_v11 = vpop.f32.mrf.mxu0  ;;  %v11436_v51 = vld [vmem:[%s14616_s12 + $0xd9] sm:$0xff] }
 0x102   : > { %v1008_v56 = vpop.f32.mrf.mxu1 }
 0x103   : > { %v15517_v4 = vadd.f32 %v13222_v46, %v1014_v28  ;;  %v1009_v27 = vadd.f32 %v1008_v56, %v15390_v52  ;;  %v13225_v13 = vpop.f32.mrf.mxu0  ;;  %13524 = vmatmul.mubr.msk.f32.gmra.mxu0 %vm494_vm0, %v19502_v31  ;;  %v11554_v52 = vld [vmem:[%s19369_s3 + $0x18] sm:$0xff]  ;;  %v11437_v46 = vld [vmem:[%s14616_s12 + $0xe1] sm:$0xff] }
 0x104   : > { %v13175_v29 = vpop.f32.mrf.mxu1  ;;  %13474 = vmatmul.mubr.msk.f32.gmra.mxu1 %vm494_vm0, %v11431_v61  ;;  %13526 = vmatprep.mubr.msk.f32.mxu0 %vm494_vm0, %v19503_v32  ;;  %v11438_v61 = vld [vmem:[%s14616_s12 + $0xf1] sm:$0xff] }
 0x105   : > { %v15523_v2 = vadd.f32 %v1363_v11, %v1009_v27  ;;  %v1024_v30 = vadd.f32 %v13175_v29, %v15394_v10  ;;  %13476 = vmatprep.mubr.msk.f32.mxu1 %vm494_vm0, %v11432_v9  ;;  %v1373_v18 = vpop.f32.mrf.mxu0  ;;  %13559 = vmatprep.subr.mxu1 %v11554_v52  ;;  %v11439_v27 = vld [vmem:[%s14616_s12 + $0xf9] sm:$0xff] }
 0x106   : > { %v1018_v17 = vpop.f32.mrf.mxu1  ;;  %13560 = vmatpush3.msra.mxu1 %v11554_v52 }
 0x107   : > { %v15534_v31 = vadd.f32 %v13225_v13, %v1024_v30  ;;  %v1019_v10 = vadd.f32 %v1018_v17, %v15406_v48  ;;  %v13228_v47 = vpop.f32.mrf.mxu0  ;;  %13527 = vmatmul.mubr.msk.f32.gmra.mxu0 %vm494_vm0, %v19504_v33  ;;  %v11440_v13 = vld [vmem:[%s14616_s12 + $0x109] sm:$0xff]  ;;  %v11441_v17 = vld [vmem:[%s14616_s12 + $0x111] sm:$0xff] }
 0x108   : > { %v13178_v19 = vpop.f32.mrf.mxu1  ;;  %13477 = vmatmul.mubr.msk.f32.gmra.mxu1 %vm494_vm0, %v11433_v16  ;;  %13529 = vmatprep.mubr.msk.f32.mxu0 %vm494_vm0, %v19505_v34 }
 0x109   : > { %v15540_v32 = vadd.f32 %v1373_v18, %v1019_v10  ;;  %v1034_v14 = vadd.f32 %v13178_v19, %v15410_v7  ;;  %13479 = vmatprep.mubr.msk.f32.mxu1 %vm494_vm0, %v11434_v20  ;;  %v1383_v24 = vpop.f32.mrf.mxu0  ;;  %v11442_v20 = vld [vmem:[%s14616_s12 + $0x121] sm:$0xff] }
 0x10a   : > { %v1028_v48 = vpop.f32.mrf.mxu1 }
 0x10b   : > { %v15548_v59 = vadd.f32 %v13228_v47, %v1034_v14  ;;  %v1029_v23 = vadd.f32 %v1028_v48, %v15422_v42  ;;  %v13231_v26 = vpop.f32.mrf.mxu0  ;;  %13530 = vmatmul.mubr.msk.f32.gmra.mxu0 %vm494_vm0, %v19506_v35  ;;  %v11443_v14 = vld [vmem:[%s14616_s12 + $0x129] sm:$0xff]  ;;  %v11444_v48 = vld [vmem:[%s14616_s12 + $0x139] sm:$0xff] }
 0x10c   : > { %v13181_v33 = vpop.f32.mrf.mxu1  ;;  %13480 = vmatmul.mubr.msk.f32.gmra.mxu1 %vm494_vm0, %v11435_v21  ;;  %13532 = vmatprep.mubr.msk.f32.mxu0 %vm494_vm0, %v19507_v36 }
 0x10d   : > { %v15554_v7 = vadd.f32 %v1383_v24, %v1029_v23  ;;  %v1044_v34 = vadd.f32 %v13181_v33, %v15430_v1  ;;  %13482 = vmatprep.mubr.msk.f32.mxu1 %vm494_vm0, %v11436_v51  ;;  %v1393_v42 = vpop.f32.mrf.mxu0 }
 0x10e   : > { %v1038_v28 = vpop.f32.mrf.mxu1 }
 0x10f   : > { %v15562_v56 = vadd.f32 %v13231_v26, %v1044_v34  ;;  %v1039_v11 = vadd.f32 %v1038_v28, %v15445_v50  ;;  %v13234_v9 = vpop.f32.mrf.mxu0  ;;  %13533 = vmatmul.mubr.msk.f32.gmra.mxu0 %vm494_vm0, %v19508_v44  ;;  %v11446_v26 = vld [vmem:[%s14616_s12 + $0x151] sm:$0xff] }
 0x110   : > { %v13184_v35 = vpop.f32.mrf.mxu1  ;;  %13483 = vmatmul.mubr.msk.f32.gmra.mxu1 %vm494_vm0, %v11437_v46  ;;  %13535 = vmatprep.mubr.msk.f32.mxu0 %vm494_vm0, %v19509_v45 }
 0x111   : > { %v15568_v1 = vadd.f32 %v1393_v42, %v1039_v11  ;;  %v1054_v36 = vadd.f32 %v13184_v35, %v15449_v6  ;;  %13485 = vmatprep.mubr.msk.f32.mxu1 %vm494_vm0, %v11438_v61  ;;  %v1403_v50 = vpop.f32.mrf.mxu0  ;;  %v11448_v61 = vld [vmem:[%s14616_s12 + $0x169] sm:$0xff] }
 0x112   : > { %v1048_v29 = vpop.f32.mrf.mxu1  ;;  %v11513_v11 = vld [vmem:[%s14616_s12 + $0x16a] sm:$0xff] }
 0x113   : > { %v15576_v30 = vadd.f32 %v13234_v9, %v1054_v36  ;;  %v1049_v16 = vadd.f32 %v1048_v29, %v15460_v8  ;;  %v13237_v52 = vpop.f32.mrf.mxu0  ;;  %13536 = vmatmul.mubr.msk.f32.gmra.mxu0 %vm494_vm0, %v19510_v55  ;;  %v11514_v36 = vld [vmem:[%s14616_s12 + $0x172] sm:$0xff] }
 0x114   : > { %v13187_v44 = vpop.f32.mrf.mxu1  ;;  %13486 = vmatmul.mubr.msk.f32.gmra.mxu1 %vm494_vm0, %v11439_v27  ;;  %13538 = vmatprep.mubr.msk.f32.mxu0 %vm494_vm0, %v19511_v57  ;;  %v11553_v27 = vld [vmem:[%s19369_s3 + $0x10] sm:$0xff] }
 0x115   : > { %v15582_v6 = vadd.f32 %v1403_v50, %v1049_v16  ;;  %v1064_v45 = vadd.f32 %v13187_v44, %v15332_v43  ;;  %13488 = vmatprep.mubr.msk.f32.mxu1 %vm494_vm0, %v11440_v13  ;;  %v1413_v8 = vpop.f32.mrf.mxu0  ;;  %13561 = vmatprep.subr.mxu1 %v11553_v27  ;;  %v19535_v44 = vld [vmem:[#allocation34_spill] sm:$0xff] }
 0x116   : > { %v1058_v18 = vpop.f32.mrf.mxu1  ;;  %13562 = vmatpush3.msra.mxu1 %v11553_v27  ;;  %v19433_v27 = vmov 0.0  }
 0x117   : > { %19531 = vst [vmem:[#allocation16_spill] sm:$0xff] %v15582_v6  ;;  %v15590_v10 = vadd.f32 %v13237_v52, %v1064_v45  ;;  %v1059_v19 = vadd.f32 %v1058_v18, %v15344_v49  ;;  %v13240_v47 = vpop.f32.mrf.mxu0  ;;  %13539 = vmatmul.mubr.msk.f32.gmra.mxu0 %vm494_vm0, %v19513_v0  ;;  %v19536_v52 = vld [vmem:[#allocation10_spill] sm:$0xff]  ;;  %v11452_v18 = vld [vmem:[%s14616_s12 + $0x199] sm:$0xff]  ;;  %287 = vst.msk [vmem:[#allocation2 + $0x30] sm:$0xff] %vm279_vm1, %v19433_v27 }
 0x118   : > { %v13190_v55 = vpop.f32.mrf.mxu1  ;;  %13489 = vmatmul.mubr.msk.f32.gmra.mxu1 %vm494_vm0, %v11441_v17  ;;  %13541 = vmatprep.mubr.msk.f32.mxu0 %vm494_vm0, %v19514_v62  ;;  %v11445_v62 = vld [vmem:[%s14616_s12 + $0x141] sm:$0xff]  ;;  %280 = vst.msk [vmem:[#allocation2] sm:$0xff] %vm279_vm1, %v19433_v27  ;;  %281 = vst.msk [vmem:[#allocation2 + $0x8] sm:$0xff] %vm279_vm1, %v19433_v27 }
 0x119   : > { %v15596_v43 = vadd.f32 %v1413_v8, %v1059_v19  ;;  %v1074_v57 = vadd.f32 %v13190_v55, %v15348_v53  ;;  %13491 = vmatprep.mubr.msk.f32.mxu1 %vm494_vm0, %v11442_v20  ;;  %v15605_v21 = vpop.f32.mrf.mxu0  ;;  %v11517_v8 = vld [vmem:[%s14616_s12 + $0x19a] sm:$0xff]  ;;  %282 = vst.msk [vmem:[#allocation2 + $0x10] sm:$0xff] %vm279_vm1, %v19433_v27  ;;  %285 = vst.msk [vmem:[#allocation2 + $0x20] sm:$0xff] %vm279_vm1, %v19433_v27 }
 0x11a   : > { %v15603_v49 = vpop.f32.mrf.mxu1  ;;  %286 = vst.msk [vmem:[#allocation2 + $0x28] sm:$0xff] %vm279_vm1, %v19433_v27  ;;  %289 = vst.msk [vmem:[#allocation2 + $0x40] sm:$0xff] %vm279_vm1, %v19433_v27 }
 0x11b   : > { %19532 = vst [vmem:[#allocation17_spill] sm:$0xff] %v15596_v43  ;;  %v15608_v24 = vadd.f32 %v13240_v47, %v1074_v57  ;;  %v13243_v51 = vpop.f32.mrf.mxu0  ;;  %13542 = vmatmul.mubr.msk.f32.gmra.mxu0 %vm494_vm0, %v19516_v5  ;;  %v19539_v47 = vld [vmem:[#allocation4_spill] sm:$0xff]  ;;  %v19541_v57 = vld [vmem:[#allocation11_spill] sm:$0xff]  ;;  %290 = vst.msk [vmem:[#allocation2 + $0x48] sm:$0xff] %vm279_vm1, %v19433_v27 }
 0x11c   : > { %v13193_v0 = vpop.f32.mrf.mxu1  ;;  %13492 = vmatmul.mubr.msk.f32.gmra.mxu1 %vm494_vm0, %v11443_v14  ;;  %13544 = vmatprep.mubr.msk.f32.mxu0 %vm494_vm0, %v19517_v58  ;;  %v11447_v58 = vld [vmem:[%s14616_s12 + $0x159] sm:$0xff]  ;;  %291 = vst.msk [vmem:[#allocation2 + $0x50] sm:$0xff] %vm279_vm1, %v19433_v27  ;;  %293 = vst.msk [vmem:[#allocation2 + $0x60] sm:$0xff] %vm279_vm1, %v19433_v27 }
 0x11d   : > { %v1084_v53 = vadd.f32 %v13193_v0, %v15364_v63  ;;  %13494 = vmatprep.mubr.msk.f32.mxu1 %vm494_vm0, %v11444_v48  ;;  %v15620_v33 = vpop.f32.mrf.mxu0  ;;  %v11453_v48 = vld [vmem:[%s14616_s12 + $0x1a1] sm:$0xff]  ;;  %294 = vst.msk [vmem:[#allocation2 + $0x68] sm:$0xff] %vm279_vm1, %v19433_v27  ;;  %295 = vst.msk [vmem:[#allocation2 + $0x70] sm:$0xff] %vm279_vm1, %v19433_v27 }
 0x11e   : > { %v15618_v23 = vpop.f32.mrf.mxu1  ;;  %v11518_v0 = vld [vmem:[%s14616_s12 + $0x1a2] sm:$0xff]  ;;  %297 = vst.msk [vmem:[#allocation2 + $0x80] sm:$0xff] %vm279_vm1, %v19433_v27  ;;  %298 = vst.msk [vmem:[#allocation2 + $0x88] sm:$0xff] %vm279_vm1, %v19433_v27 }
 0x11f   : > { %v15623_v34 = vadd.f32 %v13243_v51, %v1084_v53  ;;  %v13246_v5 = vpop.f32.mrf.mxu0  ;;  %13545 = vmatmul.mubr.msk.f32.gmra.mxu0 %vm494_vm0, %v19519_v38  ;;  %299 = vst.msk [vmem:[#allocation2 + $0x90] sm:$0xff] %vm279_vm1, %v19433_v27  ;;  %301 = vst.msk [vmem:[#allocation2 + $0xa0] sm:$0xff] %vm279_vm1, %v19433_v27 }
 0x120   : > { %v13196_v46 = vpop.f32.mrf.mxu1  ;;  %13495 = vmatmul.mubr.msk.f32.gmra.mxu1 %vm494_vm0, %v11445_v62  ;;  %13547 = vmatprep.mubr.msk.f32.mxu0 %vm494_vm0, %v19520_v54  ;;  %v11449_v54 = vld [vmem:[%s14616_s12 + $0x171] sm:$0xff]  ;;  %302 = vst.msk [vmem:[#allocation2 + $0xa8] sm:$0xff] %vm279_vm1, %v19433_v27  ;;  %303 = vst.msk [vmem:[#allocation2 + $0xb0] sm:$0xff] %vm279_vm1, %v19433_v27 }
 0x121   : > { %v1094_v63 = vadd.f32 %v13196_v46, %v15380_v3  ;;  %13497 = vmatprep.mubr.msk.f32.mxu1 %vm494_vm0, %v11446_v26  ;;  %v15635_v42 = vpop.f32.mrf.mxu0  ;;  %305 = vst.msk [vmem:[#allocation2 + $0xc0] sm:$0xff] %vm279_vm1, %v19433_v27  ;;  %306 = vst.msk [vmem:[#allocation2 + $0xc8] sm:$0xff] %vm279_vm1, %v19433_v27 }
 0x122   : > { %v15633_v28 = vpop.f32.mrf.mxu1  ;;  %307 = vst.msk [vmem:[#allocation2 + $0xd0] sm:$0xff] %vm279_vm1, %v19433_v27  ;;  %309 = vst.msk [vmem:[#allocation2 + $0xe0] sm:$0xff] %vm279_vm1, %v19433_v27 }
 0x123   : > { %v15639_v35 = vadd.f32 %v13246_v5, %v1094_v63  ;;  %v13249_v38 = vpop.f32.mrf.mxu0  ;;  %13548 = vmatmul.mubr.msk.f32.gmra.mxu0 %vm494_vm0, %v15080_v40  ;;  %v19544_v5 = vld [vmem:[#allocation14_spill] sm:$0xff]  ;;  %310 = vst.msk [vmem:[#allocation2 + $0xe8] sm:$0xff] %vm279_vm1, %v19433_v27  ;;  %311 = vst.msk [vmem:[#allocation2 + $0xf0] sm:$0xff] %vm279_vm1, %v19433_v27 }
 0x124   : > { %v13199_v9 = vpop.f32.mrf.mxu1  ;;  %13498 = vmatmul.mubr.msk.f32.gmra.mxu1 %vm494_vm0, %v11447_v58  ;;  %13550 = vmatprep.mubr.msk.f32.mxu0 %vm494_vm0, %v11513_v11  ;;  %313 = vst.msk [vmem:[#allocation2 + $0x100] sm:$0xff] %vm279_vm1, %v19433_v27  ;;  %314 = vst.msk [vmem:[#allocation2 + $0x108] sm:$0xff] %vm279_vm1, %v19433_v27 }
 0x125   : > { %v1104_v3 = vadd.f32 %v13199_v9, %v15396_v37  ;;  %13500 = vmatprep.mubr.msk.f32.mxu1 %vm494_vm0, %v11448_v61  ;;  %v15654_v50 = vpop.f32.mrf.mxu0  ;;  %315 = vst.msk [vmem:[#allocation2 + $0x110] sm:$0xff] %vm279_vm1, %v19433_v27  ;;  %317 = vst.msk [vmem:[#allocation2 + $0x120] sm:$0xff] %vm279_vm1, %v19433_v27 }
 0x126   : > { %v15652_v29 = vpop.f32.mrf.mxu1  ;;  %19534 = vst [vmem:[#allocation19_spill] sm:$0xff] %v15654_v50  ;;  %318 = vst.msk [vmem:[#allocation2 + $0x128] sm:$0xff] %vm279_vm1, %v19433_v27 }
 0x127   : > { %19533 = vst [vmem:[#allocation18_spill] sm:$0xff] %v15652_v29  ;;  %v15656_v40 = vadd.f32 %v13249_v38, %v1104_v3  ;;  %v13252_v13 = vpop.f32.mrf.mxu0  ;;  %13551 = vmatmul.mubr.msk.f32.gmra.mxu0 %vm494_vm0, %v11514_v36  ;;  %319 = vst.msk [vmem:[#allocation2 + $0x130] sm:$0xff] %vm279_vm1, %v19433_v27 }
 0x128   : > { %v13202_v37 = vpop.f32.mrf.mxu1  ;;  %13501 = vmatmul.mubr.msk.f32.gmra.mxu1 %vm494_vm0, %v11449_v54  ;;  %13553 = vmatprep.mubr.msk.f32.mxu0 %vm494_vm0, %v19536_v52  ;;  %321 = vst.msk [vmem:[#allocation2 + $0x140] sm:$0xff] %vm279_vm1, %v19433_v27  ;;  %322 = vst.msk [vmem:[#allocation2 + $0x148] sm:$0xff] %vm279_vm1, %v19433_v27 }
 0x129   : > { %v1114_v16 = vadd.f32 %v13202_v37, %v15412_v12  ;;  %13503 = vmatprep.mubr.msk.f32.mxu1 %vm494_vm0, %v19535_v44  ;;  %v15667_v17 = vpop.f32.mrf.mxu0  ;;  %v19540_v12 = vld [vmem:[#allocation12_spill] sm:$0xff]  ;;  %323 = vst.msk [vmem:[#allocation2 + $0x150] sm:$0xff] %vm279_vm1, %v19433_v27  ;;  %325 = vst.msk [vmem:[#allocation2 + $0x160] sm:$0xff] %vm279_vm1, %v19433_v27 }
 0x12a   : > { %v15665_v45 = vpop.f32.mrf.mxu1  ;;  %19538 = vst [vmem:[#allocation21_spill] sm:$0xff] %v15667_v17  ;;  %326 = vst.msk [vmem:[#allocation2 + $0x168] sm:$0xff] %vm279_vm1, %v19433_v27 }
 0x12b   : > { %19537 = vst [vmem:[#allocation20_spill] sm:$0xff] %v15665_v45  ;;  %v15671_v20 = vadd.f32 %v13252_v13, %v1114_v16  ;;  %v13255_v55 = vpop.f32.mrf.mxu0  ;;  %13554 = vmatmul.mubr.msk.f32.gmra.mxu0 %vm494_vm0, %v19540_v12  ;;  %327 = vst.msk [vmem:[#allocation2 + $0x170] sm:$0xff] %vm279_vm1, %v19433_v27 }
 0x12c   : > { %v13205_v19 = vpop.f32.mrf.mxu1  ;;  %13504 = vmatmul.mubr.msk.f32.gmra.mxu1 %vm494_vm0, %v19539_v47  ;;  %13556 = vmatprep.mubr.msk.f32.mxu0 %vm494_vm0, %v11517_v8  ;;  %329 = vst.msk [vmem:[#allocation2 + $0x180] sm:$0xff] %vm279_vm1, %v19433_v27  ;;  %330 = vst.msk [vmem:[#allocation2 + $0x188] sm:$0xff] %vm279_vm1, %v19433_v27  ;;  %v3985_v47 = vld [vmem:[%s19369_s3 + $0x8] sm:$0xff] }
 0x12d   : > { %v1124_v14 = vadd.f32 %v13205_v19, %v19541_v57  ;;  %13506 = vmatprep.mubr.msk.f32.mxu1 %vm494_vm0, %v11452_v18  ;;  %v15684_v53 = vpop.f32.mrf.mxu0  ;;  %331 = vst.msk [vmem:[#allocation2 + $0x190] sm:$0xff] %vm279_vm1, %v19433_v27  ;;  %333 = vst.msk [vmem:[#allocation2 + $0x1a0] sm:$0xff] %vm279_vm1, %v19433_v27  ;;  %13611 = vmatprep.subr.mxu0 %v3985_v47  ;;  %v3984_v57 = vld [vmem:[%s19369_s3] sm:$0xff] }
 0x12e   : > { %v15682_v51 = vpop.f32.mrf.mxu1  ;;  %19543 = vst [vmem:[#allocation23_spill] sm:$0xff] %v15684_v53  ;;  %334 = vst.msk [vmem:[#allocation2 + $0x1a8] sm:$0xff] %vm279_vm1, %v19433_v27  ;;  %13612 = vmatpush3.msra.mxu0 %v3985_v47 }
 0x12f   : > { %19542 = vst [vmem:[#allocation22_spill] sm:$0xff] %v15682_v51  ;;  %v15686_v62 = vadd.f32 %v13255_v55, %v1124_v14  ;;  %v13258_v46 = vpop.f32.mrf.mxu0  ;;  %13557 = vmatmul.mubr.msk.f32.gmra.mxu0 %vm494_vm0, %v11518_v0  ;;  %335 = vst.msk [vmem:[#allocation2 + $0x1b0] sm:$0xff] %vm279_vm1, %v19433_v27  ;;  %13613 = vmatprep.subr.mxu0 %v3984_v57  ;;  %v3986_v0 = vld [vmem:[#allocation2 + $0x8] sm:$0xff] }
 0x130   : > { %v13208_v26 = vpop.f32.mrf.mxu1  ;;  %13507 = vmatmul.mubr.msk.f32.gmra.mxu1 %vm494_vm0, %v11453_v48  ;;  %337 = vst.msk [vmem:[#allocation2 + $0x1c0] sm:$0xff] %vm279_vm1, %v19433_v27  ;;  %338 = vst.msk [vmem:[#allocation2 + $0x1c8] sm:$0xff] %vm279_vm1, %v19433_v27  ;;  %13614 = vmatpush3.msra.mxu0 %v3984_v57 }
 0x131   : > { %v1134_v63 = vadd.f32 %v13208_v26, %v19544_v5  ;;  %v15693_v61 = vpop.f32.mrf.mxu0  ;;  %339 = vst.msk [vmem:[#allocation2 + $0x1d0] sm:$0xff] %vm279_vm1, %v19433_v27  ;;  %341 = vst.msk [vmem:[#allocation2 + $0x1e0] sm:$0xff] %vm279_vm1, %v19433_v27  ;;  %v3952_v26 = vld [vmem:[#allocation2 + $0x7] sm:$0xff]  ;;  %13563 = vmatprep.mubr.msk.f32.mxu1 %vm279_vm1, %v3986_v0  ;;  %v3987_v5 = vld [vmem:[#allocation2 + $0x10] sm:$0xff] }
 0x132   : > { %v15691_v58 = vpop.f32.mrf.mxu1  ;;  %19546 = vst [vmem:[#allocation25_spill] sm:$0xff] %v15693_v61  ;;  %342 = vst.msk [vmem:[#allocation2 + $0x1e8] sm:$0xff] %vm279_vm1, %v19433_v27  ;;  %13615 = vmatprep.mubr.msk.f32.mxu0 %vm279_vm1, %v3952_v26 }
 0x133   : > { %19545 = vst [vmem:[#allocation24_spill] sm:$0xff] %v15691_v58  ;;  %v15695_v11 = vadd.f32 %v13258_v46, %v1134_v63  ;;  %v13313_v38 = vpop.f32.mrf.mxu0  ;;  %343 = vst.msk [vmem:[#allocation2 + $0x1f0] sm:$0xff] %vm279_vm1, %v19433_v27  ;;  %v3953_v63 = vld [vmem:[#allocation2 + $0xf] sm:$0xff] }
 0x134   : > { %v13263_v9 = vpop.f32.mrf.mxu1  ;;  %345 = vst.msk [vmem:[#allocation2 + $0x200] sm:$0xff] %vm279_vm1, %v19433_v27  ;;  %346 = vst.msk [vmem:[#allocation2 + $0x208] sm:$0xff] %vm279_vm1, %v19433_v27  ;;  %13564 = vmatmul.mubr.msk.f32.vlgmr.msra.gmra.mxu1 %vm279_vm1, %v3987_v5  ;;  %13616 = vmatmul.mubr.msk.f32.vlgmr.msra.gmra.mxu0 %vm279_vm1, %v3953_v63 }
 0x135   : > { %v1881_v3 = vadd.f32 %v13263_v9, %v15473_v60  ;;  %v15700_v36 = vpop.f32.mrf.mxu0  ;;  %347 = vst.msk [vmem:[#allocation2 + $0x210] sm:$0xff] %vm279_vm1, %v19433_v27  ;;  %349 = vst.msk [vmem:[#allocation2 + $0x220] sm:$0xff] %vm279_vm1, %v19433_v27 }
 0x136   : > { %v15698_v54 = vpop.f32.mrf.mxu1  ;;  %350 = vst.msk [vmem:[#allocation2 + $0x228] sm:$0xff] %vm279_vm1, %v19433_v27  ;;  %351 = vst.msk [vmem:[#allocation2 + $0x230] sm:$0xff] %vm279_vm1, %v19433_v27 }
 0x137   : > { %v15810_v60 = vadd.f32 %v13313_v38, %v1881_v3  ;;  %v13316_v13 = vpop.f32.mrf.mxu0  ;;  %284 = vst.msk [vmem:[#allocation2 + $0x18] sm:$0x1] %vm283_vm2, %v19433_v27  ;;  %288 = vst.msk [vmem:[#allocation2 + $0x38] sm:$0x1] %vm283_vm2, %v19433_v27 }
 0x138   : > { %v13266_v37 = vpop.f32.mrf.mxu1  ;;  %292 = vst.msk [vmem:[#allocation2 + $0x58] sm:$0x1] %vm283_vm2, %v19433_v27  ;;  %296 = vst.msk [vmem:[#allocation2 + $0x78] sm:$0x1] %vm283_vm2, %v19433_v27 }
 0x139   : > { %v1883_v16 = vadd.f32 %v13266_v37, %v15487_v41  ;;  %v15815_v52 = vpop.f32.mrf.mxu0  ;;  %300 = vst.msk [vmem:[#allocation2 + $0x98] sm:$0x1] %vm283_vm2, %v19433_v27  ;;  %304 = vst.msk [vmem:[#allocation2 + $0xb8] sm:$0x1] %vm283_vm2, %v19433_v27 }
 0x13a   : > { %v15813_v44 = vpop.f32.mrf.mxu1  ;;  %308 = vst.msk [vmem:[#allocation2 + $0xd8] sm:$0x1] %vm283_vm2, %v19433_v27  ;;  %312 = vst.msk [vmem:[#allocation2 + $0xf8] sm:$0x1] %vm283_vm2, %v19433_v27 }
 0x13b   : > { %v15817_v18 = vadd.f32 %v13316_v13, %v1883_v16  ;;  %v13319_v19 = vpop.f32.mrf.mxu0  ;;  %316 = vst.msk [vmem:[#allocation2 + $0x118] sm:$0x1] %vm283_vm2, %v19433_v27  ;;  %320 = vst.msk [vmem:[#allocation2 + $0x138] sm:$0x1] %vm283_vm2, %v19433_v27 }
 0x13c   : > { %v13269_v8 = vpop.f32.mrf.mxu1  ;;  %324 = vst.msk [vmem:[#allocation2 + $0x158] sm:$0x1] %vm283_vm2, %v19433_v27  ;;  %328 = vst.msk [vmem:[#allocation2 + $0x178] sm:$0x1] %vm283_vm2, %v19433_v27 }
 0x13d   : > { %v1885_v55 = vadd.f32 %v13269_v8, %v15502_v39  ;;  %332 = vst.msk [vmem:[#allocation2 + $0x198] sm:$0x1] %vm283_vm2, %v19433_v27  ;;  %336 = vst.msk [vmem:[#allocation2 + $0x1b8] sm:$0x1] %vm283_vm2, %v19433_v27  ;;  %v15861_v39 = vpop.f32.mrf.mxu0 }
 0x13e   : > { %340 = vst.msk [vmem:[#allocation2 + $0x1d8] sm:$0x1] %vm283_vm2, %v19433_v27  ;;  %344 = vst.msk [vmem:[#allocation2 + $0x1f8] sm:$0x1] %vm283_vm2, %v19433_v27  ;;  %v15859_v41 = vpop.f32.mrf.mxu1 }
 0x13f   : > { %348 = vst.msk [vmem:[#allocation2 + $0x218] sm:$0x1] %vm283_vm2, %v19433_v27  ;;  %352 = vst.msk [vmem:[#allocation2 + $0x238] sm:$0x1] %vm283_vm2, %v19433_v27  ;;  %v15863_v12 = vadd.f32 %v13319_v19, %v1885_v55  ;;  %v13322_v48 = vpop.f32.mrf.mxu0 }
 0x140   : > { %v13272_v14 = vpop.f32.mrf.mxu1 }
 0x141   : > { %v1887_v46 = vadd.f32 %v13272_v14, %v15517_v4  ;;  %v15872_v38 = vpop.f32.mrf.mxu0 }
 0x142   : > { %v15870_v9 = vpop.f32.mrf.mxu1 }
 0x143   : > { %v15876_v3 = vadd.f32 %v13322_v48, %v1887_v46  ;;  %v13325_v13 = vpop.f32.mrf.mxu0 }
 0x144   : > { %v13275_v37 = vpop.f32.mrf.mxu1 }
 0x145   : > { %v1889_v4 = vadd.f32 %v13275_v37, %v15534_v31  ;;  %v15882_v8 = vpop.f32.mrf.mxu0  ;;  %v11620_v31 = vld [vmem:[%s19369_s3 + $0x28] sm:$0xff] }
 0x146   : > { %v15880_v16 = vpop.f32.mrf.mxu1  ;;  %13663 = vmatprep.subr.mxu1 %v11620_v31 }
 0x147   : > { %v15884_v19 = vadd.f32 %v13325_v13, %v1889_v4  ;;  %v13328_v47 = vpop.f32.mrf.mxu0  ;;  %13664 = vmatpush3.msra.mxu1 %v11620_v31 }
 0x148   : > { %v13278_v55 = vpop.f32.mrf.mxu1 }
 0x149   : > { %v1891_v57 = vadd.f32 %v13278_v55, %v15548_v59  ;;  %v15889_v48 = vpop.f32.mrf.mxu0 }
 0x14a   : > { %v15887_v14 = vpop.f32.mrf.mxu1 }
 0x14b   : > { %v15891_v0 = vadd.f32 %v13328_v47, %v1891_v57  ;;  %v13331_v46 = vpop.f32.mrf.mxu0 }
 0x14c   : > { %v13281_v26 = vpop.f32.mrf.mxu1 }
 0x14d   : > { %v1893_v5 = vadd.f32 %v13281_v26, %v15562_v56  ;;  %v15899_v37 = vpop.f32.mrf.mxu0 }
 0x14e   : > { %v15897_v63 = vpop.f32.mrf.mxu1  ;;  %19547 = vst [vmem:[#allocation26_spill] sm:$0xff] %v15899_v37 }
 0x14f   : > { %v15901_v59 = vadd.f32 %v13331_v46, %v1893_v5  ;;  %v13334_v4 = vpop.f32.mrf.mxu0 }
 0x150   : > { %v13284_v13 = vpop.f32.mrf.mxu1 }
 0x151   : > { %19548 = vst [vmem:[#allocation27_spill] sm:$0xff] %v15901_v59  ;;  %v1895_v55 = vadd.f32 %v13284_v13, %v15576_v30  ;;  %v15906_v57 = vpop.f32.mrf.mxu0 }
 0x152   : > { %v15904_v47 = vpop.f32.mrf.mxu1  ;;  %19550 = vst [vmem:[#allocation29_spill] sm:$0xff] %v15906_v57 }
 0x153   : > { %19549 = vst [vmem:[#allocation28_spill] sm:$0xff] %v15904_v47  ;;  %v15908_v27 = vadd.f32 %v13334_v4, %v1895_v55  ;;  %v13337_v58 = vpop.f32.mrf.mxu0 }
 0x154   : > { %v13287_v61 = vpop.f32.mrf.mxu1 }
 0x155   : > { %19551 = vst [vmem:[#allocation30_spill] sm:$0xff] %v15908_v27  ;;  %v1897_v56 = vadd.f32 %v13287_v61, %v15590_v10  ;;  %v15913_v26 = vpop.f32.mrf.mxu0 }
 0x156   : > { %v15911_v31 = vpop.f32.mrf.mxu1  ;;  %19553 = vst [vmem:[#allocation32_spill] sm:$0xff] %v15913_v26 }
 0x157   : > { %19552 = vst [vmem:[#allocation31_spill] sm:$0xff] %v15911_v31  ;;  %v15915_v46 = vadd.f32 %v13337_v58, %v1897_v56  ;;  %v13340_v53 = vpop.f32.mrf.mxu0 }
 0x158   : > { %v13290_v5 = vpop.f32.mrf.mxu1 }
 0x159   : > { %19554 = vst [vmem:[#allocation33_spill] sm:$0xff] %v15915_v46  ;;  %v1899_v30 = vadd.f32 %v13290_v5, %v15608_v24  ;;  %v15920_v51 = vpop.f32.mrf.mxu0 }
 0x15a   : > { %v15918_v13 = vpop.f32.mrf.mxu1  ;;  %19556 = vst [vmem:[#allocation10_spill] sm:$0xff] %v15920_v51 }
 0x15b   : > { %19555 = vst [vmem:[#allocation34_spill] sm:$0xff] %v15918_v13  ;;  %v15922_v4 = vadd.f32 %v13340_v53, %v1899_v30  ;;  %v13343_v17 = vpop.f32.mrf.mxu0 }
 0x15c   : > { %v13293_v55 = vpop.f32.mrf.mxu1 }
 0x15d   : > { %19557 = vst [vmem:[#allocation4_spill] sm:$0xff] %v15922_v4  ;;  %v1901_v10 = vadd.f32 %v13293_v55, %v15623_v34  ;;  %v15927_v45 = vpop.f32.mrf.mxu0 }
 0x15e   : > { %v15925_v61 = vpop.f32.mrf.mxu1  ;;  %19559 = vst [vmem:[#allocation11_spill] sm:$0xff] %v15927_v45 }
 0x15f   : > { %19558 = vst [vmem:[#allocation12_spill] sm:$0xff] %v15925_v61  ;;  %v15929_v58 = vadd.f32 %v13343_v17, %v1901_v10  ;;  %v13346_v46 = vpop.f32.mrf.mxu0 }
 0x160   : > { %v13296_v56 = vpop.f32.mrf.mxu1 }
 0x161   : > { %19560 = vst [vmem:[#allocation14_spill] sm:$0xff] %v15929_v58  ;;  %v1903_v24 = vadd.f32 %v13296_v56, %v15639_v35  ;;  %v15934_v13 = vpop.f32.mrf.mxu0 }
 0x162   : > { %v15932_v5 = vpop.f32.mrf.mxu1  ;;  %19562 = vst [vmem:[#allocation36_spill] sm:$0xff] %v15934_v13 }
 0x163   : > { %19561 = vst [vmem:[#allocation35_spill] sm:$0xff] %v15932_v5  ;;  %v15936_v53 = vadd.f32 %v13346_v46, %v1903_v24  ;;  %v13349_v4 = vpop.f32.mrf.mxu0 }
 0x164   : > { %v13299_v30 = vpop.f32.mrf.mxu1 }
 0x165   : > { %19563 = vst [vmem:[#allocation37_spill] sm:$0xff] %v15936_v53  ;;  %v1905_v34 = vadd.f32 %v13299_v30, %v15656_v40  ;;  %v15941_v61 = vpop.f32.mrf.mxu0  ;;  %v11619_v40 = vld [vmem:[%s19369_s3 + $0x20] sm:$0xff]  ;;  %v11688_v53 = vld [vmem:[%s19369_s3 + $0x48] sm:$0xff] }
 0x166   : > { %v15939_v55 = vpop.f32.mrf.mxu1  ;;  %19565 = vst [vmem:[#allocation39_spill] sm:$0xff] %v15941_v61  ;;  %13665 = vmatprep.subr.mxu1 %v11619_v40 }
 0x167   : > { %19564 = vst [vmem:[#allocation38_spill] sm:$0xff] %v15939_v55  ;;  %v15943_v17 = vadd.f32 %v13349_v4, %v1905_v34  ;;  %v13352_v58 = vpop.f32.mrf.mxu0  ;;  %13666 = vmatpush3.msra.mxu1 %v11619_v40 }
 0x168   : > { %v13302_v10 = vpop.f32.mrf.mxu1  ;;  %13767 = vmatprep.subr.mxu1 %v11688_v53 }
 0x169   : > { %19566 = vst [vmem:[#allocation40_spill] sm:$0xff] %v15943_v17  ;;  %v1907_v35 = vadd.f32 %v13302_v10, %v15671_v20  ;;  %v15948_v5 = vpop.f32.mrf.mxu0 }
 0x16a   : > { %v15946_v56 = vpop.f32.mrf.mxu1  ;;  %19568 = vst [vmem:[#allocation42_spill] sm:$0xff] %v15948_v5 }
 0x16b   : > { %19567 = vst [vmem:[#allocation41_spill] sm:$0xff] %v15946_v56  ;;  %v15950_v46 = vadd.f32 %v13352_v58, %v1907_v35  ;;  %v13355_v30 = vpop.f32.mrf.mxu0 }
 0x16c   : > { %v13305_v24 = vpop.f32.mrf.mxu1 }
 0x16d   : > { %19569 = vst [vmem:[#allocation43_spill] sm:$0xff] %v15950_v46  ;;  %v1909_v4 = vadd.f32 %v13305_v24, %v15686_v62  ;;  %v15958_v17 = vpop.f32.mrf.mxu0 }
 0x16e   : > { %v15956_v34 = vpop.f32.mrf.mxu1  ;;  %19571 = vst [vmem:[#allocation45_spill] sm:$0xff] %v15958_v17 }
 0x16f   : > { %19570 = vst [vmem:[#allocation44_spill] sm:$0xff] %v15956_v34  ;;  %v15960_v20 = vadd.f32 %v13355_v30, %v1909_v4  ;;  %v13358_v5 = vpop.f32.mrf.mxu0  ;;  %v11653_v34 = vld [vmem:[%s19369_s3 + $0x30] sm:$0xff] }
 0x170   : > { %v13308_v10 = vpop.f32.mrf.mxu1 }
 0x171   : > { %19572 = vst [vmem:[#allocation46_spill] sm:$0xff] %v15960_v20  ;;  %v1911_v58 = vadd.f32 %v13308_v10, %v15695_v11  ;;  %v15965_v46 = vpop.f32.mrf.mxu0 }
 0x172   : > { %v15963_v35 = vpop.f32.mrf.mxu1  ;;  %19574 = vst [vmem:[#allocation48_spill] sm:$0xff] %v15965_v46  ;;  %v11654_v46 = vld [vmem:[%s19369_s3 + $0x38] sm:$0xff] }
 0x173   : > { %19573 = vst [vmem:[#allocation47_spill] sm:$0xff] %v15963_v35  ;;  %v15967_v56 = vadd.f32 %v13358_v5, %v1911_v58  ;;  %v15971_v62 = vpop.f32.mrf.mxu0  ;;  %13715 = vmatprep.subr.mxu0 %v11654_v46 }
 0x174   : > { %v15969_v61 = vpop.f32.mrf.mxu1  ;;  %13716 = vmatpush3.msra.mxu0 %v11654_v46 }
 0x175   : > { %19575 = vst [vmem:[#allocation49_spill] sm:$0xff] %v15967_v56  ;;  %v15975_v24 = vpop.f32.mrf.mxu0  ;;  %13717 = vmatprep.subr.mxu0 %v11653_v34 }
 0x176   : > { %v15973_v40 = vpop.f32.mrf.mxu1  ;;  %13718 = vmatpush3.msra.mxu0 %v11653_v34 }
 0x177   : > { %v15979_v4 = vpop.f32.mrf.mxu0 }
 0x178   : > { %v15977_v30 = vpop.f32.mrf.mxu1 }
 0x179   : > { %v15983_v11 = vpop.f32.mrf.mxu0 }
 0x17a   : > { %v15981_v20 = vpop.f32.mrf.mxu1 }
 0x17b   : > { %v15987_v5 = vpop.f32.mrf.mxu0 }
 0x17c   : > { %v15985_v10 = vpop.f32.mrf.mxu1 }
 0x17d   : > { %v15991_v56 = vpop.f32.mrf.mxu0 }
 0x17e   : > { %v15989_v58 = vpop.f32.mrf.mxu1 }
 0x17f   : > { %v15998_v17 = vpop.f32.mrf.mxu0 }
 0x180   : > { %v15996_v35 = vpop.f32.mrf.mxu1 }
 0x181   : > { %v16008_v13 = vpop.f32.mrf.mxu0 }
 0x182   : > { %v16006_v55 = vpop.f32.mrf.mxu1 }
 0x183   : > { %v16012_v51 = vpop.f32.mrf.mxu0 }
 0x184   : > { %v16010_v45 = vpop.f32.mrf.mxu1 }
 0x185   : > { %v16016_v26 = vpop.f32.mrf.mxu0 }
 0x186   : > { %v16014_v46 = vpop.f32.mrf.mxu1 }
 0x187   : > { %v16020_v27 = vpop.f32.mrf.mxu0 }
 0x188   : > { %v16018_v50 = vpop.f32.mrf.mxu1  ;;  %19576 = vst [vmem:[#allocation50_spill] sm:$0xff] %v16020_v27 }
 0x189   : > { %v16024_v43 = vpop.f32.mrf.mxu0 }
 0x18a   : > { %v16022_v31 = vpop.f32.mrf.mxu1  ;;  %19578 = vst [vmem:[#allocation52_spill] sm:$0xff] %v16024_v43 }
 0x18b   : > { %19577 = vst [vmem:[#allocation51_spill] sm:$0xff] %v16022_v31  ;;  %v16028_v53 = vpop.f32.mrf.mxu0 }
 0x18c   : > { %v16026_v57 = vpop.f32.mrf.mxu1  ;;  %19580 = vst [vmem:[#allocation54_spill] sm:$0xff] %v16028_v53 }
 0x18d   : > { %19579 = vst [vmem:[#allocation53_spill] sm:$0xff] %v16026_v57  ;;  %v16032_v29 = vpop.f32.mrf.mxu0 }
 0x18e   : > { %v16030_v34 = vpop.f32.mrf.mxu1  ;;  %19582 = vst [vmem:[#allocation56_spill] sm:$0xff] %v16032_v29 }
 0x18f   : > { %19581 = vst [vmem:[#allocation55_spill] sm:$0xff] %v16030_v34  ;;  %v16036_v47 = vpop.f32.mrf.mxu0 }
 0x190   : > { %v16034_v59 = vpop.f32.mrf.mxu1  ;;  %19584 = vst [vmem:[#allocation58_spill] sm:$0xff] %v16036_v47 }
 0x191   : > { %19583 = vst [vmem:[#allocation57_spill] sm:$0xff] %v16034_v59  ;;  %v16040_v37 = vpop.f32.mrf.mxu0 }
 0x192   : > { %v16038_v6 = vpop.f32.mrf.mxu1  ;;  %19586 = vst [vmem:[#allocation60_spill] sm:$0xff] %v16040_v37 }
 0x193   : > { %19585 = vst [vmem:[#allocation59_spill] sm:$0xff] %v16038_v6  ;;  %v16044_v31 = vpop.f32.mrf.mxu0 }
 0x194   : > { %v16042_v27 = vpop.f32.mrf.mxu1  ;;  %19588 = vst [vmem:[#allocation62_spill] sm:$0xff] %v16044_v31 }
 0x195   : > { %19587 = vst [vmem:[#allocation61_spill] sm:$0xff] %v16042_v27  ;;  %v16048_v57 = vpop.f32.mrf.mxu0 }
 0x196   : > { %v16046_v43 = vpop.f32.mrf.mxu1  ;;  %19590 = vst [vmem:[#allocation64_spill] sm:$0xff] %v16048_v57 }
 0x197   : > { %19589 = vst [vmem:[#allocation63_spill] sm:$0xff] %v16046_v43  ;;  %v16052_v34 = vpop.f32.mrf.mxu0 }
 0x198   : > { %v16050_v53 = vpop.f32.mrf.mxu1  ;;  %19592 = vst [vmem:[#allocation66_spill] sm:$0xff] %v16052_v34 }
 0x199   : > { %19591 = vst [vmem:[#allocation65_spill] sm:$0xff] %v16050_v53  ;;  %v16056_v59 = vpop.f32.mrf.mxu0 }
 0x19a   : > { %v16054_v29 = vpop.f32.mrf.mxu1  ;;  %19594 = vst [vmem:[#allocation68_spill] sm:$0xff] %v16056_v59 }
 0x19b   : > { %19593 = vst [vmem:[#allocation67_spill] sm:$0xff] %v16054_v29  ;;  %v16060_v6 = vpop.f32.mrf.mxu0 }
 0x19c   : > { %v16058_v47 = vpop.f32.mrf.mxu1  ;;  %19596 = vst [vmem:[#allocation70_spill] sm:$0xff] %v16060_v6 }
 0x19d   : > { %19595 = vst [vmem:[#allocation69_spill] sm:$0xff] %v16058_v47  ;;  %v16064_v27 = vpop.f32.mrf.mxu0 }
 0x19e   : > { %v16062_v37 = vpop.f32.mrf.mxu1  ;;  %19598 = vst [vmem:[#allocation72_spill] sm:$0xff] %v16064_v27 }
 0x19f   : > { %19597 = vst [vmem:[#allocation71_spill] sm:$0xff] %v16062_v37  ;;  %v16068_v43 = vpop.f32.mrf.mxu0 }
 0x1a0   : > { %v16066_v31 = vpop.f32.mrf.mxu1  ;;  %19600 = vst [vmem:[#allocation74_spill] sm:$0xff] %v16068_v43  ;;  %v1880_v43 = vadd.f32 %v15698_v54, %v15480_v15  ;;  %v1884_v54 = vadd.f32 %v15859_v41, %v15509_v25  ;;  %v1886_v41 = vadd.f32 %v15870_v9, %v15523_v2 }
 0x1a1   : > { %19599 = vst [vmem:[#allocation73_spill] sm:$0xff] %v16066_v31  ;;  %v16072_v53 = vpop.f32.mrf.mxu0 }
 0x1a2   : > { %v16070_v57 = vpop.f32.mrf.mxu1  ;;  %19601 = vst [vmem:[#allocation75_spill] sm:$0xff] %v16072_v53  ;;  %v2271_v25 = vadd.f32 %v15861_v39, %v1884_v54 }
 0x1a3   : > { %v16076_v29 = vpop.f32.mrf.mxu0 }
 0x1a4   : > { %v16074_v34 = vpop.f32.mrf.mxu1  ;;  %19603 = vst [vmem:[#allocation77_spill] sm:$0xff] %v16076_v29 }
 0x1a5   : > { %19602 = vst [vmem:[#allocation76_spill] sm:$0xff] %v16074_v34  ;;  %v16080_v47 = vpop.f32.mrf.mxu0 }
 0x1a6   : > { %v16078_v59 = vpop.f32.mrf.mxu1  ;;  %19605 = vst [vmem:[#allocation79_spill] sm:$0xff] %v16080_v47  ;;  %v2267_v47 = vadd.f32 %v15700_v36, %v1880_v43  ;;  %v2657_v36 = vadd.f32 %v15977_v30, %v15817_v18  ;;  %v19612_v30 = vld [vmem:[#allocation5_spill] sm:$0xff] }
 0x1a7   : > { %19604 = vst [vmem:[#allocation78_spill] sm:$0xff] %v16078_v59  ;;  %v16084_v37 = vpop.f32.mrf.mxu0  ;;  %v1069_v39 = vadd.f32 %v15603_v49, %v19612_v30  ;;  %v2661_v49 = vadd.f32 %v15996_v35, %v15876_v3 }
 0x1a8   : > { %v16082_v6 = vpop.f32.mrf.mxu1  ;;  %19607 = vst [vmem:[#allocation81_spill] sm:$0xff] %v16084_v37  ;;  %v1882_v37 = vadd.f32 %v15813_v44, %v15494_v22  ;;  %v2654_v15 = vadd.f32 %v15973_v40, %v2267_v47 }
 0x1a9   : > { %19606 = vst [vmem:[#allocation80_spill] sm:$0xff] %v16082_v6  ;;  %v16088_v31 = vpop.f32.mrf.mxu0 }
 0x1aa   : > { %v16086_v27 = vpop.f32.mrf.mxu1  ;;  %19609 = vst [vmem:[#allocation83_spill] sm:$0xff] %v16088_v31  ;;  %v2269_v43 = vadd.f32 %v15815_v52, %v1882_v37  ;;  %v2659_v52 = vadd.f32 %v15985_v10, %v15863_v12 }
 0x1ab   : > { %19608 = vst [vmem:[#allocation82_spill] sm:$0xff] %v16086_v27  ;;  %v16094_v34 = vpop.f32.mrf.mxu0  ;;  %v2655_v27 = vadd.f32 %v15969_v61, %v15810_v60  ;;  %v3042_v61 = vadd.f32 %v15975_v24, %v2654_v15  ;;  %v2658_v15 = vadd.f32 %v15989_v58, %v2271_v25 }
 0x1ac   : > { %v16092_v53 = vpop.f32.mrf.mxu1  ;;  %19610 = vst [vmem:[#allocation84_spill] sm:$0xff] %v16094_v34  ;;  %v2656_v47 = vadd.f32 %v15981_v20, %v2269_v43 }
 0x1ad   : > { %v16098_v59 = vpop.f32.mrf.mxu0  ;;  %v3043_v22 = vadd.f32 %v15971_v62, %v2655_v27  ;;  %v16130_v27 = vld [vmem:[%s19368_s2] ss:$0 sm:$0xff]  ;;  %v3045_v62 = vadd.f32 %v15979_v4, %v2657_v36  ;;  %v1888_v4 = vadd.f32 %v15880_v16, %v15540_v32  ;;  %v3047_v36 = vadd.f32 %v15987_v5, %v2659_v52 }
 0x1ae   : > { %v16096_v29 = vpop.f32.mrf.mxu1  ;;  %19611 = vst [vmem:[#allocation85_spill] sm:$0xff] %v16098_v59  ;;  %v3044_v12 = vadd.f32 %v15983_v11, %v2656_v47 }
 0x1af   : > { %v16107_v6 = vpop.f32.mrf.mxu0  ;;  %v2275_v52 = vadd.f32 %v15882_v8, %v1888_v4 }
 0x1b0   : > { %v16105_v31 = vpop.f32.mrf.mxu1 }
 0x1b1   : > { %v16114_v59 = vpop.f32.mrf.mxu0 }
 0x1b2   : > { %v16112_v34 = vpop.f32.mrf.mxu1 }
 0x1b3   : > { %v13513_v44 = vpop.f32.mrf.mxu0 }
 0x1b4   : > { %v13463_v60 = vpop.f32.mrf.mxu1 }
 0x1b5   : > { %v3430_v40 = vadd.f32 %v13463_v60, %v3043_v22  ;;  %v3657_v37 = vpop.f32.mrf.mxu0  ;;  %v2273_v22 = vadd.f32 %v15872_v38, %v1886_v41  ;;  %v3046_v38 = vadd.f32 %v15991_v56, %v2658_v15  ;;  %v2663_v56 = vadd.f32 %v16010_v45, %v15884_v19  ;;  %v19614_v15 = vld [vmem:[#allocation7_spill] sm:$0xff] }
 0x1b6   : > { %v3270_v18 = vpop.f32.mrf.mxu1 }
 0x1b7   : > { %v3817_v24 = vadd.f32 %v13513_v44, %v3430_v40  ;;  %v3429_v20 = vadd.f32 %v3270_v18, %v3042_v61  ;;  %v13516_v9 = vpop.f32.mrf.mxu0  ;;  %v16146_v40 = vadd.f32 %v15605_v21, %v1069_v39  ;;  %v2660_v25 = vadd.f32 %v16006_v55, %v2273_v22  ;;  %v19613_v39 = vld [vmem:[#allocation6_spill] sm:$0xff] }
 0x1b8   : > { %v13466_v2 = vpop.f32.mrf.mxu1  ;;  %v1890_v18 = vadd.f32 %v15887_v14, %v15554_v7  ;;  %v3049_v21 = vadd.f32 %v15998_v17, %v2661_v49  ;;  %v1079_v8 = vadd.f32 %v15618_v23, %v19613_v39  ;;  %v1089_v7 = vadd.f32 %v15633_v28, %v19614_v15  ;;  %v19623_v39 = vld [vmem:[#allocation18_spill] sm:$0xff]  ;;  %v19624_v15 = vld [vmem:[#allocation52_spill] sm:$0xff] }
 0x1b9   : > { %v3856_v10 = vadd.f32 %v16130_v27, %v3817_v24  ;;  %v3816_v54 = vadd.f32 %v3657_v37, %v3429_v20  ;;  %v3432_v43 = vadd.f32 %v13466_v2, %v3045_v62  ;;  %v3667_v58 = vpop.f32.mrf.mxu0  ;;  %v3048_v14 = vadd.f32 %v16008_v13, %v2660_v25  ;;  %v16169_v2 = vld [vmem:[%s19369_s3 + $0x58] sm:$0xff] }
 0x1ba   : > { %v3280_v60 = vpop.f32.mrf.mxu1  ;;  %v2662_v17 = vadd.f32 %v16014_v46, %v2275_v52  ;;  %13819 = vmatprep.subr.mxu0 %v16169_v2  ;;  %v2277_v28 = vadd.f32 %v15889_v48, %v1890_v18  ;;  %v1892_v13 = vadd.f32 %v15897_v63, %v15568_v1  ;;  %v3051_v46 = vadd.f32 %v16012_v51, %v2663_v56  ;;  %v19615_v51 = vld [vmem:[#allocation51_spill] sm:$0xff] }
 0x1bb   : > { %v3888_v44 = vmax.f32 %v3856_v10, 0.0  ;;  %v3855_v61 = vadd.f32 %v16130_v27, %v3816_v54  ;;  %v3819_v11 = vadd.f32 %v13516_v9, %v3432_v43  ;;  %v3431_v47 = vadd.f32 %v3280_v60, %v3044_v12  ;;  %v13519_v16 = vpop.f32.mrf.mxu0 }
 0x1bc   : > { %v13469_v32 = vpop.f32.mrf.mxu1  ;;  %v2665_v54 = vadd.f32 %v16018_v50, %v15891_v0  ;;  %v16186_v48 = vadd.f32 %v15635_v42, %v1089_v7  ;;  %v3050_v1 = vadd.f32 %v16016_v26, %v2662_v17  ;;  %v2664_v63 = vadd.f32 %v19615_v51, %v2277_v28  ;;  %v19619_v42 = vld [vmem:[#allocation50_spill] sm:$0xff]  ;;  %v19621_v26 = vld [vmem:[#allocation53_spill] sm:$0xff] }
 0x1bd   : > { %3921 = vst.msk [vmem:[#allocation2 + $0x30] sm:$0xff] %vm279_vm1, %v3888_v44  ;;  %v3887_v5 = vmax.f32 %v3855_v61, 0.0  ;;  %v3858_v3 = vadd.f32 %v16130_v27, %v3819_v11  ;;  %v3818_v35 = vadd.f32 %v3667_v58, %v3431_v47  ;;  %v3434_v41 = vadd.f32 %v13469_v32, %v3047_v36  ;;  %v3677_v37 = vpop.f32.mrf.mxu0  ;;  %v19618_v32 = vld [vmem:[#allocation28_spill] sm:$0xff]  ;;  %v19626_v28 = vld [vmem:[#allocation29_spill] sm:$0xff] }
 0x1be   : > { %v3290_v55 = vpop.f32.mrf.mxu1  ;;  %v16183_v58 = vadd.f32 %v15620_v33, %v1079_v8  ;;  %v19617_v33 = vld [vmem:[#allocation16_spill] sm:$0xff]  ;;  %v3052_v7 = vadd.f32 %v19624_v15, %v2664_v63  ;;  %v19638_v15 = vld [vmem:[#allocation33_spill] sm:$0xff] }
 0x1bf   : > { %3920 = vst.msk [vmem:[#allocation2 + $0x28] sm:$0xff] %vm279_vm1, %v3887_v5  ;;  %v3890_v62 = vmax.f32 %v3858_v3, 0.0  ;;  %v3857_v24 = vadd.f32 %v16130_v27, %v3818_v35  ;;  %v3821_v20 = vadd.f32 %v13519_v16, %v3434_v41  ;;  %v3433_v30 = vadd.f32 %v3290_v55, %v3046_v38  ;;  %v13522_v19 = vpop.f32.mrf.mxu0  ;;  %v19616_v38 = vld [vmem:[#allocation26_spill] sm:$0xff]  ;;  %v19620_v3 = vld [vmem:[#allocation27_spill] sm:$0xff] }
 0x1c0   : > { %v13472_v45 = vpop.f32.mrf.mxu1  ;;  %v2279_v25 = vadd.f32 %v19616_v38, %v1892_v13  ;;  %v1894_v16 = vadd.f32 %v19618_v32, %v19617_v33  ;;  %v3053_v5 = vadd.f32 %v19619_v42, %v2665_v54  ;;  %v2667_v35 = vadd.f32 %v19621_v26, %v19620_v3  ;;  %v19628_v54 = vld [vmem:[#allocation31_spill] sm:$0xff]  ;;  %v19633_v32 = vld [vmem:[#allocation56_spill] sm:$0xff] }
 0x1c1   : > { %3923 = vst.msk [vmem:[#allocation2 + $0x50] sm:$0xff] %vm279_vm1, %v3890_v62  ;;  %v3889_v9 = vmax.f32 %v3857_v24, 0.0  ;;  %v3860_v12 = vadd.f32 %v16130_v27, %v3821_v20  ;;  %v3820_v23 = vadd.f32 %v3677_v37, %v3433_v30  ;;  %v3436_v10 = vadd.f32 %v13472_v45, %v3049_v21  ;;  %v3687_v22 = vpop.f32.mrf.mxu0  ;;  %v19622_v30 = vld [vmem:[#allocation8_spill] sm:$0xff]  ;;  %v19634_v42 = vld [vmem:[#allocation59_spill] sm:$0xff] }
 0x1c2   : > { %v3300_v43 = vpop.f32.mrf.mxu1  ;;  %v1099_v8 = vadd.f32 %v19623_v39, %v19622_v30  ;;  %v2281_v13 = vadd.f32 %v19626_v28, %v1894_v16  ;;  %v19637_v39 = vld [vmem:[#allocation58_spill] sm:$0xff] }
 0x1c3   : > { %3922 = vst.msk [vmem:[#allocation2 + $0x48] sm:$0xff] %vm279_vm1, %v3889_v9  ;;  %v3892_v4 = vmax.f32 %v3860_v12, 0.0  ;;  %v3859_v36 = vadd.f32 %v16130_v27, %v3820_v23  ;;  %v3823_v49 = vadd.f32 %v13522_v19, %v3436_v10  ;;  %v3435_v60 = vadd.f32 %v3300_v43, %v3048_v14  ;;  %v13525_v0 = vpop.f32.mrf.mxu0  ;;  %v19625_v14 = vld [vmem:[#allocation55_spill] sm:$0xff] }
 0x1c4   : > { %v13475_v50 = vpop.f32.mrf.mxu1  ;;  %v16210_v20 = vld [vmem:[#allocation2 + $0x30] sm:$0xff]  ;;  %v2666_v17 = vadd.f32 %v19625_v14, %v2279_v25  ;;  %v19632_v25 = vld [vmem:[#allocation19_spill] sm:$0xff] }
 0x1c5   : > { %3925 = vst.msk [vmem:[#allocation2 + $0x70] sm:$0xff] %vm279_vm1, %v3892_v4  ;;  %v3891_v44 = vmax.f32 %v3859_v36, 0.0  ;;  %v3862_v61 = vadd.f32 %v16130_v27, %v3823_v49  ;;  %v3822_v11 = vadd.f32 %v3687_v22, %v3435_v60  ;;  %v3438_v47 = vadd.f32 %v13475_v50, %v3051_v46  ;;  %v3697_v52 = vpop.f32.mrf.mxu0  ;;  %v19627_v46 = vld [vmem:[#allocation17_spill] sm:$0xff]  ;;  %v19629_v22 = vld [vmem:[#allocation54_spill] sm:$0xff] }
 0x1c6   : > { %v3310_v41 = vpop.f32.mrf.mxu1  ;;  %v16198_v18 = vld [vmem:[#allocation2 + $0x28] sm:$0xff]  ;;  %v1896_v43 = vadd.f32 %v19628_v54, %v19627_v46  ;;  %v3055_v4 = vadd.f32 %v19629_v22, %v2667_v35  ;;  %v19630_v36 = vld [vmem:[#allocation30_spill] sm:$0xff]  ;;  %v16243_v33 = vadd.f32 %v19632_v25, %v1099_v8  ;;  %v3054_v16 = vadd.f32 %v19633_v32, %v2666_v17  ;;  %v19641_v54 = vld [vmem:[#allocation20_spill] sm:$0xff] }
 0x1c7   : > { %v16200_v21 = vld [vmem:[#allocation2 + $0x27] sm:$0xff]  ;;  %v16202_v56 = vld [vmem:[#allocation2 + $0x2f] sm:$0xff]  ;;  %3924 = vst.msk [vmem:[#allocation2 + $0x68] sm:$0xff] %vm279_vm1, %v3891_v44  ;;  %v3894_v55 = vmax.f32 %v3862_v61, 0.0  ;;  %v3861_v37 = vadd.f32 %v16130_v27, %v3822_v11  ;;  %v3825_v62 = vadd.f32 %v13525_v0, %v3438_v47  ;;  %v3437_v24 = vadd.f32 %v3310_v41, %v3050_v1  ;;  %13566 = vmatprep.mubr.msk.f32.mxu1 %vm279_vm1, %v16198_v18  ;;  %v13528_v19 = vpop.f32.mrf.mxu0 }
 0x1c8   : > { %13618 = vmatprep.mubr.msk.f32.mxu0 %vm279_vm1, %v16200_v21  ;;  %v13478_v45 = vpop.f32.mrf.mxu1  ;;  %13567 = vmatmul.mubr.msk.f32.gmra.mxu1 %vm279_vm1, %v16210_v20  ;;  %v19631_v49 = vld [vmem:[#allocation57_spill] sm:$0xff]  ;;  %v16240_v38 = vld [vmem:[#allocation2 + $0x50] sm:$0xff]  ;;  %v19642_v22 = vld [vmem:[#allocation60_spill] sm:$0xff] }
 0x1c9   : > { %13619 = vmatmul.mubr.msk.f32.gmra.mxu0 %vm279_vm1, %v16202_v56  ;;  %3927 = vst.msk [vmem:[#allocation2 + $0x90] sm:$0xff] %vm279_vm1, %v3894_v55  ;;  %v3893_v9 = vmax.f32 %v3861_v37, 0.0  ;;  %v3864_v12 = vadd.f32 %v16130_v27, %v3825_v62  ;;  %v3824_v23 = vadd.f32 %v3697_v52, %v3437_v24  ;;  %v3440_v10 = vadd.f32 %v13478_v45, %v3053_v5  ;;  %v3707_v51 = vpop.f32.mrf.mxu0  ;;  %v19635_v37 = vld [vmem:[#allocation32_spill] sm:$0xff]  ;;  %v19636_v24 = vld [vmem:[#allocation34_spill] sm:$0xff]  ;;  %v19640_v46 = vld [vmem:[#allocation9_spill] sm:$0xff] }
 0x1ca   : > { %v2669_v60 = vadd.f32 %v19631_v49, %v19630_v36  ;;  %v3320_v1 = vpop.f32.mrf.mxu1  ;;  %v16228_v63 = vld [vmem:[#allocation2 + $0x48] sm:$0xff]  ;;  %v2668_v5 = vadd.f32 %v19634_v42, %v2281_v13  ;;  %v2283_v62 = vadd.f32 %v19635_v37, %v1896_v43  ;;  %v1898_v30 = vadd.f32 %v19636_v24, %v16146_v40  ;;  %v19643_v36 = vld [vmem:[#allocation63_spill] sm:$0xff]  ;;  %v19645_v32 = vld [vmem:[#allocation12_spill] sm:$0xff] }
 0x1cb   : > { %v16230_v50 = vld [vmem:[#allocation2 + $0x47] sm:$0xff]  ;;  %v16232_v0 = vld [vmem:[#allocation2 + $0x4f] sm:$0xff]  ;;  %3926 = vst.msk [vmem:[#allocation2 + $0x88] sm:$0xff] %vm279_vm1, %v3893_v9  ;;  %v3896_v44 = vmax.f32 %v3864_v12, 0.0  ;;  %v3863_v61 = vadd.f32 %v16130_v27, %v3824_v23  ;;  %v3827_v11 = vadd.f32 %v13528_v19, %v3440_v10  ;;  %v3439_v47 = vadd.f32 %v3320_v1, %v3052_v7  ;;  %13569 = vmatprep.mubr.msk.f32.mxu1 %vm279_vm1, %v16228_v63  ;;  %v13531_v26 = vpop.f32.mrf.mxu0 }
 0x1cc   : > { %13621 = vmatprep.mubr.msk.f32.mxu0 %vm279_vm1, %v16230_v50  ;;  %v13481_v3 = vpop.f32.mrf.mxu1  ;;  %13570 = vmatmul.mubr.msk.f32.gmra.mxu1 %vm279_vm1, %v16240_v38  ;;  %v3057_v8 = vadd.f32 %v19637_v39, %v2669_v60  ;;  %v19639_v7 = vld [vmem:[#allocation61_spill] sm:$0xff]  ;;  %v16271_v13 = vld [vmem:[#allocation2 + $0x70] sm:$0xff]  ;;  %v1109_v43 = vadd.f32 %v19641_v54, %v19640_v46  ;;  %v2670_v49 = vadd.f32 %v19643_v36, %v2283_v62  ;;  %v19653_v36 = vld [vmem:[#allocation35_spill] sm:$0xff] }
 0x1cd   : > { %13622 = vmatmul.mubr.msk.f32.gmra.mxu0 %vm279_vm1, %v16232_v0  ;;  %3929 = vst.msk [vmem:[#allocation2 + $0xb0] sm:$0xff] %vm279_vm1, %v3896_v44  ;;  %v3895_v35 = vmax.f32 %v3863_v61, 0.0  ;;  %v3866_v41 = vadd.f32 %v16130_v27, %v3827_v11  ;;  %v3826_v52 = vadd.f32 %v3707_v51, %v3439_v47  ;;  %v3442_v55 = vadd.f32 %v13481_v3, %v3055_v4  ;;  %v3717_v45 = vpop.f32.mrf.mxu0  ;;  %v19644_v47 = vld [vmem:[#allocation10_spill] sm:$0xff]  ;;  %v19647_v3 = vld [vmem:[#allocation4_spill] sm:$0xff] }
 0x1ce   : > { %v2671_v14 = vadd.f32 %v19639_v7, %v19638_v15  ;;  %v3330_v17 = vpop.f32.mrf.mxu1  ;;  %v16259_v19 = vld [vmem:[#allocation2 + $0x68] sm:$0xff]  ;;  %v3056_v4 = vadd.f32 %v19642_v22, %v2668_v5  ;;  %v2285_v25 = vadd.f32 %v19644_v47, %v1898_v30  ;;  %v19646_v42 = vld [vmem:[#allocation62_spill] sm:$0xff]  ;;  %v19652_v22 = vld [vmem:[#allocation11_spill] sm:$0xff] }
 0x1cf   : > { %v16261_v9 = vld [vmem:[#allocation2 + $0x67] sm:$0xff]  ;;  %v16263_v12 = vld [vmem:[#allocation2 + $0x6f] sm:$0xff]  ;;  %3928 = vst.msk [vmem:[#allocation2 + $0xa8] sm:$0xff] %vm279_vm1, %v3895_v35  ;;  %v3898_v23 = vmax.f32 %v3866_v41, 0.0  ;;  %v3865_v10 = vadd.f32 %v16130_v27, %v3826_v52  ;;  %v3829_v28 = vadd.f32 %v13531_v26, %v3442_v55  ;;  %v3441_v40 = vadd.f32 %v3330_v17, %v3054_v16  ;;  %13572 = vmatprep.mubr.msk.f32.mxu1 %vm279_vm1, %v16259_v19  ;;  %v13534_v1 = vpop.f32.mrf.mxu0 }
 0x1d0   : > { %13624 = vmatprep.mubr.msk.f32.mxu0 %vm279_vm1, %v16261_v9  ;;  %v13484_v60 = vpop.f32.mrf.mxu1  ;;  %13573 = vmatmul.mubr.msk.f32.gmra.mxu1 %vm279_vm1, %v16271_v13  ;;  %v1900_v16 = vadd.f32 %v19645_v32, %v16183_v58  ;;  %v3059_v5 = vadd.f32 %v19646_v42, %v2671_v14  ;;  %v19648_v26 = vld [vmem:[#allocation65_spill] sm:$0xff]  ;;  %v19650_v14 = vld [vmem:[#allocation64_spill] sm:$0xff] }
 0x1d1   : > { %13625 = vmatmul.mubr.msk.f32.gmra.mxu0 %vm279_vm1, %v16263_v12  ;;  %3931 = vst.msk [vmem:[#allocation2 + $0xd0] sm:$0xff] %vm279_vm1, %v3898_v23  ;;  %v3897_v51 = vmax.f32 %v3865_v10, 0.0  ;;  %v3868_v44 = vadd.f32 %v16130_v27, %v3829_v28  ;;  %v3828_v61 = vadd.f32 %v3717_v45, %v3441_v40  ;;  %v3444_v11 = vadd.f32 %v13484_v60, %v3057_v8  ;;  %v3727_v52 = vpop.f32.mrf.mxu0  ;;  %v16301_v8 = vld [vmem:[#allocation2 + $0x90] sm:$0xff]  ;;  %v19649_v15 = vld [vmem:[#allocation21_spill] sm:$0xff]  ;;  %v19651_v45 = vld [vmem:[#allocation67_spill] sm:$0xff] }
 0x1d2   : > { %v2673_v35 = vadd.f32 %v19648_v26, %v19647_v3  ;;  %v3340_v41 = vpop.f32.mrf.mxu1  ;;  %v16289_v55 = vld [vmem:[#allocation2 + $0x88] sm:$0xff]  ;;  %v16304_v7 = vadd.f32 %v19649_v15, %v1109_v43  ;;  %v3058_v17 = vadd.f32 %v19650_v14, %v2670_v49  ;;  %v2672_v23 = vadd.f32 %v19651_v45, %v2285_v25  ;;  %v19654_v60 = vld [vmem:[#allocation66_spill] sm:$0xff] }
 0x1d3   : > { %v16291_v37 = vld [vmem:[#allocation2 + $0x87] sm:$0xff]  ;;  %v16293_v62 = vld [vmem:[#allocation2 + $0x8f] sm:$0xff]  ;;  %3930 = vst.msk [vmem:[#allocation2 + $0xc8] sm:$0xff] %vm279_vm1, %v3897_v51  ;;  %v3900_v24 = vmax.f32 %v3868_v44, 0.0  ;;  %v3867_v30 = vadd.f32 %v16130_v27, %v3828_v61  ;;  %v3831_v39 = vadd.f32 %v13534_v1, %v3444_v11  ;;  %v3443_v58 = vadd.f32 %v3340_v41, %v3056_v4  ;;  %13575 = vmatprep.mubr.msk.f32.mxu1 %vm279_vm1, %v16289_v55  ;;  %v13537_v28 = vpop.f32.mrf.mxu0 }
 0x1d4   : > { %13627 = vmatprep.mubr.msk.f32.mxu0 %vm279_vm1, %v16291_v37  ;;  %v13487_v10 = vpop.f32.mrf.mxu1  ;;  %13576 = vmatmul.mubr.msk.f32.gmra.mxu1 %vm279_vm1, %v16301_v8  ;;  %v2287_v4 = vadd.f32 %v19652_v22, %v1900_v16  ;;  %v1902_v49 = vadd.f32 %v19653_v36, %v16186_v48  ;;  %v3061_v1 = vadd.f32 %v19654_v60, %v2673_v35  ;;  %v19655_v51 = vld [vmem:[#allocation14_spill] sm:$0xff]  ;;  %v19656_v44 = vld [vmem:[#allocation69_spill] sm:$0xff] }
 0x1d5   : > { %13628 = vmatmul.mubr.msk.f32.gmra.mxu0 %vm279_vm1, %v16293_v62  ;;  %3933 = vst.msk [vmem:[#allocation2 + $0xf0] sm:$0xff] %vm279_vm1, %v3900_v24  ;;  %v3899_v40 = vmax.f32 %v3867_v30, 0.0  ;;  %v3870_v46 = vadd.f32 %v16130_v27, %v3831_v39  ;;  %v3830_v54 = vadd.f32 %v3727_v52, %v3443_v58  ;;  %v3446_v43 = vadd.f32 %v13487_v10, %v3059_v5  ;;  %v3737_v47 = vpop.f32.mrf.mxu0  ;;  %v16332_v26 = vld [vmem:[#allocation2 + $0xb0] sm:$0xff]  ;;  %v19657_v35 = vld [vmem:[#allocation13_spill] sm:$0xff]  ;;  %v19659_v24 = vld [vmem:[#allocation68_spill] sm:$0xff] }
 0x1d6   : > { %v2675_v61 = vadd.f32 %v19656_v44, %v19655_v51  ;;  %v3350_v11 = vpop.f32.mrf.mxu1  ;;  %v16320_v25 = vld [vmem:[#allocation2 + $0xa8] sm:$0xff]  ;;  %v19658_v41 = vld [vmem:[#allocation22_spill] sm:$0xff]  ;;  %v3060_v30 = vadd.f32 %v19659_v24, %v2672_v23  ;;  %v19660_v39 = vld [vmem:[#allocation71_spill] sm:$0xff] }
 0x1d7   : > { %v16322_v32 = vld [vmem:[#allocation2 + $0xa7] sm:$0xff]  ;;  %v16324_v42 = vld [vmem:[#allocation2 + $0xaf] sm:$0xff]  ;;  %3932 = vst.msk [vmem:[#allocation2 + $0xe8] sm:$0xff] %vm279_vm1, %v3899_v40  ;;  %v3902_v5 = vmax.f32 %v3870_v46, 0.0  ;;  %v3869_v16 = vadd.f32 %v16130_v27, %v3830_v54  ;;  %v3833_v3 = vadd.f32 %v13537_v28, %v3446_v43  ;;  %v3445_v48 = vadd.f32 %v3350_v11, %v3058_v17  ;;  %13578 = vmatprep.mubr.msk.f32.mxu1 %vm279_vm1, %v16320_v25  ;;  %v13540_v14 = vpop.f32.mrf.mxu0 }
 0x1d8   : > { %13630 = vmatprep.mubr.msk.f32.mxu0 %vm279_vm1, %v16322_v32  ;;  %v1119_v52 = vadd.f32 %v19658_v41, %v19657_v35  ;;  %v2674_v58 = vadd.f32 %v19660_v39, %v2287_v4  ;;  %v13490_v15 = vpop.f32.mrf.mxu1  ;;  %13579 = vmatmul.mubr.msk.f32.gmra.mxu1 %vm279_vm1, %v16332_v26  ;;  %v19661_v40 = vld [vmem:[#allocation36_spill] sm:$0xff]  ;;  %v19662_v23 = vld [vmem:[#allocation38_spill] sm:$0xff]  ;;  %v19664_v4 = vld [vmem:[#allocation37_spill] sm:$0xff] }
 0x1d9   : > { %13631 = vmatmul.mubr.msk.f32.gmra.mxu0 %vm279_vm1, %v16324_v42  ;;  %3935 = vst.msk [vmem:[#allocation2 + $0x110] sm:$0xff] %vm279_vm1, %v3902_v5  ;;  %v3901_v17 = vmax.f32 %v3869_v16, 0.0  ;;  %v3872_v45 = vadd.f32 %v16130_v27, %v3833_v3  ;;  %v3832_v10 = vadd.f32 %v3737_v47, %v3445_v48  ;;  %v3448_v28 = vadd.f32 %v13490_v15, %v3061_v1  ;;  %v19663_v43 = vld [vmem:[#allocation70_spill] sm:$0xff]  ;;  %v19665_v36 = vld [vmem:[#allocation73_spill] sm:$0xff]  ;;  %v3747_v44 = vpop.f32.mrf.mxu0  ;;  %v19667_v3 = vld [vmem:[#allocation23_spill] sm:$0xff] }
 0x1da   : > { %v2289_v46 = vadd.f32 %v19661_v40, %v1902_v49  ;;  %v1904_v54 = vadd.f32 %v19662_v23, %v16243_v33  ;;  %v3063_v22 = vadd.f32 %v19663_v43, %v2675_v61  ;;  %v2677_v60 = vadd.f32 %v19665_v36, %v19664_v4  ;;  %v3360_v51 = vpop.f32.mrf.mxu1  ;;  %v16350_v11 = vld [vmem:[#allocation2 + $0xc8] sm:$0xff]  ;;  %v16362_v61 = vld [vmem:[#allocation2 + $0xd0] sm:$0xff]  ;;  %v19668_v35 = vld [vmem:[#allocation72_spill] sm:$0xff] }
 0x1db   : > { %v16352_v5 = vld [vmem:[#allocation2 + $0xc7] sm:$0xff]  ;;  %v16354_v16 = vld [vmem:[#allocation2 + $0xcf] sm:$0xff]  ;;  %3934 = vst.msk [vmem:[#allocation2 + $0x108] sm:$0xff] %vm279_vm1, %v3901_v17  ;;  %v3904_v1 = vmax.f32 %v3872_v45, 0.0  ;;  %v3871_v49 = vadd.f32 %v16130_v27, %v3832_v10  ;;  %v3835_v47 = vadd.f32 %v13540_v14, %v3448_v28  ;;  %v3447_v33 = vadd.f32 %v3360_v51, %v3060_v30  ;;  %13581 = vmatprep.mubr.msk.f32.mxu1 %vm279_vm1, %v16350_v11  ;;  %v13543_v15 = vpop.f32.mrf.mxu0 }
 0x1dc   : > { %13633 = vmatprep.mubr.msk.f32.mxu0 %vm279_vm1, %v16352_v5  ;;  %19666 = vst [vmem:[#allocation5_spill] sm:$0xff] %v16362_v61  ;;  %v1520_v48 = vadd.f32 %v19667_v3, %v1119_v52  ;;  %v3062_v41 = vadd.f32 %v19668_v35, %v2674_v58  ;;  %v2676_v24 = vadd.f32 %v16070_v57, %v2289_v46  ;;  %v13493_v39 = vpop.f32.mrf.mxu1  ;;  %v19669_v52 = vld [vmem:[#allocation39_spill] sm:$0xff]  ;;  %v19670_v58 = vld [vmem:[#allocation41_spill] sm:$0xff]  ;;  %v19671_v28 = vld [vmem:[#allocation74_spill] sm:$0xff] }
 0x1dd   : > { %13582 = vmatmul.mubr.msk.f32.gmra.mxu1 %vm279_vm1, %v16362_v61  ;;  %13634 = vmatmul.mubr.msk.f32.gmra.mxu0 %vm279_vm1, %v16354_v16  ;;  %3937 = vst.msk [vmem:[#allocation2 + $0x130] sm:$0xff] %vm279_vm1, %v3904_v1  ;;  %v3903_v30 = vmax.f32 %v3871_v49, 0.0  ;;  %v3874_v14 = vadd.f32 %v16130_v27, %v3835_v47  ;;  %v3834_v17 = vadd.f32 %v3747_v44, %v3447_v33  ;;  %v19672_v46 = vld [vmem:[#allocation40_spill] sm:$0xff]  ;;  %v3757_v36 = vpop.f32.mrf.mxu0  ;;  %v19676_v47 = vld [vmem:[#allocation15_spill] sm:$0xff] }
 0x1de   : > { %v3450_v45 = vadd.f32 %v13493_v39, %v3063_v22  ;;  %v2291_v10 = vadd.f32 %v19669_v52, %v1904_v54  ;;  %v1906_v57 = vadd.f32 %v19670_v58, %v16304_v7  ;;  %v3065_v40 = vadd.f32 %v19671_v28, %v2677_v60  ;;  %v19673_v23 = vld [vmem:[#allocation76_spill] sm:$0xff]  ;;  %v3370_v4 = vpop.f32.mrf.mxu1  ;;  %v16379_v51 = vld [vmem:[#allocation2 + $0xe8] sm:$0xff]  ;;  %v16391_v60 = vld [vmem:[#allocation2 + $0xf0] sm:$0xff] }
 0x1df   : > { %v2679_v43 = vadd.f32 %v19673_v23, %v19672_v46  ;;  %19674 = vst [vmem:[#allocation6_spill] sm:$0xff] %v16379_v51  ;;  %v16381_v1 = vld [vmem:[#allocation2 + $0xe7] sm:$0xff]  ;;  %v16383_v49 = vld [vmem:[#allocation2 + $0xef] sm:$0xff]  ;;  %3936 = vst.msk [vmem:[#allocation2 + $0x128] sm:$0xff] %vm279_vm1, %v3903_v30  ;;  %v3906_v22 = vmax.f32 %v3874_v14, 0.0  ;;  %v3873_v54 = vadd.f32 %v16130_v27, %v3834_v17  ;;  %v3449_v7 = vadd.f32 %v3370_v4, %v3062_v41  ;;  %v13546_v58 = vpop.f32.mrf.mxu0 }
 0x1e0   : > { %v3837_v44 = vadd.f32 %v13543_v15, %v3450_v45  ;;  %13584 = vmatprep.mubr.msk.f32.mxu1 %vm279_vm1, %v16379_v51  ;;  %13636 = vmatprep.mubr.msk.f32.mxu0 %vm279_vm1, %v16381_v1  ;;  %19675 = vst [vmem:[#allocation7_spill] sm:$0xff] %v16391_v60  ;;  %v19677_v33 = vld [vmem:[#allocation24_spill] sm:$0xff]  ;;  %v19678_v35 = vld [vmem:[#allocation75_spill] sm:$0xff]  ;;  %v19679_v52 = vld [vmem:[#allocation78_spill] sm:$0xff]  ;;  %v13496_v14 = vpop.f32.mrf.mxu1 }
 0x1e1   : > { %v1129_v3 = vadd.f32 %v19677_v33, %v19676_v47  ;;  %v3064_v39 = vadd.f32 %v19678_v35, %v2676_v24  ;;  %v2678_v30 = vadd.f32 %v19679_v52, %v2291_v10  ;;  %13585 = vmatmul.mubr.msk.f32.gmra.mxu1 %vm279_vm1, %v16391_v60  ;;  %13637 = vmatmul.mubr.msk.f32.gmra.mxu0 %vm279_vm1, %v16383_v49  ;;  %v3905_v41 = vmax.f32 %v3873_v54, 0.0  ;;  %v19680_v28 = vld [vmem:[#allocation42_spill] sm:$0xff]  ;;  %v19681_v24 = vld [vmem:[#allocation44_spill] sm:$0xff]  ;;  %v19682_v10 = vld [vmem:[#allocation77_spill] sm:$0xff]  ;;  %v3767_v60 = vpop.f32.mrf.mxu0 }
 0x1e2   : > { %3939 = vst.msk [vmem:[#allocation2 + $0x150] sm:$0xff] %vm279_vm1, %v3906_v22  ;;  %v3876_v15 = vadd.f32 %v16130_v27, %v3837_v44  ;;  %v3836_v17 = vadd.f32 %v3757_v36, %v3449_v7  ;;  %v3452_v45 = vadd.f32 %v13496_v14, %v3065_v40  ;;  %v2293_v46 = vadd.f32 %v19680_v28, %v1906_v57  ;;  %v19683_v47 = vld [vmem:[#allocation43_spill] sm:$0xff]  ;;  %v19684_v33 = vld [vmem:[#allocation80_spill] sm:$0xff]  ;;  %v3380_v52 = vpop.f32.mrf.mxu1  ;;  %v16408_v51 = vld [vmem:[#allocation2 + $0x108] sm:$0xff] }
 0x1e3   : > { %v1908_v23 = vadd.f32 %v19681_v24, %v1520_v48  ;;  %v3067_v4 = vadd.f32 %v19682_v10, %v2679_v43  ;;  %v2681_v35 = vadd.f32 %v19684_v33, %v19683_v47  ;;  %19685 = vst [vmem:[#allocation51_spill] sm:$0xff] %v16408_v51  ;;  %v16410_v61 = vld [vmem:[#allocation2 + $0x107] sm:$0xff]  ;;  %v16412_v22 = vld [vmem:[#allocation2 + $0x10f] sm:$0xff]  ;;  %3938 = vst.msk [vmem:[#allocation2 + $0x148] sm:$0xff] %vm279_vm1, %v3905_v41  ;;  %13587 = vmatprep.mubr.msk.f32.mxu1 %vm279_vm1, %v16408_v51 }
 0x1e4   : > { %v3908_v40 = vmax.f32 %v3876_v15, 0.0  ;;  %v3875_v57 = vadd.f32 %v16130_v27, %v3836_v17  ;;  %v3839_v36 = vadd.f32 %v13546_v58, %v3452_v45  ;;  %v3451_v48 = vadd.f32 %v3380_v52, %v3064_v39  ;;  %13639 = vmatprep.mubr.msk.f32.mxu0 %vm279_vm1, %v16410_v61  ;;  %v16420_v43 = vld [vmem:[#allocation2 + $0x110] sm:$0xff]  ;;  %v19687_v54 = vld [vmem:[#allocation25_spill] sm:$0xff]  ;;  %v19688_v7 = vld [vmem:[#allocation79_spill] sm:$0xff]  ;;  %v13499_v41 = vpop.f32.mrf.mxu1  ;;  %v13549_v15 = vpop.f32.mrf.mxu0 }
 0x1e5   : > { %19686 = vst [vmem:[#allocation26_spill] sm:$0xff] %v16420_v43  ;;  %v1522_v44 = vadd.f32 %v19687_v54, %v1129_v3  ;;  %v3066_v14 = vadd.f32 %v19688_v7, %v2678_v30  ;;  %v19689_v28 = vld [vmem:[#allocation82_spill] sm:$0xff]  ;;  %13588 = vmatmul.mubr.msk.f32.gmra.mxu1 %vm279_vm1, %v16420_v43  ;;  %13640 = vmatmul.mubr.msk.f32.gmra.mxu0 %vm279_vm1, %v16412_v22  ;;  %v19690_v3 = vld [vmem:[#allocation45_spill] sm:$0xff]  ;;  %v19691_v30 = vld [vmem:[#allocation47_spill] sm:$0xff] }
 0x1e6   : > { %v2680_v24 = vadd.f32 %v19689_v28, %v2293_v46  ;;  %3941 = vst.msk [vmem:[#allocation2 + $0x170] sm:$0xff] %vm279_vm1, %v3908_v40  ;;  %v3907_v39 = vmax.f32 %v3875_v57, 0.0  ;;  %v3878_v58 = vadd.f32 %v16130_v27, %v3839_v36  ;;  %v3838_v17 = vadd.f32 %v3767_v60, %v3451_v48  ;;  %v19692_v46 = vld [vmem:[#allocation81_spill] sm:$0xff]  ;;  %v19693_v52 = vld [vmem:[#allocation46_spill] sm:$0xff]  ;;  %v3390_v7 = vpop.f32.mrf.mxu1  ;;  %v3777_v28 = vpop.f32.mrf.mxu0 }
 0x1e7   : > { %v3454_v45 = vadd.f32 %v13499_v41, %v3067_v4  ;;  %v2295_v10 = vadd.f32 %v19690_v3, %v1908_v23  ;;  %v1910_v47 = vadd.f32 %v19691_v30, %v1522_v44  ;;  %v3069_v33 = vadd.f32 %v19692_v46, %v2681_v35  ;;  %v16436_v43 = vld [vmem:[#allocation2 + $0x128] sm:$0xff]  ;;  %v19694_v35 = vld [vmem:[#allocation83_spill] sm:$0xff] }
 0x1e8   : > { %v2683_v54 = vadd.f32 %v16092_v53, %v19693_v52  ;;  %v16438_v51 = vld [vmem:[#allocation2 + $0x127] sm:$0xff]  ;;  %v16440_v40 = vld [vmem:[#allocation2 + $0x12f] sm:$0xff]  ;;  %3940 = vst.msk [vmem:[#allocation2 + $0x168] sm:$0xff] %vm279_vm1, %v3907_v39  ;;  %v3910_v60 = vmax.f32 %v3878_v58, 0.0  ;;  %v3877_v23 = vadd.f32 %v16130_v27, %v3838_v17  ;;  %v3453_v57 = vadd.f32 %v3390_v7, %v3066_v14  ;;  %13590 = vmatprep.mubr.msk.f32.mxu1 %vm279_vm1, %v16436_v43  ;;  %v13502_v44 = vpop.f32.mrf.mxu1  ;;  %v13552_v41 = vpop.f32.mrf.mxu0 }
 0x1e9   : > { %v3841_v4 = vadd.f32 %v13549_v15, %v3454_v45  ;;  %13642 = vmatprep.mubr.msk.f32.mxu0 %vm279_vm1, %v16438_v51  ;;  %v16448_v53 = vld [vmem:[#allocation2 + $0x130] sm:$0xff]  ;;  %v3068_v36 = vadd.f32 %v19694_v35, %v2680_v24  ;;  %v2682_v48 = vadd.f32 %v16096_v29, %v2295_v10  ;;  %v3456_v58 = vadd.f32 %v13502_v44, %v3069_v33  ;;  %v19695_v17 = vld [vmem:[#allocation48_spill] sm:$0xff]  ;;  %v19697_v29 = vld [vmem:[#allocation49_spill] sm:$0xff] }
 0x1ea   : > { %13591 = vmatmul.mubr.msk.f32.gmra.mxu1 %vm279_vm1, %v16448_v53  ;;  %13643 = vmatmul.mubr.msk.f32.gmra.mxu0 %vm279_vm1, %v16440_v40  ;;  %3943 = vst.msk [vmem:[#allocation2 + $0x190] sm:$0xff] %vm279_vm1, %v3910_v60  ;;  %v3909_v14 = vmax.f32 %v3877_v23, 0.0  ;;  %v3840_v39 = vadd.f32 %v3777_v28, %v3453_v57  ;;  %v2297_v45 = vadd.f32 %v19695_v17, %v1910_v47  ;;  %v19696_v24 = vld [vmem:[#allocation84_spill] sm:$0xff]  ;;  %v3400_v30 = vpop.f32.mrf.mxu1  ;;  %v3787_v46 = vpop.f32.mrf.mxu0  ;;  %v16462_v52 = vld [vmem:[#allocation2 + $0x148] sm:$0xff] }
 0x1eb   : > { %v3880_v15 = vadd.f32 %v16130_v27, %v3841_v4  ;;  %v3071_v3 = vadd.f32 %v19696_v24, %v2683_v54  ;;  %v2685_v10 = vadd.f32 %v16105_v31, %v19697_v29  ;;  %v16464_v7 = vld [vmem:[#allocation2 + $0x147] sm:$0xff]  ;;  %v16466_v35 = vld [vmem:[#allocation2 + $0x14f] sm:$0xff]  ;;  %v3843_v28 = vadd.f32 %v13552_v41, %v3456_v58  ;;  %13593 = vmatprep.mubr.msk.f32.mxu1 %vm279_vm1, %v16462_v52 }
 0x1ec   : > { %19698 = vst [vmem:[#allocation16_spill] sm:$0xff] %v16464_v7  ;;  %19699 = vst [vmem:[#allocation28_spill] sm:$0xff] %v16466_v35  ;;  %v3879_v33 = vadd.f32 %v16130_v27, %v3840_v39  ;;  %v3455_v47 = vadd.f32 %v3400_v30, %v3068_v36  ;;  %13645 = vmatprep.mubr.msk.f32.mxu0 %vm279_vm1, %v16464_v7  ;;  %v16474_v31 = vld [vmem:[#allocation2 + $0x150] sm:$0xff]  ;;  %v19700_v54 = vld [vmem:[#allocation85_spill] sm:$0xff]  ;;  %v2684_v4 = vadd.f32 %v16112_v34, %v2297_v45  ;;  %v13505_v57 = vpop.f32.mrf.mxu1  ;;  %v13555_v44 = vpop.f32.mrf.mxu0 }
 0x1ed   : > { %3942 = vst.msk [vmem:[#allocation2 + $0x188] sm:$0xff] %vm279_vm1, %v3909_v14  ;;  %v3912_v60 = vmax.f32 %v3880_v15, 0.0  ;;  %v3070_v23 = vadd.f32 %v19700_v54, %v2682_v48  ;;  %v3882_v41 = vadd.f32 %v16130_v27, %v3843_v28  ;;  %v3458_v15 = vadd.f32 %v13505_v57, %v3071_v3 }
 0x1ee   : > { %13594 = vmatmul.mubr.msk.f32.gmra.mxu1 %vm279_vm1, %v16474_v31  ;;  %13646 = vmatmul.mubr.msk.f32.gmra.mxu0 %vm279_vm1, %v16466_v35  ;;  %v3911_v36 = vmax.f32 %v3879_v33, 0.0  ;;  %v3842_v14 = vadd.f32 %v3787_v46, %v3455_v47  ;;  %v3073_v39 = vadd.f32 %v16107_v6, %v2685_v10  ;;  %v3410_v48 = vpop.f32.mrf.mxu1  ;;  %v3797_v58 = vpop.f32.mrf.mxu0  ;;  %v16497_v6 = vld [vmem:[#allocation2 + $0x170] sm:$0xff]  ;;  %v3072_v3 = vadd.f32 %v16114_v59, %v2684_v4 }
 0x1ef   : > { %3945 = vst.msk [vmem:[#allocation2 + $0x1b0] sm:$0xff] %vm279_vm1, %v3912_v60  ;;  %v16485_v34 = vld [vmem:[#allocation2 + $0x168] sm:$0xff]  ;;  %v3914_v24 = vmax.f32 %v3882_v41, 0.0  ;;  %v3845_v30 = vadd.f32 %v13555_v44, %v3458_v15  ;;  %v3457_v60 = vadd.f32 %v3410_v48, %v3070_v23 }
 0x1f0   : > { %v16487_v17 = vld [vmem:[#allocation2 + $0x167] sm:$0xff]  ;;  %v16489_v45 = vld [vmem:[#allocation2 + $0x16f] sm:$0xff]  ;;  %3944 = vst.msk [vmem:[#allocation2 + $0x1a8] sm:$0xff] %vm279_vm1, %v3911_v36  ;;  %v3881_v29 = vadd.f32 %v16130_v27, %v3842_v14  ;;  %13596 = vmatprep.mubr.msk.f32.mxu1 %vm279_vm1, %v16485_v34  ;;  %v13508_v10 = vpop.f32.mrf.mxu1  ;;  %v13558_v46 = vpop.f32.mrf.mxu0 }
 0x1f1   : > { %19701 = vst [vmem:[#allocation50_spill] sm:$0xff] %v16487_v17  ;;  %19702 = vst [vmem:[#allocation27_spill] sm:$0xff] %v16489_v45  ;;  %13648 = vmatprep.mubr.msk.f32.mxu0 %vm279_vm1, %v16487_v17  ;;  %v3884_v28 = vadd.f32 %v16130_v27, %v3845_v30  ;;  %v3844_v47 = vadd.f32 %v3797_v58, %v3457_v60  ;;  %v3460_v54 = vadd.f32 %v13508_v10, %v3073_v39  ;;  %v16518_v39 = vld [vmem:[#allocation2 + $0x190] sm:$0xff] }
 0x1f2   : > { %13597 = vmatmul.mubr.msk.f32.gmra.mxu1 %vm279_vm1, %v16497_v6  ;;  %13649 = vmatmul.mubr.msk.f32.gmra.mxu0 %vm279_vm1, %v16489_v45  ;;  %3947 = vst.msk [vmem:[#allocation2 + $0x1d0] sm:$0xff] %vm279_vm1, %v3914_v24  ;;  %v3913_v33 = vmax.f32 %v3881_v29, 0.0  ;;  %v3420_v23 = vpop.f32.mrf.mxu1  ;;  %v3807_v59 = vpop.f32.mrf.mxu0 }
 0x1f3   : > { %v3916_v36 = vmax.f32 %v3884_v28, 0.0  ;;  %v3883_v41 = vadd.f32 %v16130_v27, %v3844_v47  ;;  %v3459_v14 = vadd.f32 %v3420_v23, %v3072_v3  ;;  %v3847_v15 = vadd.f32 %v13558_v46, %v3460_v54  ;;  %v4663_v23 = vld [vmem:[#allocation2 + $0x9] sm:$0xff] }
 0x1f4   : > { %v16506_v57 = vld [vmem:[#allocation2 + $0x188] sm:$0xff]  ;;  %3946 = vst.msk [vmem:[#allocation2 + $0x1c8] sm:$0xff] %vm279_vm1, %v3913_v33 }
 0x1f5   : > { %v16508_v44 = vld [vmem:[#allocation2 + $0x187] sm:$0xff]  ;;  %v16510_v4 = vld [vmem:[#allocation2 + $0x18f] sm:$0xff]  ;;  %13599 = vmatprep.mubr.msk.f32.mxu1 %vm279_vm1, %v16506_v57  ;;  %3949 = vst.msk [vmem:[#allocation2 + $0x1f0] sm:$0xff] %vm279_vm1, %v3916_v36  ;;  %v3915_v48 = vmax.f32 %v3883_v41, 0.0  ;;  %v3886_v58 = vadd.f32 %v16130_v27, %v3847_v15  ;;  %v3846_v24 = vadd.f32 %v3807_v59, %v3459_v14 }
 0x1f6   : > { %19703 = vst [vmem:[#allocation53_spill] sm:$0xff] %v16508_v44  ;;  %19704 = vst [vmem:[#allocation8_spill] sm:$0xff] %v16510_v4  ;;  %13651 = vmatprep.mubr.msk.f32.mxu0 %vm279_vm1, %v16508_v44  ;;  %13600 = vmatmul.mubr.msk.f32.gmra.mxu1 %vm279_vm1, %v16518_v39  ;;  %v16538_v46 = vld [vmem:[#allocation2 + $0x1b0] sm:$0xff] }
 0x1f7   : > { %13652 = vmatmul.mubr.msk.f32.gmra.mxu0 %vm279_vm1, %v16510_v4  ;;  %v16526_v29 = vld [vmem:[#allocation2 + $0x1a8] sm:$0xff]  ;;  %3948 = vst.msk [vmem:[#allocation2 + $0x1e8] sm:$0xff] %vm279_vm1, %v3915_v48  ;;  %v3918_v3 = vmax.f32 %v3886_v58, 0.0  ;;  %v3885_v10 = vadd.f32 %v16130_v27, %v3846_v24  ;;  %v4664_v15 = vld [vmem:[#allocation2 + $0x11] sm:$0xff]  ;;  %v11687_v48 = vld [vmem:[%s19369_s3 + $0x40] sm:$0xff]  ;;  %v13565_v58 = vpop.f32.mrf.mxu1  ;;  %v13617_v24 = vpop.f32.mrf.mxu0 }
 0x1f8   : > { %v16528_v30 = vld [vmem:[#allocation2 + $0x1a7] sm:$0xff]  ;;  %v16530_v60 = vld [vmem:[#allocation2 + $0x1af] sm:$0xff]  ;;  %13602 = vmatprep.mubr.msk.f32.mxu1 %vm279_vm1, %v16526_v29 }
 0x1f9   : > { %19705 = vst [vmem:[#allocation18_spill] sm:$0xff] %v16528_v30  ;;  %19706 = vst [vmem:[#allocation52_spill] sm:$0xff] %v16530_v60  ;;  %13654 = vmatprep.mubr.msk.f32.mxu0 %vm279_vm1, %v16528_v30  ;;  %v3917_v33 = vmax.f32 %v3885_v10, 0.0  ;;  %v16556_v54 = vld [vmem:[#allocation2 + $0x1d0] sm:$0xff]  ;;  %v16589_v10 = vadd.f32 %v13617_v24, %v13565_v58 }
 0x1fa   : > { %13603 = vmatmul.mubr.msk.f32.gmra.mxu1 %vm279_vm1, %v16538_v46  ;;  %3951 = vst.msk [vmem:[#allocation2 + $0x210] sm:$0xff] %vm279_vm1, %v3918_v3  ;;  %v16587_v3 = vld [vmem:[#allocation2 + $0x29] sm:$0xff]  ;;  %v16710_v24 = vld [vmem:[#allocation2 + $0x131] sm:$0xff] }
 0x1fb   : > { %13655 = vmatmul.mubr.msk.f32.gmra.mxu0 %vm279_vm1, %v16530_v60  ;;  %v16545_v28 = vld [vmem:[#allocation2 + $0x1c8] sm:$0xff]  ;;  %3950 = vst.msk [vmem:[#allocation2 + $0x208] sm:$0xff] %vm279_vm1, %v3917_v33  ;;  %19710 = vst [vmem:[#allocation31_spill] sm:$0xff] %v16589_v10  ;;  %v16598_v33 = vld [vmem:[#allocation2 + $0x31] sm:$0xff] }
 0x1fc   : > { %v16547_v27 = vld [vmem:[#allocation2 + $0x1c7] sm:$0xff]  ;;  %v16549_v47 = vld [vmem:[#allocation2 + $0x1cf] sm:$0xff]  ;;  %13605 = vmatprep.mubr.msk.f32.mxu1 %vm279_vm1, %v16545_v28 }
 0x1fd   : > { %19707 = vst [vmem:[#allocation55_spill] sm:$0xff] %v16547_v27  ;;  %19708 = vst [vmem:[#allocation29_spill] sm:$0xff] %v16549_v47  ;;  %13657 = vmatprep.mubr.msk.f32.mxu0 %vm279_vm1, %v16547_v27  ;;  %v16572_v14 = vld [vmem:[#allocation2 + $0x1f0] sm:$0xff] }
 0x1fe   : > { %13606 = vmatmul.mubr.msk.f32.gmra.mxu1 %vm279_vm1, %v16556_v54  ;;  %v16562_v59 = vld [vmem:[#allocation2 + $0x1e8] sm:$0xff] }
 0x1ff   : > { %13658 = vmatmul.mubr.msk.f32.gmra.mxu0 %vm279_vm1, %v16549_v47  ;;  %v16564_v36 = vld [vmem:[#allocation2 + $0x1e7] sm:$0xff]  ;;  %v16566_v41 = vld [vmem:[#allocation2 + $0x1ef] sm:$0xff]  ;;  %13608 = vmatprep.mubr.msk.f32.mxu1 %vm279_vm1, %v16562_v59 }
 0x200   : > { %19709 = vst [vmem:[#allocation17_spill] sm:$0xff] %v16564_v36  ;;  %13660 = vmatprep.mubr.msk.f32.mxu0 %vm279_vm1, %v16564_v36  ;;  %v16704_v58 = vld [vmem:[#allocation2 + $0x129] sm:$0xff] }
 0x201   : > { %v16728_v10 = vld [vmem:[#allocation2 + $0x169] sm:$0xff] }
 0x202   : > { %13609 = vmatmul.mubr.msk.f32.gmra.mxu1 %vm279_vm1, %v16572_v14 }
 0x203   : > { %13661 = vmatmul.mubr.msk.f32.gmra.mxu0 %vm279_vm1, %v16566_v41  ;;  %13667 = vmatprep.mubr.msk.f32.mxu1 %vm279_vm1, %v4663_v23  ;;  %v16607_v23 = vld [vmem:[%s19369_s3 + $0x68] sm:$0xff] }
 0x204   : > { %13719 = vmatprep.mubr.msk.f32.mxu0 %vm279_vm1, %v16200_v21  ;;  %v14543_v21 = vld [vmem:[%s19369_s3 + $0x48] sm:$0xff] }
 0x206   : > { %13668 = vmatmul.mubr.msk.f32.vlgmr.msra.gmra.mxu1 %vm279_vm1, %v4664_v15  ;;  %v16625_v15 = vld [vmem:[%s19369_s3 + $0x78] sm:$0xff] }
 0x207   : > { %13720 = vmatmul.mubr.msk.f32.vlgmr.msra.gmra.mxu0 %vm279_vm1, %v16202_v56  ;;  %13768 = vmatpush3.msra.mxu1 %v14543_v21  ;;  %v11721_v56 = vld [vmem:[%s19369_s3 + $0x50] sm:$0xff] }
 0x208   : > { %13670 = vmatprep.mubr.msk.f32.mxu1 %vm279_vm1, %v16587_v3  ;;  %13722 = vmatprep.mubr.msk.f32.mxu0 %vm279_vm1, %v16230_v50  ;;  %v16613_v50 = vld [vmem:[#allocation2 + $0x49] sm:$0xff] }
 0x209   : > { %13769 = vmatprep.subr.mxu1 %v11687_v48  ;;  %13820 = vmatpush3.msra.mxu0 %v16169_v2  ;;  %v16620_v2 = vld [vmem:[#allocation2 + $0x51] sm:$0xff]  ;;  %v16716_v21 = vld [vmem:[#allocation2 + $0x149] sm:$0xff] }
 0x20a   : > { %13770 = vmatpush3.msra.mxu1 %v11687_v48  ;;  %13821 = vmatprep.subr.mxu0 %v11721_v56  ;;  %v16644_v48 = vld [vmem:[#allocation2 + $0x89] sm:$0xff] }
 0x20b   : > { %13671 = vmatmul.mubr.msk.f32.gmra.mxu1 %vm279_vm1, %v16598_v33  ;;  %13723 = vmatmul.mubr.msk.f32.gmra.mxu0 %vm279_vm1, %v16232_v0  ;;  %v16631_v0 = vld [vmem:[#allocation2 + $0x69] sm:$0xff] }
 0x20c   : > { %13673 = vmatprep.mubr.msk.f32.mxu1 %vm279_vm1, %v16613_v50  ;;  %13725 = vmatprep.mubr.msk.f32.mxu0 %vm279_vm1, %v16261_v9  ;;  %v16638_v9 = vld [vmem:[#allocation2 + $0x71] sm:$0xff] }
 0x20d   : > { %13871 = vmatprep.subr.mxu1 %v16607_v23  ;;  %13822 = vmatpush3.msra.mxu0 %v11721_v56  ;;  %v16722_v56 = vld [vmem:[#allocation2 + $0x151] sm:$0xff] }
 0x20e   : > { %13923 = vmatprep.subr.mxu0 %v16625_v15 }
 0x20f   : > { %13674 = vmatmul.mubr.msk.f32.gmra.mxu1 %vm279_vm1, %v16620_v2  ;;  %13726 = vmatmul.mubr.msk.f32.gmra.mxu0 %vm279_vm1, %v16263_v12  ;;  %v16650_v12 = vld [vmem:[#allocation2 + $0x91] sm:$0xff] }
 0x210   : > { %13676 = vmatprep.mubr.msk.f32.mxu1 %vm279_vm1, %v16631_v0  ;;  %13728 = vmatprep.mubr.msk.f32.mxu0 %vm279_vm1, %v16291_v37  ;;  %v16656_v37 = vld [vmem:[#allocation2 + $0xa9] sm:$0xff] }
 0x213   : > { %13677 = vmatmul.mubr.msk.f32.gmra.mxu1 %vm279_vm1, %v16638_v9  ;;  %13729 = vmatmul.mubr.msk.f32.gmra.mxu0 %vm279_vm1, %v16293_v62  ;;  %v16662_v62 = vld [vmem:[#allocation2 + $0xb1] sm:$0xff] }
 0x214   : > { %13679 = vmatprep.mubr.msk.f32.mxu1 %vm279_vm1, %v16644_v48  ;;  %13731 = vmatprep.mubr.msk.f32.mxu0 %vm279_vm1, %v16322_v32  ;;  %v16668_v32 = vld [vmem:[#allocation2 + $0xc9] sm:$0xff] }
 0x217   : > { %13680 = vmatmul.mubr.msk.f32.gmra.mxu1 %vm279_vm1, %v16650_v12  ;;  %13732 = vmatmul.mubr.msk.f32.gmra.mxu0 %vm279_vm1, %v16324_v42  ;;  %v16674_v42 = vld [vmem:[#allocation2 + $0xd1] sm:$0xff] }
 0x218   : > { %13682 = vmatprep.mubr.msk.f32.mxu1 %vm279_vm1, %v16656_v37  ;;  %13734 = vmatprep.mubr.msk.f32.mxu0 %vm279_vm1, %v16352_v5  ;;  %v16680_v5 = vld [vmem:[#allocation2 + $0xe9] sm:$0xff] }
 0x21b   : > { %13683 = vmatmul.mubr.msk.f32.gmra.mxu1 %vm279_vm1, %v16662_v62  ;;  %13735 = vmatmul.mubr.msk.f32.gmra.mxu0 %vm279_vm1, %v16354_v16  ;;  %v16686_v16 = vld [vmem:[#allocation2 + $0xf1] sm:$0xff] }
 0x21c   : > { %13685 = vmatprep.mubr.msk.f32.mxu1 %vm279_vm1, %v16668_v32  ;;  %13737 = vmatprep.mubr.msk.f32.mxu0 %vm279_vm1, %v16381_v1  ;;  %v16692_v1 = vld [vmem:[#allocation2 + $0x109] sm:$0xff] }
 0x21f   : > { %13686 = vmatmul.mubr.msk.f32.gmra.mxu1 %vm279_vm1, %v16674_v42  ;;  %13738 = vmatmul.mubr.msk.f32.gmra.mxu0 %vm279_vm1, %v16383_v49  ;;  %v16698_v49 = vld [vmem:[#allocation2 + $0x111] sm:$0xff] }
 0x220   : > { %13688 = vmatprep.mubr.msk.f32.mxu1 %vm279_vm1, %v16680_v5  ;;  %13740 = vmatprep.mubr.msk.f32.mxu0 %vm279_vm1, %v16410_v61 }
 0x223   : > { %13689 = vmatmul.mubr.msk.f32.gmra.mxu1 %vm279_vm1, %v16686_v16  ;;  %13741 = vmatmul.mubr.msk.f32.gmra.mxu0 %vm279_vm1, %v16412_v22 }
 0x224   : > { %13691 = vmatprep.mubr.msk.f32.mxu1 %vm279_vm1, %v16692_v1  ;;  %13743 = vmatprep.mubr.msk.f32.mxu0 %vm279_vm1, %v16438_v51 }
 0x227   : > { %13692 = vmatmul.mubr.msk.f32.gmra.mxu1 %vm279_vm1, %v16698_v49  ;;  %13744 = vmatmul.mubr.msk.f32.gmra.mxu0 %vm279_vm1, %v16440_v40 }
 0x228   : > { %13694 = vmatprep.mubr.msk.f32.mxu1 %vm279_vm1, %v16704_v58  ;;  %13746 = vmatprep.mubr.msk.f32.mxu0 %vm279_vm1, %v16464_v7  ;;  %v16778_v7 = vld [vmem:[#allocation2 + $0x207] sm:$0xff] }
 0x229   : > { %19711 = vst [vmem:[#allocation54_spill] sm:$0xff] %v16778_v7 }
 0x22b   : > { %13695 = vmatmul.mubr.msk.f32.gmra.mxu1 %vm279_vm1, %v16710_v24  ;;  %13747 = vmatmul.mubr.msk.f32.gmra.mxu0 %vm279_vm1, %v16466_v35  ;;  %v16734_v35 = vld [vmem:[#allocation2 + $0x171] sm:$0xff] }
 0x22c   : > { %13697 = vmatprep.mubr.msk.f32.mxu1 %vm279_vm1, %v16716_v21  ;;  %13749 = vmatprep.mubr.msk.f32.mxu0 %vm279_vm1, %v16487_v17  ;;  %v16740_v17 = vld [vmem:[#allocation2 + $0x189] sm:$0xff] }
 0x22f   : > { %13698 = vmatmul.mubr.msk.f32.gmra.mxu1 %vm279_vm1, %v16722_v56  ;;  %13750 = vmatmul.mubr.msk.f32.gmra.mxu0 %vm279_vm1, %v16489_v45  ;;  %v16746_v45 = vld [vmem:[#allocation2 + $0x191] sm:$0xff] }
 0x230   : > { %13700 = vmatprep.mubr.msk.f32.mxu1 %vm279_vm1, %v16728_v10  ;;  %13752 = vmatprep.mubr.msk.f32.mxu0 %vm279_vm1, %v16508_v44  ;;  %v16752_v44 = vld [vmem:[#allocation2 + $0x1a9] sm:$0xff] }
 0x233   : > { %13701 = vmatmul.mubr.msk.f32.gmra.mxu1 %vm279_vm1, %v16734_v35  ;;  %13753 = vmatmul.mubr.msk.f32.gmra.mxu0 %vm279_vm1, %v16510_v4  ;;  %v16758_v4 = vld [vmem:[#allocation2 + $0x1b1] sm:$0xff] }
 0x234   : > { %13703 = vmatprep.mubr.msk.f32.mxu1 %vm279_vm1, %v16740_v17  ;;  %13755 = vmatprep.mubr.msk.f32.mxu0 %vm279_vm1, %v16528_v30  ;;  %v16764_v30 = vld [vmem:[#allocation2 + $0x1c9] sm:$0xff] }
 0x237   : > { %13704 = vmatmul.mubr.msk.f32.gmra.mxu1 %vm279_vm1, %v16746_v45  ;;  %13756 = vmatmul.mubr.msk.f32.gmra.mxu0 %vm279_vm1, %v16530_v60  ;;  %v16770_v60 = vld [vmem:[#allocation2 + $0x1d1] sm:$0xff] }
 0x238   : > { %13706 = vmatprep.mubr.msk.f32.mxu1 %vm279_vm1, %v16752_v44  ;;  %13758 = vmatprep.mubr.msk.f32.mxu0 %vm279_vm1, %v16547_v27  ;;  %v16776_v27 = vld [vmem:[#allocation2 + $0x1e9] sm:$0xff] }
 0x23b   : > { %13707 = vmatmul.mubr.msk.f32.gmra.mxu1 %vm279_vm1, %v16758_v4  ;;  %13759 = vmatmul.mubr.msk.f32.gmra.mxu0 %vm279_vm1, %v16549_v47  ;;  %v16784_v47 = vld [vmem:[#allocation2 + $0x1f1] sm:$0xff] }
 0x23c   : > { %13709 = vmatprep.mubr.msk.f32.mxu1 %vm279_vm1, %v16764_v30  ;;  %13761 = vmatprep.mubr.msk.f32.mxu0 %vm279_vm1, %v16564_v36  ;;  %v16786_v36 = vld [vmem:[#allocation2 + $0x20f] sm:$0xff] }
 0x23f   : > { %13710 = vmatmul.mubr.msk.f32.gmra.mxu1 %vm279_vm1, %v16770_v60  ;;  %13762 = vmatmul.mubr.msk.f32.gmra.mxu0 %vm279_vm1, %v16566_v41 }
 0x240   : > { %13712 = vmatprep.mubr.msk.f32.mxu1 %vm279_vm1, %v16776_v27  ;;  %13764 = vmatprep.mubr.msk.f32.mxu0 %vm279_vm1, %v16778_v7  ;;  %v11755_v7 = vld [vmem:[%s19369_s3 + $0x60] sm:$0xff] }
 0x243   : > { %13713 = vmatmul.mubr.msk.f32.gmra.mxu1 %vm279_vm1, %v16784_v47  ;;  %13765 = vmatmul.mubr.msk.f32.gmra.mxu0 %vm279_vm1, %v16786_v36 }
 0x244   : > { %13771 = vmatprep.mubr.msk.f32.mxu1 %vm279_vm1, %v16198_v18  ;;  %13823 = vmatprep.mubr.msk.f32.mxu0 %vm279_vm1, %v16587_v3  ;;  %v11789_v18 = vld [vmem:[%s19369_s3 + $0x70] sm:$0xff] }
 0x245   : > { %v6607_v3 = vld [vmem:[#allocation2 + $0x70] sm:$0xff] }
 0x247   : > { %13772 = vmatmul.mubr.msk.f32.vlgmr.msra.gmra.mxu1 %vm279_vm1, %v16210_v20  ;;  %13824 = vmatmul.mubr.msk.f32.vlgmr.msra.gmra.mxu0 %vm279_vm1, %v16598_v33  ;;  %v16815_v20 = vld [vmem:[%s19369_s3 + $0x88] sm:$0xff] }
 0x248   : > { %13872 = vmatpush3.msra.mxu1 %v16607_v23  ;;  %13774 = vmatprep.mubr.msk.f32.mxu1 %vm279_vm1, %v16228_v63  ;;  %v19712_v63 = vld [vmem:[#allocation5_spill] sm:$0xff] }
 0x249   : > { %13826 = vmatprep.mubr.msk.f32.mxu0 %vm279_vm1, %v16613_v50  ;;  %13873 = vmatprep.subr.mxu1 %v11755_v7  ;;  %v6220_v23 = vld [vmem:[#allocation2 + $0x87] sm:$0xff] }
 0x24a   : > { %13874 = vmatpush3.msra.mxu1 %v11755_v7  ;;  %13924 = vmatpush3.msra.mxu0 %v16625_v15  ;;  %v6216_v7 = vld [vmem:[#allocation2 + $0x47] sm:$0xff] }
 0x24b   : > { %13775 = vmatmul.mubr.msk.f32.gmra.mxu1 %vm279_vm1, %v16240_v38  ;;  %13827 = vmatmul.mubr.msk.f32.gmra.mxu0 %vm279_vm1, %v16620_v2  ;;  %v19713_v38 = vld [vmem:[#allocation6_spill] sm:$0xff]  ;;  %v6608_v15 = vld [vmem:[#allocation2 + $0x88] sm:$0xff] }
 0x24c   : > { %13777 = vmatprep.mubr.msk.f32.mxu1 %vm279_vm1, %v16259_v19  ;;  %13829 = vmatprep.mubr.msk.f32.mxu0 %vm279_vm1, %v16631_v0  ;;  %v19714_v19 = vld [vmem:[#allocation7_spill] sm:$0xff] }
 0x24d   : > { %13925 = vmatprep.subr.mxu0 %v11789_v18  ;;  %13975 = vmatprep.subr.mxu1 %v16815_v20 }
 0x24e   : > { %13926 = vmatpush3.msra.mxu0 %v11789_v18  ;;  %v6609_v18 = vld [vmem:[#allocation2 + $0x90] sm:$0xff] }
 0x24f   : > { %13778 = vmatmul.mubr.msk.f32.gmra.mxu1 %vm279_vm1, %v16271_v13  ;;  %13830 = vmatmul.mubr.msk.f32.gmra.mxu0 %vm279_vm1, %v16638_v9  ;;  %v19715_v13 = vld [vmem:[#allocation51_spill] sm:$0xff] }
 0x250   : > { %13780 = vmatprep.mubr.msk.f32.mxu1 %vm279_vm1, %v16289_v55  ;;  %13832 = vmatprep.mubr.msk.f32.mxu0 %vm279_vm1, %v16644_v48  ;;  %v19716_v55 = vld [vmem:[#allocation26_spill] sm:$0xff] }
 0x253   : > { %13781 = vmatmul.mubr.msk.f32.gmra.mxu1 %vm279_vm1, %v16301_v8  ;;  %13833 = vmatmul.mubr.msk.f32.gmra.mxu0 %vm279_vm1, %v16650_v12  ;;  %v16926_v8 = vld [vmem:[#allocation2 + $0x208] sm:$0xff] }
 0x254   : > { %13783 = vmatprep.mubr.msk.f32.mxu1 %vm279_vm1, %v16320_v25  ;;  %13835 = vmatprep.mubr.msk.f32.mxu0 %vm279_vm1, %v16656_v37  ;;  %v16928_v25 = vld [vmem:[#allocation2 + $0x209] sm:$0xff] }
 0x257   : > { %13784 = vmatmul.mubr.msk.f32.gmra.mxu1 %vm279_vm1, %v16332_v26  ;;  %13836 = vmatmul.mubr.msk.f32.gmra.mxu0 %vm279_vm1, %v16662_v62  ;;  %v16934_v26 = vld [vmem:[#allocation2 + $0x210] sm:$0xff] }
 0x258   : > { %13786 = vmatprep.mubr.msk.f32.mxu1 %vm279_vm1, %v16350_v11  ;;  %13838 = vmatprep.mubr.msk.f32.mxu0 %vm279_vm1, %v16668_v32  ;;  %v16936_v11 = vld [vmem:[#allocation2 + $0x211] sm:$0xff] }
 0x25b   : > { %13787 = vmatmul.mubr.msk.f32.gmra.mxu1 %vm279_vm1, %v19712_v63  ;;  %13839 = vmatmul.mubr.msk.f32.gmra.mxu0 %vm279_vm1, %v16674_v42 }
 0x25c   : > { %13789 = vmatprep.mubr.msk.f32.mxu1 %vm279_vm1, %v19713_v38  ;;  %13841 = vmatprep.mubr.msk.f32.mxu0 %vm279_vm1, %v16680_v5  ;;  %v6222_v38 = vld [vmem:[#allocation2 + $0xa7] sm:$0xff] }
 0x25f   : > { %13790 = vmatmul.mubr.msk.f32.gmra.mxu1 %vm279_vm1, %v19714_v19  ;;  %13842 = vmatmul.mubr.msk.f32.gmra.mxu0 %vm279_vm1, %v16686_v16  ;;  %v6610_v19 = vld [vmem:[#allocation2 + $0xa8] sm:$0xff] }
 0x260   : > { %13792 = vmatprep.mubr.msk.f32.mxu1 %vm279_vm1, %v19715_v13  ;;  %13844 = vmatprep.mubr.msk.f32.mxu0 %vm279_vm1, %v16692_v1 }
 0x263   : > { %13793 = vmatmul.mubr.msk.f32.gmra.mxu1 %vm279_vm1, %v19716_v55  ;;  %13845 = vmatmul.mubr.msk.f32.gmra.mxu0 %vm279_vm1, %v16698_v49 }
 0x264   : > { %13795 = vmatprep.mubr.msk.f32.mxu1 %vm279_vm1, %v16436_v43  ;;  %13847 = vmatprep.mubr.msk.f32.mxu0 %vm279_vm1, %v16704_v58 }
 0x267   : > { %13796 = vmatmul.mubr.msk.f32.gmra.mxu1 %vm279_vm1, %v16448_v53  ;;  %13848 = vmatmul.mubr.msk.f32.gmra.mxu0 %vm279_vm1, %v16710_v24 }
 0x268   : > { %13798 = vmatprep.mubr.msk.f32.mxu1 %vm279_vm1, %v16462_v52  ;;  %13850 = vmatprep.mubr.msk.f32.mxu0 %vm279_vm1, %v16716_v21 }
 0x26b   : > { %13799 = vmatmul.mubr.msk.f32.gmra.mxu1 %vm279_vm1, %v16474_v31  ;;  %13851 = vmatmul.mubr.msk.f32.gmra.mxu0 %vm279_vm1, %v16722_v56  ;;  %v6221_v56 = vld [vmem:[#allocation2 + $0x8f] sm:$0xff] }
 0x26c   : > { %13801 = vmatprep.mubr.msk.f32.mxu1 %vm279_vm1, %v16485_v34  ;;  %13853 = vmatprep.mubr.msk.f32.mxu0 %vm279_vm1, %v16728_v10 }
 0x26f   : > { %13802 = vmatmul.mubr.msk.f32.gmra.mxu1 %vm279_vm1, %v16497_v6  ;;  %13854 = vmatmul.mubr.msk.f32.gmra.mxu0 %vm279_vm1, %v16734_v35  ;;  %v6604_v35 = vld [vmem:[#allocation2 + $0x48] sm:$0xff] }
 0x270   : > { %13804 = vmatprep.mubr.msk.f32.mxu1 %vm279_vm1, %v16506_v57  ;;  %13856 = vmatprep.mubr.msk.f32.mxu0 %vm279_vm1, %v16740_v17  ;;  %v6217_v17 = vld [vmem:[#allocation2 + $0x4f] sm:$0xff] }
 0x273   : > { %13805 = vmatmul.mubr.msk.f32.gmra.mxu1 %vm279_vm1, %v16518_v39  ;;  %13857 = vmatmul.mubr.msk.f32.gmra.mxu0 %vm279_vm1, %v16746_v45  ;;  %v6605_v45 = vld [vmem:[#allocation2 + $0x50] sm:$0xff] }
 0x274   : > { %13807 = vmatprep.mubr.msk.f32.mxu1 %vm279_vm1, %v16526_v29  ;;  %13859 = vmatprep.mubr.msk.f32.mxu0 %vm279_vm1, %v16752_v44  ;;  %v11823_v44 = vld [vmem:[%s19369_s3 + $0x80] sm:$0xff] }
 0x277   : > { %13808 = vmatmul.mubr.msk.f32.gmra.mxu1 %vm279_vm1, %v16538_v46  ;;  %13860 = vmatmul.mubr.msk.f32.gmra.mxu0 %vm279_vm1, %v16758_v4  ;;  %v6218_v4 = vld [vmem:[#allocation2 + $0x67] sm:$0xff] }
 0x278   : > { %13810 = vmatprep.mubr.msk.f32.mxu1 %vm279_vm1, %v16545_v28  ;;  %13862 = vmatprep.mubr.msk.f32.mxu0 %vm279_vm1, %v16764_v30  ;;  %v6606_v30 = vld [vmem:[#allocation2 + $0x68] sm:$0xff] }
 0x27b   : > { %13811 = vmatmul.mubr.msk.f32.gmra.mxu1 %vm279_vm1, %v16556_v54  ;;  %13863 = vmatmul.mubr.msk.f32.gmra.mxu0 %vm279_vm1, %v16770_v60  ;;  %v16951_v60 = vpop.f32.mrf.mxu1 }
 0x27c   : > { %13813 = vmatprep.mubr.msk.f32.mxu1 %vm279_vm1, %v16562_v59  ;;  %13865 = vmatprep.mubr.msk.f32.mxu0 %vm279_vm1, %v16776_v27  ;;  %v16953_v27 = vpop.f32.mrf.mxu0 }
 0x27f   : > { %13814 = vmatmul.mubr.msk.f32.gmra.mxu1 %vm279_vm1, %v16572_v14  ;;  %13866 = vmatmul.mubr.msk.f32.gmra.mxu0 %vm279_vm1, %v16784_v47  ;;  %v6219_v47 = vld [vmem:[#allocation2 + $0x6f] sm:$0xff] }
 0x280   : > { %13816 = vmatprep.mubr.msk.f32.mxu1 %vm279_vm1, %v16926_v8  ;;  %13868 = vmatprep.mubr.msk.f32.mxu0 %vm279_vm1, %v16928_v25 }
 0x283   : > { %13817 = vmatmul.mubr.msk.f32.gmra.mxu1 %vm279_vm1, %v16934_v26  ;;  %13869 = vmatmul.mubr.msk.f32.gmra.mxu0 %vm279_vm1, %v16936_v11 }
 0x284   : > { %13875 = vmatprep.mubr.msk.f32.mxu1 %vm279_vm1, %v6216_v7  ;;  %13927 = vmatprep.mubr.msk.f32.mxu0 %vm279_vm1, %v6604_v35 }
 0x287   : > { %13876 = vmatmul.mubr.msk.f32.vlgmr.msra.gmra.mxu1 %vm279_vm1, %v6217_v17  ;;  %13928 = vmatmul.mubr.msk.f32.vlgmr.msra.gmra.mxu0 %vm279_vm1, %v6605_v45  ;;  %v6223_v45 = vld [vmem:[#allocation2 + $0xaf] sm:$0xff] }
 0x288   : > { %13976 = vmatpush3.msra.mxu1 %v16815_v20  ;;  %13878 = vmatprep.mubr.msk.f32.mxu1 %vm279_vm1, %v6218_v4  ;;  %v13568_v10 = vpop.f32.mrf.mxu1 }
 0x289   : > { %13930 = vmatprep.mubr.msk.f32.mxu0 %vm279_vm1, %v6606_v30  ;;  %13977 = vmatprep.subr.mxu1 %v11823_v44  ;;  %v13620_v33 = vpop.f32.mrf.mxu0 }
 0x28a   : > { %13978 = vmatpush3.msra.mxu1 %v11823_v44  ;;  %v16958_v16 = vadd.f32 %v13620_v33, %v13568_v10  ;;  %v4193_v49 = vpop.f32.mrf.mxu1  ;;  %v6611_v44 = vld [vmem:[#allocation2 + $0xb0] sm:$0xff] }
 0x28b   : > { %13879 = vmatmul.mubr.msk.f32.gmra.mxu1 %vm279_vm1, %v6219_v47  ;;  %13931 = vmatmul.mubr.msk.f32.gmra.mxu0 %vm279_vm1, %v6607_v3  ;;  %v4514_v24 = vpop.f32.mrf.mxu0  ;;  %v6224_v47 = vld [vmem:[#allocation2 + $0xc7] sm:$0xff] }
 0x28c   : > { %13881 = vmatprep.mubr.msk.f32.mxu1 %vm279_vm1, %v6220_v23  ;;  %13933 = vmatprep.mubr.msk.f32.mxu0 %vm279_vm1, %v6608_v15  ;;  %v16962_v21 = vadd.f32 %v4514_v24, %v4193_v49  ;;  %v13571_v20 = vpop.f32.mrf.mxu1  ;;  %v6612_v3 = vld [vmem:[#allocation2 + $0xc8] sm:$0xff]  ;;  %v6613_v24 = vld [vmem:[#allocation2 + $0xd0] sm:$0xff] }
 0x28d   : > { %v13623_v63 = vpop.f32.mrf.mxu0  ;;  %v6225_v49 = vld [vmem:[#allocation2 + $0xcf] sm:$0xff] }
 0x28e   : > { %v16966_v13 = vadd.f32 %v13623_v63, %v13571_v20  ;;  %v4203_v7 = vpop.f32.mrf.mxu1  ;;  %v6226_v20 = vld [vmem:[#allocation2 + $0xe7] sm:$0xff] }
 0x28f   : > { %13882 = vmatmul.mubr.msk.f32.gmra.mxu1 %vm279_vm1, %v6221_v56  ;;  %13934 = vmatmul.mubr.msk.f32.gmra.mxu0 %vm279_vm1, %v6609_v18  ;;  %v4524_v35 = vpop.f32.mrf.mxu0  ;;  %v6614_v63 = vld [vmem:[#allocation2 + $0xe8] sm:$0xff] }
 0x290   : > { %13884 = vmatprep.mubr.msk.f32.mxu1 %vm279_vm1, %v6222_v38  ;;  %13936 = vmatprep.mubr.msk.f32.mxu0 %vm279_vm1, %v6610_v19  ;;  %v16970_v17 = vadd.f32 %v4524_v35, %v4203_v7  ;;  %v13574_v4 = vpop.f32.mrf.mxu1 }
 0x291   : > { %v13626_v30 = vpop.f32.mrf.mxu0 }
 0x292   : > { %v16974_v10 = vadd.f32 %v13626_v30, %v13574_v4  ;;  %v4213_v33 = vpop.f32.mrf.mxu1 }
 0x293   : > { %13885 = vmatmul.mubr.msk.f32.gmra.mxu1 %vm279_vm1, %v6223_v45  ;;  %13937 = vmatmul.mubr.msk.f32.gmra.mxu0 %vm279_vm1, %v6611_v44  ;;  %v4534_v23 = vpop.f32.mrf.mxu0  ;;  %v6227_v45 = vld [vmem:[#allocation2 + $0xef] sm:$0xff] }
 0x294   : > { %13887 = vmatprep.mubr.msk.f32.mxu1 %vm279_vm1, %v6224_v47  ;;  %13939 = vmatprep.mubr.msk.f32.mxu0 %vm279_vm1, %v6612_v3  ;;  %v16978_v15 = vadd.f32 %v4534_v23, %v4213_v33  ;;  %v13577_v56 = vpop.f32.mrf.mxu1  ;;  %v6615_v44 = vld [vmem:[#allocation2 + $0xf0] sm:$0xff]  ;;  %v6616_v47 = vld [vmem:[#allocation2 + $0x108] sm:$0xff] }
 0x295   : > { %v13629_v18 = vpop.f32.mrf.mxu0 }
 0x296   : > { %v16982_v38 = vadd.f32 %v13629_v18, %v13577_v56  ;;  %v4223_v19 = vpop.f32.mrf.mxu1 }
 0x297   : > { %13888 = vmatmul.mubr.msk.f32.gmra.mxu1 %vm279_vm1, %v6225_v49  ;;  %13940 = vmatmul.mubr.msk.f32.gmra.mxu0 %vm279_vm1, %v6613_v24  ;;  %v4544_v7 = vpop.f32.mrf.mxu0 }
 0x298   : > { %13890 = vmatprep.mubr.msk.f32.mxu1 %vm279_vm1, %v6226_v20  ;;  %13942 = vmatprep.mubr.msk.f32.mxu0 %vm279_vm1, %v6614_v63  ;;  %v16986_v35 = vadd.f32 %v4544_v7, %v4223_v19  ;;  %v13580_v4 = vpop.f32.mrf.mxu1 }
 0x299   : > { %v13632_v30 = vpop.f32.mrf.mxu0 }
 0x29a   : > { %v16990_v3 = vadd.f32 %v13632_v30, %v13580_v4  ;;  %v4233_v33 = vpop.f32.mrf.mxu1  ;;  %v19718_v30 = vld [vmem:[#allocation28_spill] sm:$0xff] }
 0x29b   : > { %13891 = vmatmul.mubr.msk.f32.gmra.mxu1 %vm279_vm1, %v6227_v45  ;;  %13943 = vmatmul.mubr.msk.f32.gmra.mxu0 %vm279_vm1, %v6615_v44  ;;  %v4554_v23 = vpop.f32.mrf.mxu0 }
 0x29c   : > { %13893 = vmatprep.mubr.msk.f32.mxu1 %vm279_vm1, %v16410_v61  ;;  %13945 = vmatprep.mubr.msk.f32.mxu0 %vm279_vm1, %v6616_v47  ;;  %v16995_v49 = vadd.f32 %v4554_v23, %v4233_v33 }
 0x29d   : > { %v13583_v24 = vpop.f32.mrf.mxu1  ;;  %v13635_v56 = vpop.f32.mrf.mxu0 }
 0x29e   : > { %v17001_v18 = vadd.f32 %v13635_v56, %v13583_v24  ;;  %v19720_v24 = vld [vmem:[#allocation27_spill] sm:$0xff]  ;;  %v19721_v56 = vld [vmem:[#allocation53_spill] sm:$0xff] }
 0x29f   : > { %13894 = vmatmul.mubr.msk.f32.gmra.mxu1 %vm279_vm1, %v16412_v22  ;;  %13946 = vmatmul.mubr.msk.f32.gmra.mxu0 %vm279_vm1, %v19716_v55  ;;  %v4243_v61 = vpop.f32.mrf.mxu1  ;;  %v4564_v20 = vpop.f32.mrf.mxu0  ;;  %v19717_v55 = vld [vmem:[#allocation16_spill] sm:$0xff] }
 0x2a0   : > { %13896 = vmatprep.mubr.msk.f32.mxu1 %vm279_vm1, %v16438_v51  ;;  %13948 = vmatprep.mubr.msk.f32.mxu0 %vm279_vm1, %v16436_v43  ;;  %v17007_v63 = vadd.f32 %v4564_v20, %v4243_v61 }
 0x2a1   : > { %v13586_v19 = vpop.f32.mrf.mxu1  ;;  %v13638_v7 = vpop.f32.mrf.mxu0 }
 0x2a2   : > { %v17013_v22 = vadd.f32 %v13638_v7, %v13586_v19  ;;  %v19722_v7 = vld [vmem:[#allocation8_spill] sm:$0xff] }
 0x2a3   : > { %13897 = vmatmul.mubr.msk.f32.gmra.mxu1 %vm279_vm1, %v16440_v40  ;;  %13949 = vmatmul.mubr.msk.f32.gmra.mxu0 %vm279_vm1, %v16448_v53  ;;  %v4253_v51 = vpop.f32.mrf.mxu1  ;;  %v4574_v43 = vpop.f32.mrf.mxu0  ;;  %v19719_v53 = vld [vmem:[#allocation50_spill] sm:$0xff] }
 0x2a4   : > { %13899 = vmatprep.mubr.msk.f32.mxu1 %vm279_vm1, %v19717_v55  ;;  %13951 = vmatprep.mubr.msk.f32.mxu0 %vm279_vm1, %v16462_v52  ;;  %v17019_v45 = vadd.f32 %v4574_v43, %v4253_v51  ;;  %v19723_v55 = vld [vmem:[#allocation18_spill] sm:$0xff] }
 0x2a5   : > { %v13589_v44 = vpop.f32.mrf.mxu1  ;;  %v13641_v4 = vpop.f32.mrf.mxu0 }
 0x2a6   : > { %v17025_v40 = vadd.f32 %v13641_v4, %v13589_v44  ;;  %v19724_v4 = vld [vmem:[#allocation52_spill] sm:$0xff] }
 0x2a7   : > { %13900 = vmatmul.mubr.msk.f32.gmra.mxu1 %vm279_vm1, %v19718_v30  ;;  %13952 = vmatmul.mubr.msk.f32.gmra.mxu0 %vm279_vm1, %v16474_v31  ;;  %v17031_v52 = vpop.f32.mrf.mxu1  ;;  %v17033_v47 = vpop.f32.mrf.mxu0  ;;  %v19725_v30 = vld [vmem:[#allocation55_spill] sm:$0xff] }
 0x2a8   : > { %13902 = vmatprep.mubr.msk.f32.mxu1 %vm279_vm1, %v19719_v53  ;;  %13954 = vmatprep.mubr.msk.f32.mxu0 %vm279_vm1, %v16485_v34 }
 0x2aa   : > { %v13592_v33 = vpop.f32.mrf.mxu1  ;;  %v13644_v23 = vpop.f32.mrf.mxu0 }
 0x2ab   : > { %13903 = vmatmul.mubr.msk.f32.gmra.mxu1 %vm279_vm1, %v19720_v24  ;;  %13955 = vmatmul.mubr.msk.f32.gmra.mxu0 %vm279_vm1, %v16497_v6  ;;  %v17039_v31 = vadd.f32 %v13644_v23, %v13592_v33  ;;  %v19726_v24 = vld [vmem:[#allocation29_spill] sm:$0xff] }
 0x2ac   : > { %13905 = vmatprep.mubr.msk.f32.mxu1 %vm279_vm1, %v19721_v56  ;;  %13957 = vmatprep.mubr.msk.f32.mxu0 %vm279_vm1, %v16506_v57  ;;  %v17045_v34 = vpop.f32.mrf.mxu1  ;;  %v17047_v61 = vpop.f32.mrf.mxu0  ;;  %v19727_v56 = vld [vmem:[#allocation17_spill] sm:$0xff] }
 0x2ae   : > { %v13595_v20 = vpop.f32.mrf.mxu1  ;;  %v13647_v19 = vpop.f32.mrf.mxu0 }
 0x2af   : > { %13906 = vmatmul.mubr.msk.f32.gmra.mxu1 %vm279_vm1, %v19722_v7  ;;  %13958 = vmatmul.mubr.msk.f32.gmra.mxu0 %vm279_vm1, %v16518_v39  ;;  %v17053_v6 = vadd.f32 %v13647_v19, %v13595_v20 }
 0x2b0   : > { %13908 = vmatprep.mubr.msk.f32.mxu1 %vm279_vm1, %v19723_v55  ;;  %13960 = vmatprep.mubr.msk.f32.mxu0 %vm279_vm1, %v16526_v29  ;;  %v17059_v57 = vpop.f32.mrf.mxu1  ;;  %v17061_v51 = vpop.f32.mrf.mxu0  ;;  %v19730_v55 = vld [vmem:[#allocation54_spill] sm:$0xff] }
 0x2b2   : > { %v13598_v43 = vpop.f32.mrf.mxu1  ;;  %v13650_v44 = vpop.f32.mrf.mxu0 }
 0x2b3   : > { %13909 = vmatmul.mubr.msk.f32.gmra.mxu1 %vm279_vm1, %v19724_v4  ;;  %13961 = vmatmul.mubr.msk.f32.gmra.mxu0 %vm279_vm1, %v16538_v46  ;;  %v17067_v39 = vadd.f32 %v13650_v44, %v13598_v43  ;;  %v6246_v44 = vld [vmem:[#allocation2 + $0x227] sm:$0xff] }
 0x2b4   : > { %13911 = vmatprep.mubr.msk.f32.mxu1 %vm279_vm1, %v19725_v30  ;;  %13963 = vmatprep.mubr.msk.f32.mxu0 %vm279_vm1, %v16545_v28  ;;  %v17073_v29 = vpop.f32.mrf.mxu1  ;;  %v17075_v53 = vpop.f32.mrf.mxu0  ;;  %v6634_v4 = vld [vmem:[#allocation2 + $0x228] sm:$0xff] }
 0x2b6   : > { %v13601_v33 = vpop.f32.mrf.mxu1 }
 0x2b7   : > { %v13653_v23 = vpop.f32.mrf.mxu0  ;;  %13912 = vmatmul.mubr.msk.f32.gmra.mxu1 %vm279_vm1, %v19726_v24  ;;  %13964 = vmatmul.mubr.msk.f32.gmra.mxu0 %vm279_vm1, %v16556_v54 }
 0x2b8   : > { %v17081_v46 = vadd.f32 %v13653_v23, %v13601_v33  ;;  %13914 = vmatprep.mubr.msk.f32.mxu1 %vm279_vm1, %v19727_v56  ;;  %13966 = vmatprep.mubr.msk.f32.mxu0 %vm279_vm1, %v16562_v59  ;;  %v17087_v28 = vpop.f32.mrf.mxu1 }
 0x2b9   : > { %19728 = vst [vmem:[#allocation30_spill] sm:$0xff] %v17087_v28  ;;  %v17089_v20 = vpop.f32.mrf.mxu0 }
 0x2ba   : > { %19729 = vst [vmem:[#allocation57_spill] sm:$0xff] %v17089_v20  ;;  %v13604_v19 = vpop.f32.mrf.mxu1 }
 0x2bb   : > { %v13656_v7 = vpop.f32.mrf.mxu0  ;;  %13915 = vmatmul.mubr.msk.f32.gmra.mxu1 %vm279_vm1, %v16566_v41  ;;  %13967 = vmatmul.mubr.msk.f32.gmra.mxu0 %vm279_vm1, %v16572_v14  ;;  %v6247_v14 = vld [vmem:[#allocation2 + $0x22f] sm:$0xff] }
 0x2bc   : > { %v17095_v54 = vadd.f32 %v13656_v7, %v13604_v19  ;;  %13917 = vmatprep.mubr.msk.f32.mxu1 %vm279_vm1, %v19730_v55  ;;  %13969 = vmatprep.mubr.msk.f32.mxu0 %vm279_vm1, %v16926_v8  ;;  %v17101_v59 = vpop.f32.mrf.mxu1  ;;  %v6635_v8 = vld [vmem:[#allocation2 + $0x230] sm:$0xff] }
 0x2bd   : > { %19731 = vst [vmem:[#allocation19_spill] sm:$0xff] %v17101_v59  ;;  %v17103_v43 = vpop.f32.mrf.mxu0 }
 0x2be   : > { %19732 = vst [vmem:[#allocation56_spill] sm:$0xff] %v17103_v43  ;;  %v13607_v30 = vpop.f32.mrf.mxu1 }
 0x2bf   : > { %v13659_v33 = vpop.f32.mrf.mxu0  ;;  %13918 = vmatmul.mubr.msk.f32.gmra.mxu1 %vm279_vm1, %v16786_v36  ;;  %13970 = vmatmul.mubr.msk.f32.gmra.mxu0 %vm279_vm1, %v16934_v26 }
 0x2c0   : > { %v17109_v41 = vadd.f32 %v13659_v33, %v13607_v30  ;;  %13920 = vmatprep.mubr.msk.f32.mxu1 %vm279_vm1, %v6246_v44  ;;  %13972 = vmatprep.mubr.msk.f32.mxu0 %vm279_vm1, %v6634_v4  ;;  %v17113_v23 = vpop.f32.mrf.mxu1  ;;  %v19737_v4 = vld [vmem:[#allocation31_spill] sm:$0xff] }
 0x2c1   : > { %19733 = vst [vmem:[#allocation59_spill] sm:$0xff] %v17113_v23  ;;  %v17115_v24 = vpop.f32.mrf.mxu0 }
 0x2c2   : > { %19734 = vst [vmem:[#allocation32_spill] sm:$0xff] %v17115_v24  ;;  %v13610_v56 = vpop.f32.mrf.mxu1 }
 0x2c3   : > { %v13662_v19 = vpop.f32.mrf.mxu0  ;;  %13921 = vmatmul.mubr.msk.f32.gmra.mxu1 %vm279_vm1, %v6247_v14  ;;  %13973 = vmatmul.mubr.msk.f32.gmra.mxu0 %vm279_vm1, %v6635_v8 }
 0x2c4   : > { %v17119_v36 = vadd.f32 %v13662_v19, %v13610_v56  ;;  %13979 = vmatprep.mubr.msk.f32.mxu1 %vm279_vm1, %v16613_v50  ;;  %v17123_v26 = vpop.f32.mrf.mxu1 }
 0x2c5   : > { %19735 = vst [vmem:[#allocation34_spill] sm:$0xff] %v17123_v26  ;;  %v17125_v7 = vpop.f32.mrf.mxu0 }
 0x2c6   : > { %19736 = vst [vmem:[#allocation58_spill] sm:$0xff] %v17125_v7  ;;  %v13669_v55 = vpop.f32.mrf.mxu1 }
 0x2c7   : > { %v13721_v44 = vpop.f32.mrf.mxu0  ;;  %13980 = vmatmul.mubr.msk.f32.vlgmr.msra.gmra.mxu1 %vm279_vm1, %v16620_v2  ;;  %v5020_v30 = vadd.f32 %v13669_v55, %v19737_v4 }
 0x2c8   : > { %13982 = vmatprep.mubr.msk.f32.mxu1 %vm279_vm1, %v16631_v0  ;;  %v17132_v33 = vpop.f32.mrf.mxu1 }
 0x2c9   : > { %v17134_v14 = vpop.f32.mrf.mxu0  ;;  %v17136_v8 = vadd.f32 %v13721_v44, %v5020_v30 }
 0x2cb   : > { %v13672_v50 = vpop.f32.mrf.mxu1  ;;  %v13724_v56 = vpop.f32.mrf.mxu0  ;;  %13983 = vmatmul.mubr.msk.f32.gmra.mxu1 %vm279_vm1, %v16638_v9 }
 0x2cc   : > { %v5022_v19 = vadd.f32 %v13672_v50, %v16958_v16  ;;  %13985 = vmatprep.mubr.msk.f32.mxu1 %vm279_vm1, %v16644_v48 }
 0x2cd   : > { %v4870_v2 = vpop.f32.mrf.mxu1  ;;  %v17143_v55 = vpop.f32.mrf.mxu0 }
 0x2ce   : > { %v17145_v0 = vadd.f32 %v13724_v56, %v5022_v19  ;;  %v17148_v4 = vadd.f32 %v4870_v2, %v16962_v21 }
 0x2cf   : > { %v13675_v44 = vpop.f32.mrf.mxu1  ;;  %v13727_v30 = vpop.f32.mrf.mxu0  ;;  %13986 = vmatmul.mubr.msk.f32.gmra.mxu1 %vm279_vm1, %v16650_v12 }
 0x2d0   : > { %v5024_v9 = vadd.f32 %v13675_v44, %v16966_v13  ;;  %13988 = vmatprep.mubr.msk.f32.mxu1 %vm279_vm1, %v16656_v37 }
 0x2d1   : > { %v4880_v16 = vpop.f32.mrf.mxu1  ;;  %v17155_v48 = vpop.f32.mrf.mxu0 }
 0x2d2   : > { %v17157_v50 = vadd.f32 %v13727_v30, %v5024_v9  ;;  %v17160_v56 = vadd.f32 %v4880_v16, %v16970_v17  ;;  %v11861_v17 = vld [vmem:[%s19371_s5 + $0x38] sm:$0xff] }
 0x2d3   : > { %v13678_v21 = vpop.f32.mrf.mxu1  ;;  %v13730_v19 = vpop.f32.mrf.mxu0  ;;  %13989 = vmatmul.mubr.msk.f32.gmra.mxu1 %vm279_vm1, %v16662_v62  ;;  %14027 = vmatprep.subr.mxu0 %v11861_v17 }
 0x2d4   : > { %v5026_v12 = vadd.f32 %v13678_v21, %v16974_v10  ;;  %13991 = vmatprep.mubr.msk.f32.mxu1 %vm279_vm1, %v16668_v32  ;;  %14028 = vmatpush3.msra.mxu0 %v11861_v17  ;;  %v7003_v21 = vld [vmem:[#allocation2 + $0xf1] sm:$0xff] }
 0x2d5   : > { %v4890_v13 = vpop.f32.mrf.mxu1  ;;  %v17167_v37 = vpop.f32.mrf.mxu0 }
 0x2d6   : > { %v17169_v2 = vadd.f32 %v13730_v19, %v5026_v12  ;;  %v17172_v44 = vadd.f32 %v4890_v13, %v16978_v15 }
 0x2d7   : > { %v13681_v30 = vpop.f32.mrf.mxu1  ;;  %v13733_v9 = vpop.f32.mrf.mxu0  ;;  %13992 = vmatmul.mubr.msk.f32.gmra.mxu1 %vm279_vm1, %v16674_v42 }
 0x2d8   : > { %v5028_v62 = vadd.f32 %v13681_v30, %v16982_v38  ;;  %13994 = vmatprep.mubr.msk.f32.mxu1 %vm279_vm1, %v16680_v5 }
 0x2d9   : > { %v4900_v32 = vpop.f32.mrf.mxu1  ;;  %v17182_v10 = vpop.f32.mrf.mxu0 }
 0x2da   : > { %v17184_v15 = vadd.f32 %v13733_v9, %v5028_v62  ;;  %v17187_v16 = vadd.f32 %v4900_v32, %v16986_v35  ;;  %v7005_v35 = vld [vmem:[#allocation2 + $0x111] sm:$0xff] }
 0x2db   : > { %v13684_v19 = vpop.f32.mrf.mxu1  ;;  %v13736_v12 = vpop.f32.mrf.mxu0  ;;  %13995 = vmatmul.mubr.msk.f32.gmra.mxu1 %vm279_vm1, %v7003_v21 }
 0x2dc   : > { %v5030_v42 = vadd.f32 %v13684_v19, %v16990_v3  ;;  %13997 = vmatprep.mubr.msk.f32.mxu1 %vm279_vm1, %v16692_v1 }
 0x2dd   : > { %v4910_v5 = vpop.f32.mrf.mxu1  ;;  %v17193_v38 = vpop.f32.mrf.mxu0 }
 0x2de   : > { %v17195_v13 = vadd.f32 %v13736_v12, %v5030_v42  ;;  %v17198_v17 = vadd.f32 %v4910_v5, %v16995_v49  ;;  %v7007_v49 = vld [vmem:[#allocation2 + $0x131] sm:$0xff]  ;;  %v7008_v42 = vld [vmem:[#allocation2 + $0x149] sm:$0xff] }
 0x2df   : > { %v13687_v30 = vpop.f32.mrf.mxu1  ;;  %v13739_v9 = vpop.f32.mrf.mxu0  ;;  %13998 = vmatmul.mubr.msk.f32.gmra.mxu1 %vm279_vm1, %v7005_v35 }
 0x2e0   : > { %v5032_v62 = vadd.f32 %v13687_v30, %v17001_v18  ;;  %14000 = vmatprep.mubr.msk.f32.mxu1 %vm279_vm1, %v16704_v58 }
 0x2e1   : > { %v4920_v3 = vpop.f32.mrf.mxu1  ;;  %v17204_v1 = vpop.f32.mrf.mxu0 }
 0x2e2   : > { %19738 = vst [vmem:[#allocation33_spill] sm:$0xff] %v17204_v1  ;;  %v17206_v32 = vadd.f32 %v13739_v9, %v5032_v62  ;;  %v17209_v21 = vadd.f32 %v4920_v3, %v17007_v63  ;;  %v7009_v63 = vld [vmem:[#allocation2 + $0x151] sm:$0xff] }
 0x2e3   : > { %v13690_v19 = vpop.f32.mrf.mxu1  ;;  %v13742_v12 = vpop.f32.mrf.mxu0  ;;  %14001 = vmatmul.mubr.msk.f32.gmra.mxu1 %vm279_vm1, %v7007_v49  ;;  %v11860_v9 = vld [vmem:[%s19371_s5 + $0x30] sm:$0xff]  ;;  %v4585_v49 = vadd.f32 %v17033_v47, %v17031_v52 }
 0x2e4   : > { %19739 = vst [vmem:[#allocation61_spill] sm:$0xff] %v17209_v21  ;;  %v5034_v5 = vadd.f32 %v13690_v19, %v17013_v22  ;;  %14003 = vmatprep.mubr.msk.f32.mxu1 %vm279_vm1, %v7008_v42  ;;  %v7010_v22 = vld [vmem:[#allocation2 + $0x169] sm:$0xff]  ;;  %14029 = vmatprep.subr.mxu0 %v11860_v9 }
 0x2e5   : > { %v4930_v18 = vpop.f32.mrf.mxu1  ;;  %v17214_v58 = vpop.f32.mrf.mxu0  ;;  %14030 = vmatpush3.msra.mxu0 %v11860_v9 }
 0x2e6   : > { %19740 = vst [vmem:[#allocation9_spill] sm:$0xff] %v17214_v58  ;;  %v17216_v35 = vadd.f32 %v13742_v12, %v5034_v5  ;;  %v17219_v30 = vadd.f32 %v4930_v18, %v17019_v45  ;;  %v7011_v18 = vld [vmem:[#allocation2 + $0x171] sm:$0xff] }
 0x2e7   : > { %v13693_v62 = vpop.f32.mrf.mxu1  ;;  %v13745_v3 = vpop.f32.mrf.mxu0  ;;  %14004 = vmatmul.mubr.msk.f32.gmra.mxu1 %vm279_vm1, %v7009_v63 }
 0x2e8   : > { %19741 = vst [vmem:[#allocation20_spill] sm:$0xff] %v17219_v30  ;;  %v5036_v19 = vadd.f32 %v13693_v62, %v17025_v40  ;;  %14006 = vmatprep.mubr.msk.f32.mxu1 %vm279_vm1, %v7010_v22  ;;  %v7012_v30 = vld [vmem:[#allocation2 + $0x189] sm:$0xff]  ;;  %v7013_v62 = vld [vmem:[#allocation2 + $0x191] sm:$0xff] }
 0x2e9   : > { %v4940_v45 = vpop.f32.mrf.mxu1  ;;  %v17229_v12 = vpop.f32.mrf.mxu0 }
 0x2ea   : > { %19742 = vst [vmem:[#allocation60_spill] sm:$0xff] %v17229_v12  ;;  %v17231_v42 = vadd.f32 %v13745_v3, %v5036_v19  ;;  %v17233_v5 = vadd.f32 %v4940_v45, %v4585_v49  ;;  %v7014_v49 = vld [vmem:[#allocation2 + $0x1a9] sm:$0xff] }
 0x2eb   : > { %v13696_v58 = vpop.f32.mrf.mxu1  ;;  %v13748_v63 = vpop.f32.mrf.mxu0  ;;  %14007 = vmatmul.mubr.msk.f32.gmra.mxu1 %vm279_vm1, %v7011_v18 }
 0x2ec   : > { %19743 = vst [vmem:[#allocation63_spill] sm:$0xff] %v17233_v5  ;;  %v5038_v52 = vadd.f32 %v13696_v58, %v17039_v31  ;;  %14009 = vmatprep.mubr.msk.f32.mxu1 %vm279_vm1, %v7012_v30  ;;  %v7015_v30 = vld [vmem:[#allocation2 + $0x1b1] sm:$0xff] }
 0x2ed   : > { %v17238_v40 = vpop.f32.mrf.mxu1  ;;  %v17240_v47 = vpop.f32.mrf.mxu0 }
 0x2ee   : > { %19744 = vst [vmem:[#allocation10_spill] sm:$0xff] %v17238_v40  ;;  %19745 = vst [vmem:[#allocation12_spill] sm:$0xff] %v17240_v47  ;;  %v17242_v9 = vadd.f32 %v13748_v63, %v5038_v52  ;;  %v7016_v52 = vld [vmem:[#allocation2 + $0x1c9] sm:$0xff] }
 0x2ef   : > { %v13699_v3 = vpop.f32.mrf.mxu1  ;;  %v13751_v22 = vpop.f32.mrf.mxu0  ;;  %14010 = vmatmul.mubr.msk.f32.gmra.mxu1 %vm279_vm1, %v7013_v62 }
 0x2f0   : > { %v5040_v19 = vadd.f32 %v13699_v3, %v17053_v6  ;;  %14012 = vmatprep.mubr.msk.f32.mxu1 %vm279_vm1, %v7014_v49  ;;  %v7017_v49 = vld [vmem:[#allocation2 + $0x1d1] sm:$0xff] }
 0x2f1   : > { %v17247_v45 = vpop.f32.mrf.mxu1  ;;  %v17249_v31 = vpop.f32.mrf.mxu0 }
 0x2f2   : > { %19746 = vst [vmem:[#allocation62_spill] sm:$0xff] %v17247_v45  ;;  %19747 = vst [vmem:[#allocation4_spill] sm:$0xff] %v17249_v31  ;;  %v17251_v58 = vadd.f32 %v13751_v22, %v5040_v19  ;;  %v11859_v22 = vld [vmem:[%s19371_s5 + $0x28] sm:$0xff] }
 0x2f3   : > { %v13702_v18 = vpop.f32.mrf.mxu1  ;;  %v13754_v63 = vpop.f32.mrf.mxu0  ;;  %14013 = vmatmul.mubr.msk.f32.gmra.mxu1 %vm279_vm1, %v7015_v30  ;;  %v7018_v30 = vld [vmem:[#allocation2 + $0x1e9] sm:$0xff]  ;;  %14031 = vmatprep.subr.mxu0 %v11859_v22 }
 0x2f4   : > { %v5042_v47 = vadd.f32 %v13702_v18, %v17067_v39  ;;  %14015 = vmatprep.mubr.msk.f32.mxu1 %vm279_vm1, %v7016_v52  ;;  %14032 = vmatpush3.msra.mxu0 %v11859_v22  ;;  %v7019_v52 = vld [vmem:[#allocation2 + $0x1f1] sm:$0xff]  ;;  %v7022_v22 = vld [vmem:[#allocation2 + $0x229] sm:$0xff] }
 0x2f5   : > { %v17256_v62 = vpop.f32.mrf.mxu1  ;;  %v17258_v6 = vpop.f32.mrf.mxu0 }
 0x2f6   : > { %19748 = vst [vmem:[#allocation65_spill] sm:$0xff] %v17256_v62  ;;  %19749 = vst [vmem:[#allocation21_spill] sm:$0xff] %v17258_v6  ;;  %v17260_v3 = vadd.f32 %v13754_v63, %v5042_v47 }
 0x2f7   : > { %v13705_v19 = vpop.f32.mrf.mxu1  ;;  %v13757_v31 = vpop.f32.mrf.mxu0  ;;  %14016 = vmatmul.mubr.msk.f32.gmra.mxu1 %vm279_vm1, %v7017_v49 }
 0x2f8   : > { %v5044_v39 = vadd.f32 %v13705_v19, %v17081_v46  ;;  %14018 = vmatprep.mubr.msk.f32.mxu1 %vm279_vm1, %v7018_v30 }
 0x2f9   : > { %v17268_v18 = vpop.f32.mrf.mxu1  ;;  %v17270_v47 = vpop.f32.mrf.mxu0 }
 0x2fa   : > { %19750 = vst [vmem:[#allocation64_spill] sm:$0xff] %v17268_v18  ;;  %19751 = vst [vmem:[#allocation67_spill] sm:$0xff] %v17270_v47  ;;  %v17272_v63 = vadd.f32 %v13757_v31, %v5044_v39 }
 0x2fb   : > { %v13708_v6 = vpop.f32.mrf.mxu1  ;;  %v13760_v62 = vpop.f32.mrf.mxu0  ;;  %14019 = vmatmul.mubr.msk.f32.gmra.mxu1 %vm279_vm1, %v7019_v52 }
 0x2fc   : > { %v5046_v49 = vadd.f32 %v13708_v6, %v17095_v54  ;;  %14021 = vmatprep.mubr.msk.f32.mxu1 %vm279_vm1, %v16928_v25  ;;  %v7023_v54 = vld [vmem:[#allocation2 + $0x231] sm:$0xff] }
 0x2fd   : > { %v17278_v46 = vpop.f32.mrf.mxu1  ;;  %v17280_v19 = vpop.f32.mrf.mxu0 }
 0x2fe   : > { %19752 = vst [vmem:[#allocation11_spill] sm:$0xff] %v17278_v46  ;;  %19753 = vst [vmem:[#allocation35_spill] sm:$0xff] %v17280_v19  ;;  %v17282_v30 = vadd.f32 %v13760_v62, %v5046_v49 }
 0x2ff   : > { %v13711_v47 = vpop.f32.mrf.mxu1  ;;  %v13763_v31 = vpop.f32.mrf.mxu0  ;;  %14022 = vmatmul.mubr.msk.f32.gmra.mxu1 %vm279_vm1, %v16936_v11  ;;  %v11858_v11 = vld [vmem:[%s19371_s5 + $0x20] sm:$0xff] }
 0x300   : > { %v5048_v39 = vadd.f32 %v13711_v47, %v17109_v41  ;;  %14024 = vmatprep.mubr.msk.f32.mxu1 %vm279_vm1, %v7022_v22  ;;  %14033 = vmatprep.subr.mxu0 %v11858_v11 }
 0x301   : > { %v17288_v6 = vpop.f32.mrf.mxu1  ;;  %v17290_v25 = vpop.f32.mrf.mxu0  ;;  %14034 = vmatpush3.msra.mxu0 %v11858_v11  ;;  %v7519_v11 = vld [vmem:[%s19371_s5 + $0x18] sm:$0xff] }
 0x302   : > { %19754 = vst [vmem:[#allocation66_spill] sm:$0xff] %v17288_v6  ;;  %19755 = vst [vmem:[#allocation14_spill] sm:$0xff] %v17290_v25  ;;  %v17292_v52 = vadd.f32 %v13763_v31, %v5048_v39  ;;  %14083 = vmatprep.subr.mxu1 %v7519_v11 }
 0x303   : > { %v13714_v19 = vpop.f32.mrf.mxu1  ;;  %v13766_v46 = vpop.f32.mrf.mxu0  ;;  %14025 = vmatmul.mubr.msk.f32.gmra.mxu1 %vm279_vm1, %v7023_v54  ;;  %v19758_v54 = vmov 0.0  }
 0x304   : > { %v5050_v62 = vadd.f32 %v13714_v19, %v17119_v36  ;;  %361 = vst.msk [vmem:[#allocation3 + $0x30] sm:$0xff] %vm353_vm3, %v19758_v54  ;;  %354 = vst.msk [vmem:[#allocation3] sm:$0xff] %vm353_vm3, %v19758_v54  ;;  %14084 = vmatpush3.msra.mxu1 %v7519_v11 }
 0x305   : > { %v17299_v41 = vpop.f32.mrf.mxu1  ;;  %v17301_v47 = vpop.f32.mrf.mxu0  ;;  %355 = vst.msk [vmem:[#allocation3 + $0x8] sm:$0xff] %vm353_vm3, %v19758_v54  ;;  %356 = vst.msk [vmem:[#allocation3 + $0x10] sm:$0xff] %vm353_vm3, %v19758_v54 }
 0x306   : > { %19756 = vst [vmem:[#allocation69_spill] sm:$0xff] %v17299_v41  ;;  %19757 = vst [vmem:[#allocation13_spill] sm:$0xff] %v17301_v47  ;;  %v17303_v49 = vadd.f32 %v13766_v46, %v5050_v62  ;;  %v7518_v41 = vld [vmem:[%s19371_s5 + $0x10] sm:$0xff] }
 0x307   : > { %v13773_v22 = vpop.f32.mrf.mxu1  ;;  %v17305_v31 = vpop.f32.mrf.mxu0  ;;  %359 = vst.msk [vmem:[#allocation3 + $0x20] sm:$0xff] %vm353_vm3, %v19758_v54  ;;  %360 = vst.msk [vmem:[#allocation3 + $0x28] sm:$0xff] %vm353_vm3, %v19758_v54  ;;  %14085 = vmatprep.subr.mxu1 %v7518_v41 }
 0x308   : > { %v17308_v39 = vadd.f32 %v13773_v22, %v17136_v8  ;;  %363 = vst.msk [vmem:[#allocation3 + $0x40] sm:$0xff] %vm353_vm3, %v19758_v54  ;;  %364 = vst.msk [vmem:[#allocation3 + $0x48] sm:$0xff] %vm353_vm3, %v19758_v54  ;;  %14086 = vmatpush3.msra.mxu1 %v7518_v41  ;;  %v7516_v41 = vld [vmem:[%s19371_s5] sm:$0xff] }
 0x309   : > { %v17310_v36 = vpop.f32.mrf.mxu1  ;;  %v17312_v19 = vpop.f32.mrf.mxu0  ;;  %365 = vst.msk [vmem:[#allocation3 + $0x50] sm:$0xff] %vm353_vm3, %v19758_v54  ;;  %367 = vst.msk [vmem:[#allocation3 + $0x60] sm:$0xff] %vm353_vm3, %v19758_v54 }
 0x30a   : > { %368 = vst.msk [vmem:[#allocation3 + $0x68] sm:$0xff] %vm353_vm3, %v19758_v54  ;;  %369 = vst.msk [vmem:[#allocation3 + $0x70] sm:$0xff] %vm353_vm3, %v19758_v54 }
 0x30b   : > { %371 = vst.msk [vmem:[#allocation3 + $0x80] sm:$0xff] %vm353_vm3, %v19758_v54  ;;  %372 = vst.msk [vmem:[#allocation3 + $0x88] sm:$0xff] %vm353_vm3, %v19758_v54  ;;  %v13776_v8 = vpop.f32.mrf.mxu1  ;;  %v17422_v46 = vpop.f32.mrf.mxu0 }
 0x30c   : > { %373 = vst.msk [vmem:[#allocation3 + $0x90] sm:$0xff] %vm353_vm3, %v19758_v54  ;;  %375 = vst.msk [vmem:[#allocation3 + $0xa0] sm:$0xff] %vm353_vm3, %v19758_v54  ;;  %v17425_v62 = vadd.f32 %v13776_v8, %v17145_v0  ;;  %v7517_v8 = vld [vmem:[%s19371_s5 + $0x8] sm:$0xff] }
 0x30d   : > { %376 = vst.msk [vmem:[#allocation3 + $0xa8] sm:$0xff] %vm353_vm3, %v19758_v54  ;;  %377 = vst.msk [vmem:[#allocation3 + $0xb0] sm:$0xff] %vm353_vm3, %v19758_v54  ;;  %v17430_v22 = vpop.f32.mrf.mxu1  ;;  %v17432_v47 = vpop.f32.mrf.mxu0  ;;  %14087 = vmatprep.subr.mxu1 %v7517_v8  ;;  %v7520_v45 = vld [vmem:[#allocation3 + $0x8] sm:$0xff] }
 0x30e   : > { %379 = vst.msk [vmem:[#allocation3 + $0xc0] sm:$0xff] %vm353_vm3, %v19758_v54  ;;  %380 = vst.msk [vmem:[#allocation3 + $0xc8] sm:$0xff] %vm353_vm3, %v19758_v54  ;;  %14088 = vmatpush3.msra.mxu1 %v7517_v8  ;;  %v7484_v40 = vld [vmem:[#allocation3 + $0x7] sm:$0xff]  ;;  %14035 = vmatprep.mubr.msk.f32.mxu0 %vm353_vm3, %v7520_v45  ;;  %v7485_v5 = vld [vmem:[#allocation3 + $0xf] sm:$0xff] }
 0x30f   : > { %381 = vst.msk [vmem:[#allocation3 + $0xd0] sm:$0xff] %vm353_vm3, %v19758_v54  ;;  %383 = vst.msk [vmem:[#allocation3 + $0xe0] sm:$0xff] %vm353_vm3, %v19758_v54  ;;  %v13779_v25 = vpop.f32.mrf.mxu1  ;;  %v17437_v6 = vpop.f32.mrf.mxu0  ;;  %14089 = vmatprep.subr.mxu1 %v7516_v41  ;;  %14091 = vmatprep.mubr.msk.f32.mxu1 %vm353_vm3, %v7484_v40 }
 0x310   : > { %384 = vst.msk [vmem:[#allocation3 + $0xe8] sm:$0xff] %vm353_vm3, %v19758_v54  ;;  %385 = vst.msk [vmem:[#allocation3 + $0xf0] sm:$0xff] %vm353_vm3, %v19758_v54  ;;  %v17440_v0 = vadd.f32 %v13779_v25, %v17157_v50  ;;  %14090 = vmatpush3.msra.mxu1 %v7516_v41 }
 0x311   : > { %387 = vst.msk [vmem:[#allocation3 + $0x100] sm:$0xff] %vm353_vm3, %v19758_v54  ;;  %388 = vst.msk [vmem:[#allocation3 + $0x108] sm:$0xff] %vm353_vm3, %v19758_v54  ;;  %v17481_v50 = vpop.f32.mrf.mxu1  ;;  %v17483_v25 = vpop.f32.mrf.mxu0  ;;  %14092 = vmatmul.mubr.msk.f32.vlgmr.msra.gmra.mxu1 %vm353_vm3, %v7485_v5 }
 0x312   : > { %389 = vst.msk [vmem:[#allocation3 + $0x110] sm:$0xff] %vm353_vm3, %v19758_v54  ;;  %391 = vst.msk [vmem:[#allocation3 + $0x120] sm:$0xff] %vm353_vm3, %v19758_v54 }
 0x313   : > { %392 = vst.msk [vmem:[#allocation3 + $0x128] sm:$0xff] %vm353_vm3, %v19758_v54  ;;  %393 = vst.msk [vmem:[#allocation3 + $0x130] sm:$0xff] %vm353_vm3, %v19758_v54  ;;  %v13782_v11 = vpop.f32.mrf.mxu1  ;;  %v17488_v18 = vpop.f32.mrf.mxu0 }
 0x314   : > { %395 = vst.msk [vmem:[#allocation3 + $0x140] sm:$0xff] %vm353_vm3, %v19758_v54  ;;  %396 = vst.msk [vmem:[#allocation3 + $0x148] sm:$0xff] %vm353_vm3, %v19758_v54  ;;  %v17491_v12 = vadd.f32 %v13782_v11, %v17169_v2  ;;  %v11929_v11 = vld [vmem:[%s19371_s5 + $0x58] sm:$0xff] }
 0x315   : > { %397 = vst.msk [vmem:[#allocation3 + $0x150] sm:$0xff] %vm353_vm3, %v19758_v54  ;;  %399 = vst.msk [vmem:[#allocation3 + $0x160] sm:$0xff] %vm353_vm3, %v19758_v54  ;;  %v17494_v7 = vpop.f32.mrf.mxu1  ;;  %v17496_v8 = vpop.f32.mrf.mxu0  ;;  %14139 = vmatprep.subr.mxu0 %v11929_v11 }
 0x316   : > { %400 = vst.msk [vmem:[#allocation3 + $0x168] sm:$0xff] %vm353_vm3, %v19758_v54  ;;  %401 = vst.msk [vmem:[#allocation3 + $0x170] sm:$0xff] %vm353_vm3, %v19758_v54 }
 0x317   : > { %403 = vst.msk [vmem:[#allocation3 + $0x180] sm:$0xff] %vm353_vm3, %v19758_v54  ;;  %404 = vst.msk [vmem:[#allocation3 + $0x188] sm:$0xff] %vm353_vm3, %v19758_v54  ;;  %v13785_v26 = vpop.f32.mrf.mxu1  ;;  %v17501_v24 = vpop.f32.mrf.mxu0 }
 0x318   : > { %405 = vst.msk [vmem:[#allocation3 + $0x190] sm:$0xff] %vm353_vm3, %v19758_v54  ;;  %407 = vst.msk [vmem:[#allocation3 + $0x1a0] sm:$0xff] %vm353_vm3, %v19758_v54  ;;  %v17504_v2 = vadd.f32 %v13785_v26, %v17184_v15 }
 0x319   : > { %408 = vst.msk [vmem:[#allocation3 + $0x1a8] sm:$0xff] %vm353_vm3, %v19758_v54  ;;  %409 = vst.msk [vmem:[#allocation3 + $0x1b0] sm:$0xff] %vm353_vm3, %v19758_v54  ;;  %v17506_v45 = vpop.f32.mrf.mxu1  ;;  %v17508_v41 = vpop.f32.mrf.mxu0 }
 0x31a   : > { %411 = vst.msk [vmem:[#allocation3 + $0x1c0] sm:$0xff] %vm353_vm3, %v19758_v54  ;;  %412 = vst.msk [vmem:[#allocation3 + $0x1c8] sm:$0xff] %vm353_vm3, %v19758_v54 }
 0x31b   : > { %413 = vst.msk [vmem:[#allocation3 + $0x1d0] sm:$0xff] %vm353_vm3, %v19758_v54  ;;  %415 = vst.msk [vmem:[#allocation3 + $0x1e0] sm:$0xff] %vm353_vm3, %v19758_v54  ;;  %v13788_v23 = vpop.f32.mrf.mxu1  ;;  %v17513_v40 = vpop.f32.mrf.mxu0 }
 0x31c   : > { %416 = vst.msk [vmem:[#allocation3 + $0x1e8] sm:$0xff] %vm353_vm3, %v19758_v54  ;;  %417 = vst.msk [vmem:[#allocation3 + $0x1f0] sm:$0xff] %vm353_vm3, %v19758_v54  ;;  %v17516_v5 = vadd.f32 %v13788_v23, %v17195_v13 }
 0x31d   : > { %419 = vst.msk [vmem:[#allocation3 + $0x200] sm:$0xff] %vm353_vm3, %v19758_v54  ;;  %420 = vst.msk [vmem:[#allocation3 + $0x208] sm:$0xff] %vm353_vm3, %v19758_v54  ;;  %v17520_v26 = vpop.f32.mrf.mxu0 }
 0x31e   : > { %421 = vst.msk [vmem:[#allocation3 + $0x210] sm:$0xff] %vm353_vm3, %v19758_v54  ;;  %423 = vst.msk [vmem:[#allocation3 + $0x220] sm:$0xff] %vm353_vm3, %v19758_v54 }
 0x31f   : > { %424 = vst.msk [vmem:[#allocation3 + $0x228] sm:$0xff] %vm353_vm3, %v19758_v54  ;;  %425 = vst.msk [vmem:[#allocation3 + $0x230] sm:$0xff] %vm353_vm3, %v19758_v54  ;;  %v17522_v1 = vpop.f32.mrf.mxu0 }
 0x320   : > { %358 = vst.msk [vmem:[#allocation3 + $0x18] sm:$0x1] %vm357_vm4, %v19758_v54  ;;  %362 = vst.msk [vmem:[#allocation3 + $0x38] sm:$0x1] %vm357_vm4, %v19758_v54 }
 0x321   : > { %366 = vst.msk [vmem:[#allocation3 + $0x58] sm:$0x1] %vm357_vm4, %v19758_v54  ;;  %370 = vst.msk [vmem:[#allocation3 + $0x78] sm:$0x1] %vm357_vm4, %v19758_v54  ;;  %v17529_v59 = vpop.f32.mrf.mxu0 }
 0x322   : > { %374 = vst.msk [vmem:[#allocation3 + $0x98] sm:$0x1] %vm357_vm4, %v19758_v54  ;;  %378 = vst.msk [vmem:[#allocation3 + $0xb8] sm:$0x1] %vm357_vm4, %v19758_v54 }
 0x323   : > { %382 = vst.msk [vmem:[#allocation3 + $0xd8] sm:$0x1] %vm357_vm4, %v19758_v54  ;;  %386 = vst.msk [vmem:[#allocation3 + $0xf8] sm:$0x1] %vm357_vm4, %v19758_v54 }
 0x324   : > { %390 = vst.msk [vmem:[#allocation3 + $0x118] sm:$0x1] %vm357_vm4, %v19758_v54  ;;  %394 = vst.msk [vmem:[#allocation3 + $0x138] sm:$0x1] %vm357_vm4, %v19758_v54 }
 0x325   : > { %398 = vst.msk [vmem:[#allocation3 + $0x158] sm:$0x1] %vm357_vm4, %v19758_v54  ;;  %402 = vst.msk [vmem:[#allocation3 + $0x178] sm:$0x1] %vm357_vm4, %v19758_v54 }
 0x326   : > { %406 = vst.msk [vmem:[#allocation3 + $0x198] sm:$0x1] %vm357_vm4, %v19758_v54  ;;  %410 = vst.msk [vmem:[#allocation3 + $0x1b8] sm:$0x1] %vm357_vm4, %v19758_v54 }
 0x327   : > { %414 = vst.msk [vmem:[#allocation3 + $0x1d8] sm:$0x1] %vm357_vm4, %v19758_v54  ;;  %418 = vst.msk [vmem:[#allocation3 + $0x1f8] sm:$0x1] %vm357_vm4, %v19758_v54 }
 0x328   : > { %422 = vst.msk [vmem:[#allocation3 + $0x218] sm:$0x1] %vm357_vm4, %v19758_v54  ;;  %426 = vst.msk [vmem:[#allocation3 + $0x238] sm:$0x1] %vm357_vm4, %v19758_v54  ;;  %v7521_v54 = vld [vmem:[#allocation3 + $0x10] sm:$0xff] }
 0x329   : > { %14036 = vmatmul.mubr.msk.f32.vlgmr.msra.gmra.mxu0 %vm353_vm3, %v7521_v54  ;;  %19759 = vst [vmem:[#allocation22_spill] sm:$0xff] %v17508_v41  ;;  %19760 = vst [vmem:[#allocation68_spill] sm:$0xff] %v17513_v40  ;;  %v17518_v54 = vpop.f32.mrf.mxu1  ;;  %v17531_v41 = vpop.f32.mrf.mxu0 }
 0x32a   : > { %19761 = vst [vmem:[#allocation71_spill] sm:$0xff] %v17516_v5  ;;  %14140 = vmatpush3.msra.mxu0 %v11929_v11  ;;  %19762 = vst [vmem:[#allocation36_spill] sm:$0xff] %v17518_v54 }
 0x32b   : > { %19763 = vst [vmem:[#allocation38_spill] sm:$0xff] %v17520_v26  ;;  %v13791_v15 = vpop.f32.mrf.mxu1  ;;  %19764 = vst [vmem:[#allocation70_spill] sm:$0xff] %v17522_v1  ;;  %v17538_v11 = vpop.f32.mrf.mxu0 }
 0x32c   : > { %v17525_v21 = vadd.f32 %v13791_v15, %v17206_v32  ;;  %19767 = vst [vmem:[#allocation23_spill] sm:$0xff] %v17529_v59  ;;  %19768 = vst [vmem:[#allocation72_spill] sm:$0xff] %v17531_v41  ;;  %v11928_v41 = vld [vmem:[%s19371_s5 + $0x50] sm:$0xff] }
 0x32d   : > { %v17527_v43 = vpop.f32.mrf.mxu1  ;;  %19771 = vst [vmem:[#allocation74_spill] sm:$0xff] %v17538_v11  ;;  %v17540_v5 = vpop.f32.mrf.mxu0  ;;  %14141 = vmatprep.subr.mxu0 %v11928_v41 }
 0x32e   : > { %19765 = vst [vmem:[#allocation37_spill] sm:$0xff] %v17525_v21  ;;  %19766 = vst [vmem:[#allocation73_spill] sm:$0xff] %v17527_v43  ;;  %14142 = vmatpush3.msra.mxu0 %v11928_v41 }
 0x32f   : > { %v13794_v40 = vpop.f32.mrf.mxu1  ;;  %19772 = vst [vmem:[#allocation40_spill] sm:$0xff] %v17540_v5  ;;  %v17547_v1 = vpop.f32.mrf.mxu0 }
 0x330   : > { %v17534_v23 = vadd.f32 %v13794_v40, %v17216_v35  ;;  %19775 = vst [vmem:[#allocation24_spill] sm:$0xff] %v17547_v1 }
 0x331   : > { %v17536_v13 = vpop.f32.mrf.mxu1  ;;  %v17552_v40 = vpop.f32.mrf.mxu0 }
 0x332   : > { %19769 = vst [vmem:[#allocation39_spill] sm:$0xff] %v17534_v23  ;;  %19770 = vst [vmem:[#allocation41_spill] sm:$0xff] %v17536_v13 }
 0x333   : > { %v13797_v26 = vpop.f32.mrf.mxu1  ;;  %19776 = vst [vmem:[#allocation75_spill] sm:$0xff] %v17552_v40 }
 0x334   : > { %v17543_v32 = vadd.f32 %v13797_v26, %v17231_v42  ;;  %v17559_v42 = vpop.f32.mrf.mxu0 }
 0x335   : > { %v17545_v15 = vpop.f32.mrf.mxu1  ;;  %19779 = vst [vmem:[#allocation44_spill] sm:$0xff] %v17559_v42 }
 0x336   : > { %19773 = vst [vmem:[#allocation76_spill] sm:$0xff] %v17543_v32  ;;  %19774 = vst [vmem:[#allocation15_spill] sm:$0xff] %v17545_v15  ;;  %v17561_v32 = vpop.f32.mrf.mxu0 }
 0x337   : > { %v13800_v35 = vpop.f32.mrf.mxu1  ;;  %19780 = vst [vmem:[#allocation77_spill] sm:$0xff] %v17561_v32 }
 0x338   : > { %v17555_v11 = vadd.f32 %v13800_v35, %v17242_v9  ;;  %v17568_v23 = vpop.f32.mrf.mxu0 }
 0x339   : > { %v17557_v5 = vpop.f32.mrf.mxu1  ;;  %19783 = vst [vmem:[#allocation25_spill] sm:$0xff] %v17568_v23 }
 0x33a   : > { %19777 = vst [vmem:[#allocation78_spill] sm:$0xff] %v17555_v11  ;;  %19778 = vst [vmem:[#allocation42_spill] sm:$0xff] %v17557_v5  ;;  %v17570_v13 = vpop.f32.mrf.mxu0 }
 0x33b   : > { %v13803_v26 = vpop.f32.mrf.mxu1  ;;  %19784 = vst [vmem:[#allocation79_spill] sm:$0xff] %v17570_v13  ;;  %v11927_v13 = vld [vmem:[%s19371_s5 + $0x48] sm:$0xff] }
 0x33c   : > { %v17564_v1 = vadd.f32 %v13803_v26, %v17251_v58  ;;  %v17577_v35 = vpop.f32.mrf.mxu0  ;;  %14143 = vmatprep.subr.mxu0 %v11927_v13 }
 0x33d   : > { %v17566_v15 = vpop.f32.mrf.mxu1  ;;  %19787 = vst [vmem:[#allocation47_spill] sm:$0xff] %v17577_v35  ;;  %14144 = vmatpush3.msra.mxu0 %v11927_v13 }
 0x33e   : > { %19781 = vst [vmem:[#allocation43_spill] sm:$0xff] %v17564_v1  ;;  %19782 = vst [vmem:[#allocation80_spill] sm:$0xff] %v17566_v15  ;;  %v17579_v11 = vpop.f32.mrf.mxu0 }
 0x33f   : > { %v13806_v40 = vpop.f32.mrf.mxu1  ;;  %19788 = vst [vmem:[#allocation81_spill] sm:$0xff] %v17579_v11 }
 0x340   : > { %v17573_v9 = vadd.f32 %v13806_v40, %v17260_v3  ;;  %v17586_v32 = vpop.f32.mrf.mxu0 }
 0x341   : > { %v17575_v41 = vpop.f32.mrf.mxu1  ;;  %19791 = vst [vmem:[#allocation48_spill] sm:$0xff] %v17586_v32 }
 0x342   : > { %19785 = vst [vmem:[#allocation82_spill] sm:$0xff] %v17573_v9  ;;  %19786 = vst [vmem:[#allocation45_spill] sm:$0xff] %v17575_v41  ;;  %v17591_v40 = vpop.f32.mrf.mxu0 }
 0x343   : > { %v13809_v42 = vpop.f32.mrf.mxu1  ;;  %19792 = vst [vmem:[#allocation84_spill] sm:$0xff] %v17591_v40 }
 0x344   : > { %v17582_v58 = vadd.f32 %v13809_v42, %v17272_v63  ;;  %v17598_v63 = vpop.f32.mrf.mxu0 }
 0x345   : > { %v17584_v26 = vpop.f32.mrf.mxu1  ;;  %19795 = vst [vmem:[#allocation5_spill] sm:$0xff] %v17598_v63 }
 0x346   : > { %19789 = vst [vmem:[#allocation46_spill] sm:$0xff] %v17582_v58  ;;  %19790 = vst [vmem:[#allocation83_spill] sm:$0xff] %v17584_v26  ;;  %v17600_v58 = vpop.f32.mrf.mxu0 }
 0x347   : > { %v13812_v3 = vpop.f32.mrf.mxu1  ;;  %19796 = vst [vmem:[#allocation6_spill] sm:$0xff] %v17600_v58 }
 0x348   : > { %v17594_v35 = vadd.f32 %v13812_v3, %v17282_v30  ;;  %v17607_v9 = vpop.f32.mrf.mxu0 }
 0x349   : > { %v17596_v11 = vpop.f32.mrf.mxu1  ;;  %19799 = vst [vmem:[#allocation26_spill] sm:$0xff] %v17607_v9 }
 0x34a   : > { %19793 = vst [vmem:[#allocation49_spill] sm:$0xff] %v17594_v35  ;;  %19794 = vst [vmem:[#allocation85_spill] sm:$0xff] %v17596_v11  ;;  %v17609_v41 = vpop.f32.mrf.mxu0  ;;  %v17654_v35 = vld [vmem:[%s19371_s5 + $0x98] sm:$0xff] }
 0x34b   : > { %v13815_v42 = vpop.f32.mrf.mxu1  ;;  %19800 = vst [vmem:[#allocation16_spill] sm:$0xff] %v17609_v41  ;;  %19804 = vst [vmem:[#allocation53_spill] sm:$0xff] %v17654_v35 }
 0x34c   : > { %v17603_v32 = vadd.f32 %v13815_v42, %v17292_v52  ;;  %v17616_v3 = vpop.f32.mrf.mxu0  ;;  %v11926_v42 = vld [vmem:[%s19371_s5 + $0x40] sm:$0xff] }
 0x34d   : > { %v17605_v26 = vpop.f32.mrf.mxu1  ;;  %19803 = vst [vmem:[#allocation27_spill] sm:$0xff] %v17616_v3  ;;  %14145 = vmatprep.subr.mxu0 %v11926_v42  ;;  %v11964_v3 = vld [vmem:[%s19371_s5 + $0x70] sm:$0xff] }
 0x34e   : > { %19797 = vst [vmem:[#allocation7_spill] sm:$0xff] %v17603_v32  ;;  %19798 = vst [vmem:[#allocation51_spill] sm:$0xff] %v17605_v26  ;;  %v17620_v58 = vpop.f32.mrf.mxu0  ;;  %14146 = vmatpush3.msra.mxu0 %v11926_v42  ;;  %v11963_v42 = vld [vmem:[%s19371_s5 + $0x68] sm:$0xff]  ;;  %v11962_v26 = vld [vmem:[%s19371_s5 + $0x60] sm:$0xff] }
 0x34f   : > { %v13818_v40 = vpop.f32.mrf.mxu1  ;;  %14251 = vmatprep.subr.mxu0 %v17654_v35 }
 0x350   : > { %v17612_v30 = vadd.f32 %v13818_v40, %v17303_v49  ;;  %v17627_v9 = vpop.f32.mrf.mxu0  ;;  %v11965_v40 = vld [vmem:[%s19371_s5 + $0x78] sm:$0xff] }
 0x351   : > { %v17614_v13 = vpop.f32.mrf.mxu1  ;;  %14195 = vmatprep.subr.mxu1 %v11965_v40 }
 0x352   : > { %19801 = vst [vmem:[#allocation28_spill] sm:$0xff] %v17612_v30  ;;  %19802 = vst [vmem:[#allocation50_spill] sm:$0xff] %v17614_v13  ;;  %v17639_v30 = vpop.f32.mrf.mxu0  ;;  %14196 = vmatpush3.msra.mxu1 %v11965_v40 }
 0x353   : > { %v17618_v63 = vpop.f32.mrf.mxu1  ;;  %14197 = vmatprep.subr.mxu1 %v11964_v3 }
 0x354   : > { %14198 = vmatpush3.msra.mxu1 %v11964_v3  ;;  %v17656_v11 = vpop.f32.mrf.mxu0 }
 0x355   : > { %v17622_v52 = vpop.f32.mrf.mxu1  ;;  %14199 = vmatprep.subr.mxu1 %v11963_v42 }
 0x356   : > { %14200 = vmatpush3.msra.mxu1 %v11963_v42  ;;  %v17663_v23 = vpop.f32.mrf.mxu0 }
 0x357   : > { %v17629_v41 = vpop.f32.mrf.mxu1  ;;  %14201 = vmatprep.subr.mxu1 %v11962_v26 }
 0x358   : > { %14202 = vmatpush3.msra.mxu1 %v11962_v26  ;;  %v17669_v5 = vpop.f32.mrf.mxu0 }
 0x359   : > { %v17631_v49 = vpop.f32.mrf.mxu1 }
 0x35a   : > { %v17675_v43 = vpop.f32.mrf.mxu0 }
 0x35b   : > { %v17641_v13 = vpop.f32.mrf.mxu1  ;;  %19809 = vst [vmem:[#allocation29_spill] sm:$0xff] %v17675_v43 }
 0x35c   : > { %v17681_v54 = vpop.f32.mrf.mxu0 }
 0x35d   : > { %v17643_v32 = vpop.f32.mrf.mxu1  ;;  %19812 = vst [vmem:[#allocation31_spill] sm:$0xff] %v17681_v54 }
 0x35f   : > { %v17658_v40 = vpop.f32.mrf.mxu1 }
 0x361   : > { %v17661_v3 = vpop.f32.mrf.mxu1 }
 0x363   : > { %v17665_v1 = vpop.f32.mrf.mxu1 }
 0x364   : > { %19805 = vst [vmem:[#allocation8_spill] sm:$0xff] %v17665_v1  ;;  %v17687_v1 = vpop.f32.mrf.mxu0 }
 0x365   : > { %v17667_v15 = vpop.f32.mrf.mxu1  ;;  %19815 = vst [vmem:[#allocation88_spill] sm:$0xff] %v17687_v1 }
 0x366   : > { %19806 = vst [vmem:[#allocation18_spill] sm:$0xff] %v17667_v15 }
 0x367   : > { %v17671_v59 = vpop.f32.mrf.mxu1 }
 0x368   : > { %19807 = vst [vmem:[#allocation52_spill] sm:$0xff] %v17671_v59  ;;  %v17693_v59 = vpop.f32.mrf.mxu0 }
 0x369   : > { %v17673_v21 = vpop.f32.mrf.mxu1  ;;  %19818 = vst [vmem:[#allocation91_spill] sm:$0xff] %v17693_v59 }
 0x36a   : > { %19808 = vst [vmem:[#allocation55_spill] sm:$0xff] %v17673_v21 }
 0x36b   : > { %v17677_v42 = vpop.f32.mrf.mxu1 }
 0x36c   : > { %19810 = vst [vmem:[#allocation17_spill] sm:$0xff] %v17677_v42  ;;  %v17699_v42 = vpop.f32.mrf.mxu0 }
 0x36d   : > { %v17679_v35 = vpop.f32.mrf.mxu1  ;;  %19821 = vst [vmem:[#allocation94_spill] sm:$0xff] %v17699_v42 }
 0x36e   : > { %19811 = vst [vmem:[#allocation54_spill] sm:$0xff] %v17679_v35 }
 0x36f   : > { %v17683_v26 = vpop.f32.mrf.mxu1 }
 0x370   : > { %19813 = vst [vmem:[#allocation86_spill] sm:$0xff] %v17683_v26  ;;  %v17705_v26 = vpop.f32.mrf.mxu0 }
 0x371   : > { %v17685_v20 = vpop.f32.mrf.mxu1  ;;  %19824 = vst [vmem:[#allocation97_spill] sm:$0xff] %v17705_v26 }
 0x372   : > { %19814 = vst [vmem:[#allocation87_spill] sm:$0xff] %v17685_v20 }
 0x373   : > { %v17689_v15 = vpop.f32.mrf.mxu1 }
 0x374   : > { %19816 = vst [vmem:[#allocation89_spill] sm:$0xff] %v17689_v15  ;;  %v17713_v15 = vpop.f32.mrf.mxu0 }
 0x375   : > { %v17691_v28 = vpop.f32.mrf.mxu1 }
 0x376   : > { %19817 = vst [vmem:[#allocation90_spill] sm:$0xff] %v17691_v28  ;;  %v4505_v28 = vadd.f32 %v16953_v27, %v16951_v60  ;;  %v5409_v27 = vadd.f32 %v17143_v55, %v17148_v4  ;;  %v6186_v55 = vadd.f32 %v17422_v46, %v17425_v62  ;;  %v17765_v62 = vld [vmem:[%s19370_s4] ss:$0 sm:$0xff] }
 0x377   : > { %v17695_v21 = vpop.f32.mrf.mxu1 }
 0x378   : > { %19819 = vst [vmem:[#allocation92_spill] sm:$0xff] %v17695_v21 }
 0x379   : > { %v17697_v43 = vpop.f32.mrf.mxu1 }
 0x37a   : > { %19820 = vst [vmem:[#allocation93_spill] sm:$0xff] %v17697_v43  ;;  %v5019_v43 = vadd.f32 %v17132_v33, %v4505_v28  ;;  %v6184_v28 = vadd.f32 %v17305_v31, %v17308_v39 }
 0x37b   : > { %v17701_v35 = vpop.f32.mrf.mxu1 }
 0x37c   : > { %19822 = vst [vmem:[#allocation95_spill] sm:$0xff] %v17701_v35  ;;  %v17720_v35 = vpop.f32.mrf.mxu0  ;;  %v5407_v26 = vadd.f32 %v17134_v14, %v5019_v43  ;;  %v5797_v43 = vadd.f32 %v17430_v22, %v5409_v27  ;;  %v6573_v14 = vadd.f32 %v17618_v63, %v6184_v28  ;;  %v6575_v22 = vadd.f32 %v17629_v41, %v6186_v55 }
 0x37d   : > { %v17703_v54 = vpop.f32.mrf.mxu1  ;;  %v17776_v27 = vadd.f32 %v17047_v61, %v17045_v34  ;;  %v17789_v34 = vadd.f32 %v17061_v51, %v17059_v57 }
 0x37e   : > { %19823 = vst [vmem:[#allocation96_spill] sm:$0xff] %v17703_v54  ;;  %v17728_v59 = vpop.f32.mrf.mxu0 }
 0x37f   : > { %v17707_v20 = vpop.f32.mrf.mxu1 }
 0x380   : > { %19825 = vst [vmem:[#allocation98_spill] sm:$0xff] %v17707_v20 }
 0x381   : > { %v17709_v1 = vpop.f32.mrf.mxu1 }
 0x382   : > { %19826 = vst [vmem:[#allocation99_spill] sm:$0xff] %v17709_v1  ;;  %v5795_v1 = vadd.f32 %v17310_v36, %v5407_v26  ;;  %v5411_v36 = vadd.f32 %v17155_v48, %v17160_v56  ;;  %v17743_v26 = vpop.f32.mrf.mxu0  ;;  %v5413_v48 = vadd.f32 %v17167_v37, %v17172_v44  ;;  %v6188_v56 = vadd.f32 %v17437_v6, %v17440_v0 }
 0x383   : > { %v17715_v21 = vpop.f32.mrf.mxu1  ;;  %v6963_v0 = vadd.f32 %v17639_v30, %v6575_v22 }
 0x384   : > { %v5799_v31 = vadd.f32 %v17481_v50, %v5411_v36  ;;  %v17760_v63 = vpop.f32.mrf.mxu0  ;;  %v5801_v37 = vadd.f32 %v17494_v7, %v5413_v48  ;;  %v6577_v44 = vadd.f32 %v17641_v13, %v6188_v56 }
 0x385   : > { %v17718_v42 = vpop.f32.mrf.mxu1 }
 0x386   : > { %v6187_v41 = vadd.f32 %v17483_v25, %v5799_v31  ;;  %v6190_v25 = vadd.f32 %v17488_v18, %v17491_v12  ;;  %v6189_v61 = vadd.f32 %v17496_v8, %v5801_v37  ;;  %v17797_v18 = vld [vmem:[%s19371_s5 + $0xb8] sm:$0xff]  ;;  %v17805_v8 = vadd.f32 %v17075_v53, %v17073_v29  ;;  %v19829_v53 = vld [vmem:[#allocation30_spill] sm:$0xff]  ;;  %v19836_v37 = vld [vmem:[#allocation56_spill] sm:$0xff] }
 0x387   : > { %v17722_v54 = vpop.f32.mrf.mxu1  ;;  %14307 = vmatprep.subr.mxu1 %v17797_v18 }
 0x388   : > { %19827 = vst [vmem:[#allocation100_spill] sm:$0xff] %v17722_v54  ;;  %v6183_v54 = vadd.f32 %v17312_v19, %v5795_v1  ;;  %v6185_v1 = vadd.f32 %v17432_v47, %v5797_v43  ;;  %v6961_v19 = vadd.f32 %v17620_v58, %v6573_v14  ;;  %v6576_v7 = vadd.f32 %v17643_v32, %v6187_v41  ;;  %v19835_v41 = vld [vmem:[#allocation19_spill] sm:$0xff] }
 0x389   : > { %v17725_v20 = vpop.f32.mrf.mxu1 }
 0x38a   : > { %v6572_v4 = vadd.f32 %v17622_v52, %v6183_v54  ;;  %v6574_v50 = vadd.f32 %v17631_v49, %v6185_v1  ;;  %v17783_v49 = vpop.f32.mrf.mxu0 }
 0x38b   : > { %v17730_v60 = vpop.f32.mrf.mxu1 }
 0x38c   : > { %19828 = vst [vmem:[#allocation101_spill] sm:$0xff] %v17730_v60  ;;  %v6960_v47 = vadd.f32 %v17627_v9, %v6572_v4  ;;  %v5415_v9 = vadd.f32 %v17182_v10, %v17187_v16  ;;  %v6962_v30 = vadd.f32 %v17656_v11, %v6574_v50  ;;  %v6965_v16 = vadd.f32 %v17663_v23, %v6577_v44  ;;  %v17812_v36 = vpop.f32.mrf.mxu0 }
 0x38d   : > { %v17736_v33 = vpop.f32.mrf.mxu1  ;;  %v6579_v11 = vadd.f32 %v17658_v40, %v6190_v25  ;;  %v6192_v23 = vadd.f32 %v17501_v24, %v17504_v2  ;;  %v6964_v40 = vadd.f32 %v17669_v5, %v6576_v7  ;;  %v6578_v4 = vadd.f32 %v17661_v3, %v6189_v61  ;;  %v19832_v24 = vld [vmem:[#allocation36_spill] sm:$0xff]  ;;  %v19841_v7 = vld [vmem:[#allocation18_spill] sm:$0xff] }
 0x38e   : > { %v5803_v10 = vadd.f32 %v17506_v45, %v5415_v9  ;;  %v5417_v45 = vadd.f32 %v17193_v38, %v17198_v17  ;;  %v19831_v38 = vld [vmem:[#allocation22_spill] sm:$0xff]  ;;  %v19833_v5 = vld [vmem:[#allocation8_spill] sm:$0xff]  ;;  %v17829_v44 = vadd.f32 %v19836_v37, %v19835_v41 }
 0x38f   : > { %v17745_v60 = vpop.f32.mrf.mxu1  ;;  %v6581_v48 = vadd.f32 %v19833_v5, %v6192_v23  ;;  %v19840_v9 = vld [vmem:[#allocation68_spill] sm:$0xff] }
 0x390   : > { %v6191_v17 = vadd.f32 %v19831_v38, %v5803_v10  ;;  %v5805_v2 = vadd.f32 %v19832_v24, %v5417_v45  ;;  %v19846_v45 = vld [vmem:[#allocation73_spill] sm:$0xff]  ;;  %v19849_v38 = vld [vmem:[#allocation34_spill] sm:$0xff]  ;;  %v19851_v5 = vld [vmem:[#allocation20_spill] sm:$0xff] }
 0x391   : > { %v17751_v39 = vpop.f32.mrf.mxu1 }
 0x393   : > { %v13981_v46 = vpop.f32.mrf.mxu1 }
 0x394   : > { %v7349_v54 = vadd.f32 %v13981_v46, %v6961_v19  ;;  %v19830_v19 = vld [vmem:[#allocation57_spill] sm:$0xff] }
 0x395   : > { %v7189_v6 = vpop.f32.mrf.mxu1  ;;  %v17819_v22 = vadd.f32 %v19830_v19, %v19829_v53  ;;  %v19834_v46 = vld [vmem:[#allocation29_spill] sm:$0xff] }
 0x396   : > { %v7388_v58 = vadd.f32 %v17765_v62, %v7349_v54  ;;  %v7348_v52 = vadd.f32 %v7189_v6, %v6960_v47  ;;  %v6967_v47 = vadd.f32 %v19834_v46, %v6579_v11  ;;  %v19837_v6 = vld [vmem:[#allocation61_spill] sm:$0xff]  ;;  %v19844_v11 = vld [vmem:[#allocation32_spill] sm:$0xff] }
 0x397   : > { %v13984_v13 = vpop.f32.mrf.mxu1  ;;  %v19853_v46 = vld [vmem:[#allocation37_spill] sm:$0xff] }
 0x398   : > { %v7420_v28 = vmax.f32 %v7388_v58, 0.0  ;;  %v7387_v43 = vadd.f32 %v17765_v62, %v7348_v52  ;;  %v7351_v14 = vadd.f32 %v13984_v13, %v6963_v0  ;;  %v19838_v0 = vld [vmem:[#allocation33_spill] sm:$0xff]  ;;  %v19839_v52 = vld [vmem:[#allocation71_spill] sm:$0xff]  ;;  %v6580_v13 = vadd.f32 %v19841_v7, %v6191_v17  ;;  %v19850_v17 = vld [vmem:[#allocation58_spill] sm:$0xff] }
 0x399   : > { %v7199_v12 = vpop.f32.mrf.mxu1  ;;  %v5419_v58 = vadd.f32 %v19838_v0, %v19837_v6  ;;  %v6194_v25 = vadd.f32 %v19840_v9, %v19839_v52  ;;  %v17853_v24 = vadd.f32 %v19850_v17, %v19849_v38  ;;  %v19866_v17 = vld [vmem:[#allocation54_spill] sm:$0xff] }
 0x39a   : > { %7453 = vst.msk [vmem:[#allocation3 + $0x30] sm:$0xff] %vm353_vm3, %v7420_v28  ;;  %v7419_v32 = vmax.f32 %v7387_v43, 0.0  ;;  %v7390_v57 = vadd.f32 %v17765_v62, %v7351_v14  ;;  %v7350_v51 = vadd.f32 %v7199_v12, %v6962_v30  ;;  %v17836_v30 = vpop.f32.mrf.mxu0  ;;  %v19842_v43 = vld [vmem:[#allocation31_spill] sm:$0xff] }
 0x39b   : > { %v13987_v55 = vpop.f32.mrf.mxu1  ;;  %v6966_v14 = vadd.f32 %v19842_v43, %v6578_v4  ;;  %v19843_v12 = vld [vmem:[#allocation59_spill] sm:$0xff]  ;;  %v5807_v23 = vadd.f32 %v19846_v45, %v5419_v58 }
 0x39c   : > { %7452 = vst.msk [vmem:[#allocation3 + $0x28] sm:$0xff] %vm353_vm3, %v7419_v32  ;;  %v7422_v31 = vmax.f32 %v7390_v57, 0.0  ;;  %v7389_v1 = vadd.f32 %v17765_v62, %v7350_v51  ;;  %v7353_v29 = vadd.f32 %v13987_v55, %v6965_v16  ;;  %v17843_v32 = vadd.f32 %v19844_v11, %v19843_v12  ;;  %v19845_v57 = vld [vmem:[#allocation38_spill] sm:$0xff]  ;;  %v19856_v58 = vld [vmem:[#allocation55_spill] sm:$0xff] }
 0x39d   : > { %v7209_v56 = vpop.f32.mrf.mxu1  ;;  %v6193_v51 = vadd.f32 %v19845_v57, %v5805_v2  ;;  %v19860_v11 = vld [vmem:[#allocation94_spill] sm:$0xff] }
 0x39e   : > { %7455 = vst.msk [vmem:[#allocation3 + $0x50] sm:$0xff] %vm353_vm3, %v7422_v31  ;;  %v7421_v3 = vmax.f32 %v7389_v1, 0.0  ;;  %v7392_v50 = vadd.f32 %v17765_v62, %v7353_v29  ;;  %v7352_v54 = vadd.f32 %v7209_v56, %v6964_v40  ;;  %v19847_v40 = vld [vmem:[#allocation88_spill] sm:$0xff]  ;;  %v19852_v56 = vld [vmem:[#allocation9_spill] sm:$0xff] }
 0x39f   : > { %v13990_v28 = vpop.f32.mrf.mxu1  ;;  %v6969_v55 = vadd.f32 %v19847_v40, %v6581_v48  ;;  %v19848_v1 = vld [vmem:[#allocation52_spill] sm:$0xff]  ;;  %v5421_v2 = vadd.f32 %v19852_v56, %v19851_v5  ;;  %v19855_v48 = vld [vmem:[#allocation91_spill] sm:$0xff]  ;;  %v6582_v52 = vadd.f32 %v19856_v58, %v6193_v51 }
 0x3a0   : > { %7454 = vst.msk [vmem:[#allocation3 + $0x48] sm:$0xff] %vm353_vm3, %v7421_v3  ;;  %v7424_v61 = vmax.f32 %v7392_v50, 0.0  ;;  %v7391_v10 = vadd.f32 %v17765_v62, %v7352_v54  ;;  %v7355_v16 = vadd.f32 %v13990_v28, %v6967_v47  ;;  %v6583_v29 = vadd.f32 %v19848_v1, %v6194_v25  ;;  %v19854_v47 = vld [vmem:[#allocation70_spill] sm:$0xff]  ;;  %v17860_v54 = vpop.f32.mrf.mxu0  ;;  %v19857_v28 = vld [vmem:[#allocation23_spill] sm:$0xff] }
 0x3a1   : > { %v7219_v31 = vpop.f32.mrf.mxu1  ;;  %v6196_v3 = vadd.f32 %v19854_v47, %v19853_v46  ;;  %v6968_v50 = vadd.f32 %v19855_v48, %v6580_v13  ;;  %v17875_v13 = vld [vmem:[#allocation3 + $0x30] sm:$0xff]  ;;  %v6195_v43 = vadd.f32 %v19857_v28, %v5807_v23  ;;  %v19861_v23 = vld [vmem:[#allocation63_spill] sm:$0xff] }
 0x3a2   : > { %7457 = vst.msk [vmem:[#allocation3 + $0x70] sm:$0xff] %vm353_vm3, %v7424_v61  ;;  %v7423_v4 = vmax.f32 %v7391_v10, 0.0  ;;  %v7394_v53 = vadd.f32 %v17765_v62, %v7355_v16  ;;  %v7354_v19 = vadd.f32 %v7219_v31, %v6966_v14  ;;  %v19858_v14 = vld [vmem:[#allocation41_spill] sm:$0xff]  ;;  %v6971_v57 = vadd.f32 %v19860_v11, %v6583_v29  ;;  %v19863_v1 = vld [vmem:[#allocation10_spill] sm:$0xff]  ;;  %v17894_v56 = vpop.f32.mrf.mxu0 }
 0x3a3   : > { %v13993_v41 = vpop.f32.mrf.mxu1  ;;  %v17862_v37 = vld [vmem:[#allocation3 + $0x28] sm:$0xff]  ;;  %v5809_v61 = vadd.f32 %v19858_v14, %v5421_v2  ;;  %v6584_v5 = vadd.f32 %v19866_v17, %v6195_v43  ;;  %v19870_v14 = vld [vmem:[#allocation86_spill] sm:$0xff]  ;;  %v19875_v17 = vld [vmem:[#allocation87_spill] sm:$0xff] }
 0x3a4   : > { %v17864_v6 = vld [vmem:[#allocation3 + $0x27] sm:$0xff]  ;;  %v17866_v0 = vld [vmem:[#allocation3 + $0x2f] sm:$0xff]  ;;  %7456 = vst.msk [vmem:[#allocation3 + $0x68] sm:$0xff] %vm353_vm3, %v7423_v4  ;;  %v7426_v9 = vmax.f32 %v7394_v53, 0.0  ;;  %v7393_v25 = vadd.f32 %v17765_v62, %v7354_v19  ;;  %v7357_v7 = vadd.f32 %v13993_v41, %v6969_v55  ;;  %14038 = vmatprep.mubr.msk.f32.mxu0 %vm353_vm3, %v17862_v37  ;;  %v5037_v4 = vadd.f32 %v19863_v1, %v17776_v27  ;;  %v19864_v53 = vld [vmem:[#allocation39_spill] sm:$0xff] }
 0x3a5   : > { %14094 = vmatprep.mubr.msk.f32.mxu1 %vm353_vm3, %v17864_v6  ;;  %v19859_v10 = vld [vmem:[#allocation17_spill] sm:$0xff]  ;;  %v7229_v12 = vpop.f32.mrf.mxu1  ;;  %14039 = vmatmul.mubr.msk.f32.gmra.mxu0 %vm353_vm3, %v17875_v13  ;;  %v19862_v55 = vld [vmem:[#allocation60_spill] sm:$0xff]  ;;  %v17909_v58 = vld [vmem:[#allocation3 + $0x50] sm:$0xff] }
 0x3a6   : > { %v6585_v16 = vadd.f32 %v19859_v10, %v6196_v3  ;;  %14095 = vmatmul.mubr.msk.f32.gmra.mxu1 %vm353_vm3, %v17866_v0  ;;  %7459 = vst.msk [vmem:[#allocation3 + $0x90] sm:$0xff] %vm353_vm3, %v7426_v9  ;;  %v7425_v51 = vmax.f32 %v7393_v25, 0.0  ;;  %v7396_v45 = vadd.f32 %v17765_v62, %v7357_v7  ;;  %v7356_v40 = vadd.f32 %v7229_v12, %v6968_v50  ;;  %v19865_v19 = vld [vmem:[#allocation72_spill] sm:$0xff]  ;;  %v19867_v3 = vld [vmem:[#allocation97_spill] sm:$0xff]  ;;  %v19868_v9 = vld [vmem:[#allocation74_spill] sm:$0xff] }
 0x3a7   : > { %v5423_v31 = vadd.f32 %v19862_v55, %v19861_v23  ;;  %v6198_v38 = vadd.f32 %v19865_v19, %v19864_v53  ;;  %v13996_v29 = vpop.f32.mrf.mxu1  ;;  %v17896_v2 = vld [vmem:[#allocation3 + $0x48] sm:$0xff]  ;;  %v6970_v48 = vadd.f32 %v19867_v3, %v6582_v52  ;;  %v6197_v25 = vadd.f32 %v19868_v9, %v5809_v61  ;;  %v19869_v7 = vld [vmem:[#allocation15_spill] sm:$0xff]  ;;  %v19871_v61 = vld [vmem:[#allocation12_spill] sm:$0xff] }
 0x3a8   : > { %v17898_v46 = vld [vmem:[#allocation3 + $0x47] sm:$0xff]  ;;  %v17900_v47 = vld [vmem:[#allocation3 + $0x4f] sm:$0xff]  ;;  %7458 = vst.msk [vmem:[#allocation3 + $0x88] sm:$0xff] %vm353_vm3, %v7425_v51  ;;  %v7428_v50 = vmax.f32 %v7396_v45, 0.0  ;;  %v7395_v27 = vadd.f32 %v17765_v62, %v7356_v40  ;;  %v7359_v41 = vadd.f32 %v13996_v29, %v6971_v57  ;;  %14041 = vmatprep.mubr.msk.f32.mxu0 %vm353_vm3, %v17896_v2  ;;  %v6973_v52 = vadd.f32 %v17713_v15, %v6585_v16 }
 0x3a9   : > { %14097 = vmatprep.mubr.msk.f32.mxu1 %vm353_vm3, %v17898_v46  ;;  %v5811_v28 = vadd.f32 %v19869_v7, %v5423_v31  ;;  %v7239_v43 = vpop.f32.mrf.mxu1  ;;  %14042 = vmatmul.mubr.msk.f32.gmra.mxu0 %vm353_vm3, %v17909_v58  ;;  %v6587_v10 = vadd.f32 %v19870_v14, %v6198_v38  ;;  %v5425_v51 = vadd.f32 %v19871_v61, %v5037_v4  ;;  %v19872_v45 = vld [vmem:[#allocation62_spill] sm:$0xff]  ;;  %v19873_v16 = vld [vmem:[#allocation76_spill] sm:$0xff]  ;;  %v17927_v31 = vpop.f32.mrf.mxu0 }
 0x3aa   : > { %14098 = vmatmul.mubr.msk.f32.gmra.mxu1 %vm353_vm3, %v17900_v47  ;;  %7461 = vst.msk [vmem:[#allocation3 + $0xb0] sm:$0xff] %vm353_vm3, %v7428_v50  ;;  %v7427_v12 = vmax.f32 %v7395_v27, 0.0  ;;  %v7398_v11 = vadd.f32 %v17765_v62, %v7359_v41  ;;  %v7358_v57 = vadd.f32 %v7239_v43, %v6970_v48  ;;  %v5039_v15 = vadd.f32 %v19872_v45, %v17789_v34  ;;  %v19874_v40 = vld [vmem:[#allocation40_spill] sm:$0xff]  ;;  %v19877_v50 = vld [vmem:[#allocation42_spill] sm:$0xff]  ;;  %v19878_v41 = vld [vmem:[#allocation89_spill] sm:$0xff] }
 0x3ab   : > { %v6200_v23 = vadd.f32 %v19874_v40, %v19873_v16  ;;  %v6972_v55 = vadd.f32 %v17720_v35, %v6584_v5  ;;  %v13999_v1 = vpop.f32.mrf.mxu1  ;;  %v17929_v53 = vld [vmem:[#allocation3 + $0x68] sm:$0xff]  ;;  %v6586_v29 = vadd.f32 %v19875_v17, %v6197_v25  ;;  %v17942_v35 = vld [vmem:[#allocation3 + $0x70] sm:$0xff]  ;;  %v19876_v5 = vld [vmem:[#allocation24_spill] sm:$0xff]  ;;  %v5813_v27 = vadd.f32 %v19877_v50, %v5425_v51 }
 0x3ac   : > { %v17931_v19 = vld [vmem:[#allocation3 + $0x67] sm:$0xff]  ;;  %v17933_v38 = vld [vmem:[#allocation3 + $0x6f] sm:$0xff]  ;;  %7460 = vst.msk [vmem:[#allocation3 + $0xa8] sm:$0xff] %vm353_vm3, %v7427_v12  ;;  %v7430_v4 = vmax.f32 %v7398_v11, 0.0  ;;  %v7397_v34 = vadd.f32 %v17765_v62, %v7358_v57  ;;  %v7361_v3 = vadd.f32 %v13999_v1, %v6973_v52  ;;  %14044 = vmatprep.mubr.msk.f32.mxu0 %vm353_vm3, %v17929_v53  ;;  %v6199_v48 = vadd.f32 %v19876_v5, %v5811_v28  ;;  %v19882_v51 = vld [vmem:[#allocation75_spill] sm:$0xff] }
 0x3ad   : > { %14100 = vmatprep.mubr.msk.f32.mxu1 %vm353_vm3, %v17931_v19  ;;  %v6589_v9 = vadd.f32 %v19878_v41, %v6200_v23  ;;  %v7249_v25 = vpop.f32.mrf.mxu1  ;;  %14045 = vmatmul.mubr.msk.f32.gmra.mxu0 %vm353_vm3, %v17942_v35  ;;  %v6975_v7 = vadd.f32 %v17728_v59, %v6587_v10  ;;  %v19879_v28 = vld [vmem:[#allocation4_spill] sm:$0xff]  ;;  %v19880_v11 = vld [vmem:[#allocation65_spill] sm:$0xff]  ;;  %v19881_v61 = vld [vmem:[#allocation78_spill] sm:$0xff]  ;;  %v17960_v23 = vpop.f32.mrf.mxu0 }
 0x3ae   : > { %14101 = vmatmul.mubr.msk.f32.gmra.mxu1 %vm353_vm3, %v17933_v38  ;;  %7463 = vst.msk [vmem:[#allocation3 + $0xd0] sm:$0xff] %vm353_vm3, %v7430_v4  ;;  %v7429_v52 = vmax.f32 %v7397_v34, 0.0  ;;  %v7400_v43 = vadd.f32 %v17765_v62, %v7361_v3  ;;  %v7360_v14 = vadd.f32 %v7249_v25, %v6972_v55  ;;  %v5427_v12 = vadd.f32 %v19879_v28, %v5039_v15  ;;  %v19883_v16 = vld [vmem:[#allocation90_spill] sm:$0xff]  ;;  %v19884_v3 = vld [vmem:[#allocation44_spill] sm:$0xff] }
 0x3af   : > { %v5041_v57 = vadd.f32 %v19880_v11, %v17805_v8  ;;  %v6202_v45 = vadd.f32 %v19882_v51, %v19881_v61  ;;  %v6588_v40 = vadd.f32 %v19883_v16, %v6199_v48  ;;  %v14002_v1 = vpop.f32.mrf.mxu1  ;;  %v17962_v59 = vld [vmem:[#allocation3 + $0x88] sm:$0xff]  ;;  %v6974_v55 = vadd.f32 %v17743_v26, %v6586_v29  ;;  %v17975_v34 = vld [vmem:[#allocation3 + $0x90] sm:$0xff]  ;;  %v19885_v48 = vld [vmem:[#allocation80_spill] sm:$0xff]  ;;  %v17993_v51 = vpop.f32.mrf.mxu0 }
 0x3b0   : > { %v17964_v10 = vld [vmem:[#allocation3 + $0x87] sm:$0xff]  ;;  %v17966_v17 = vld [vmem:[#allocation3 + $0x8f] sm:$0xff]  ;;  %7462 = vst.msk [vmem:[#allocation3 + $0xc8] sm:$0xff] %vm353_vm3, %v7429_v52  ;;  %v7432_v15 = vmax.f32 %v7400_v43, 0.0  ;;  %v7399_v8 = vadd.f32 %v17765_v62, %v7360_v14  ;;  %v7363_v4 = vadd.f32 %v14002_v1, %v6975_v7  ;;  %14047 = vmatprep.mubr.msk.f32.mxu0 %vm353_vm3, %v17962_v59  ;;  %v6201_v5 = vadd.f32 %v19884_v3, %v5813_v27 }
 0x3b1   : > { %14103 = vmatprep.mubr.msk.f32.mxu1 %vm353_vm3, %v17964_v10  ;;  %v5815_v50 = vadd.f32 %v19885_v48, %v5427_v12  ;;  %v6977_v26 = vadd.f32 %v17760_v63, %v6589_v9  ;;  %v7259_v29 = vpop.f32.mrf.mxu1  ;;  %14048 = vmatmul.mubr.msk.f32.gmra.mxu0 %vm353_vm3, %v17975_v34  ;;  %v19886_v41 = vld [vmem:[#allocation92_spill] sm:$0xff]  ;;  %v19887_v27 = vld [vmem:[#allocation21_spill] sm:$0xff]  ;;  %v19889_v9 = vld [vmem:[#allocation43_spill] sm:$0xff]  ;;  %v6976_v61 = vadd.f32 %v17783_v49, %v6588_v40 }
 0x3b2   : > { %14104 = vmatmul.mubr.msk.f32.gmra.mxu1 %vm353_vm3, %v17966_v17  ;;  %v6591_v25 = vadd.f32 %v19886_v41, %v6202_v45  ;;  %7465 = vst.msk [vmem:[#allocation3 + $0xf0] sm:$0xff] %vm353_vm3, %v7432_v15  ;;  %v7431_v7 = vmax.f32 %v7399_v8, 0.0  ;;  %v7402_v52 = vadd.f32 %v17765_v62, %v7363_v4  ;;  %v7362_v43 = vadd.f32 %v7259_v29, %v6974_v55  ;;  %v19888_v28 = vld [vmem:[#allocation64_spill] sm:$0xff]  ;;  %v19890_v12 = vld [vmem:[#allocation77_spill] sm:$0xff]  ;;  %v18008_v49 = vld [vmem:[#allocation3 + $0xb0] sm:$0xff] }
 0x3b3   : > { %v5429_v14 = vadd.f32 %v19887_v27, %v5041_v57  ;;  %v5043_v63 = vadd.f32 %v19888_v28, %v17819_v22  ;;  %v6204_v11 = vadd.f32 %v19890_v12, %v19889_v9  ;;  %v14005_v16 = vpop.f32.mrf.mxu1  ;;  %v17995_v45 = vld [vmem:[#allocation3 + $0xa8] sm:$0xff]  ;;  %v19894_v41 = vld [vmem:[#allocation95_spill] sm:$0xff]  ;;  %v19897_v12 = vld [vmem:[#allocation82_spill] sm:$0xff] }
 0x3b4   : > { %v17997_v1 = vld [vmem:[#allocation3 + $0xa7] sm:$0xff]  ;;  %v17999_v15 = vld [vmem:[#allocation3 + $0xaf] sm:$0xff]  ;;  %7464 = vst.msk [vmem:[#allocation3 + $0xe8] sm:$0xff] %vm353_vm3, %v7431_v7  ;;  %v7434_v57 = vmax.f32 %v7402_v52, 0.0  ;;  %v7401_v22 = vadd.f32 %v17765_v62, %v7362_v43  ;;  %v7365_v4 = vadd.f32 %v14005_v16, %v6977_v26  ;;  %14050 = vmatprep.mubr.msk.f32.mxu0 %vm353_vm3, %v17995_v45  ;;  %v6979_v26 = vadd.f32 %v17812_v36, %v6591_v25 }
 0x3b5   : > { %v19891_v55 = vld [vmem:[#allocation93_spill] sm:$0xff]  ;;  %14106 = vmatprep.mubr.msk.f32.mxu1 %vm353_vm3, %v17997_v1  ;;  %v7269_v27 = vpop.f32.mrf.mxu1  ;;  %14051 = vmatmul.mubr.msk.f32.gmra.mxu0 %vm353_vm3, %v18008_v49 }
 0x3b6   : > { %v6590_v8 = vadd.f32 %v19891_v55, %v6201_v5  ;;  %v19892_v40 = vld [vmem:[#allocation25_spill] sm:$0xff]  ;;  %v6593_v5 = vadd.f32 %v19894_v41, %v6204_v11  ;;  %14107 = vmatmul.mubr.msk.f32.gmra.mxu1 %vm353_vm3, %v17999_v15  ;;  %7467 = vst.msk [vmem:[#allocation3 + $0x110] sm:$0xff] %vm353_vm3, %v7434_v57  ;;  %v7433_v7 = vmax.f32 %v7401_v22, 0.0  ;;  %v7404_v52 = vadd.f32 %v17765_v62, %v7365_v4  ;;  %v19898_v11 = vld [vmem:[#allocation79_spill] sm:$0xff]  ;;  %v19899_v55 = vld [vmem:[#allocation96_spill] sm:$0xff] }
 0x3b7   : > { %v6203_v3 = vadd.f32 %v19892_v40, %v5815_v50  ;;  %v19893_v48 = vld [vmem:[#allocation45_spill] sm:$0xff]  ;;  %v7364_v43 = vadd.f32 %v7269_v27, %v6976_v61  ;;  %v19895_v50 = vld [vmem:[#allocation67_spill] sm:$0xff]  ;;  %v6206_v16 = vadd.f32 %v19898_v11, %v19897_v12  ;;  %v14008_v41 = vpop.f32.mrf.mxu1  ;;  %v18041_v4 = vld [vmem:[#allocation3 + $0xd0] sm:$0xff] }
 0x3b8   : > { %v5817_v29 = vadd.f32 %v19893_v48, %v5429_v14  ;;  %v5431_v28 = vadd.f32 %v19895_v50, %v5043_v63  ;;  %v19896_v14 = vld [vmem:[#allocation11_spill] sm:$0xff]  ;;  %v18026_v48 = vpop.f32.mrf.mxu0  ;;  %v18028_v36 = vld [vmem:[#allocation3 + $0xc8] sm:$0xff]  ;;  %v6978_v61 = vadd.f32 %v17836_v30, %v6590_v8  ;;  %7466 = vst.msk [vmem:[#allocation3 + $0x108] sm:$0xff] %vm353_vm3, %v7433_v7  ;;  %v7436_v63 = vmax.f32 %v7404_v52, 0.0  ;;  %19900 = vst [vmem:[#allocation30_spill] sm:$0xff] %v18041_v4 }
 0x3b9   : > { %v5045_v9 = vadd.f32 %v19896_v14, %v17829_v44  ;;  %v6592_v40 = vadd.f32 %v19899_v55, %v6203_v3  ;;  %v18030_v25 = vld [vmem:[#allocation3 + $0xc7] sm:$0xff]  ;;  %v18032_v57 = vld [vmem:[#allocation3 + $0xcf] sm:$0xff]  ;;  %v7403_v44 = vadd.f32 %v17765_v62, %v7364_v43  ;;  %v7367_v22 = vadd.f32 %v14008_v41, %v6979_v26  ;;  %14053 = vmatprep.mubr.msk.f32.mxu0 %vm353_vm3, %v18028_v36  ;;  %v19901_v3 = vld [vmem:[#allocation47_spill] sm:$0xff]  ;;  %v7279_v8 = vpop.f32.mrf.mxu1 }
 0x3ba   : > { %14109 = vmatprep.mubr.msk.f32.mxu1 %vm353_vm3, %v18030_v25  ;;  %v6205_v27 = vadd.f32 %v19901_v3, %v5817_v29  ;;  %v19902_v50 = vld [vmem:[#allocation83_spill] sm:$0xff]  ;;  %v6981_v30 = vadd.f32 %v17860_v54, %v6593_v5  ;;  %14054 = vmatmul.mubr.msk.f32.gmra.mxu0 %vm353_vm3, %v18041_v4  ;;  %v19903_v26 = vld [vmem:[#allocation98_spill] sm:$0xff]  ;;  %7469 = vst.msk [vmem:[#allocation3 + $0x130] sm:$0xff] %vm353_vm3, %v7436_v63  ;;  %v19907_v55 = vld [vmem:[#allocation81_spill] sm:$0xff] }
 0x3bb   : > { %v5819_v14 = vadd.f32 %v19902_v50, %v5431_v28  ;;  %14110 = vmatmul.mubr.msk.f32.gmra.mxu1 %vm353_vm3, %v18032_v57  ;;  %v6595_v7 = vadd.f32 %v19903_v26, %v6206_v16  ;;  %v7435_v52 = vmax.f32 %v7403_v44, 0.0  ;;  %v7406_v43 = vadd.f32 %v17765_v62, %v7367_v22  ;;  %v19904_v29 = vld [vmem:[#allocation35_spill] sm:$0xff]  ;;  %v19905_v28 = vld [vmem:[#allocation66_spill] sm:$0xff]  ;;  %v18059_v50 = vpop.f32.mrf.mxu0  ;;  %v14011_v4 = vpop.f32.mrf.mxu1  ;;  %v18061_v16 = vld [vmem:[#allocation3 + $0xe8] sm:$0xff] }
 0x3bc   : > { %v7366_v12 = vadd.f32 %v7279_v8, %v6978_v61  ;;  %v5433_v11 = vadd.f32 %v19904_v29, %v5045_v9  ;;  %v5047_v54 = vadd.f32 %v19905_v28, %v17843_v32  ;;  %v19906_v5 = vld [vmem:[#allocation46_spill] sm:$0xff]  ;;  %v6980_v3 = vadd.f32 %v17894_v56, %v6592_v40  ;;  %19908 = vst [vmem:[#allocation57_spill] sm:$0xff] %v18061_v16  ;;  %v18063_v63 = vld [vmem:[#allocation3 + $0xe7] sm:$0xff]  ;;  %v19909_v61 = vld [vmem:[#allocation99_spill] sm:$0xff] }
 0x3bd   : > { %v6208_v41 = vadd.f32 %v19907_v55, %v19906_v5  ;;  %v18065_v44 = vld [vmem:[#allocation3 + $0xef] sm:$0xff]  ;;  %v6594_v22 = vadd.f32 %v19909_v61, %v6205_v27  ;;  %7468 = vst.msk [vmem:[#allocation3 + $0x128] sm:$0xff] %vm353_vm3, %v7435_v52  ;;  %v7438_v9 = vmax.f32 %v7406_v43, 0.0  ;;  %v7369_v8 = vadd.f32 %v14011_v4, %v6981_v30  ;;  %14056 = vmatprep.mubr.msk.f32.mxu0 %vm353_vm3, %v18061_v16  ;;  %v19911_v40 = vld [vmem:[#allocation48_spill] sm:$0xff]  ;;  %v7289_v5 = vpop.f32.mrf.mxu1 }
 0x3be   : > { %v7405_v32 = vadd.f32 %v17765_v62, %v7366_v12  ;;  %14112 = vmatprep.mubr.msk.f32.mxu1 %vm353_vm3, %v18063_v63  ;;  %v18074_v56 = vld [vmem:[#allocation3 + $0xf0] sm:$0xff]  ;;  %v6207_v26 = vadd.f32 %v19911_v40, %v5819_v14  ;;  %v19912_v29 = vld [vmem:[#allocation85_spill] sm:$0xff]  ;;  %v6983_v4 = vadd.f32 %v17927_v31, %v6595_v7  ;;  %v7368_v43 = vadd.f32 %v7289_v5, %v6980_v3 }
 0x3bf   : > { %19910 = vst [vmem:[#allocation22_spill] sm:$0xff] %v18074_v56  ;;  %v5821_v28 = vadd.f32 %v19912_v29, %v5433_v11  ;;  %v6597_v27 = vadd.f32 %v17715_v21, %v6208_v41  ;;  %14057 = vmatmul.mubr.msk.f32.gmra.mxu0 %vm353_vm3, %v18074_v56  ;;  %14113 = vmatmul.mubr.msk.f32.gmra.mxu1 %vm353_vm3, %v18065_v44  ;;  %7471 = vst.msk [vmem:[#allocation3 + $0x150] sm:$0xff] %vm353_vm3, %v7438_v9  ;;  %v19913_v14 = vld [vmem:[#allocation14_spill] sm:$0xff]  ;;  %v19914_v11 = vld [vmem:[#allocation69_spill] sm:$0xff]  ;;  %v6931_v29 = vpop.f32.mrf.mxu0  ;;  %v14014_v56 = vpop.f32.mrf.mxu1 }
 0x3c0   : > { %v7437_v30 = vmax.f32 %v7405_v32, 0.0  ;;  %v7408_v52 = vadd.f32 %v17765_v62, %v7369_v8  ;;  %v5435_v12 = vadd.f32 %v19913_v14, %v5047_v54  ;;  %v5049_v21 = vadd.f32 %v19914_v11, %v17853_v24  ;;  %v19915_v55 = vld [vmem:[#allocation49_spill] sm:$0xff]  ;;  %v19916_v41 = vld [vmem:[#allocation84_spill] sm:$0xff]  ;;  %v19922_v11 = vld [vmem:[#allocation6_spill] sm:$0xff] }
 0x3c1   : > { %v6210_v61 = vadd.f32 %v19916_v41, %v19915_v55  ;;  %v6596_v40 = vadd.f32 %v17718_v42, %v6207_v26  ;;  %v18092_v16 = vld [vmem:[#allocation3 + $0x108] sm:$0xff]  ;;  %v6982_v3 = vadd.f32 %v17960_v23, %v6594_v22  ;;  %v7407_v24 = vadd.f32 %v17765_v62, %v7368_v43  ;;  %v18105_v42 = vld [vmem:[#allocation3 + $0x110] sm:$0xff]  ;;  %v19918_v26 = vld [vmem:[#allocation51_spill] sm:$0xff]  ;;  %v7299_v22 = vpop.f32.mrf.mxu1  ;;  %v13971_v55 = vpop.f32.mrf.mxu0 }
 0x3c2   : > { %v18094_v31 = vld [vmem:[#allocation3 + $0x107] sm:$0xff]  ;;  %v18096_v7 = vld [vmem:[#allocation3 + $0x10f] sm:$0xff]  ;;  %7470 = vst.msk [vmem:[#allocation3 + $0x148] sm:$0xff] %vm353_vm3, %v7437_v30  ;;  %v7440_v54 = vmax.f32 %v7408_v52, 0.0  ;;  %v7371_v9 = vadd.f32 %v14014_v56, %v6983_v4  ;;  %14059 = vmatprep.mubr.msk.f32.mxu0 %vm353_vm3, %v18092_v16  ;;  %v5823_v5 = vadd.f32 %v19918_v26, %v5435_v12  ;;  %v6985_v23 = vadd.f32 %v17993_v51, %v6597_v27  ;;  %v19921_v12 = vld [vmem:[#allocation7_spill] sm:$0xff] }
 0x3c3   : > { %14115 = vmatprep.mubr.msk.f32.mxu1 %vm353_vm3, %v18094_v31  ;;  %v19917_v32 = vld [vmem:[#allocation5_spill] sm:$0xff]  ;;  %14060 = vmatmul.mubr.msk.f32.gmra.mxu0 %vm353_vm3, %v18105_v42  ;;  %v19919_v56 = vld [vmem:[#allocation100_spill] sm:$0xff]  ;;  %v7439_v30 = vmax.f32 %v7407_v24, 0.0  ;;  %v7370_v43 = vadd.f32 %v7299_v22, %v6982_v3  ;;  %v6212_v51 = vadd.f32 %v19922_v11, %v19921_v12  ;;  %v6984_v27 = vadd.f32 %v18026_v48, %v6596_v40  ;;  %v14017_v41 = vpop.f32.mrf.mxu1  ;;  %v18134_v48 = vld [vmem:[#allocation3 + $0x130] sm:$0xff] }
 0x3c4   : > { %v6209_v8 = vadd.f32 %v19917_v32, %v5821_v28  ;;  %14116 = vmatmul.mubr.msk.f32.gmra.mxu1 %vm353_vm3, %v18096_v7  ;;  %v6599_v4 = vadd.f32 %v19919_v56, %v6210_v61  ;;  %7473 = vst.msk [vmem:[#allocation3 + $0x170] sm:$0xff] %vm353_vm3, %v7440_v54  ;;  %v7410_v52 = vadd.f32 %v17765_v62, %v7371_v9  ;;  %v19920_v28 = vld [vmem:[#allocation13_spill] sm:$0xff]  ;;  %v19923_v40 = vld [vmem:[#allocation26_spill] sm:$0xff]  ;;  %v19927_v12 = vld [vmem:[#allocation16_spill] sm:$0xff] }
 0x3c5   : > { %v5437_v14 = vadd.f32 %v19920_v28, %v5049_v21  ;;  %v18121_v32 = vld [vmem:[#allocation3 + $0x128] sm:$0xff]  ;;  %7472 = vst.msk [vmem:[#allocation3 + $0x168] sm:$0xff] %vm353_vm3, %v7439_v30  ;;  %v7409_v21 = vadd.f32 %v17765_v62, %v7370_v43  ;;  %v7373_v24 = vadd.f32 %v14017_v41, %v6985_v23  ;;  %v6211_v9 = vadd.f32 %v19923_v40, %v5823_v5  ;;  %v19924_v22 = vld [vmem:[#allocation50_spill] sm:$0xff]  ;;  %v19926_v5 = vld [vmem:[#allocation28_spill] sm:$0xff] }
 0x3c6   : > { %v18123_v26 = vld [vmem:[#allocation3 + $0x127] sm:$0xff]  ;;  %v18125_v61 = vld [vmem:[#allocation3 + $0x12f] sm:$0xff]  ;;  %v6598_v54 = vadd.f32 %v17725_v20, %v6209_v8  ;;  %v7442_v3 = vmax.f32 %v7410_v52, 0.0  ;;  %14062 = vmatprep.mubr.msk.f32.mxu0 %vm353_vm3, %v18121_v32  ;;  %v7309_v8 = vpop.f32.mrf.mxu1  ;;  %v6987_v23 = vadd.f32 %v18059_v50, %v6599_v4 }
 0x3c7   : > { %14118 = vmatprep.mubr.msk.f32.mxu1 %vm353_vm3, %v18123_v26  ;;  %v5825_v56 = vadd.f32 %v19924_v22, %v5437_v14  ;;  %v19925_v28 = vld [vmem:[#allocation101_spill] sm:$0xff]  ;;  %14063 = vmatmul.mubr.msk.f32.gmra.mxu0 %vm353_vm3, %v18134_v48  ;;  %v7441_v30 = vmax.f32 %v7409_v21, 0.0  ;;  %v7412_v52 = vadd.f32 %v17765_v62, %v7373_v24  ;;  %v7372_v43 = vadd.f32 %v7309_v8, %v6984_v27  ;;  %v19928_v21 = vld [vmem:[#allocation27_spill] sm:$0xff] }
 0x3c8   : > { %v6601_v20 = vadd.f32 %v19925_v28, %v6212_v51  ;;  %14119 = vmatmul.mubr.msk.f32.gmra.mxu1 %vm353_vm3, %v18125_v61  ;;  %7475 = vst.msk [vmem:[#allocation3 + $0x190] sm:$0xff] %vm353_vm3, %v7442_v3  ;;  %v6214_v14 = vadd.f32 %v19927_v12, %v19926_v5  ;;  %v6600_v11 = vadd.f32 %v17736_v33, %v6211_v9  ;;  %v6941_v51 = vpop.f32.mrf.mxu0  ;;  %v14020_v41 = vpop.f32.mrf.mxu1  ;;  %v18161_v33 = vld [vmem:[#allocation3 + $0x150] sm:$0xff] }
 0x3c9   : > { %v18149_v40 = vld [vmem:[#allocation3 + $0x148] sm:$0xff]  ;;  %v6986_v50 = vadd.f32 %v6931_v29, %v6598_v54  ;;  %7474 = vst.msk [vmem:[#allocation3 + $0x188] sm:$0xff] %vm353_vm3, %v7441_v30  ;;  %v7444_v4 = vmax.f32 %v7412_v52, 0.0  ;;  %v7411_v3 = vadd.f32 %v17765_v62, %v7372_v43  ;;  %v7375_v27 = vadd.f32 %v14020_v41, %v6987_v23 }
 0x3ca   : > { %v18151_v22 = vld [vmem:[#allocation3 + $0x147] sm:$0xff]  ;;  %v18153_v28 = vld [vmem:[#allocation3 + $0x14f] sm:$0xff]  ;;  %14065 = vmatprep.mubr.msk.f32.mxu0 %vm353_vm3, %v18149_v40  ;;  %v6213_v24 = vadd.f32 %v19928_v21, %v5825_v56  ;;  %v6989_v9 = vadd.f32 %v13971_v55, %v6601_v20  ;;  %v13974_v8 = vpop.f32.mrf.mxu0  ;;  %v7319_v5 = vpop.f32.mrf.mxu1  ;;  %v6603_v29 = vadd.f32 %v17745_v60, %v6214_v14  ;;  %v6988_v52 = vadd.f32 %v6941_v51, %v6600_v11 }
 0x3cb   : > { %14121 = vmatprep.mubr.msk.f32.mxu1 %vm353_vm3, %v18151_v22  ;;  %14066 = vmatmul.mubr.msk.f32.gmra.mxu0 %vm353_vm3, %v18161_v33  ;;  %7477 = vst.msk [vmem:[#allocation3 + $0x1b0] sm:$0xff] %vm353_vm3, %v7444_v4  ;;  %v7443_v54 = vmax.f32 %v7411_v3, 0.0  ;;  %v7414_v23 = vadd.f32 %v17765_v62, %v7375_v27  ;;  %v7374_v30 = vadd.f32 %v7319_v5, %v6986_v50  ;;  %v18184_v11 = vld [vmem:[#allocation3 + $0x170] sm:$0xff] }
 0x3cc   : > { %14122 = vmatmul.mubr.msk.f32.gmra.mxu1 %vm353_vm3, %v18153_v28  ;;  %v14023_v43 = vpop.f32.mrf.mxu1  ;;  %v18171_v56 = vld [vmem:[#allocation3 + $0x168] sm:$0xff]  ;;  %v6602_v12 = vadd.f32 %v17751_v39, %v6213_v24  ;;  %v6951_v51 = vpop.f32.mrf.mxu0  ;;  %v6991_v39 = vadd.f32 %v13974_v8, %v6603_v29 }
 0x3cd   : > { %v18173_v55 = vld [vmem:[#allocation3 + $0x167] sm:$0xff]  ;;  %v18175_v20 = vld [vmem:[#allocation3 + $0x16f] sm:$0xff]  ;;  %7476 = vst.msk [vmem:[#allocation3 + $0x1a8] sm:$0xff] %vm353_vm3, %v7443_v54  ;;  %v7446_v41 = vmax.f32 %v7414_v23, 0.0  ;;  %v7413_v60 = vadd.f32 %v17765_v62, %v7374_v30  ;;  %v7377_v14 = vadd.f32 %v14023_v43, %v6989_v9  ;;  %14068 = vmatprep.mubr.msk.f32.mxu0 %vm353_vm3, %v18171_v56 }
 0x3ce   : > { %14124 = vmatprep.mubr.msk.f32.mxu1 %vm353_vm3, %v18173_v55  ;;  %v7329_v50 = vpop.f32.mrf.mxu1  ;;  %v6990_v54 = vadd.f32 %v6951_v51, %v6602_v12 }
 0x3cf   : > { %14069 = vmatmul.mubr.msk.f32.gmra.mxu0 %vm353_vm3, %v18184_v11  ;;  %7479 = vst.msk [vmem:[#allocation3 + $0x1d0] sm:$0xff] %vm353_vm3, %v7446_v41  ;;  %v7445_v4 = vmax.f32 %v7413_v60, 0.0  ;;  %v7416_v3 = vadd.f32 %v17765_v62, %v7377_v14  ;;  %v7376_v27 = vadd.f32 %v7329_v50, %v6988_v52  ;;  %v18204_v29 = vld [vmem:[#allocation3 + $0x190] sm:$0xff] }
 0x3d0   : > { %14125 = vmatmul.mubr.msk.f32.gmra.mxu1 %vm353_vm3, %v18175_v20  ;;  %v14026_v21 = vpop.f32.mrf.mxu1  ;;  %v18192_v24 = vld [vmem:[#allocation3 + $0x188] sm:$0xff] }
 0x3d1   : > { %v18194_v9 = vld [vmem:[#allocation3 + $0x187] sm:$0xff]  ;;  %v18196_v5 = vld [vmem:[#allocation3 + $0x18f] sm:$0xff]  ;;  %7478 = vst.msk [vmem:[#allocation3 + $0x1c8] sm:$0xff] %vm353_vm3, %v7445_v4  ;;  %v7448_v23 = vmax.f32 %v7416_v3, 0.0  ;;  %v7415_v30 = vadd.f32 %v17765_v62, %v7376_v27  ;;  %v7379_v8 = vadd.f32 %v14026_v21, %v6991_v39  ;;  %14071 = vmatprep.mubr.msk.f32.mxu0 %vm353_vm3, %v18192_v24 }
 0x3d2   : > { %14127 = vmatprep.mubr.msk.f32.mxu1 %vm353_vm3, %v18194_v9  ;;  %v7339_v52 = vpop.f32.mrf.mxu1  ;;  %v18224_v4 = vld [vmem:[#allocation3 + $0x1b0] sm:$0xff] }
 0x3d3   : > { %14072 = vmatmul.mubr.msk.f32.gmra.mxu0 %vm353_vm3, %v18204_v29  ;;  %7481 = vst.msk [vmem:[#allocation3 + $0x1f0] sm:$0xff] %vm353_vm3, %v7448_v23  ;;  %v7447_v43 = vmax.f32 %v7415_v30, 0.0  ;;  %v7418_v12 = vadd.f32 %v17765_v62, %v7379_v8  ;;  %v7378_v41 = vadd.f32 %v7339_v52, %v6990_v54  ;;  %v8199_v23 = vld [vmem:[#allocation3 + $0x9] sm:$0xff] }
 0x3d4   : > { %14128 = vmatmul.mubr.msk.f32.gmra.mxu1 %vm353_vm3, %v18196_v5  ;;  %v18212_v60 = vld [vmem:[#allocation3 + $0x1a8] sm:$0xff] }
 0x3d5   : > { %v18214_v14 = vld [vmem:[#allocation3 + $0x1a7] sm:$0xff]  ;;  %v18216_v51 = vld [vmem:[#allocation3 + $0x1af] sm:$0xff]  ;;  %7480 = vst.msk [vmem:[#allocation3 + $0x1e8] sm:$0xff] %vm353_vm3, %v7447_v43  ;;  %v7450_v50 = vmax.f32 %v7418_v12, 0.0  ;;  %v7417_v39 = vadd.f32 %v17765_v62, %v7378_v41  ;;  %14074 = vmatprep.mubr.msk.f32.mxu0 %vm353_vm3, %v18212_v60 }
 0x3d6   : > { %14130 = vmatprep.mubr.msk.f32.mxu1 %vm353_vm3, %v18214_v14  ;;  %v18242_v54 = vld [vmem:[#allocation3 + $0x1d0] sm:$0xff] }
 0x3d7   : > { %14075 = vmatmul.mubr.msk.f32.gmra.mxu0 %vm353_vm3, %v18224_v4  ;;  %7483 = vst.msk [vmem:[#allocation3 + $0x210] sm:$0xff] %vm353_vm3, %v7450_v50  ;;  %v7449_v3 = vmax.f32 %v7417_v39, 0.0  ;;  %v8200_v12 = vld [vmem:[#allocation3 + $0x11] sm:$0xff]  ;;  %v18273_v50 = vld [vmem:[#allocation3 + $0x29] sm:$0xff] }
 0x3d8   : > { %14131 = vmatmul.mubr.msk.f32.gmra.mxu1 %vm353_vm3, %v18216_v51  ;;  %v18231_v27 = vld [vmem:[#allocation3 + $0x1c8] sm:$0xff]  ;;  %v12000_v41 = vld [vmem:[%s19371_s5 + $0x90] sm:$0xff] }
 0x3d9   : > { %v18233_v62 = vld [vmem:[#allocation3 + $0x1c7] sm:$0xff]  ;;  %v18235_v21 = vld [vmem:[#allocation3 + $0x1cf] sm:$0xff]  ;;  %7482 = vst.msk [vmem:[#allocation3 + $0x208] sm:$0xff] %vm353_vm3, %v7449_v3  ;;  %14077 = vmatprep.mubr.msk.f32.mxu0 %vm353_vm3, %v18231_v27  ;;  %v14093_v3 = vpop.f32.mrf.mxu1 }
 0x3da   : > { %14133 = vmatprep.mubr.msk.f32.mxu1 %vm353_vm3, %v18233_v62  ;;  %v18258_v43 = vld [vmem:[#allocation3 + $0x1f0] sm:$0xff]  ;;  %v19930_v39 = vld [vmem:[#allocation53_spill] sm:$0xff] }
 0x3db   : > { %14078 = vmatmul.mubr.msk.f32.gmra.mxu0 %vm353_vm3, %v18242_v54  ;;  %19929 = vst [vmem:[#allocation36_spill] sm:$0xff] %v18258_v43 }
 0x3dc   : > { %14134 = vmatmul.mubr.msk.f32.gmra.mxu1 %vm353_vm3, %v18235_v21  ;;  %v18248_v30 = vld [vmem:[#allocation3 + $0x1e8] sm:$0xff] }
 0x3dd   : > { %v18250_v8 = vld [vmem:[#allocation3 + $0x1e7] sm:$0xff]  ;;  %v18252_v52 = vld [vmem:[#allocation3 + $0x1ef] sm:$0xff]  ;;  %14080 = vmatprep.mubr.msk.f32.mxu0 %vm353_vm3, %v18248_v30 }
 0x3de   : > { %14136 = vmatprep.mubr.msk.f32.mxu1 %vm353_vm3, %v18250_v8 }
 0x3df   : > { %14081 = vmatmul.mubr.msk.f32.gmra.mxu0 %vm353_vm3, %v18258_v43  ;;  %v18282_v43 = vld [vmem:[#allocation3 + $0x31] sm:$0xff] }
 0x3e0   : > { %14137 = vmatmul.mubr.msk.f32.gmra.mxu1 %vm353_vm3, %v18252_v52  ;;  %14147 = vmatprep.mubr.msk.f32.mxu0 %vm353_vm3, %v8199_v23 }
 0x3e1   : > { %14203 = vmatprep.mubr.msk.f32.mxu1 %vm353_vm3, %v17864_v6 }
 0x3e3   : > { %14148 = vmatmul.mubr.msk.f32.vlgmr.msra.gmra.mxu0 %vm353_vm3, %v8200_v12  ;;  %v12036_v12 = vld [vmem:[%s19371_s5 + $0xb0] sm:$0xff] }
 0x3e4   : > { %14204 = vmatmul.mubr.msk.f32.vlgmr.msra.gmra.mxu1 %vm353_vm3, %v17866_v0  ;;  %14252 = vmatpush3.msra.mxu0 %v19930_v39  ;;  %v11999_v0 = vld [vmem:[%s19371_s5 + $0x88] sm:$0xff]  ;;  %v18319_v39 = vld [vmem:[#allocation3 + $0x71] sm:$0xff] }
 0x3e5   : > { %14150 = vmatprep.mubr.msk.f32.mxu0 %vm353_vm3, %v18273_v50  ;;  %14206 = vmatprep.mubr.msk.f32.mxu1 %vm353_vm3, %v17898_v46  ;;  %v18295_v46 = vld [vmem:[#allocation3 + $0x49] sm:$0xff] }
 0x3e6   : > { %14253 = vmatprep.subr.mxu0 %v12000_v41  ;;  %14308 = vmatpush3.msra.mxu1 %v17797_v18  ;;  %v18301_v18 = vld [vmem:[#allocation3 + $0x51] sm:$0xff] }
 0x3e7   : > { %14254 = vmatpush3.msra.mxu0 %v12000_v41  ;;  %14309 = vmatprep.subr.mxu1 %v12036_v12  ;;  %v11998_v41 = vld [vmem:[%s19371_s5 + $0x80] sm:$0xff] }
 0x3e8   : > { %14151 = vmatmul.mubr.msk.f32.gmra.mxu0 %vm353_vm3, %v18282_v43  ;;  %14207 = vmatmul.mubr.msk.f32.gmra.mxu1 %vm353_vm3, %v17900_v47  ;;  %v12035_v47 = vld [vmem:[%s19371_s5 + $0xa8] sm:$0xff] }
 0x3e9   : > { %v14037_v6 = vpop.f32.mrf.mxu0  ;;  %14153 = vmatprep.mubr.msk.f32.mxu0 %vm353_vm3, %v18295_v46  ;;  %14209 = vmatprep.mubr.msk.f32.mxu1 %vm353_vm3, %v17931_v19  ;;  %v18313_v19 = vld [vmem:[#allocation3 + $0x69] sm:$0xff] }
 0x3ea   : > { %v18280_v23 = vadd.f32 %v14093_v3, %v14037_v6  ;;  %14255 = vmatprep.subr.mxu0 %v11999_v0  ;;  %14310 = vmatpush3.msra.mxu1 %v12036_v12  ;;  %v12034_v6 = vld [vmem:[%s19371_s5 + $0xa0] sm:$0xff]  ;;  %v18340_v3 = vld [vmem:[#allocation3 + $0x91] sm:$0xff]  ;;  %v18364_v12 = vld [vmem:[#allocation3 + $0xc9] sm:$0xff] }
 0x3eb   : > { %14256 = vmatpush3.msra.mxu0 %v11999_v0  ;;  %14311 = vmatprep.subr.mxu1 %v12035_v47  ;;  %v18345_v0 = vld [vmem:[%s19371_s5 + $0xf8] sm:$0xff] }
 0x3ec   : > { %14154 = vmatmul.mubr.msk.f32.gmra.mxu0 %vm353_vm3, %v18301_v18  ;;  %14210 = vmatmul.mubr.msk.f32.gmra.mxu1 %vm353_vm3, %v17933_v38  ;;  %v18327_v38 = vld [vmem:[%s19371_s5 + $0xd8] sm:$0xff] }
 0x3ed   : > { %14156 = vmatprep.mubr.msk.f32.mxu0 %vm353_vm3, %v18313_v19  ;;  %14212 = vmatprep.mubr.msk.f32.mxu1 %vm353_vm3, %v17964_v10  ;;  %v18333_v10 = vld [vmem:[#allocation3 + $0x89] sm:$0xff] }
 0x3ee   : > { %14257 = vmatprep.subr.mxu0 %v11998_v41  ;;  %14312 = vmatpush3.msra.mxu1 %v12035_v47 }
 0x3ef   : > { %14258 = vmatpush3.msra.mxu0 %v11998_v41  ;;  %14313 = vmatprep.subr.mxu1 %v12034_v6  ;;  %v18474_v41 = vld [vmem:[#allocation3 + $0x207] sm:$0xff] }
 0x3f0   : > { %14157 = vmatmul.mubr.msk.f32.gmra.mxu0 %vm353_vm3, %v18319_v39  ;;  %14213 = vmatmul.mubr.msk.f32.gmra.mxu1 %vm353_vm3, %v17966_v17  ;;  %v18351_v17 = vld [vmem:[#allocation3 + $0xa9] sm:$0xff] }
 0x3f1   : > { %14159 = vmatprep.mubr.msk.f32.mxu0 %vm353_vm3, %v18333_v10  ;;  %14215 = vmatprep.mubr.msk.f32.mxu1 %vm353_vm3, %v17997_v1  ;;  %v18358_v1 = vld [vmem:[#allocation3 + $0xb1] sm:$0xff] }
 0x3f2   : > { %14363 = vmatprep.subr.mxu0 %v18327_v38  ;;  %14314 = vmatpush3.msra.mxu1 %v12034_v6 }
 0x3f3   : > { %14419 = vmatprep.subr.mxu1 %v18345_v0 }
 0x3f4   : > { %14160 = vmatmul.mubr.msk.f32.gmra.mxu0 %vm353_vm3, %v18340_v3  ;;  %14216 = vmatmul.mubr.msk.f32.gmra.mxu1 %vm353_vm3, %v17999_v15  ;;  %v18370_v15 = vld [vmem:[#allocation3 + $0xd1] sm:$0xff] }
 0x3f5   : > { %14162 = vmatprep.mubr.msk.f32.mxu0 %vm353_vm3, %v18351_v17  ;;  %14218 = vmatprep.mubr.msk.f32.mxu1 %vm353_vm3, %v18030_v25  ;;  %v18376_v25 = vld [vmem:[#allocation3 + $0xe9] sm:$0xff] }
 0x3f8   : > { %14163 = vmatmul.mubr.msk.f32.gmra.mxu0 %vm353_vm3, %v18358_v1  ;;  %14219 = vmatmul.mubr.msk.f32.gmra.mxu1 %vm353_vm3, %v18032_v57  ;;  %v18382_v57 = vld [vmem:[#allocation3 + $0xf1] sm:$0xff] }
 0x3f9   : > { %14165 = vmatprep.mubr.msk.f32.mxu0 %vm353_vm3, %v18364_v12  ;;  %14221 = vmatprep.mubr.msk.f32.mxu1 %vm353_vm3, %v18063_v63  ;;  %v18388_v63 = vld [vmem:[#allocation3 + $0x109] sm:$0xff] }
 0x3fc   : > { %14166 = vmatmul.mubr.msk.f32.gmra.mxu0 %vm353_vm3, %v18370_v15  ;;  %14222 = vmatmul.mubr.msk.f32.gmra.mxu1 %vm353_vm3, %v18065_v44  ;;  %v18394_v44 = vld [vmem:[#allocation3 + $0x111] sm:$0xff] }
 0x3fd   : > { %14168 = vmatprep.mubr.msk.f32.mxu0 %vm353_vm3, %v18376_v25  ;;  %14224 = vmatprep.mubr.msk.f32.mxu1 %vm353_vm3, %v18094_v31  ;;  %v18400_v31 = vld [vmem:[#allocation3 + $0x129] sm:$0xff] }
 0x400   : > { %14169 = vmatmul.mubr.msk.f32.gmra.mxu0 %vm353_vm3, %v18382_v57  ;;  %14225 = vmatmul.mubr.msk.f32.gmra.mxu1 %vm353_vm3, %v18096_v7  ;;  %v18406_v7 = vld [vmem:[#allocation3 + $0x131] sm:$0xff] }
 0x401   : > { %14171 = vmatprep.mubr.msk.f32.mxu0 %vm353_vm3, %v18388_v63  ;;  %14227 = vmatprep.mubr.msk.f32.mxu1 %vm353_vm3, %v18123_v26  ;;  %v18412_v26 = vld [vmem:[#allocation3 + $0x149] sm:$0xff] }
 0x404   : > { %14172 = vmatmul.mubr.msk.f32.gmra.mxu0 %vm353_vm3, %v18394_v44  ;;  %14228 = vmatmul.mubr.msk.f32.gmra.mxu1 %vm353_vm3, %v18125_v61  ;;  %v18418_v61 = vld [vmem:[#allocation3 + $0x151] sm:$0xff] }
 0x405   : > { %14174 = vmatprep.mubr.msk.f32.mxu0 %vm353_vm3, %v18400_v31  ;;  %14230 = vmatprep.mubr.msk.f32.mxu1 %vm353_vm3, %v18151_v22  ;;  %v18424_v22 = vld [vmem:[#allocation3 + $0x169] sm:$0xff] }
 0x408   : > { %14175 = vmatmul.mubr.msk.f32.gmra.mxu0 %vm353_vm3, %v18406_v7  ;;  %14231 = vmatmul.mubr.msk.f32.gmra.mxu1 %vm353_vm3, %v18153_v28  ;;  %v18430_v28 = vld [vmem:[#allocation3 + $0x171] sm:$0xff] }
 0x409   : > { %14177 = vmatprep.mubr.msk.f32.mxu0 %vm353_vm3, %v18412_v26  ;;  %14233 = vmatprep.mubr.msk.f32.mxu1 %vm353_vm3, %v18173_v55  ;;  %v18436_v55 = vld [vmem:[#allocation3 + $0x189] sm:$0xff] }
 0x40c   : > { %14178 = vmatmul.mubr.msk.f32.gmra.mxu0 %vm353_vm3, %v18418_v61  ;;  %14234 = vmatmul.mubr.msk.f32.gmra.mxu1 %vm353_vm3, %v18175_v20  ;;  %v18442_v20 = vld [vmem:[#allocation3 + $0x191] sm:$0xff] }
 0x40d   : > { %14180 = vmatprep.mubr.msk.f32.mxu0 %vm353_vm3, %v18424_v22  ;;  %14236 = vmatprep.mubr.msk.f32.mxu1 %vm353_vm3, %v18194_v9  ;;  %v18448_v9 = vld [vmem:[#allocation3 + $0x1a9] sm:$0xff] }
 0x410   : > { %14181 = vmatmul.mubr.msk.f32.gmra.mxu0 %vm353_vm3, %v18430_v28  ;;  %14237 = vmatmul.mubr.msk.f32.gmra.mxu1 %vm353_vm3, %v18196_v5  ;;  %v18454_v5 = vld [vmem:[#allocation3 + $0x1b1] sm:$0xff] }
 0x411   : > { %14183 = vmatprep.mubr.msk.f32.mxu0 %vm353_vm3, %v18436_v55  ;;  %14239 = vmatprep.mubr.msk.f32.mxu1 %vm353_vm3, %v18214_v14  ;;  %v18460_v14 = vld [vmem:[#allocation3 + $0x1c9] sm:$0xff] }
 0x414   : > { %14184 = vmatmul.mubr.msk.f32.gmra.mxu0 %vm353_vm3, %v18442_v20  ;;  %14240 = vmatmul.mubr.msk.f32.gmra.mxu1 %vm353_vm3, %v18216_v51  ;;  %v18466_v51 = vld [vmem:[#allocation3 + $0x1d1] sm:$0xff] }
 0x415   : > { %14186 = vmatprep.mubr.msk.f32.mxu0 %vm353_vm3, %v18448_v9  ;;  %14242 = vmatprep.mubr.msk.f32.mxu1 %vm353_vm3, %v18233_v62  ;;  %v18472_v62 = vld [vmem:[#allocation3 + $0x1e9] sm:$0xff] }
 0x418   : > { %14187 = vmatmul.mubr.msk.f32.gmra.mxu0 %vm353_vm3, %v18454_v5  ;;  %14243 = vmatmul.mubr.msk.f32.gmra.mxu1 %vm353_vm3, %v18235_v21  ;;  %v18480_v21 = vld [vmem:[#allocation3 + $0x1f1] sm:$0xff] }
 0x419   : > { %14189 = vmatprep.mubr.msk.f32.mxu0 %vm353_vm3, %v18460_v14  ;;  %14245 = vmatprep.mubr.msk.f32.mxu1 %vm353_vm3, %v18250_v8  ;;  %v18482_v8 = vld [vmem:[#allocation3 + $0x20f] sm:$0xff] }
 0x41c   : > { %14190 = vmatmul.mubr.msk.f32.gmra.mxu0 %vm353_vm3, %v18466_v51  ;;  %14246 = vmatmul.mubr.msk.f32.gmra.mxu1 %vm353_vm3, %v18252_v52  ;;  %v12072_v52 = vld [vmem:[%s19371_s5 + $0xd0] sm:$0xff] }
 0x41d   : > { %14192 = vmatprep.mubr.msk.f32.mxu0 %vm353_vm3, %v18472_v62  ;;  %14248 = vmatprep.mubr.msk.f32.mxu1 %vm353_vm3, %v18474_v41 }
 0x420   : > { %14193 = vmatmul.mubr.msk.f32.gmra.mxu0 %vm353_vm3, %v18480_v21  ;;  %14249 = vmatmul.mubr.msk.f32.gmra.mxu1 %vm353_vm3, %v18482_v8 }
 0x421   : > { %14259 = vmatprep.mubr.msk.f32.mxu0 %vm353_vm3, %v17862_v37  ;;  %14315 = vmatprep.mubr.msk.f32.mxu1 %vm353_vm3, %v18273_v50  ;;  %v12071_v37 = vld [vmem:[%s19371_s5 + $0xc8] sm:$0xff] }
 0x424   : > { %14260 = vmatmul.mubr.msk.f32.vlgmr.msra.gmra.mxu0 %vm353_vm3, %v17875_v13  ;;  %14316 = vmatmul.mubr.msk.f32.vlgmr.msra.gmra.mxu1 %vm353_vm3, %v18282_v43  ;;  %v12108_v13 = vld [vmem:[%s19371_s5 + $0xf0] sm:$0xff] }
 0x425   : > { %14364 = vmatpush3.msra.mxu0 %v18327_v38  ;;  %14262 = vmatprep.mubr.msk.f32.mxu0 %vm353_vm3, %v17896_v2  ;;  %v12070_v2 = vld [vmem:[%s19371_s5 + $0xc0] sm:$0xff]  ;;  %v9765_v38 = vld [vmem:[#allocation3 + $0x8f] sm:$0xff] }
 0x426   : > { %14318 = vmatprep.mubr.msk.f32.mxu1 %vm353_vm3, %v18295_v46  ;;  %14365 = vmatprep.subr.mxu0 %v12072_v52  ;;  %v9764_v46 = vld [vmem:[#allocation3 + $0x87] sm:$0xff] }
 0x427   : > { %14366 = vmatpush3.msra.mxu0 %v12072_v52  ;;  %14420 = vmatpush3.msra.mxu1 %v18345_v0  ;;  %v10160_v52 = vld [vmem:[#allocation3 + $0xe8] sm:$0xff] }
 0x428   : > { %14263 = vmatmul.mubr.msk.f32.gmra.mxu0 %vm353_vm3, %v17909_v58  ;;  %14319 = vmatmul.mubr.msk.f32.gmra.mxu1 %vm353_vm3, %v18301_v18  ;;  %v12107_v58 = vld [vmem:[%s19371_s5 + $0xe8] sm:$0xff] }
 0x429   : > { %14265 = vmatprep.mubr.msk.f32.mxu0 %vm353_vm3, %v17929_v53  ;;  %14321 = vmatprep.mubr.msk.f32.mxu1 %vm353_vm3, %v18313_v19  ;;  %v12106_v53 = vld [vmem:[%s19371_s5 + $0xe0] sm:$0xff]  ;;  %v10154_v18 = vld [vmem:[#allocation3 + $0x88] sm:$0xff] }
 0x42a   : > { %14367 = vmatprep.subr.mxu0 %v12071_v37  ;;  %14421 = vmatprep.subr.mxu1 %v12108_v13 }
 0x42b   : > { %14368 = vmatpush3.msra.mxu0 %v12071_v37  ;;  %14422 = vmatpush3.msra.mxu1 %v12108_v13 }
 0x42c   : > { %14266 = vmatmul.mubr.msk.f32.gmra.mxu0 %vm353_vm3, %v17942_v35  ;;  %14322 = vmatmul.mubr.msk.f32.gmra.mxu1 %vm353_vm3, %v18319_v39  ;;  %v18539_v35 = vld [vmem:[%s19371_s5 + $0x118] sm:$0xff] }
 0x42d   : > { %14268 = vmatprep.mubr.msk.f32.mxu0 %vm353_vm3, %v17962_v59  ;;  %14324 = vmatprep.mubr.msk.f32.mxu1 %vm353_vm3, %v18333_v10  ;;  %v19931_v59 = vld [vmem:[#allocation30_spill] sm:$0xff] }
 0x42e   : > { %14369 = vmatprep.subr.mxu0 %v12070_v2  ;;  %14423 = vmatprep.subr.mxu1 %v12107_v58  ;;  %v10155_v10 = vld [vmem:[#allocation3 + $0x90] sm:$0xff] }
 0x42f   : > { %14370 = vmatpush3.msra.mxu0 %v12070_v2  ;;  %14424 = vmatpush3.msra.mxu1 %v12107_v58 }
 0x430   : > { %14269 = vmatmul.mubr.msk.f32.gmra.mxu0 %vm353_vm3, %v17975_v34  ;;  %14325 = vmatmul.mubr.msk.f32.gmra.mxu1 %vm353_vm3, %v18340_v3  ;;  %v19932_v34 = vld [vmem:[#allocation57_spill] sm:$0xff]  ;;  %v12142_v3 = vld [vmem:[%s19371_s5 + $0x100] sm:$0xff] }
 0x431   : > { %14271 = vmatprep.mubr.msk.f32.mxu0 %vm353_vm3, %v17995_v45  ;;  %14327 = vmatprep.mubr.msk.f32.mxu1 %vm353_vm3, %v18351_v17  ;;  %v19933_v45 = vld [vmem:[#allocation22_spill] sm:$0xff] }
 0x432   : > { %14425 = vmatprep.subr.mxu1 %v12106_v53  ;;  %14475 = vmatprep.subr.mxu0 %v18539_v35 }
 0x433   : > { %14426 = vmatpush3.msra.mxu1 %v12106_v53  ;;  %v9771_v53 = vld [vmem:[#allocation3 + $0xef] sm:$0xff] }
 0x434   : > { %14272 = vmatmul.mubr.msk.f32.gmra.mxu0 %vm353_vm3, %v18008_v49  ;;  %14328 = vmatmul.mubr.msk.f32.gmra.mxu1 %vm353_vm3, %v18358_v1  ;;  %v19934_v49 = vld [vmem:[#allocation36_spill] sm:$0xff] }
 0x435   : > { %14274 = vmatprep.mubr.msk.f32.mxu0 %vm353_vm3, %v18028_v36  ;;  %14330 = vmatprep.mubr.msk.f32.mxu1 %vm353_vm3, %v18364_v12  ;;  %v18634_v36 = vld [vmem:[#allocation3 + $0x208] sm:$0xff] }
 0x436   : > { %v9766_v1 = vld [vmem:[#allocation3 + $0xa7] sm:$0xff] }
 0x437   : > { %v10156_v12 = vld [vmem:[#allocation3 + $0xa8] sm:$0xff] }
 0x438   : > { %14275 = vmatmul.mubr.msk.f32.gmra.mxu0 %vm353_vm3, %v19931_v59  ;;  %14331 = vmatmul.mubr.msk.f32.gmra.mxu1 %vm353_vm3, %v18370_v15 }
 0x439   : > { %14277 = vmatprep.mubr.msk.f32.mxu0 %vm353_vm3, %v19932_v34  ;;  %14333 = vmatprep.mubr.msk.f32.mxu1 %vm353_vm3, %v18376_v25 }
 0x43c   : > { %14278 = vmatmul.mubr.msk.f32.gmra.mxu0 %vm353_vm3, %v19933_v45  ;;  %14334 = vmatmul.mubr.msk.f32.gmra.mxu1 %vm353_vm3, %v18382_v57  ;;  %v9772_v45 = vld [vmem:[#allocation3 + $0x107] sm:$0xff] }
 0x43d   : > { %14280 = vmatprep.mubr.msk.f32.mxu0 %vm353_vm3, %v18092_v16  ;;  %14336 = vmatprep.mubr.msk.f32.mxu1 %vm353_vm3, %v18388_v63  ;;  %v18636_v16 = vld [vmem:[#allocation3 + $0x209] sm:$0xff] }
 0x440   : > { %14281 = vmatmul.mubr.msk.f32.gmra.mxu0 %vm353_vm3, %v18105_v42  ;;  %14337 = vmatmul.mubr.msk.f32.gmra.mxu1 %vm353_vm3, %v18394_v44  ;;  %v18642_v42 = vld [vmem:[#allocation3 + $0x210] sm:$0xff] }
 0x441   : > { %14283 = vmatprep.mubr.msk.f32.mxu0 %vm353_vm3, %v18121_v32  ;;  %14339 = vmatprep.mubr.msk.f32.mxu1 %vm353_vm3, %v18400_v31  ;;  %v18644_v32 = vld [vmem:[#allocation3 + $0x211] sm:$0xff] }
 0x442   : > { %v9767_v44 = vld [vmem:[#allocation3 + $0xaf] sm:$0xff] }
 0x443   : > { %v10157_v31 = vld [vmem:[#allocation3 + $0xb0] sm:$0xff] }
 0x444   : > { %14284 = vmatmul.mubr.msk.f32.gmra.mxu0 %vm353_vm3, %v18134_v48  ;;  %14340 = vmatmul.mubr.msk.f32.gmra.mxu1 %vm353_vm3, %v18406_v7  ;;  %v9760_v48 = vld [vmem:[#allocation3 + $0x47] sm:$0xff] }
 0x445   : > { %14286 = vmatprep.mubr.msk.f32.mxu0 %vm353_vm3, %v18149_v40  ;;  %14342 = vmatprep.mubr.msk.f32.mxu1 %vm353_vm3, %v18412_v26  ;;  %v10150_v40 = vld [vmem:[#allocation3 + $0x48] sm:$0xff] }
 0x448   : > { %14287 = vmatmul.mubr.msk.f32.gmra.mxu0 %vm353_vm3, %v18161_v33  ;;  %14343 = vmatmul.mubr.msk.f32.gmra.mxu1 %vm353_vm3, %v18418_v61  ;;  %v9761_v33 = vld [vmem:[#allocation3 + $0x4f] sm:$0xff]  ;;  %v9768_v61 = vld [vmem:[#allocation3 + $0xc7] sm:$0xff] }
 0x449   : > { %14289 = vmatprep.mubr.msk.f32.mxu0 %vm353_vm3, %v18171_v56  ;;  %14345 = vmatprep.mubr.msk.f32.mxu1 %vm353_vm3, %v18424_v22  ;;  %v10151_v56 = vld [vmem:[#allocation3 + $0x50] sm:$0xff]  ;;  %v10158_v22 = vld [vmem:[#allocation3 + $0xc8] sm:$0xff] }
 0x44c   : > { %14290 = vmatmul.mubr.msk.f32.gmra.mxu0 %vm353_vm3, %v18184_v11  ;;  %14346 = vmatmul.mubr.msk.f32.gmra.mxu1 %vm353_vm3, %v18430_v28  ;;  %v12144_v11 = vld [vmem:[%s19371_s5 + $0x110] sm:$0xff] }
 0x44d   : > { %14292 = vmatprep.mubr.msk.f32.mxu0 %vm353_vm3, %v18192_v24  ;;  %14348 = vmatprep.mubr.msk.f32.mxu1 %vm353_vm3, %v18436_v55  ;;  %v9762_v24 = vld [vmem:[#allocation3 + $0x67] sm:$0xff] }
 0x450   : > { %14293 = vmatmul.mubr.msk.f32.gmra.mxu0 %vm353_vm3, %v18204_v29  ;;  %14349 = vmatmul.mubr.msk.f32.gmra.mxu1 %vm353_vm3, %v18442_v20  ;;  %v10152_v29 = vld [vmem:[#allocation3 + $0x68] sm:$0xff] }
 0x451   : > { %14295 = vmatprep.mubr.msk.f32.mxu0 %vm353_vm3, %v18212_v60  ;;  %14351 = vmatprep.mubr.msk.f32.mxu1 %vm353_vm3, %v18448_v9  ;;  %v18659_v60 = vpop.f32.mrf.mxu0 }
 0x454   : > { %14296 = vmatmul.mubr.msk.f32.gmra.mxu0 %vm353_vm3, %v18224_v4  ;;  %14352 = vmatmul.mubr.msk.f32.gmra.mxu1 %vm353_vm3, %v18454_v5  ;;  %v18661_v4 = vpop.f32.mrf.mxu1  ;;  %v9769_v5 = vld [vmem:[#allocation3 + $0xcf] sm:$0xff] }
 0x455   : > { %14298 = vmatprep.mubr.msk.f32.mxu0 %vm353_vm3, %v18231_v27  ;;  %14354 = vmatprep.mubr.msk.f32.mxu1 %vm353_vm3, %v18460_v14  ;;  %v9763_v27 = vld [vmem:[#allocation3 + $0x6f] sm:$0xff] }
 0x456   : > { %v10159_v14 = vld [vmem:[#allocation3 + $0xd0] sm:$0xff] }
 0x458   : > { %14299 = vmatmul.mubr.msk.f32.gmra.mxu0 %vm353_vm3, %v18242_v54  ;;  %14355 = vmatmul.mubr.msk.f32.gmra.mxu1 %vm353_vm3, %v18466_v51  ;;  %v10153_v54 = vld [vmem:[#allocation3 + $0x70] sm:$0xff] }
 0x459   : > { %14301 = vmatprep.mubr.msk.f32.mxu0 %vm353_vm3, %v18248_v30  ;;  %14357 = vmatprep.mubr.msk.f32.mxu1 %vm353_vm3, %v18472_v62  ;;  %v12143_v30 = vld [vmem:[%s19371_s5 + $0x108] sm:$0xff] }
 0x45c   : > { %14302 = vmatmul.mubr.msk.f32.gmra.mxu0 %vm353_vm3, %v19934_v49  ;;  %14358 = vmatmul.mubr.msk.f32.gmra.mxu1 %vm353_vm3, %v18480_v21  ;;  %v9770_v21 = vld [vmem:[#allocation3 + $0xe7] sm:$0xff] }
 0x45d   : > { %14304 = vmatprep.mubr.msk.f32.mxu0 %vm353_vm3, %v18634_v36  ;;  %14360 = vmatprep.mubr.msk.f32.mxu1 %vm353_vm3, %v18636_v16  ;;  %v10162_v49 = vld [vmem:[#allocation3 + $0x108] sm:$0xff] }
 0x460   : > { %14305 = vmatmul.mubr.msk.f32.gmra.mxu0 %vm353_vm3, %v18642_v42  ;;  %14361 = vmatmul.mubr.msk.f32.gmra.mxu1 %vm353_vm3, %v18644_v32 }
 0x461   : > { %14371 = vmatprep.mubr.msk.f32.mxu0 %vm353_vm3, %v9760_v48  ;;  %14427 = vmatprep.mubr.msk.f32.mxu1 %vm353_vm3, %v10150_v40 }
 0x464   : > { %14372 = vmatmul.mubr.msk.f32.vlgmr.msra.gmra.mxu0 %vm353_vm3, %v9761_v33  ;;  %14428 = vmatmul.mubr.msk.f32.vlgmr.msra.gmra.mxu1 %vm353_vm3, %v10151_v56 }
 0x465   : > { %14476 = vmatpush3.msra.mxu0 %v18539_v35  ;;  %14374 = vmatprep.mubr.msk.f32.mxu0 %vm353_vm3, %v9762_v24  ;;  %v14040_v43 = vpop.f32.mrf.mxu0  ;;  %v10161_v35 = vld [vmem:[#allocation3 + $0xf0] sm:$0xff] }
 0x466   : > { %14430 = vmatprep.mubr.msk.f32.mxu1 %vm353_vm3, %v10152_v29  ;;  %14477 = vmatprep.subr.mxu0 %v12144_v11  ;;  %v14096_v50 = vpop.f32.mrf.mxu1  ;;  %v10163_v24 = vld [vmem:[#allocation3 + $0x110] sm:$0xff] }
 0x467   : > { %14478 = vmatpush3.msra.mxu0 %v12144_v11  ;;  %v18669_v47 = vadd.f32 %v14096_v50, %v14040_v43  ;;  %v7729_v19 = vpop.f32.mrf.mxu0  ;;  %v9773_v11 = vld [vmem:[#allocation3 + $0x10f] sm:$0xff] }
 0x468   : > { %14375 = vmatmul.mubr.msk.f32.gmra.mxu0 %vm353_vm3, %v9763_v27  ;;  %14431 = vmatmul.mubr.msk.f32.gmra.mxu1 %vm353_vm3, %v10153_v54  ;;  %v8050_v39 = vpop.f32.mrf.mxu1  ;;  %v9774_v54 = vld [vmem:[#allocation3 + $0x127] sm:$0xff] }
 0x469   : > { %14377 = vmatprep.mubr.msk.f32.mxu0 %vm353_vm3, %v9764_v46  ;;  %14433 = vmatprep.mubr.msk.f32.mxu1 %vm353_vm3, %v10154_v18  ;;  %v18673_v6 = vadd.f32 %v8050_v39, %v7729_v19  ;;  %v14043_v0 = vpop.f32.mrf.mxu0  ;;  %v9775_v19 = vld [vmem:[#allocation3 + $0x12f] sm:$0xff] }
 0x46a   : > { %14479 = vmatprep.subr.mxu0 %v12143_v30  ;;  %v14099_v17 = vpop.f32.mrf.mxu1  ;;  %v10165_v39 = vld [vmem:[#allocation3 + $0x130] sm:$0xff] }
 0x46b   : > { %14480 = vmatpush3.msra.mxu0 %v12143_v30  ;;  %v18680_v15 = vadd.f32 %v14099_v17, %v14043_v0  ;;  %v7739_v25 = vpop.f32.mrf.mxu0  ;;  %v10164_v30 = vld [vmem:[#allocation3 + $0x128] sm:$0xff] }
 0x46c   : > { %14378 = vmatmul.mubr.msk.f32.gmra.mxu0 %vm353_vm3, %v9765_v38  ;;  %14434 = vmatmul.mubr.msk.f32.gmra.mxu1 %vm353_vm3, %v10155_v10  ;;  %v8060_v57 = vpop.f32.mrf.mxu1  ;;  %v10166_v0 = vld [vmem:[#allocation3 + $0x148] sm:$0xff] }
 0x46d   : > { %14380 = vmatprep.mubr.msk.f32.mxu0 %vm353_vm3, %v9766_v1  ;;  %14436 = vmatprep.mubr.msk.f32.mxu1 %vm353_vm3, %v10156_v12  ;;  %v18684_v63 = vadd.f32 %v8060_v57, %v7739_v25  ;;  %v14046_v7 = vpop.f32.mrf.mxu0  ;;  %v9777_v57 = vld [vmem:[#allocation3 + $0x14f] sm:$0xff] }
 0x46e   : > { %14481 = vmatprep.subr.mxu0 %v12142_v3  ;;  %v14102_v26 = vpop.f32.mrf.mxu1 }
 0x46f   : > { %14482 = vmatpush3.msra.mxu0 %v12142_v3  ;;  %v18688_v28 = vadd.f32 %v14102_v26, %v14046_v7  ;;  %v7749_v55 = vpop.f32.mrf.mxu0  ;;  %v9776_v3 = vld [vmem:[#allocation3 + $0x147] sm:$0xff] }
 0x470   : > { %14381 = vmatmul.mubr.msk.f32.gmra.mxu0 %vm353_vm3, %v9767_v44  ;;  %14437 = vmatmul.mubr.msk.f32.gmra.mxu1 %vm353_vm3, %v10157_v31  ;;  %v8070_v20 = vpop.f32.mrf.mxu1  ;;  %v10167_v44 = vld [vmem:[#allocation3 + $0x150] sm:$0xff]  ;;  %v9778_v26 = vld [vmem:[#allocation3 + $0x167] sm:$0xff] }
 0x471   : > { %14383 = vmatprep.mubr.msk.f32.mxu0 %vm353_vm3, %v9768_v61  ;;  %14439 = vmatprep.mubr.msk.f32.mxu1 %vm353_vm3, %v10158_v22  ;;  %v18692_v9 = vadd.f32 %v8070_v20, %v7749_v55  ;;  %v14049_v51 = vpop.f32.mrf.mxu0  ;;  %v10168_v61 = vld [vmem:[#allocation3 + $0x168] sm:$0xff] }
 0x472   : > { %v14105_v62 = vpop.f32.mrf.mxu1 }
 0x473   : > { %v18696_v37 = vadd.f32 %v14105_v62, %v14049_v51  ;;  %v7759_v13 = vpop.f32.mrf.mxu0  ;;  %v10169_v51 = vld [vmem:[#allocation3 + $0x170] sm:$0xff] }
 0x474   : > { %14384 = vmatmul.mubr.msk.f32.gmra.mxu0 %vm353_vm3, %v9769_v5  ;;  %14440 = vmatmul.mubr.msk.f32.gmra.mxu1 %vm353_vm3, %v10159_v14  ;;  %v8080_v2 = vpop.f32.mrf.mxu1  ;;  %v9779_v14 = vld [vmem:[#allocation3 + $0x16f] sm:$0xff] }
 0x475   : > { %14386 = vmatprep.mubr.msk.f32.mxu0 %vm353_vm3, %v9770_v21  ;;  %14442 = vmatprep.mubr.msk.f32.mxu1 %vm353_vm3, %v10160_v52  ;;  %v18700_v58 = vadd.f32 %v8080_v2, %v7759_v13  ;;  %v14052_v59 = vpop.f32.mrf.mxu0  ;;  %v9780_v52 = vld [vmem:[#allocation3 + $0x187] sm:$0xff] }
 0x476   : > { %v14108_v34 = vpop.f32.mrf.mxu1  ;;  %v10170_v13 = vld [vmem:[#allocation3 + $0x188] sm:$0xff] }
 0x477   : > { %v18704_v48 = vadd.f32 %v14108_v34, %v14052_v59  ;;  %v7769_v40 = vpop.f32.mrf.mxu0  ;;  %v9781_v34 = vld [vmem:[#allocation3 + $0x18f] sm:$0xff] }
 0x478   : > { %14387 = vmatmul.mubr.msk.f32.gmra.mxu0 %vm353_vm3, %v9771_v53  ;;  %14443 = vmatmul.mubr.msk.f32.gmra.mxu1 %vm353_vm3, %v10161_v35  ;;  %v8090_v33 = vpop.f32.mrf.mxu1 }
 0x479   : > { %14389 = vmatprep.mubr.msk.f32.mxu0 %vm353_vm3, %v9772_v45  ;;  %14445 = vmatprep.mubr.msk.f32.mxu1 %vm353_vm3, %v10162_v49  ;;  %v18708_v56 = vadd.f32 %v8090_v33, %v7769_v40  ;;  %v10171_v45 = vld [vmem:[#allocation3 + $0x190] sm:$0xff]  ;;  %v9782_v33 = vld [vmem:[#allocation3 + $0x1a7] sm:$0xff] }
 0x47a   : > { %v14055_v29 = vpop.f32.mrf.mxu0 }
 0x47b   : > { %v14111_v27 = vpop.f32.mrf.mxu1 }
 0x47c   : > { %14390 = vmatmul.mubr.msk.f32.gmra.mxu0 %vm353_vm3, %v9773_v11  ;;  %14446 = vmatmul.mubr.msk.f32.gmra.mxu1 %vm353_vm3, %v10163_v24  ;;  %v18712_v43 = vadd.f32 %v14111_v27, %v14055_v29  ;;  %v7779_v50 = vpop.f32.mrf.mxu0  ;;  %v10172_v11 = vld [vmem:[#allocation3 + $0x1a8] sm:$0xff] }
 0x47d   : > { %14392 = vmatprep.mubr.msk.f32.mxu0 %vm353_vm3, %v9774_v54  ;;  %14448 = vmatprep.mubr.msk.f32.mxu1 %vm353_vm3, %v10164_v30  ;;  %v8100_v46 = vpop.f32.mrf.mxu1  ;;  %v9783_v30 = vld [vmem:[#allocation3 + $0x1af] sm:$0xff] }
 0x47e   : > { %v18716_v18 = vadd.f32 %v8100_v46, %v7779_v50  ;;  %v10173_v50 = vld [vmem:[#allocation3 + $0x1b0] sm:$0xff] }
 0x47f   : > { %v14058_v38 = vpop.f32.mrf.mxu0  ;;  %v14114_v10 = vpop.f32.mrf.mxu1 }
 0x480   : > { %14393 = vmatmul.mubr.msk.f32.gmra.mxu0 %vm353_vm3, %v9775_v19  ;;  %14449 = vmatmul.mubr.msk.f32.gmra.mxu1 %vm353_vm3, %v10165_v39  ;;  %v18720_v17 = vadd.f32 %v14114_v10, %v14058_v38  ;;  %v9784_v39 = vld [vmem:[#allocation3 + $0x1c7] sm:$0xff] }
 0x481   : > { %14395 = vmatprep.mubr.msk.f32.mxu0 %vm353_vm3, %v9776_v3  ;;  %14451 = vmatprep.mubr.msk.f32.mxu1 %vm353_vm3, %v10166_v0  ;;  %v7789_v1 = vpop.f32.mrf.mxu0  ;;  %v8110_v12 = vpop.f32.mrf.mxu1  ;;  %v10174_v38 = vld [vmem:[#allocation3 + $0x1c8] sm:$0xff] }
 0x482   : > { %v18724_v25 = vadd.f32 %v8110_v12, %v7789_v1  ;;  %v9785_v12 = vld [vmem:[#allocation3 + $0x1cf] sm:$0xff] }
 0x483   : > { %v14061_v31 = vpop.f32.mrf.mxu0 }
 0x484   : > { %v14117_v7 = vpop.f32.mrf.mxu1  ;;  %14396 = vmatmul.mubr.msk.f32.gmra.mxu0 %vm353_vm3, %v9777_v57  ;;  %14452 = vmatmul.mubr.msk.f32.gmra.mxu1 %vm353_vm3, %v10167_v44  ;;  %v10175_v57 = vld [vmem:[#allocation3 + $0x1d0] sm:$0xff] }
 0x485   : > { %v18728_v22 = vadd.f32 %v14117_v7, %v14061_v31  ;;  %14398 = vmatprep.mubr.msk.f32.mxu0 %vm353_vm3, %v9778_v26  ;;  %14454 = vmatprep.mubr.msk.f32.mxu1 %vm353_vm3, %v10168_v61  ;;  %v7799_v55 = vpop.f32.mrf.mxu0  ;;  %v9786_v7 = vld [vmem:[#allocation3 + $0x1e7] sm:$0xff] }
 0x486   : > { %v8120_v20 = vpop.f32.mrf.mxu1  ;;  %v10176_v26 = vld [vmem:[#allocation3 + $0x1e8] sm:$0xff] }
 0x487   : > { %v18732_v5 = vadd.f32 %v8120_v20, %v7799_v55  ;;  %v14064_v62 = vpop.f32.mrf.mxu0 }
 0x488   : > { %v14120_v21 = vpop.f32.mrf.mxu1  ;;  %14399 = vmatmul.mubr.msk.f32.gmra.mxu0 %vm353_vm3, %v9779_v14  ;;  %14455 = vmatmul.mubr.msk.f32.gmra.mxu1 %vm353_vm3, %v10169_v51  ;;  %v9787_v51 = vld [vmem:[#allocation3 + $0x1ef] sm:$0xff] }
 0x489   : > { %v18736_v2 = vadd.f32 %v14120_v21, %v14064_v62  ;;  %14401 = vmatprep.mubr.msk.f32.mxu0 %vm353_vm3, %v9780_v52  ;;  %14457 = vmatprep.mubr.msk.f32.mxu1 %vm353_vm3, %v10170_v13  ;;  %v7809_v53 = vpop.f32.mrf.mxu0  ;;  %v10177_v62 = vld [vmem:[#allocation3 + $0x1f0] sm:$0xff] }
 0x48a   : > { %v8130_v35 = vpop.f32.mrf.mxu1 }
 0x48b   : > { %v18740_v59 = vadd.f32 %v8130_v35, %v7809_v53  ;;  %v14067_v49 = vpop.f32.mrf.mxu0 }
 0x48c   : > { %v14123_v40 = vpop.f32.mrf.mxu1  ;;  %14402 = vmatmul.mubr.msk.f32.gmra.mxu0 %vm353_vm3, %v9781_v34  ;;  %14458 = vmatmul.mubr.msk.f32.gmra.mxu1 %vm353_vm3, %v10171_v45  ;;  %v9790_v34 = vld [vmem:[#allocation3 + $0x227] sm:$0xff] }
 0x48d   : > { %v18744_v24 = vadd.f32 %v14123_v40, %v14067_v49  ;;  %14404 = vmatprep.mubr.msk.f32.mxu0 %vm353_vm3, %v9782_v33  ;;  %14460 = vmatprep.mubr.msk.f32.mxu1 %vm353_vm3, %v10172_v11  ;;  %v7819_v29 = vpop.f32.mrf.mxu0  ;;  %v10180_v45 = vld [vmem:[#allocation3 + $0x228] sm:$0xff] }
 0x48e   : > { %v8140_v27 = vpop.f32.mrf.mxu1 }
 0x48f   : > { %v18748_v54 = vadd.f32 %v8140_v27, %v7819_v29  ;;  %v14070_v46 = vpop.f32.mrf.mxu0 }
 0x490   : > { %v14126_v19 = vpop.f32.mrf.mxu1  ;;  %14405 = vmatmul.mubr.msk.f32.gmra.mxu0 %vm353_vm3, %v9783_v30  ;;  %14461 = vmatmul.mubr.msk.f32.gmra.mxu1 %vm353_vm3, %v10173_v50 }
 0x491   : > { %v18752_v10 = vadd.f32 %v14126_v19, %v14070_v46  ;;  %14407 = vmatprep.mubr.msk.f32.mxu0 %vm353_vm3, %v9784_v39  ;;  %14463 = vmatprep.mubr.msk.f32.mxu1 %vm353_vm3, %v10174_v38  ;;  %v7829_v3 = vpop.f32.mrf.mxu0 }
 0x492   : > { %v8150_v0 = vpop.f32.mrf.mxu1 }
 0x493   : > { %v18756_v1 = vadd.f32 %v8150_v0, %v7829_v3  ;;  %v14073_v44 = vpop.f32.mrf.mxu0  ;;  %v10541_v3 = vld [vmem:[#allocation3 + $0x51] sm:$0xff] }
 0x494   : > { %v14129_v31 = vpop.f32.mrf.mxu1  ;;  %14408 = vmatmul.mubr.msk.f32.gmra.mxu0 %vm353_vm3, %v9785_v12  ;;  %14464 = vmatmul.mubr.msk.f32.gmra.mxu1 %vm353_vm3, %v10175_v57  ;;  %v10542_v57 = vld [vmem:[#allocation3 + $0x69] sm:$0xff] }
 0x495   : > { %v18760_v61 = vadd.f32 %v14129_v31, %v14073_v44  ;;  %14410 = vmatprep.mubr.msk.f32.mxu0 %vm353_vm3, %v9786_v7  ;;  %14466 = vmatprep.mubr.msk.f32.mxu1 %vm353_vm3, %v10176_v26  ;;  %v7839_v55 = vpop.f32.mrf.mxu0  ;;  %v8041_v44 = vadd.f32 %v18661_v4, %v18659_v60 }
 0x496   : > { %v8160_v20 = vpop.f32.mrf.mxu1 }
 0x497   : > { %v18764_v14 = vadd.f32 %v8160_v20, %v7839_v55  ;;  %v14076_v21 = vpop.f32.mrf.mxu0 }
 0x498   : > { %v14132_v52 = vpop.f32.mrf.mxu1  ;;  %14411 = vmatmul.mubr.msk.f32.gmra.mxu0 %vm353_vm3, %v9787_v51  ;;  %14467 = vmatmul.mubr.msk.f32.gmra.mxu1 %vm353_vm3, %v10177_v62  ;;  %v10543_v51 = vld [vmem:[#allocation3 + $0x71] sm:$0xff] }
 0x499   : > { %v18768_v13 = vadd.f32 %v14132_v52, %v14076_v21  ;;  %14413 = vmatprep.mubr.msk.f32.mxu0 %vm353_vm3, %v18474_v41  ;;  %14469 = vmatprep.mubr.msk.f32.mxu1 %vm353_vm3, %v18634_v36  ;;  %v7849_v53 = vpop.f32.mrf.mxu0  ;;  %v9791_v41 = vld [vmem:[#allocation3 + $0x22f] sm:$0xff] }
 0x49a   : > { %v8170_v35 = vpop.f32.mrf.mxu1  ;;  %v10181_v36 = vld [vmem:[#allocation3 + $0x230] sm:$0xff] }
 0x49b   : > { %v18774_v49 = vadd.f32 %v8170_v35, %v7849_v53  ;;  %v14079_v40 = vpop.f32.mrf.mxu0  ;;  %v10544_v52 = vld [vmem:[#allocation3 + $0x89] sm:$0xff] }
 0x49c   : > { %v14135_v33 = vpop.f32.mrf.mxu1  ;;  %14414 = vmatmul.mubr.msk.f32.gmra.mxu0 %vm353_vm3, %v18482_v8  ;;  %14470 = vmatmul.mubr.msk.f32.gmra.mxu1 %vm353_vm3, %v18642_v42  ;;  %v10540_v8 = vld [vmem:[#allocation3 + $0x49] sm:$0xff] }
 0x49d   : > { %v18780_v11 = vadd.f32 %v14135_v33, %v14079_v40  ;;  %14416 = vmatprep.mubr.msk.f32.mxu0 %vm353_vm3, %v9790_v34  ;;  %14472 = vmatprep.mubr.msk.f32.mxu1 %vm353_vm3, %v10180_v45  ;;  %v7859_v29 = vpop.f32.mrf.mxu0  ;;  %v10545_v45 = vld [vmem:[#allocation3 + $0x91] sm:$0xff] }
 0x49e   : > { %v8180_v27 = vpop.f32.mrf.mxu1 }
 0x49f   : > { %v18784_v30 = vadd.f32 %v8180_v27, %v7859_v29  ;;  %v14082_v50 = vpop.f32.mrf.mxu0 }
 0x4a0   : > { %v14138_v46 = vpop.f32.mrf.mxu1  ;;  %14417 = vmatmul.mubr.msk.f32.gmra.mxu0 %vm353_vm3, %v9791_v41  ;;  %14473 = vmatmul.mubr.msk.f32.gmra.mxu1 %vm353_vm3, %v10181_v36  ;;  %v10546_v41 = vld [vmem:[#allocation3 + $0xa9] sm:$0xff] }
 0x4a1   : > { %v18788_v42 = vadd.f32 %v14138_v46, %v14082_v50  ;;  %14483 = vmatprep.mubr.msk.f32.mxu0 %vm353_vm3, %v10540_v8  ;;  %v7869_v19 = vpop.f32.mrf.mxu0  ;;  %v10547_v8 = vld [vmem:[#allocation3 + $0xb1] sm:$0xff] }
 0x4a2   : > { %v8190_v39 = vpop.f32.mrf.mxu1 }
 0x4a3   : > { %v18791_v38 = vadd.f32 %v8190_v39, %v7869_v19  ;;  %v14149_v0 = vpop.f32.mrf.mxu0  ;;  %v10548_v39 = vld [vmem:[#allocation3 + $0xc9] sm:$0xff] }
 0x4a4   : > { %v14205_v12 = vpop.f32.mrf.mxu1  ;;  %14484 = vmatmul.mubr.msk.f32.vlgmr.msra.gmra.mxu0 %vm353_vm3, %v10541_v3  ;;  %v8558_v31 = vadd.f32 %v14149_v0, %v18280_v23 }
 0x4a5   : > { %14486 = vmatprep.mubr.msk.f32.mxu0 %vm353_vm3, %v10542_v57  ;;  %v8398_v7 = vpop.f32.mrf.mxu0 }
 0x4a6   : > { %v8788_v26 = vpop.f32.mrf.mxu1  ;;  %v18798_v55 = vadd.f32 %v14205_v12, %v8558_v31  ;;  %v8557_v20 = vadd.f32 %v8398_v7, %v8041_v44  ;;  %v10549_v31 = vld [vmem:[#allocation3 + $0xd1] sm:$0xff] }
 0x4a8   : > { %v14152_v62 = vpop.f32.mrf.mxu0  ;;  %v14208_v21 = vpop.f32.mrf.mxu1  ;;  %14487 = vmatmul.mubr.msk.f32.gmra.mxu0 %vm353_vm3, %v10543_v51  ;;  %v18801_v53 = vadd.f32 %v8788_v26, %v8557_v20  ;;  %v10550_v26 = vld [vmem:[#allocation3 + $0xe9] sm:$0xff] }
 0x4a9   : > { %v8560_v35 = vadd.f32 %v14152_v62, %v18669_v47  ;;  %14489 = vmatprep.mubr.msk.f32.mxu0 %vm353_vm3, %v10544_v52 }
 0x4aa   : > { %v8408_v23 = vpop.f32.mrf.mxu0  ;;  %v8798_v60 = vpop.f32.mrf.mxu1 }
 0x4ab   : > { %v18805_v4 = vadd.f32 %v14208_v21, %v8560_v35  ;;  %v8559_v34 = vadd.f32 %v8408_v23, %v18673_v6  ;;  %v10551_v35 = vld [vmem:[#allocation3 + $0xf1] sm:$0xff] }
 0x4ac   : > { %v14155_v40 = vpop.f32.mrf.mxu0  ;;  %v14211_v33 = vpop.f32.mrf.mxu1  ;;  %14490 = vmatmul.mubr.msk.f32.gmra.mxu0 %vm353_vm3, %v10545_v45 }
 0x4ad   : > { %v18809_v36 = vadd.f32 %v8798_v60, %v8559_v34  ;;  %v8562_v29 = vadd.f32 %v14155_v40, %v18680_v15  ;;  %14492 = vmatprep.mubr.msk.f32.mxu0 %vm353_vm3, %v10546_v41  ;;  %v10552_v60 = vld [vmem:[#allocation3 + $0x109] sm:$0xff] }
 0x4ae   : > { %v8418_v47 = vpop.f32.mrf.mxu0  ;;  %v8808_v27 = vpop.f32.mrf.mxu1 }
 0x4af   : > { %v18813_v50 = vadd.f32 %v14211_v33, %v8562_v29  ;;  %v8561_v46 = vadd.f32 %v8418_v47, %v18684_v63  ;;  %v10553_v29 = vld [vmem:[#allocation3 + $0x111] sm:$0xff] }
 0x4b0   : > { %v14158_v6 = vpop.f32.mrf.mxu0  ;;  %v14214_v19 = vpop.f32.mrf.mxu1  ;;  %14493 = vmatmul.mubr.msk.f32.gmra.mxu0 %vm353_vm3, %v10547_v8 }
 0x4b1   : > { %v18817_v3 = vadd.f32 %v8808_v27, %v8561_v46  ;;  %v8564_v0 = vadd.f32 %v14158_v6, %v18688_v28  ;;  %14495 = vmatprep.mubr.msk.f32.mxu0 %vm353_vm3, %v10548_v39  ;;  %v10554_v27 = vld [vmem:[#allocation3 + $0x129] sm:$0xff] }
 0x4b2   : > { %v8428_v15 = vpop.f32.mrf.mxu0  ;;  %v8818_v12 = vpop.f32.mrf.mxu1 }
 0x4b3   : > { %v18821_v57 = vadd.f32 %v14214_v19, %v8564_v0  ;;  %v8563_v44 = vadd.f32 %v8428_v15, %v18692_v9  ;;  %v10555_v0 = vld [vmem:[#allocation3 + $0x131] sm:$0xff] }
 0x4b4   : > { %v14161_v63 = vpop.f32.mrf.mxu0  ;;  %v14217_v7 = vpop.f32.mrf.mxu1  ;;  %14496 = vmatmul.mubr.msk.f32.gmra.mxu0 %vm353_vm3, %v10549_v31 }
 0x4b5   : > { %v18825_v20 = vadd.f32 %v8818_v12, %v8563_v44  ;;  %v8566_v51 = vadd.f32 %v14161_v63, %v18696_v37  ;;  %14498 = vmatprep.mubr.msk.f32.mxu0 %vm353_vm3, %v10550_v26  ;;  %v10556_v12 = vld [vmem:[#allocation3 + $0x149] sm:$0xff] }
 0x4b6   : > { %v8438_v28 = vpop.f32.mrf.mxu0  ;;  %v8828_v62 = vpop.f32.mrf.mxu1 }
 0x4b7   : > { %v18829_v21 = vadd.f32 %v14217_v7, %v8566_v51  ;;  %v8565_v52 = vadd.f32 %v8438_v28, %v18700_v58  ;;  %v10557_v51 = vld [vmem:[#allocation3 + $0x151] sm:$0xff] }
 0x4b8   : > { %v14164_v9 = vpop.f32.mrf.mxu0  ;;  %v14220_v23 = vpop.f32.mrf.mxu1  ;;  %14499 = vmatmul.mubr.msk.f32.gmra.mxu0 %vm353_vm3, %v10551_v35 }
 0x4b9   : > { %v18833_v34 = vadd.f32 %v8828_v62, %v8565_v52  ;;  %v8568_v45 = vadd.f32 %v14164_v9, %v18704_v48  ;;  %14501 = vmatprep.mubr.msk.f32.mxu0 %vm353_vm3, %v10552_v60  ;;  %v10558_v62 = vld [vmem:[#allocation3 + $0x169] sm:$0xff] }
 0x4ba   : > { %v8448_v37 = vpop.f32.mrf.mxu0  ;;  %v8838_v40 = vpop.f32.mrf.mxu1 }
 0x4bb   : > { %v18837_v33 = vadd.f32 %v14220_v23, %v8568_v45  ;;  %v8567_v41 = vadd.f32 %v8448_v37, %v18708_v56  ;;  %v10559_v45 = vld [vmem:[#allocation3 + $0x171] sm:$0xff] }
 0x4bc   : > { %v14167_v58 = vpop.f32.mrf.mxu0  ;;  %v14223_v47 = vpop.f32.mrf.mxu1  ;;  %14502 = vmatmul.mubr.msk.f32.gmra.mxu0 %vm353_vm3, %v10553_v29 }
 0x4bd   : > { %v18841_v46 = vadd.f32 %v8838_v40, %v8567_v41  ;;  %v8570_v8 = vadd.f32 %v14167_v58, %v18712_v43  ;;  %14504 = vmatprep.mubr.msk.f32.mxu0 %vm353_vm3, %v10554_v27  ;;  %v10560_v40 = vld [vmem:[#allocation3 + $0x189] sm:$0xff] }
 0x4be   : > { %v8458_v48 = vpop.f32.mrf.mxu0  ;;  %v8848_v6 = vpop.f32.mrf.mxu1 }
 0x4bf   : > { %v18845_v19 = vadd.f32 %v14223_v47, %v8570_v8  ;;  %v8569_v39 = vadd.f32 %v8458_v48, %v18716_v18  ;;  %v10561_v8 = vld [vmem:[#allocation3 + $0x191] sm:$0xff] }
 0x4c0   : > { %v14170_v56 = vpop.f32.mrf.mxu0  ;;  %v14226_v15 = vpop.f32.mrf.mxu1  ;;  %14505 = vmatmul.mubr.msk.f32.gmra.mxu0 %vm353_vm3, %v10555_v0 }
 0x4c1   : > { %v18849_v44 = vadd.f32 %v8848_v6, %v8569_v39  ;;  %v8572_v31 = vadd.f32 %v14170_v56, %v18720_v17  ;;  %14507 = vmatprep.mubr.msk.f32.mxu0 %vm353_vm3, %v10556_v12  ;;  %v10562_v6 = vld [vmem:[#allocation3 + $0x1a9] sm:$0xff] }
 0x4c2   : > { %v8468_v43 = vpop.f32.mrf.mxu0  ;;  %v8858_v63 = vpop.f32.mrf.mxu1 }
 0x4c3   : > { %v18853_v7 = vadd.f32 %v14226_v15, %v8572_v31  ;;  %v8571_v26 = vadd.f32 %v8468_v43, %v18724_v25  ;;  %v10563_v31 = vld [vmem:[#allocation3 + $0x1b1] sm:$0xff] }
 0x4c4   : > { %v14173_v18 = vpop.f32.mrf.mxu0  ;;  %v14229_v28 = vpop.f32.mrf.mxu1  ;;  %14508 = vmatmul.mubr.msk.f32.gmra.mxu0 %vm353_vm3, %v10557_v51 }
 0x4c5   : > { %v18857_v52 = vadd.f32 %v8858_v63, %v8571_v26  ;;  %v8574_v35 = vadd.f32 %v14173_v18, %v18728_v22  ;;  %14510 = vmatprep.mubr.msk.f32.mxu0 %vm353_vm3, %v10558_v62  ;;  %v10564_v63 = vld [vmem:[#allocation3 + $0x1c9] sm:$0xff] }
 0x4c6   : > { %v8478_v17 = vpop.f32.mrf.mxu0  ;;  %v8868_v9 = vpop.f32.mrf.mxu1 }
 0x4c7   : > { %v18861_v23 = vadd.f32 %v14229_v28, %v8574_v35  ;;  %v8573_v60 = vadd.f32 %v8478_v17, %v18732_v5  ;;  %v10565_v35 = vld [vmem:[#allocation3 + $0x1d1] sm:$0xff] }
 0x4c8   : > { %v14176_v25 = vpop.f32.mrf.mxu0  ;;  %v14232_v37 = vpop.f32.mrf.mxu1  ;;  %14511 = vmatmul.mubr.msk.f32.gmra.mxu0 %vm353_vm3, %v10559_v45 }
 0x4c9   : > { %v18865_v41 = vadd.f32 %v8868_v9, %v8573_v60  ;;  %v8576_v29 = vadd.f32 %v14176_v25, %v18736_v2  ;;  %14513 = vmatprep.mubr.msk.f32.mxu0 %vm353_vm3, %v10560_v40  ;;  %v10566_v9 = vld [vmem:[#allocation3 + $0x1e9] sm:$0xff] }
 0x4ca   : > { %v8488_v22 = vpop.f32.mrf.mxu0  ;;  %v8878_v58 = vpop.f32.mrf.mxu1 }
 0x4cb   : > { %v18869_v47 = vadd.f32 %v14232_v37, %v8576_v29  ;;  %v8575_v27 = vadd.f32 %v8488_v22, %v18740_v59  ;;  %v10567_v29 = vld [vmem:[#allocation3 + $0x1f1] sm:$0xff] }
 0x4cc   : > { %v14179_v5 = vpop.f32.mrf.mxu0  ;;  %v14235_v48 = vpop.f32.mrf.mxu1  ;;  %14514 = vmatmul.mubr.msk.f32.gmra.mxu0 %vm353_vm3, %v10561_v8 }
 0x4cd   : > { %v18873_v39 = vadd.f32 %v8878_v58, %v8575_v27  ;;  %v8578_v0 = vadd.f32 %v14179_v5, %v18744_v24  ;;  %14516 = vmatprep.mubr.msk.f32.mxu0 %vm353_vm3, %v10562_v6  ;;  %v10570_v5 = vld [vmem:[#allocation3 + $0x229] sm:$0xff] }
 0x4ce   : > { %v8498_v2 = vpop.f32.mrf.mxu0  ;;  %v8888_v56 = vpop.f32.mrf.mxu1 }
 0x4cf   : > { %v18877_v15 = vadd.f32 %v14235_v48, %v8578_v0  ;;  %v8577_v12 = vadd.f32 %v8498_v2, %v18748_v54 }
 0x4d0   : > { %v14182_v59 = vpop.f32.mrf.mxu0  ;;  %v14238_v43 = vpop.f32.mrf.mxu1  ;;  %14517 = vmatmul.mubr.msk.f32.gmra.mxu0 %vm353_vm3, %v10563_v31 }
 0x4d1   : > { %v18881_v26 = vadd.f32 %v8888_v56, %v8577_v12  ;;  %v8580_v51 = vadd.f32 %v14182_v59, %v18752_v10  ;;  %14519 = vmatprep.mubr.msk.f32.mxu0 %vm353_vm3, %v10564_v63 }
 0x4d2   : > { %v8508_v24 = vpop.f32.mrf.mxu0  ;;  %v8898_v18 = vpop.f32.mrf.mxu1 }
 0x4d3   : > { %v18885_v28 = vadd.f32 %v14238_v43, %v8580_v51  ;;  %v8579_v62 = vadd.f32 %v8508_v24, %v18756_v1 }
 0x4d4   : > { %v14185_v54 = vpop.f32.mrf.mxu0  ;;  %v14241_v17 = vpop.f32.mrf.mxu1  ;;  %14520 = vmatmul.mubr.msk.f32.gmra.mxu0 %vm353_vm3, %v10565_v35 }
 0x4d5   : > { %v18889_v60 = vadd.f32 %v8898_v18, %v8579_v62  ;;  %v8582_v45 = vadd.f32 %v14185_v54, %v18760_v61  ;;  %14522 = vmatprep.mubr.msk.f32.mxu0 %vm353_vm3, %v10566_v9 }
 0x4d6   : > { %v8518_v10 = vpop.f32.mrf.mxu0  ;;  %v8908_v25 = vpop.f32.mrf.mxu1 }
 0x4d7   : > { %v18893_v37 = vadd.f32 %v14241_v17, %v8582_v45  ;;  %v8581_v40 = vadd.f32 %v8518_v10, %v18764_v14 }
 0x4d8   : > { %v14188_v1 = vpop.f32.mrf.mxu0  ;;  %v14244_v22 = vpop.f32.mrf.mxu1  ;;  %14523 = vmatmul.mubr.msk.f32.gmra.mxu0 %vm353_vm3, %v10567_v29 }
 0x4d9   : > { %v18897_v58 = vadd.f32 %v8908_v25, %v8581_v40  ;;  %v8584_v27 = vadd.f32 %v14188_v1, %v18768_v13  ;;  %14525 = vmatprep.mubr.msk.f32.mxu0 %vm353_vm3, %v18636_v16  ;;  %v10571_v13 = vld [vmem:[#allocation3 + $0x231] sm:$0xff] }
 0x4da   : > { %v8528_v61 = vpop.f32.mrf.mxu0  ;;  %v8918_v8 = vpop.f32.mrf.mxu1 }
 0x4db   : > { %v18902_v48 = vadd.f32 %v14244_v22, %v8584_v27  ;;  %v8583_v6 = vadd.f32 %v8528_v61, %v18774_v49 }
 0x4dc   : > { %v14191_v14 = vpop.f32.mrf.mxu0  ;;  %v14247_v0 = vpop.f32.mrf.mxu1  ;;  %14526 = vmatmul.mubr.msk.f32.gmra.mxu0 %vm353_vm3, %v18644_v32 }
 0x4dd   : > { %v18907_v2 = vadd.f32 %v8918_v8, %v8583_v6  ;;  %v8586_v56 = vadd.f32 %v14191_v14, %v18780_v11  ;;  %14528 = vmatprep.mubr.msk.f32.mxu0 %vm353_vm3, %v10570_v5 }
 0x4de   : > { %v8538_v16 = vpop.f32.mrf.mxu0  ;;  %v8928_v12 = vpop.f32.mrf.mxu1 }
 0x4df   : > { %v18911_v31 = vadd.f32 %v14247_v0, %v8586_v56  ;;  %v8585_v59 = vadd.f32 %v8538_v16, %v18784_v30 }
 0x4e0   : > { %v14194_v43 = vpop.f32.mrf.mxu0  ;;  %v14250_v49 = vpop.f32.mrf.mxu1  ;;  %14529 = vmatmul.mubr.msk.f32.gmra.mxu0 %vm353_vm3, %v10571_v13 }
 0x4e1   : > { %v18915_v63 = vadd.f32 %v8928_v12, %v8585_v59  ;;  %v8588_v32 = vadd.f32 %v14194_v43, %v18788_v42 }
 0x4e2   : > { %v8548_v51 = vpop.f32.mrf.mxu0  ;;  %v8938_v24 = vpop.f32.mrf.mxu1 }
 0x4e3   : > { %v18918_v11 = vadd.f32 %v14250_v49, %v8588_v32  ;;  %v8587_v18 = vadd.f32 %v8548_v51, %v18791_v38 }
 0x4e4   : > { %v14261_v62 = vpop.f32.mrf.mxu0  ;;  %v18921_v35 = vpop.f32.mrf.mxu1 }
 0x4e5   : > { %v18923_v54 = vadd.f32 %v8938_v24, %v8587_v18  ;;  %v18926_v30 = vadd.f32 %v14261_v62, %v18798_v55 }
 0x4e6   : > { %v9178_v17 = vpop.f32.mrf.mxu0  ;;  %v18928_v9 = vpop.f32.mrf.mxu1 }
 0x4e7   : > { %v18931_v45 = vadd.f32 %v9178_v17, %v18801_v53 }
 0x4e8   : > { %v14264_v42 = vpop.f32.mrf.mxu0  ;;  %v18933_v10 = vpop.f32.mrf.mxu1 }
 0x4e9   : > { %v18936_v25 = vadd.f32 %v14264_v42, %v18805_v4 }
 0x4ea   : > { %v9188_v38 = vpop.f32.mrf.mxu0  ;;  %v18938_v40 = vpop.f32.mrf.mxu1 }
 0x4eb   : > { %v18941_v29 = vadd.f32 %v9188_v38, %v18809_v36 }
 0x4ec   : > { %v14267_v55 = vpop.f32.mrf.mxu0  ;;  %v18943_v1 = vpop.f32.mrf.mxu1 }
 0x4ed   : > { %v18946_v22 = vadd.f32 %v14267_v55, %v18813_v50 }
 0x4ee   : > { %v9198_v53 = vpop.f32.mrf.mxu0  ;;  %v18948_v27 = vpop.f32.mrf.mxu1 }
 0x4ef   : > { %v18951_v61 = vadd.f32 %v9198_v53, %v18817_v3 }
 0x4f0   : > { %v14270_v4 = vpop.f32.mrf.mxu0  ;;  %v18953_v8 = vpop.f32.mrf.mxu1 }
 0x4f1   : > { %v18956_v5 = vadd.f32 %v14270_v4, %v18821_v57 }
 0x4f2   : > { %v9208_v36 = vpop.f32.mrf.mxu0  ;;  %v18958_v6 = vpop.f32.mrf.mxu1 }
 0x4f3   : > { %v18961_v14 = vadd.f32 %v9208_v36, %v18825_v20 }
 0x4f4   : > { %v14273_v50 = vpop.f32.mrf.mxu0  ;;  %v18963_v0 = vpop.f32.mrf.mxu1 }
 0x4f5   : > { %v18966_v56 = vadd.f32 %v14273_v50, %v18829_v21 }
 0x4f6   : > { %v9218_v3 = vpop.f32.mrf.mxu0  ;;  %v18968_v13 = vpop.f32.mrf.mxu1 }
 0x4f7   : > { %v18971_v16 = vadd.f32 %v9218_v3, %v18833_v34 }
 0x4f8   : > { %v14276_v57 = vpop.f32.mrf.mxu0  ;;  %v18973_v12 = vpop.f32.mrf.mxu1 }
 0x4f9   : > { %v18976_v59 = vadd.f32 %v14276_v57, %v18837_v33 }
 0x4fa   : > { %v9228_v20 = vpop.f32.mrf.mxu0  ;;  %v18978_v43 = vpop.f32.mrf.mxu1 }
 0x4fb   : > { %v18981_v49 = vadd.f32 %v9228_v20, %v18841_v46 }
 0x4fc   : > { %v14279_v21 = vpop.f32.mrf.mxu0  ;;  %v18983_v32 = vpop.f32.mrf.mxu1 }
 0x4fd   : > { %v18986_v51 = vadd.f32 %v14279_v21, %v18845_v19 }
 0x4fe   : > { %v9238_v34 = vpop.f32.mrf.mxu0  ;;  %v18988_v24 = vpop.f32.mrf.mxu1 }
 0x4ff   : > { %v18991_v18 = vadd.f32 %v9238_v34, %v18849_v44 }
 0x500   : > { %v14282_v33 = vpop.f32.mrf.mxu0  ;;  %v18993_v62 = vpop.f32.mrf.mxu1 }
 0x501   : > { %v18996_v17 = vadd.f32 %v14282_v33, %v18853_v7 }
 0x502   : > { %v9248_v46 = vpop.f32.mrf.mxu0  ;;  %v18998_v42 = vpop.f32.mrf.mxu1 }
 0x503   : > { %19935 = vst [vmem:[#allocation8_spill] sm:$0xff] %v18998_v42  ;;  %v19001_v38 = vadd.f32 %v9248_v46, %v18857_v52 }
 0x504   : > { %v14285_v19 = vpop.f32.mrf.mxu0  ;;  %v19003_v55 = vpop.f32.mrf.mxu1 }
 0x505   : > { %19936 = vst [vmem:[#allocation29_spill] sm:$0xff] %v19001_v38  ;;  %19937 = vst [vmem:[#allocation19_spill] sm:$0xff] %v19003_v55  ;;  %v19006_v53 = vadd.f32 %v14285_v19, %v18861_v23 }
 0x506   : > { %v9258_v44 = vpop.f32.mrf.mxu0  ;;  %v19008_v4 = vpop.f32.mrf.mxu1 }
 0x507   : > { %19938 = vst [vmem:[#allocation56_spill] sm:$0xff] %v19006_v53  ;;  %19939 = vst [vmem:[#allocation61_spill] sm:$0xff] %v19008_v4  ;;  %v19011_v36 = vadd.f32 %v9258_v44, %v18865_v41 }
 0x508   : > { %v14288_v7 = vpop.f32.mrf.mxu0  ;;  %v19013_v50 = vpop.f32.mrf.mxu1 }
 0x509   : > { %19940 = vst [vmem:[#allocation33_spill] sm:$0xff] %v19011_v36  ;;  %19941 = vst [vmem:[#allocation71_spill] sm:$0xff] %v19013_v50  ;;  %v19016_v3 = vadd.f32 %v14288_v7, %v18869_v47 }
 0x50a   : > { %v9268_v52 = vpop.f32.mrf.mxu0  ;;  %v19018_v57 = vpop.f32.mrf.mxu1 }
 0x50b   : > { %19942 = vst [vmem:[#allocation68_spill] sm:$0xff] %v19016_v3  ;;  %19943 = vst [vmem:[#allocation18_spill] sm:$0xff] %v19018_v57  ;;  %v19021_v20 = vadd.f32 %v9268_v52, %v18873_v39 }
 0x50c   : > { %v14291_v23 = vpop.f32.mrf.mxu0  ;;  %v19023_v21 = vpop.f32.mrf.mxu1 }
 0x50d   : > { %19944 = vst [vmem:[#allocation31_spill] sm:$0xff] %v19021_v20  ;;  %19945 = vst [vmem:[#allocation59_spill] sm:$0xff] %v19023_v21  ;;  %v19026_v34 = vadd.f32 %v14291_v23, %v18877_v15 }
 0x50e   : > { %v9278_v41 = vpop.f32.mrf.mxu0  ;;  %v19028_v33 = vpop.f32.mrf.mxu1 }
 0x50f   : > { %19946 = vst [vmem:[#allocation32_spill] sm:$0xff] %v19026_v34  ;;  %19947 = vst [vmem:[#allocation38_spill] sm:$0xff] %v19028_v33  ;;  %v19031_v46 = vadd.f32 %v9278_v41, %v18881_v26 }
 0x510   : > { %v14294_v47 = vpop.f32.mrf.mxu0  ;;  %v19033_v19 = vpop.f32.mrf.mxu1 }
 0x511   : > { %19948 = vst [vmem:[#allocation73_spill] sm:$0xff] %v19031_v46  ;;  %19949 = vst [vmem:[#allocation88_spill] sm:$0xff] %v19033_v19  ;;  %v19036_v44 = vadd.f32 %v14294_v47, %v18885_v28 }
 0x512   : > { %v9288_v39 = vpop.f32.mrf.mxu0  ;;  %v19038_v7 = vpop.f32.mrf.mxu1 }
 0x513   : > { %19950 = vst [vmem:[#allocation52_spill] sm:$0xff] %v19036_v44  ;;  %19951 = vst [vmem:[#allocation34_spill] sm:$0xff] %v19038_v7  ;;  %v19041_v52 = vadd.f32 %v9288_v39, %v18889_v60 }
 0x514   : > { %v14297_v15 = vpop.f32.mrf.mxu0  ;;  %v19043_v23 = vpop.f32.mrf.mxu1 }
 0x515   : > { %19952 = vst [vmem:[#allocation58_spill] sm:$0xff] %v19041_v52  ;;  %19953 = vst [vmem:[#allocation20_spill] sm:$0xff] %v19043_v23  ;;  %v19046_v33 = vadd.f32 %v14297_v15, %v18893_v37 }
 0x516   : > { %v9298_v26 = vpop.f32.mrf.mxu0  ;;  %v19048_v41 = vpop.f32.mrf.mxu1 }
 0x517   : > { %19954 = vst [vmem:[#allocation9_spill] sm:$0xff] %v19046_v33  ;;  %19955 = vst [vmem:[#allocation37_spill] sm:$0xff] %v19048_v41  ;;  %v19051_v19 = vadd.f32 %v9298_v26, %v18897_v58 }
 0x518   : > { %v14300_v28 = vpop.f32.mrf.mxu0  ;;  %v19053_v47 = vpop.f32.mrf.mxu1 }
 0x519   : > { %19956 = vst [vmem:[#allocation70_spill] sm:$0xff] %v19051_v19  ;;  %19957 = vst [vmem:[#allocation91_spill] sm:$0xff] %v19053_v47  ;;  %v19056_v7 = vadd.f32 %v14300_v28, %v18902_v48 }
 0x51a   : > { %v9308_v60 = vpop.f32.mrf.mxu0  ;;  %v19058_v39 = vpop.f32.mrf.mxu1 }
 0x51b   : > { %19958 = vst [vmem:[#allocation55_spill] sm:$0xff] %v19056_v7  ;;  %19959 = vst [vmem:[#allocation23_spill] sm:$0xff] %v19058_v39  ;;  %v19061_v23 = vadd.f32 %v9308_v60, %v18907_v2 }
 0x51c   : > { %v14303_v37 = vpop.f32.mrf.mxu0  ;;  %v19063_v15 = vpop.f32.mrf.mxu1 }
 0x51d   : > { %19960 = vst [vmem:[#allocation41_spill] sm:$0xff] %v19061_v23  ;;  %19961 = vst [vmem:[#allocation17_spill] sm:$0xff] %v19063_v15  ;;  %v19066_v41 = vadd.f32 %v14303_v37, %v18911_v31 }
 0x51e   : > { %v9318_v58 = vpop.f32.mrf.mxu0  ;;  %v19068_v26 = vpop.f32.mrf.mxu1 }
 0x51f   : > { %19962 = vst [vmem:[#allocation94_spill] sm:$0xff] %v19066_v41  ;;  %19963 = vst [vmem:[#allocation63_spill] sm:$0xff] %v19068_v26  ;;  %v19071_v47 = vadd.f32 %v9318_v58, %v18915_v63 }
 0x520   : > { %v14306_v48 = vpop.f32.mrf.mxu0  ;;  %v19073_v28 = vpop.f32.mrf.mxu1 }
 0x521   : > { %19964 = vst [vmem:[#allocation60_spill] sm:$0xff] %v19071_v47  ;;  %19965 = vst [vmem:[#allocation10_spill] sm:$0xff] %v19073_v28  ;;  %v19076_v39 = vadd.f32 %v14306_v48, %v18918_v11 }
 0x522   : > { %v9328_v2 = vpop.f32.mrf.mxu0  ;;  %v19078_v60 = vpop.f32.mrf.mxu1 }
 0x523   : > { %19966 = vst [vmem:[#allocation39_spill] sm:$0xff] %v19076_v39  ;;  %19967 = vst [vmem:[#allocation72_spill] sm:$0xff] %v19078_v60  ;;  %v19081_v15 = vadd.f32 %v9328_v2, %v18923_v54 }
 0x524   : > { %v14373_v31 = vpop.f32.mrf.mxu0  ;;  %v14429_v37 = vpop.f32.mrf.mxu1 }
 0x525   : > { %19968 = vst [vmem:[#allocation54_spill] sm:$0xff] %v19081_v15 }
 0x526   : > { %v9959_v41 = vpop.f32.mrf.mxu0  ;;  %v10349_v23 = vpop.f32.mrf.mxu1 }
 0x528   : > { %v14376_v26 = vpop.f32.mrf.mxu0  ;;  %v14432_v63 = vpop.f32.mrf.mxu1 }
 0x52a   : > { %v9969_v7 = vpop.f32.mrf.mxu0  ;;  %v19085_v28 = vpop.f32.mrf.mxu1 }
 0x52c   : > { %v14379_v58 = vpop.f32.mrf.mxu0  ;;  %v19091_v60 = vpop.f32.mrf.mxu1 }
 0x52e   : > { %v19083_v47 = vpop.f32.mrf.mxu0  ;;  %v19097_v15 = vpop.f32.mrf.mxu1 }
 0x530   : > { %v19087_v11 = vpop.f32.mrf.mxu0  ;;  %v19103_v33 = vpop.f32.mrf.mxu1 }
 0x532   : > { %v19089_v48 = vpop.f32.mrf.mxu0  ;;  %v19109_v46 = vpop.f32.mrf.mxu1 }
 0x534   : > { %v19093_v54 = vpop.f32.mrf.mxu0  ;;  %v19115_v57 = vpop.f32.mrf.mxu1 }
 0x536   : > { %v19095_v2 = vpop.f32.mrf.mxu0  ;;  %v19121_v3 = vpop.f32.mrf.mxu1 }
 0x538   : > { %v19099_v39 = vpop.f32.mrf.mxu0  ;;  %v19127_v55 = vpop.f32.mrf.mxu1 }
 0x53a   : > { %v19101_v19 = vpop.f32.mrf.mxu0 }
 0x53c   : > { %v19105_v52 = vpop.f32.mrf.mxu0 }
 0x53e   : > { %v19107_v44 = vpop.f32.mrf.mxu0 }
 0x53f   : > { %19969 = vst [vmem:[#allocation97_spill] sm:$0xff] %v19107_v44 }
 0x540   : > { %v19111_v21 = vpop.f32.mrf.mxu0 }
 0x541   : > { %19970 = vst [vmem:[#allocation74_spill] sm:$0xff] %v19111_v21  ;;  %v19133_v21 = vpop.f32.mrf.mxu1 }
 0x542   : > { %v19113_v34 = vpop.f32.mrf.mxu0  ;;  %19978 = vst [vmem:[#allocation24_spill] sm:$0xff] %v19133_v21 }
 0x543   : > { %19971 = vst [vmem:[#allocation15_spill] sm:$0xff] %v19113_v34 }
 0x544   : > { %v19117_v20 = vpop.f32.mrf.mxu0 }
 0x545   : > { %19972 = vst [vmem:[#allocation86_spill] sm:$0xff] %v19117_v20  ;;  %v19139_v20 = vpop.f32.mrf.mxu1 }
 0x546   : > { %v19119_v50 = vpop.f32.mrf.mxu0  ;;  %19981 = vst [vmem:[#allocation4_spill] sm:$0xff] %v19139_v20 }
 0x547   : > { %19973 = vst [vmem:[#allocation12_spill] sm:$0xff] %v19119_v50 }
 0x548   : > { %v19123_v4 = vpop.f32.mrf.mxu0 }
 0x549   : > { %19974 = vst [vmem:[#allocation62_spill] sm:$0xff] %v19123_v4  ;;  %v19145_v4 = vpop.f32.mrf.mxu1 }
 0x54a   : > { %v19125_v36 = vpop.f32.mrf.mxu0  ;;  %19984 = vst [vmem:[#allocation75_spill] sm:$0xff] %v19145_v4 }
 0x54b   : > { %19975 = vst [vmem:[#allocation76_spill] sm:$0xff] %v19125_v36 }
 0x54c   : > { %v19129_v53 = vpop.f32.mrf.mxu0 }
 0x54d   : > { %19976 = vst [vmem:[#allocation40_spill] sm:$0xff] %v19129_v53 }
 0x54e   : > { %v19131_v42 = vpop.f32.mrf.mxu0 }
 0x54f   : > { %19977 = vst [vmem:[#allocation87_spill] sm:$0xff] %v19131_v42  ;;  %v19151_v42 = vpop.f32.mrf.mxu1 }
 0x550   : > { %v19135_v34 = vpop.f32.mrf.mxu0  ;;  %19987 = vst [vmem:[#allocation80_spill] sm:$0xff] %v19151_v42 }
 0x551   : > { %19979 = vst [vmem:[#allocation42_spill] sm:$0xff] %v19135_v34  ;;  %v19161_v20 = vpop.f32.mrf.mxu1 }
 0x552   : > { %v19137_v38 = vpop.f32.mrf.mxu0 }
 0x553   : > { %19980 = vst [vmem:[#allocation89_spill] sm:$0xff] %v19137_v38  ;;  %v9728_v38 = vadd.f32 %v18921_v35, %v18926_v30 }
 0x554   : > { %v19141_v50 = vpop.f32.mrf.mxu0 }
 0x555   : > { %19982 = vst [vmem:[#allocation65_spill] sm:$0xff] %v19141_v50  ;;  %v9727_v50 = vadd.f32 %v18928_v9, %v18931_v45  ;;  %v19177_v45 = vld [vmem:[%s19372_s6] ss:$0 sm:$0xff] }
 0x556   : > { %v19143_v44 = vpop.f32.mrf.mxu0 }
 0x557   : > { %19983 = vst [vmem:[#allocation78_spill] sm:$0xff] %v19143_v44  ;;  %v10119_v44 = vadd.f32 %v14373_v31, %v9728_v38 }
 0x558   : > { %v19147_v36 = vpop.f32.mrf.mxu0 }
 0x559   : > { %19985 = vst [vmem:[#allocation90_spill] sm:$0xff] %v19147_v36  ;;  %v10118_v36 = vadd.f32 %v9959_v41, %v9727_v50  ;;  %v10509_v35 = vadd.f32 %v14429_v37, %v10119_v44 }
 0x55a   : > { %v19149_v53 = vpop.f32.mrf.mxu0 }
 0x55b   : > { %19986 = vst [vmem:[#allocation44_spill] sm:$0xff] %v19149_v53  ;;  %v9730_v53 = vadd.f32 %v18933_v10, %v18936_v25  ;;  %v9732_v10 = vadd.f32 %v18943_v1, %v18946_v22  ;;  %v10508_v25 = vadd.f32 %v10349_v23, %v10118_v36  ;;  %v9734_v1 = vadd.f32 %v18953_v8, %v18956_v5 }
 0x55c   : > { %v19153_v21 = vpop.f32.mrf.mxu0  ;;  %v9733_v23 = vadd.f32 %v18958_v6, %v18961_v14 }
 0x55d   : > { %19988 = vst [vmem:[#allocation92_spill] sm:$0xff] %v19153_v21  ;;  %v9729_v21 = vadd.f32 %v18938_v40, %v18941_v29  ;;  %v10121_v30 = vadd.f32 %v14376_v26, %v9730_v53  ;;  %v9731_v40 = vadd.f32 %v18948_v27, %v18951_v61  ;;  %v10123_v44 = vadd.f32 %v14379_v58, %v9732_v10 }
 0x55e   : > { %v19157_v34 = vpop.f32.mrf.mxu0  ;;  %v10125_v8 = vadd.f32 %v19087_v11, %v9734_v1  ;;  %v10124_v6 = vadd.f32 %v19089_v48, %v9733_v23  ;;  %v9735_v11 = vadd.f32 %v18968_v13, %v18971_v16  ;;  %v9738_v48 = vadd.f32 %v18973_v12, %v18976_v59 }
 0x55f   : > { %19989 = vst [vmem:[#allocation21_spill] sm:$0xff] %v19157_v34  ;;  %v19172_v34 = vpop.f32.mrf.mxu1  ;;  %v10120_v38 = vadd.f32 %v9969_v7, %v9729_v21  ;;  %v10511_v53 = vadd.f32 %v14432_v63, %v10121_v30  ;;  %v10122_v61 = vadd.f32 %v19083_v47, %v9731_v40  ;;  %v10513_v37 = vadd.f32 %v19091_v60, %v10123_v44 }
 0x560   : > { %v19163_v4 = vpop.f32.mrf.mxu0  ;;  %v9736_v47 = vadd.f32 %v18963_v0, %v18966_v56  ;;  %v10126_v13 = vadd.f32 %v19095_v2, %v9735_v11  ;;  %v10129_v12 = vadd.f32 %v19099_v39, %v9738_v48  ;;  %v9740_v2 = vadd.f32 %v18983_v32, %v18986_v51  ;;  %v20001_v48 = vld [vmem:[#allocation61_spill] sm:$0xff] }
 0x561   : > { %v19191_v22 = vpop.f32.mrf.mxu1  ;;  %v10510_v27 = vadd.f32 %v19085_v28, %v10120_v38  ;;  %v10514_v38 = vadd.f32 %v19109_v46, %v10124_v6  ;;  %v9739_v39 = vadd.f32 %v18988_v24, %v18991_v18 }
 0x562   : > { %v19167_v42 = vpop.f32.mrf.mxu0  ;;  %v10127_v0 = vadd.f32 %v19093_v54, %v9736_v47  ;;  %v9737_v54 = vadd.f32 %v18978_v43, %v18981_v49  ;;  %v10516_v44 = vadd.f32 %v19121_v3, %v10126_v13  ;;  %v10131_v32 = vadd.f32 %v19105_v52, %v9740_v2  ;;  %v19992_v52 = vld [vmem:[#allocation29_spill] sm:$0xff]  ;;  %v19996_v47 = vld [vmem:[#allocation56_spill] sm:$0xff] }
 0x563   : > { %v19205_v63 = vpop.f32.mrf.mxu1  ;;  %v20002_v13 = vld [vmem:[#allocation80_spill] sm:$0xff] }
 0x564   : > { %v14485_v9 = vpop.f32.mrf.mxu0  ;;  %v10517_v40 = vadd.f32 %v19115_v57, %v10127_v0  ;;  %v10128_v43 = vadd.f32 %v19101_v19, %v9737_v54  ;;  %v9742_v19 = vadd.f32 %v18993_v62, %v18996_v17 }
 0x565   : > { %v10899_v50 = vadd.f32 %v14485_v9, %v10509_v35  ;;  %v10512_v35 = vadd.f32 %v19097_v15, %v10122_v61  ;;  %v10515_v9 = vadd.f32 %v19103_v33, %v10125_v8  ;;  %v19219_v10 = vpop.f32.mrf.mxu1 }
 0x566   : > { %v10739_v29 = vpop.f32.mrf.mxu0 }
 0x567   : > { %v10938_v41 = vadd.f32 %v19177_v45, %v10899_v50  ;;  %v10898_v26 = vadd.f32 %v10739_v29, %v10508_v25  ;;  %v19233_v29 = vpop.f32.mrf.mxu1 }
 0x568   : > { %v14488_v36 = vpop.f32.mrf.mxu0 }
 0x569   : > { %10970 = vst [vmem:[%s19186_s25 + $0x8] sm:$0xff] %v10938_v41  ;;  %v10937_v21 = vadd.f32 %v19177_v45, %v10898_v26  ;;  %v10901_v7 = vadd.f32 %v14488_v36, %v10511_v53  ;;  %v10519_v26 = vadd.f32 %v19127_v55, %v10129_v12  ;;  %v19247_v1 = vpop.f32.mrf.mxu1  ;;  %v20004_v12 = vld [vmem:[#allocation68_spill] sm:$0xff] }
 0x56a   : > { %v10749_v31 = vpop.f32.mrf.mxu0 }
 0x56b   : > { %10969 = vst [vmem:[%s19186_s25] sm:$0xff] %v10937_v21  ;;  %v10940_v5 = vadd.f32 %v19177_v45, %v10901_v7  ;;  %v10900_v28 = vadd.f32 %v10749_v31, %v10510_v27  ;;  %v19990_v27 = vld [vmem:[#allocation24_spill] sm:$0xff]  ;;  %v19991_v21 = vld [vmem:[#allocation97_spill] sm:$0xff]  ;;  %v19261_v6 = vpop.f32.mrf.mxu1 }
 0x56c   : > { %v14491_v58 = vpop.f32.mrf.mxu0  ;;  %v10518_v61 = vadd.f32 %v19990_v27, %v10128_v43  ;;  %v10130_v24 = vadd.f32 %v19991_v21, %v9739_v39  ;;  %v19993_v7 = vld [vmem:[#allocation8_spill] sm:$0xff]  ;;  %v20011_v21 = vld [vmem:[#allocation59_spill] sm:$0xff] }
 0x56d   : > { %10972 = vst [vmem:[%s19186_s25 + $0x18] sm:$0xff] %v10940_v5  ;;  %v10939_v14 = vadd.f32 %v19177_v45, %v10900_v28  ;;  %v10903_v60 = vadd.f32 %v14491_v58, %v10513_v37  ;;  %v9741_v23 = vadd.f32 %v19993_v7, %v19992_v52  ;;  %v19994_v37 = vld [vmem:[#allocation4_spill] sm:$0xff]  ;;  %v19995_v5 = vld [vmem:[#allocation74_spill] sm:$0xff]  ;;  %v19997_v58 = vld [vmem:[#allocation19_spill] sm:$0xff]  ;;  %v10459_v2 = vpop.f32.mrf.mxu1 }
 0x56e   : > { %v10759_v30 = vpop.f32.mrf.mxu0  ;;  %v10521_v8 = vadd.f32 %v19994_v37, %v10131_v32  ;;  %v10133_v62 = vadd.f32 %v19995_v5, %v9742_v19  ;;  %v20006_v43 = vld [vmem:[#allocation12_spill] sm:$0xff]  ;;  %v20009_v19 = vld [vmem:[#allocation62_spill] sm:$0xff]  ;;  %v20013_v37 = vld [vmem:[#allocation73_spill] sm:$0xff] }
 0x56f   : > { %10971 = vst [vmem:[%s19186_s25 + $0x10] sm:$0xff] %v10939_v14  ;;  %v10942_v56 = vadd.f32 %v19177_v45, %v10903_v60  ;;  %v10902_v15 = vadd.f32 %v10759_v30, %v10512_v35  ;;  %v9744_v35 = vadd.f32 %v19997_v58, %v19996_v47  ;;  %v19998_v60 = vld [vmem:[#allocation75_spill] sm:$0xff]  ;;  %v20012_v7 = vld [vmem:[#allocation76_spill] sm:$0xff] }
 0x570   : > { %v14494_v25 = vpop.f32.mrf.mxu0  ;;  %v10520_v11 = vadd.f32 %v19998_v60, %v10130_v24  ;;  %v19999_v30 = vld [vmem:[#allocation15_spill] sm:$0xff] }
 0x571   : > { %10974 = vst [vmem:[%s19186_s25 + $0x28] sm:$0xff] %v10942_v56  ;;  %v10941_v16 = vadd.f32 %v19177_v45, %v10902_v15  ;;  %v10905_v33 = vadd.f32 %v14494_v25, %v10515_v9  ;;  %v10132_v9 = vadd.f32 %v19999_v30, %v9741_v23  ;;  %v20000_v15 = vld [vmem:[#allocation33_spill] sm:$0xff] }
 0x572   : > { %v10769_v50 = vpop.f32.mrf.mxu0  ;;  %v9743_v25 = vadd.f32 %v20001_v48, %v20000_v15  ;;  %v20019_v48 = vld [vmem:[#allocation58_spill] sm:$0xff] }
 0x573   : > { %10973 = vst [vmem:[%s19186_s25 + $0x20] sm:$0xff] %v10941_v16  ;;  %v10944_v59 = vadd.f32 %v19177_v45, %v10905_v33  ;;  %v10904_v46 = vadd.f32 %v10769_v50, %v10514_v38  ;;  %v10523_v16 = vadd.f32 %v20002_v13, %v10133_v62  ;;  %v20003_v33 = vld [vmem:[#allocation86_spill] sm:$0xff] }
 0x574   : > { %v14497_v53 = vpop.f32.mrf.mxu0  ;;  %v10135_v54 = vadd.f32 %v20003_v33, %v9744_v35  ;;  %v20016_v35 = vld [vmem:[#allocation52_spill] sm:$0xff]  ;;  %v20021_v33 = vld [vmem:[#allocation42_spill] sm:$0xff] }
 0x575   : > { %10976 = vst [vmem:[%s19186_s25 + $0x38] sm:$0xff] %v10944_v59  ;;  %v10943_v49 = vadd.f32 %v19177_v45, %v10904_v46  ;;  %v10907_v57 = vadd.f32 %v14497_v53, %v10517_v40  ;;  %v20005_v59 = vld [vmem:[#allocation71_spill] sm:$0xff] }
 0x576   : > { %v10779_v41 = vpop.f32.mrf.mxu0  ;;  %v9746_v46 = vadd.f32 %v20005_v59, %v20004_v12  ;;  %v20023_v12 = vld [vmem:[#allocation20_spill] sm:$0xff] }
 0x577   : > { %10975 = vst [vmem:[%s19186_s25 + $0x30] sm:$0xff] %v10943_v49  ;;  %v10946_v51 = vadd.f32 %v19177_v45, %v10907_v57  ;;  %v10906_v3 = vadd.f32 %v10779_v41, %v10516_v44  ;;  %v10522_v44 = vadd.f32 %v19161_v20, %v10132_v9  ;;  %v10134_v49 = vadd.f32 %v20006_v43, %v9743_v25  ;;  %v20007_v41 = vld [vmem:[#allocation31_spill] sm:$0xff]  ;;  %v20020_v25 = vld [vmem:[#allocation34_spill] sm:$0xff]  ;;  %v20024_v43 = vld [vmem:[#allocation89_spill] sm:$0xff] }
 0x578   : > { %v14500_v36 = vpop.f32.mrf.mxu0 }
 0x579   : > { %10978 = vst [vmem:[%s19186_s25 + $0x48] sm:$0xff] %v10946_v51  ;;  %v10945_v18 = vadd.f32 %v19177_v45, %v10906_v3  ;;  %v10909_v55 = vadd.f32 %v14500_v36, %v10519_v26  ;;  %v20008_v26 = vld [vmem:[#allocation18_spill] sm:$0xff]  ;;  %v10525_v3 = vadd.f32 %v19172_v34, %v10135_v54  ;;  %v10137_v36 = vadd.f32 %v20009_v19, %v9746_v46 }
 0x57a   : > { %v10789_v31 = vpop.f32.mrf.mxu0  ;;  %v9745_v32 = vadd.f32 %v20008_v26, %v20007_v41  ;;  %v10524_v52 = vadd.f32 %v19191_v22, %v10134_v49  ;;  %v20026_v41 = vld [vmem:[#allocation37_spill] sm:$0xff] }
 0x57b   : > { %10977 = vst [vmem:[%s19186_s25 + $0x40] sm:$0xff] %v10945_v18  ;;  %v10948_v17 = vadd.f32 %v19177_v45, %v10909_v55  ;;  %v10908_v28 = vadd.f32 %v10789_v31, %v10518_v61  ;;  %v20010_v61 = vld [vmem:[#allocation32_spill] sm:$0xff]  ;;  %v14465_v18 = vpop.f32.mrf.mxu1 }
 0x57c   : > { %v14503_v14 = vpop.f32.mrf.mxu0  ;;  %v9748_v24 = vadd.f32 %v20011_v21, %v20010_v61  ;;  %v10136_v23 = vadd.f32 %v20012_v7, %v9745_v32 }
 0x57d   : > { %10980 = vst [vmem:[%s19186_s25 + $0x58] sm:$0xff] %v10948_v17  ;;  %v10947_v0 = vadd.f32 %v19177_v45, %v10908_v28  ;;  %v10911_v56 = vadd.f32 %v14503_v14, %v10521_v8  ;;  %v20014_v8 = vld [vmem:[#allocation38_spill] sm:$0xff]  ;;  %v10527_v17 = vadd.f32 %v19205_v63, %v10137_v36  ;;  %v20015_v28 = vld [vmem:[#allocation40_spill] sm:$0xff] }
 0x57e   : > { %v10799_v38 = vpop.f32.mrf.mxu0  ;;  %v9747_v5 = vadd.f32 %v20014_v8, %v20013_v37  ;;  %v10139_v47 = vadd.f32 %v20015_v28, %v9748_v24  ;;  %v20017_v14 = vld [vmem:[#allocation88_spill] sm:$0xff]  ;;  %v10526_v9 = vadd.f32 %v19219_v10, %v10136_v23 }
 0x57f   : > { %10979 = vst [vmem:[%s19186_s25 + $0x50] sm:$0xff] %v10947_v0  ;;  %v10950_v50 = vadd.f32 %v19177_v45, %v10911_v56  ;;  %v10910_v40 = vadd.f32 %v10799_v38, %v10520_v11  ;;  %v9750_v60 = vadd.f32 %v20017_v14, %v20016_v35  ;;  %v10469_v11 = vpop.f32.mrf.mxu1  ;;  %v20018_v0 = vld [vmem:[#allocation87_spill] sm:$0xff]  ;;  %v9749_v38 = vadd.f32 %v20020_v25, %v20019_v48 }
 0x580   : > { %v14506_v53 = vpop.f32.mrf.mxu0  ;;  %v10138_v56 = vadd.f32 %v20018_v0, %v9747_v5 }
 0x581   : > { %10982 = vst [vmem:[%s19186_s25 + $0x68] sm:$0xff] %v10950_v50  ;;  %v10949_v57 = vadd.f32 %v19177_v45, %v10910_v40  ;;  %v10913_v39 = vadd.f32 %v14506_v53, %v10523_v16  ;;  %v10529_v16 = vadd.f32 %v19233_v29, %v10139_v47  ;;  %v10141_v54 = vadd.f32 %v20021_v33, %v9750_v60  ;;  %v20022_v40 = vld [vmem:[#allocation9_spill] sm:$0xff]  ;;  %v14468_v46 = vpop.f32.mrf.mxu1 }
 0x582   : > { %v10809_v51 = vpop.f32.mrf.mxu0  ;;  %v9752_v59 = vadd.f32 %v20023_v12, %v20022_v40  ;;  %v10140_v49 = vadd.f32 %v20024_v43, %v9749_v38  ;;  %v20039_v38 = vld [vmem:[#allocation92_spill] sm:$0xff]  ;;  %v20043_v43 = vld [vmem:[#allocation54_spill] sm:$0xff] }
 0x583   : > { %10981 = vst [vmem:[%s19186_s25 + $0x60] sm:$0xff] %v10949_v57  ;;  %v10952_v27 = vadd.f32 %v19177_v45, %v10913_v39  ;;  %v10912_v20 = vadd.f32 %v10809_v51, %v10522_v44  ;;  %v10528_v44 = vadd.f32 %v19247_v1, %v10138_v56  ;;  %v20025_v39 = vld [vmem:[#allocation70_spill] sm:$0xff]  ;;  %v10531_v51 = vadd.f32 %v19261_v6, %v10141_v54  ;;  %v10479_v21 = vpop.f32.mrf.mxu1  ;;  %v20037_v56 = vld [vmem:[#allocation60_spill] sm:$0xff] }
 0x584   : > { %v14509_v55 = vpop.f32.mrf.mxu0  ;;  %v9751_v26 = vadd.f32 %v20026_v41, %v20025_v39  ;;  %v20041_v54 = vld [vmem:[#allocation10_spill] sm:$0xff] }
 0x585   : > { %10984 = vst [vmem:[%s19186_s25 + $0x78] sm:$0xff] %v10952_v27  ;;  %v10951_v34 = vadd.f32 %v19177_v45, %v10912_v20  ;;  %v10915_v31 = vadd.f32 %v14509_v55, %v10525_v3  ;;  %v20027_v3 = vld [vmem:[#allocation65_spill] sm:$0xff]  ;;  %v20028_v27 = vld [vmem:[#allocation55_spill] sm:$0xff]  ;;  %v10530_v55 = vadd.f32 %v10459_v2, %v10140_v49  ;;  %v20034_v2 = vld [vmem:[#allocation94_spill] sm:$0xff]  ;;  %v14471_v35 = vpop.f32.mrf.mxu1 }
 0x586   : > { %v10819_v62 = vpop.f32.mrf.mxu0  ;;  %v10143_v19 = vadd.f32 %v20027_v3, %v9752_v59  ;;  %v20029_v20 = vld [vmem:[#allocation91_spill] sm:$0xff]  ;;  %v20042_v59 = vld [vmem:[#allocation21_spill] sm:$0xff]  ;;  %v20044_v49 = vld [vmem:[#allocation72_spill] sm:$0xff] }
 0x587   : > { %10983 = vst [vmem:[%s19186_s25 + $0x70] sm:$0xff] %v10951_v34  ;;  %v10954_v58 = vadd.f32 %v19177_v45, %v10915_v31  ;;  %v10914_v22 = vadd.f32 %v10819_v62, %v10524_v52  ;;  %v9754_v61 = vadd.f32 %v20029_v20, %v20028_v27  ;;  %v20030_v52 = vld [vmem:[#allocation78_spill] sm:$0xff]  ;;  %v20031_v34 = vld [vmem:[#allocation41_spill] sm:$0xff]  ;;  %v20032_v31 = vld [vmem:[#allocation23_spill] sm:$0xff] }
 0x588   : > { %v14512_v30 = vpop.f32.mrf.mxu0  ;;  %v10142_v7 = vadd.f32 %v20030_v52, %v9751_v26  ;;  %v9753_v37 = vadd.f32 %v20032_v31, %v20031_v34  ;;  %v10533_v5 = vadd.f32 %v14465_v18, %v10143_v19  ;;  %v20033_v62 = vld [vmem:[#allocation90_spill] sm:$0xff] }
 0x589   : > { %10986 = vst [vmem:[%s19186_s25 + $0x88] sm:$0xff] %v10954_v58  ;;  %v10953_v63 = vadd.f32 %v19177_v45, %v10914_v22  ;;  %v10917_v15 = vadd.f32 %v14512_v30, %v10527_v17  ;;  %v10145_v17 = vadd.f32 %v20033_v62, %v9754_v61  ;;  %v20035_v58 = vld [vmem:[#allocation17_spill] sm:$0xff]  ;;  %v20036_v30 = vld [vmem:[#allocation44_spill] sm:$0xff] }
 0x58a   : > { %v10829_v13 = vpop.f32.mrf.mxu0  ;;  %v9756_v22 = vadd.f32 %v20035_v58, %v20034_v2  ;;  %v10532_v60 = vadd.f32 %v10469_v11, %v10142_v7  ;;  %v20040_v11 = vld [vmem:[#allocation39_spill] sm:$0xff] }
 0x58b   : > { %10985 = vst [vmem:[%s19186_s25 + $0x80] sm:$0xff] %v10953_v63  ;;  %v10956_v50 = vadd.f32 %v19177_v45, %v10917_v15  ;;  %v10916_v10 = vadd.f32 %v10829_v13, %v10526_v9  ;;  %v10144_v9 = vadd.f32 %v20036_v30, %v9753_v37  ;;  %v20038_v63 = vld [vmem:[#allocation63_spill] sm:$0xff]  ;;  %v10535_v25 = vadd.f32 %v14468_v46, %v10145_v17 }
 0x58c   : > { %v14515_v53 = vpop.f32.mrf.mxu0  ;;  %v9755_v15 = vadd.f32 %v20038_v63, %v20037_v56  ;;  %v10147_v13 = vadd.f32 %v20039_v38, %v9756_v22 }
 0x58d   : > { %10988 = vst [vmem:[%s19186_s25 + $0x98] sm:$0xff] %v10956_v50  ;;  %v10955_v29 = vadd.f32 %v19177_v45, %v10916_v10  ;;  %v10919_v57 = vadd.f32 %v14515_v53, %v10529_v16  ;;  %v9758_v50 = vadd.f32 %v20041_v54, %v20040_v11  ;;  %v10489_v10 = vpop.f32.mrf.mxu1  ;;  %v10534_v12 = vadd.f32 %v10479_v21, %v10144_v9 }
 0x58e   : > { %v10839_v32 = vpop.f32.mrf.mxu0  ;;  %v10146_v53 = vadd.f32 %v20042_v59, %v9755_v15  ;;  %v10537_v41 = vadd.f32 %v14471_v35, %v10147_v13 }
 0x58f   : > { %10987 = vst [vmem:[%s19186_s25 + $0x90] sm:$0xff] %v10955_v29  ;;  %v10958_v36 = vadd.f32 %v19177_v45, %v10919_v57  ;;  %v10918_v1 = vadd.f32 %v10839_v32, %v10528_v44  ;;  %v9757_v29 = vadd.f32 %v20044_v49, %v20043_v43  ;;  %v14474_v57 = vpop.f32.mrf.mxu1  ;;  %v10149_v26 = vadd.f32 %v19163_v4, %v9758_v50 }
 0x590   : > { %v14518_v24 = vpop.f32.mrf.mxu0  ;;  %v10536_v19 = vadd.f32 %v10489_v10, %v10146_v53 }
 0x591   : > { %10990 = vst [vmem:[%s19186_s25 + $0xa8] sm:$0xff] %v10958_v36  ;;  %v10957_v23 = vadd.f32 %v19177_v45, %v10918_v1  ;;  %v10921_v6 = vadd.f32 %v14518_v24, %v10531_v51  ;;  %v10148_v36 = vadd.f32 %v19167_v42, %v9757_v29  ;;  %v10499_v20 = vpop.f32.mrf.mxu1  ;;  %v10539_v21 = vadd.f32 %v14474_v57, %v10149_v26 }
 0x592   : > { %v10849_v8 = vpop.f32.mrf.mxu0 }
 0x593   : > { %10989 = vst [vmem:[%s19186_s25 + $0xa0] sm:$0xff] %v10957_v23  ;;  %v10960_v28 = vadd.f32 %v19177_v45, %v10921_v6  ;;  %v10920_v47 = vadd.f32 %v10849_v8, %v10530_v55  ;;  %v10538_v52 = vadd.f32 %v10499_v20, %v10148_v36 }
 0x594   : > { %v14521_v14 = vpop.f32.mrf.mxu0 }
 0x595   : > { %10992 = vst [vmem:[%s19186_s25 + $0xb8] sm:$0xff] %v10960_v28  ;;  %v10959_v0 = vadd.f32 %v19177_v45, %v10920_v47  ;;  %v10923_v18 = vadd.f32 %v14521_v14, %v10533_v5 }
 0x596   : > { %v10859_v48 = vpop.f32.mrf.mxu0 }
 0x597   : > { %10991 = vst [vmem:[%s19186_s25 + $0xb0] sm:$0xff] %v10959_v0  ;;  %v10962_v16 = vadd.f32 %v19177_v45, %v10923_v18  ;;  %v10922_v33 = vadd.f32 %v10859_v48, %v10532_v60 }
 0x598   : > { %v14524_v40 = vpop.f32.mrf.mxu0 }
 0x599   : > { %10994 = vst [vmem:[%s19186_s25 + $0xc8] sm:$0xff] %v10962_v16  ;;  %v10961_v44 = vadd.f32 %v19177_v45, %v10922_v33  ;;  %v10925_v46 = vadd.f32 %v14524_v40, %v10535_v25 }
 0x59a   : > { %v10869_v39 = vpop.f32.mrf.mxu0 }
 0x59b   : > { %10993 = vst [vmem:[%s19186_s25 + $0xc0] sm:$0xff] %v10961_v44  ;;  %v10964_v32 = vadd.f32 %v19177_v45, %v10925_v46  ;;  %v10924_v51 = vadd.f32 %v10869_v39, %v10534_v12 }
 0x59c   : > { %v14527_v3 = vpop.f32.mrf.mxu0 }
 0x59d   : > { %10996 = vst [vmem:[%s19186_s25 + $0xd8] sm:$0xff] %v10964_v32  ;;  %v10963_v1 = vadd.f32 %v19177_v45, %v10924_v51  ;;  %v10927_v27 = vadd.f32 %v14527_v3, %v10537_v41 }
 0x59e   : > { %v10879_v61 = vpop.f32.mrf.mxu0 }
 0x59f   : > { %10995 = vst [vmem:[%s19186_s25 + $0xd0] sm:$0xff] %v10963_v1  ;;  %v10966_v4 = vadd.f32 %v19177_v45, %v10927_v27  ;;  %v10926_v24 = vadd.f32 %v10879_v61, %v10536_v19 }
 0x5a0   : > { %v14530_v55 = vpop.f32.mrf.mxu0 }
 0x5a1   : > { %10998 = vst [vmem:[%s19186_s25 + $0xe8] sm:$0xff] %v10966_v4  ;;  %v10965_v7 = vadd.f32 %v19177_v45, %v10926_v24  ;;  %v10929_v42 = vadd.f32 %v14530_v55, %v10539_v21 }
 0x5a2   : > { %v10889_v23 = vpop.f32.mrf.mxu0 }
 0x5a3   : > { %10997 = vst [vmem:[%s19186_s25 + $0xe0] sm:$0xff] %v10965_v7  ;;  %v10968_v6 = vadd.f32 %v19177_v45, %v10929_v42  ;;  %v10928_v34 = vadd.f32 %v10889_v23, %v10538_v52 }
 0x5a5   : > { %11000 = vst [vmem:[%s19186_s25 + $0xf8] sm:$0xff] %v10968_v6  ;;  %v10967_v31 = vadd.f32 %v19177_v45, %v10928_v34 }
 0x5a7   : > { %10999 = vst [vmem:[%s19186_s25 + $0xf0] sm:$0xff] %v10967_v31 }
 0x5a8 PF: > { %s17_s24 = sadd.s32 1, %s14550_s24  }
 0x5a9   : > { %p14_p4 = scmp.ge.s32.totalorder %s17_s24, 4  }
 0x5ab   :  { %16 = sbr.rel (!%p14_p4) target bundleno = 1 (0x1), region = 108 }

</bundles_post_ra>
